<compile_context>
chip_gen: v7x
topology: tpu7x:2x2x1
jax: 0.10.0
libtpu: 0.0.40
codegen_flags: <defaults>
</compile_context>

<pallas_src>
import jax
import jax.numpy as jnp
from jax import lax
from jax.experimental import pallas as pl
from jax.experimental.pallas import tpu as pltpu

# ----------------------------- config ---------------------------------------
HIDDEN = 16          # hidden_size H
WORD_DIM = 24        # word vector dim
CHAR_DIM = 8         # char vector dim
WORD_VOCAB = 50
CHAR_VOCAB = 30
CHAR_K = 3           # char CNN kernel width
NEG_INF = -1e30
VMEM_LIMIT = 48 * 1024 * 1024     # fits v5e/v6e (128 MiB) and v7x (64 MiB) with headroom


def _round_up(x, m):
    return ((x + m - 1) // m) * m


def _row_tiles(n, max_blk=256, align=16):
    """Return (n_pad, blk): blk | n_pad, blk % align == 0, >=2 tiles once n > align."""
    if n <= align:
        p = _round_up(n, align)
        return p, p
    if n <= 2 * max_blk:
        p = _round_up(n, 2 * align)
        return p, p // 2
    p = _round_up(n, max_blk)
    return p, max_blk


def _cparams(*sem):
    return pltpu.CompilerParams(dimension_semantics=sem, vmem_limit_bytes=VMEM_LIMIT)


def _softmax_lanes(x):
    """Softmax along the last (lane) axis with an EUP approximate reciprocal."""
    m = jnp.max(x, axis=-1, keepdims=True)
    e = jnp.exp(x - m)
    return e * pl.reciprocal(jnp.sum(e, axis=-1, keepdims=True), approx=True)


# ----------------------------- generic linear (matmul) kernel ---------------
def _linear_kernel(x_ref, w_ref, b_ref, o_ref):
    o_ref[...] = (
        jnp.dot(x_ref[...], w_ref[...], preferred_element_type=jnp.float32)
        + b_ref[...]
    )


def linear(x, w, b=None):
    """y = x @ w + b.  Row-tiled, parallel grid, bf16 transport / MXU, f32 accum."""
    orig_shape = x.shape
    din, dout = w.shape
    x2 = x.reshape(-1, din).astype(jnp.bfloat16)
    n = x2.shape[0]
    n_pad, blk = _row_tiles(n, max_blk=256)
    if n_pad != n:
        x2 = jnp.pad(x2, ((0, n_pad - n), (0, 0)))
    if b is None:
        b = jnp.zeros((dout,), jnp.float32)
    b2 = b.reshape(1, dout).astype(jnp.float32)
    out = pl.pallas_call(
        _linear_kernel,
        out_shape=jax.ShapeDtypeStruct((n_pad, dout), jnp.float32),
        grid=(n_pad // blk,),
        in_specs=[
            pl.BlockSpec((blk, din), lambda i: (i, 0)),
            pl.BlockSpec((din, dout), lambda i: (0, 0)),
            pl.BlockSpec((1, dout), lambda i: (0, 0)),
        ],
        out_specs=pl.BlockSpec((blk, dout), lambda i: (i, 0)),
        compiler_params=_cparams("parallel"),
    )(x2, w.astype(jnp.bfloat16), b2)
    return out[:n].reshape(orig_shape[:-1] + (dout,))


# ----------------------------- fused embedding kernel -----------------------
def _embed_kernel(wemb_ref, patch_ref, cw_ref, cb_ref, pww_ref, pwc_ref,
                  hww_ref, hwb_ref, o_ref):
    # char-CNN (ONE matmul over all window positions) + ReLU + max-pool +
    # projection + 2 fused highway layers.
    pat = patch_ref[...]                         # (P, blk, K*Dc) bf16, position-major
    n_pos, blk, kd = pat.shape
    h = cb_ref.shape[-1]
    conv = jnp.maximum(
        jnp.dot(pat.reshape(n_pos * blk, kd), cw_ref[...],
                preferred_element_type=jnp.float32) + cb_ref[...], 0.0)   # (P*blk, H)
    cf = jnp.max(conv.reshape(n_pos, blk, h), axis=0)                     # (blk, H)
    # projection (bias=False); proj weight split word/char to avoid in-kernel concat
    x = (jnp.dot(wemb_ref[...], pww_ref[...], preferred_element_type=jnp.float32)
         + jnp.dot(cf.astype(jnp.bfloat16), pwc_ref[...],
                   preferred_element_type=jnp.float32))
    for l in range(hww_ref.shape[0]):            # highway: gate|transform in ONE matmul
        gt = jnp.dot(x.astype(jnp.bfloat16), hww_ref[l],
                     preferred_element_type=jnp.float32) + hwb_ref[l]
        gate = jax.nn.sigmoid(gt[:, :h])
        tr = jnp.maximum(gt[:, h:], 0.0)
        x = gate * tr + (1.0 - gate) * x
    o_ref[...] = x


def embedding(p, w_idxs, c_idxs):
    w_emb = p['word_vectors'][w_idxs]                      # (B,L,Dw) gather in plain JAX
    c_emb = p['char_vectors'][c_idxs]                      # (B,L,Wc,Dc)
    bsz, seq_len, wc, dc = c_emb.shape
    pout = wc - CHAR_K + 1
    n = bsz * seq_len
    # position-major patches so the in-kernel flatten/unflatten stays tile aligned
    patches = jnp.stack(
        [c_emb[:, :, i:i + CHAR_K, :].reshape(n, CHAR_K * dc) for i in range(pout)],
        axis=0).astype(jnp.bfloat16)                       # (pout, N, K*Dc)
    w2 = w_emb.reshape(n, -1).astype(jnp.bfloat16)
    h = p['proj_w_char'].shape[1]
    n_pad, blk = _row_tiles(n, max_blk=128)
    if n_pad != n:
        w2 = jnp.pad(w2, ((0, n_pad - n), (0, 0)))
        patches = jnp.pad(patches, ((0, 0), (0, n_pad - n), (0, 0)))
    out = pl.pallas_call(
        _embed_kernel,
        out_shape=jax.ShapeDtypeStruct((n_pad, h), jnp.float32),
        grid=(n_pad // blk,),
        in_specs=[
            pl.BlockSpec((blk, WORD_DIM), lambda i: (i, 0)),
            pl.BlockSpec((pout, blk, CHAR_K * dc), lambda i: (0, i, 0)),
            pl.BlockSpec((CHAR_K * dc, h), lambda i: (0, 0)),
            pl.BlockSpec((1, h), lambda i: (0, 0)),
            pl.BlockSpec((WORD_DIM, h), lambda i: (0, 0)),
            pl.BlockSpec((h, h), lambda i: (0, 0)),
            pl.BlockSpec((2, h, 2 * h), lambda i: (0, 0, 0)),
            pl.BlockSpec((2, 1, 2 * h), lambda i: (0, 0, 0)),
        ],
        out_specs=pl.BlockSpec((blk, h), lambda i: (i, 0)),
        compiler_params=_cparams("parallel"),
    )(w2, patches, p['char_conv_w'].astype(jnp.bfloat16), p['char_conv_b'],
      p['proj_w_word'].astype(jnp.bfloat16), p['proj_w_char'].astype(jnp.bfloat16),
      p['hw_w'].astype(jnp.bfloat16), p['hw_b'])
    return out[:n].reshape(bsz, seq_len, h)


# ----------------------------- BiDAF attention kernel -----------------------
def _bidaf_att_kernel(c_ref, q_ref, cm_ref, qm_ref, wc_ref, wq_ref, wcq_ref, o_ref):
    # Similarity s[i,j] = (c_i*wcq).q_j + wc.c_i + wq.q_j (+bias).
    # Terms constant along each softmax axis cancel, so both score matrices are
    # single matmuls contracting the feature dim and both softmaxes reduce along lanes.
    c = c_ref[0]                                  # (Lc, D) f32
    q = q_ref[0]                                  # (Lq, D) f32
    wcq = wcq_ref[...]                            # (1, D)
    cb = c.astype(jnp.bfloat16)
    qb = q.astype(jnp.bfloat16)
    c_aug = (c * wcq + wq_ref[...]).astype(jnp.bfloat16)      # (Lc, D)
    q_aug = (q * wcq + wc_ref[...]).astype(jnp.bfloat16)      # (Lq, D)
    s1 = jnp.einsum('id,jd->ij', c_aug, qb,
                    preferred_element_type=jnp.float32)       # (Lc, Lq)
    s2t = jnp.einsum('jd,id->ji', q_aug, cb,
                     preferred_element_type=jnp.float32)      # (Lq, Lc)
    s1m = _softmax_lanes(jnp.where(qm_ref[0] > 0, s1, jnp.float32(NEG_INF)))
    s2mt = _softmax_lanes(jnp.where(cm_ref[0] > 0, s2t, jnp.float32(NEG_INF)))
    s1b = s1m.astype(jnp.bfloat16)
    a = jnp.einsum('ij,jd->id', s1b, qb,
                   preferred_element_type=jnp.float32)        # (Lc, D)
    tmp = jnp.einsum('ji,id->jd', s2mt.astype(jnp.bfloat16), cb,
                     preferred_element_type=jnp.float32)      # (Lq, D) = s2m^T @ c
    b_att = jnp.einsum('ij,jd->id', s1b, tmp.astype(jnp.bfloat16),
                       preferred_element_type=jnp.float32)    # (Lc, D)
    o_ref[0] = jnp.concatenate([c, a, c * a, c * b_att], axis=-1)


def bidaf_attention(p, c, q, c_mask, q_mask):
    bsz, lc, d = c.shape
    lq = q.shape[1]
    cm_row = c_mask.astype(jnp.float32)[:, None, :]   # (B,1,Lc)
    qm_row = q_mask.astype(jnp.float32)[:, None, :]   # (B,1,Lq)
    return pl.pallas_call(
        _bidaf_att_kernel,
        out_shape=jax.ShapeDtypeStruct((bsz, lc, 4 * d), jnp.float32),
        grid=(bsz,),
        in_specs=[
            pl.BlockSpec((1, lc, d), lambda i: (i, 0, 0)),
            pl.BlockSpec((1, lq, d), lambda i: (i, 0, 0)),
            pl.BlockSpec((1, 1, lc), lambda i: (i, 0, 0)),
            pl.BlockSpec((1, 1, lq), lambda i: (i, 0, 0)),
            pl.BlockSpec((1, d), lambda i: (0, 0)),
            pl.BlockSpec((1, d), lambda i: (0, 0)),
            pl.BlockSpec((1, d), lambda i: (0, 0)),
        ],
        out_specs=pl.BlockSpec((1, lc, 4 * d), lambda i: (i, 0, 0)),
        compiler_params=_cparams("parallel"),
    )(c, q, cm_row, qm_row,
      p['wc'].reshape(1, d), p['wq'].reshape(1, d), p['wcq'].reshape(1, d))


# ----------------------------- fused bidirectional LSTM recurrence ----------
def _bilstm_kernel(gx_ref, whh_ref, m_ref, sel_ref, o_ref, h_sc, c_sc):
    # gx_ref : (L, 2B, 4H) time-major precomputed input gates;
    #          rows [0:B] forward, rows [B:2B] backward (time pre-flipped).
    # whh_ref: (2H, 4H) bf16 = [W_hh_fwd ; W_hh_bwd] stacked on rows, gates [i,f,o,g].
    # sel_ref: (2B, 2H) column mask -- fwd rows keep [h|0], bwd rows keep [0|h].
    # h_sc   : (2B, 2H) "wide" hidden state; c_sc: (2B, H) cell state (both f32).
    seq_len = gx_ref.shape[0]
    h = o_ref.shape[-1]
    whh = whh_ref[...]
    sel = sel_ref[...]
    h_sc[...] = jnp.zeros_like(h_sc)
    c_sc[...] = jnp.zeros_like(c_sc)

    def step(t, carry):
        g = gx_ref[t] + jnp.dot(h_sc[...].astype(jnp.bfloat16), whh,
                                preferred_element_type=jnp.float32)      # (2B, 4H)
        sg = jax.nn.sigmoid(g[:, :3 * h])          # i|f|o in one contiguous slice
        i_g = sg[:, 0:h]
        f_g = sg[:, h:2 * h]
        o_g = sg[:, 2 * h:3 * h]
        g_g = jnp.tanh(g[:, 3 * h:])
        m = m_ref[t]                               # (2B, 1)
        c_new = f_g * c_sc[...] + i_g * g_g
        h_new = o_g * jnp.tanh(c_new)
        c_sc[...] = m * c_new + (1.0 - m) * c_sc[...]
        h_wide = jnp.concatenate([h_new, h_new], axis=-1) * sel
        h_sc[...] = m * h_wide + (1.0 - m) * h_sc[...]
        o_ref[t] = h_new * m                       # padded steps -> 0 (pad_packed)
        return carry

    unroll = True if seq_len <= 32 else 8
    lax.fori_loop(0, seq_len, step, 0, unroll=unroll)


def bilstm_layer(x, mask_f, lp):
    # Emulates a packed bidirectional nn.LSTM layer (suffix padding, padded outputs 0).
    bsz, seq_len, _ = x.shape
    h = lp['w_hh'].shape[0]
    h4 = 4 * h

    # One fused (Din, 8H) input projection for both directions.
    gx = linear(x, lp['w_ih'], lp['b'])            # (B, L, 8H)
    gx_f = gx[..., :h4]
    # Simple time flip (no length gather): masked zero-init recurrence makes this
    # exactly equivalent to per-length reversal for suffix-padded sequences.
    gx_b = jnp.flip(gx[..., h4:], axis=1)
    gx_both = jnp.transpose(jnp.concatenate([gx_f, gx_b], axis=0), (1, 0, 2))  # (L,2B,4H)
    m_both = jnp.transpose(
        jnp.concatenate([mask_f, jnp.flip(mask_f, axis=1)], axis=0), (1, 0))[:, :, None]

    whh_stk = jnp.concatenate([lp['w_hh'][:, :h4], lp['w_hh'][:, h4:]],
                              axis=0).astype(jnp.bfloat16)                      # (2H,4H)
    ones = jnp.ones((bsz, h), jnp.float32)
    zeros = jnp.zeros((bsz, h), jnp.float32)
    sel = jnp.concatenate([jnp.concatenate([ones, zeros], axis=1),
                           jnp.concatenate([zeros, ones], axis=1)], axis=0)     # (2B,2H)

    out = pl.pallas_call(
        _bilstm_kernel,
        out_shape=jax.ShapeDtypeStruct((seq_len, 2 * bsz, h), jnp.float32),
        grid=(1,),
        in_specs=[
            pl.BlockSpec((seq_len, 2 * bsz, h4), lambda i: (0, 0, 0)),
            pl.BlockSpec((2 * h, h4), lambda i: (0, 0)),
            pl.BlockSpec((seq_len, 2 * bsz, 1), lambda i: (0, 0, 0)),
            pl.BlockSpec((2 * bsz, 2 * h), lambda i: (0, 0)),
        ],
        out_specs=pl.BlockSpec((seq_len, 2 * bsz, h), lambda i: (0, 0, 0)),
        scratch_shapes=[pltpu.VMEM((2 * bsz, 2 * h), jnp.float32),
                        pltpu.VMEM((2 * bsz, h), jnp.float32)],
        compiler_params=_cparams("arbitrary"),
    )(gx_both, whh_stk, m_both, sel)

    out = jnp.transpose(out, (1, 0, 2))            # (2B, L, H)
    h_f = out[:bsz]
    h_b = jnp.flip(out[bsz:], axis=1)
    return jnp.concatenate([h_f, h_b], axis=-1)


def rnn_encoder(layer_params, x, mask):
    mask_f = mask.astype(jnp.float32)
    hcur = x
    for lp in layer_params:
        hcur = bilstm_layer(hcur, mask_f, lp)
    return hcur


# ----------------------------- fused self-attention block -------------------
def _selfatt_kernel(att_ref, mod_ref, m_ref, wl_ref, bl_ref,
                    wq_ref, wk_ref, wv_ref, bq_ref, bk_ref, bv_ref, o_ref):
    # 8H->2H linear + residual with mod + separate Q/K/V projections + SDPA + residual.
    att = att_ref[0]                               # (Lc, 8H) bf16
    x = (jnp.dot(att, wl_ref[...], preferred_element_type=jnp.float32)
         + bl_ref[...] + mod_ref[0])               # (Lc, 2H) f32
    xb = x.astype(jnp.bfloat16)
    q = jnp.dot(xb, wq_ref[...], preferred_element_type=jnp.float32) + bq_ref[...]
    k = jnp.dot(xb, wk_ref[...], preferred_element_type=jnp.float32) + bk_ref[...]
    v = jnp.dot(xb, wv_ref[...], preferred_element_type=jnp.float32) + bv_ref[...]
    d = x.shape[-1]
    scale = jnp.float32(1.0 / (d ** 0.5))
    s = jnp.einsum('id,jd->ij', q.astype(jnp.bfloat16), k.astype(jnp.bfloat16),
                   preferred_element_type=jnp.float32) * scale
    p = _softmax_lanes(jnp.where(m_ref[0] > 0, s, jnp.float32(NEG_INF)))
    o_ref[0] = x + jnp.einsum('ij,jd->id', p.astype(jnp.bfloat16),
                              v.astype(jnp.bfloat16),
                              preferred_element_type=jnp.float32)


def self_attention_block(sa_p, lin_p, att, mod_rnn, mask):
    # TODO(synk): layers.SelfAttention source is not provided (its declared input_size=8H
    # is inconsistent with the 2H tensor passed); implemented as dimension-preserving
    # scaled-dot-product self-attention with a residual connection.
    bsz, lc, d8 = att.shape
    d = mod_rnn.shape[-1]
    w_qkv = sa_p['w_qkv']
    b_qkv = sa_p['b_qkv']
    wq, wk, wv = w_qkv[:, :d], w_qkv[:, d:2 * d], w_qkv[:, 2 * d:]
    bq = b_qkv[:d].reshape(1, d)
    bk = b_qkv[d:2 * d].reshape(1, d)
    bv = b_qkv[2 * d:].reshape(1, d)
    m = mask.astype(jnp.float32)[:, None, :]
    return pl.pallas_call(
        _selfatt_kernel,
        out_shape=jax.ShapeDtypeStruct((bsz, lc, d), jnp.float32),
        grid=(bsz,),
        in_specs=[
            pl.BlockSpec((1, lc, d8), lambda i: (i, 0, 0)),
            pl.BlockSpec((1, lc, d), lambda i: (i, 0, 0)),
            pl.BlockSpec((1, 1, lc), lambda i: (i, 0, 0)),
            pl.BlockSpec((d8, d), lambda i: (0, 0)),
            pl.BlockSpec((1, d), lambda i: (0, 0)),
            pl.BlockSpec((d, d), lambda i: (0, 0)),
            pl.BlockSpec((d, d), lambda i: (0, 0)),
            pl.BlockSpec((d, d), lambda i: (0, 0)),
            pl.BlockSpec((1, d), lambda i: (0, 0)),
            pl.BlockSpec((1, d), lambda i: (0, 0)),
            pl.BlockSpec((1, d), lambda i: (0, 0)),
        ],
        out_specs=pl.BlockSpec((1, lc, d), lambda i: (i, 0, 0)),
        compiler_params=_cparams("parallel"),
    )(att.astype(jnp.bfloat16), mod_rnn, m,
      lin_p['w'].astype(jnp.bfloat16), lin_p['b'].reshape(1, d),
      wq.astype(jnp.bfloat16), wk.astype(jnp.bfloat16), wv.astype(jnp.bfloat16),
      bq, bk, bv)


# ----------------------------- fused output heads + masked log-softmax ------
def _out_kernel(x_ref, m_ref, w_ref, b_ref, o_ref):
    # [att|mod|mod_2] @ W gives both start/end logits in one matmul with the
    # sequence axis in lanes; masked log-softmax reduces along lanes.
    x = x_ref[0]                                   # (Lc, 12H) bf16
    logits = jnp.einsum('dk,ld->kl', w_ref[...], x,
                        preferred_element_type=jnp.float32) + b_ref[...]   # (2, Lc)
    masked = jnp.where(m_ref[0] > 0, logits, jnp.float32(NEG_INF))
    mx = jnp.max(masked, axis=-1, keepdims=True)
    z = masked - mx
    lse = jnp.log(jnp.sum(jnp.exp(z), axis=-1, keepdims=True))
    o_ref[0] = z - lse


def bidaf_output(p, att, mod, mask):
    mod_2 = rnn_encoder(p['rnn'], mod, mask)
    x = jnp.concatenate([att, mod, mod_2], axis=-1).astype(jnp.bfloat16)   # (B, Lc, 12H)
    bsz, lc, dx = x.shape
    m = mask.astype(jnp.float32)[:, None, :]
    out = pl.pallas_call(
        _out_kernel,
        out_shape=jax.ShapeDtypeStruct((bsz, 2, lc), jnp.float32),
        grid=(bsz,),
        in_specs=[
            pl.BlockSpec((1, lc, dx), lambda i: (i, 0, 0)),
            pl.BlockSpec((1, 1, lc), lambda i: (i, 0, 0)),
            pl.BlockSpec((dx, 2), lambda i: (0, 0)),
            pl.BlockSpec((2, 1), lambda i: (0, 0)),
        ],
        out_specs=pl.BlockSpec((1, 2, lc), lambda i: (i, 0, 0)),
        compiler_params=_cparams("parallel"),
    )(x, m, p['w'].astype(jnp.bfloat16), p['b'].reshape(2, 1))
    return out[:, 0, :], out[:, 1, :]


# ----------------------------- full forward ----------------------------------
def bidaf_forward(params, cw_idxs, qw_idxs, cc_idxs, qc_idxs):
    c_mask = cw_idxs != 0
    q_mask = qw_idxs != 0

    c_emb = embedding(params['emb'], cw_idxs, cc_idxs)          # (B,Lc,H)
    q_emb = embedding(params['emb'], qw_idxs, qc_idxs)          # (B,Lq,H)

    c_enc = rnn_encoder(params['enc'], c_emb, c_mask)           # (B,Lc,2H)
    q_enc = rnn_encoder(params['enc'], q_emb, q_mask)           # (B,Lq,2H)

    att = bidaf_attention(params['att'], c_enc, q_enc, c_mask, q_mask)   # (B,Lc,8H)

    mod_rnn = rnn_encoder(params['mod'], att, c_mask)            # (B,Lc,2H)
    mod = self_attention_block(params['selfatt'], params['linear'], att, mod_rnn, c_mask)

    return bidaf_output(params['out'], att, mod, c_mask)


# ----------------------------- deterministic parameter init ------------------
class KeyGen:
    def __init__(self, key):
        self.key = key

    def __call__(self):
        self.key, sub = jax.random.split(self.key)
        return sub


def _norm(kg, shape, scale=0.1):
    return scale * jax.random.normal(kg(), shape, dtype=jnp.float32)


def _init_lstm_layer(kg, din, h):
    # w_ih / w_hh columns: [fwd gates (4H) | bwd gates (4H)], gate order [i,f,o,g].
    return dict(
        w_ih=_norm(kg, (din, 8 * h)),
        w_hh=_norm(kg, (h, 8 * h)),
        b=jnp.zeros((8 * h,), jnp.float32),
    )


def _init_rnn(kg, din, h, num_layers):
    layers = [_init_lstm_layer(kg, din, h)]
    for _ in range(num_layers - 1):
        layers.append(_init_lstm_layer(kg, 2 * h, h))
    return layers


def _init_out_block(kg, h):
    # Block-structured (12H, 2) weight so one matmul produces both logit heads:
    # rows [att | mod | mod_2]; col0 = start head (att_w1, mod_w1, 0),
    # col1 = end head (att_w2, 0, mod_w2).
    d8, d2 = 8 * h, 2 * h
    att_w1 = _norm(kg, (d8, 1))
    mod_w1 = _norm(kg, (d2, 1))
    att_w2 = _norm(kg, (d8, 1))
    mod_w2 = _norm(kg, (d2, 1))
    z = jnp.zeros((d2, 1), jnp.float32)
    col1 = jnp.concatenate([att_w1, mod_w1, z], axis=0)
    col2 = jnp.concatenate([att_w2, z, mod_w2], axis=0)
    return jnp.concatenate([col1, col2], axis=1), jnp.zeros((1, 2), jnp.float32)


def init_params(key):
    h = HIDDEN
    d2 = 2 * h
    kg = KeyGen(key)
    emb = dict(
        word_vectors=_norm(kg, (WORD_VOCAB, WORD_DIM), 1.0),
        char_vectors=_norm(kg, (CHAR_VOCAB, CHAR_DIM), 1.0),
        char_conv_w=_norm(kg, (CHAR_K * CHAR_DIM, h)),
        char_conv_b=jnp.zeros((1, h), jnp.float32),
        proj_w_word=_norm(kg, (WORD_DIM, h)),
        proj_w_char=_norm(kg, (h, h)),
        hw_w=_norm(kg, (2, h, 2 * h)),          # per layer: [gate | transform] columns
        hw_b=jnp.zeros((2, 1, 2 * h), jnp.float32),
    )
    out_w, out_b = _init_out_block(kg, h)
    # BiDAFAttention global bias is omitted: it is constant over both softmax axes
    # and therefore cancels exactly.
    params = dict(
        emb=emb,
        enc=_init_rnn(kg, h, h, 1),
        att=dict(wc=_norm(kg, (1, 1, d2)), wq=_norm(kg, (1, 1, d2)),
                 wcq=_norm(kg, (1, 1, d2))),
        linear=dict(w=_norm(kg, (8 * h, d2)), b=jnp.zeros((d2,), jnp.float32)),
        mod=_init_rnn(kg, 8 * h, h, 4),
        selfatt=dict(w_qkv=_norm(kg, (d2, 3 * d2)),
                     b_qkv=jnp.zeros((3 * d2,), jnp.float32)),
        out=dict(rnn=_init_rnn(kg, d2, h, 1), w=out_w, b=out_b),
    )
    return params


# ----------------------------- main -------------------------------------------
if __name__ == "__main__":
    root = jax.random.PRNGKey(0)
    pkey, dkey = jax.random.split(root)
    params = init_params(pkey)

    B, Lc, Lq, Wc = 2, 16, 8, 8
    kg = KeyGen(dkey)

    c_lens = jnp.array([Lc, 12], dtype=jnp.int32)
    q_lens = jnp.array([Lq, 6], dtype=jnp.int32)
    pos_c = jnp.arange(Lc)[None, :]
    pos_q = jnp.arange(Lq)[None, :]

    cw_idxs = jax.random.randint(kg(), (B, Lc), 1, WORD_VOCAB)
    cw_idxs = jnp.where(pos_c < c_lens[:, None], cw_idxs, 0)
    qw_idxs = jax.random.randint(kg(), (B, Lq), 1, WORD_VOCAB)
    qw_idxs = jnp.where(pos_q < q_lens[:, None], qw_idxs, 0)
    cc_idxs = jax.random.randint(kg(), (B, Lc, Wc), 1, CHAR_VOCAB)
    cc_idxs = jnp.where(pos_c[:, :, None] < c_lens[:, None, None], cc_idxs, 0)
    qc_idxs = jax.random.randint(kg(), (B, Lq, Wc), 1, CHAR_VOCAB)
    qc_idxs = jnp.where(pos_q[:, :, None] < q_lens[:, None, None], qc_idxs, 0)

    fwd = jax.jit(bidaf_forward)
    log_p1, log_p2 = fwd(params, cw_idxs, qw_idxs, cc_idxs, qc_idxs)
    jax.block_until_ready((log_p1, log_p2))

    assert log_p1.shape == (B, Lc) and log_p2.shape == (B, Lc)
    assert bool(jnp.all(jnp.isfinite(log_p1))) and bool(jnp.all(jnp.isfinite(log_p2)))
    print("KERNEL_OK")
</pallas_src>

<mosaic_0001>
module attributes {stable_mosaic.version = 11 : i64} {
  func.func @_linear_kernel(%arg0: i32, %arg1: memref<16x16xbf16, #tpu.memory_space<vmem>>, %arg2: memref<16x128xbf16, #tpu.memory_space<vmem>>, %arg3: memref<1x128xf32, #tpu.memory_space<vmem>>, %arg4: memref<16x128xf32, #tpu.memory_space<vmem>>) attributes {dimension_semantics = [#tpu.dimension_semantics<parallel>], iteration_bounds = array<i64: 2>, scalar_prefetch = 0 : i64, scratch_operands = 0 : i64, tpu.core_type = #tpu.core_type<tc>, window_params = [{transform_indices = @transform_0, window_bounds = array<i64: 16, 16>}, {pipeline_mode = #tpu.pipeline_mode<synchronous>, transform_indices = @transform_1, window_bounds = array<i64: 16, 128>}, {pipeline_mode = #tpu.pipeline_mode<synchronous>, transform_indices = @transform_2, window_bounds = array<i64: 1, 128>}, {transform_indices = @transform_3, window_bounds = array<i64: 16, 128>}]} {
    %c0 = arith.constant 0 : index
    %c0_0 = arith.constant 0 : index
    %0 = vector.load %arg1[%c0, %c0_0] : memref<16x16xbf16, #tpu.memory_space<vmem>>, vector<16x16xbf16>
    %c0_1 = arith.constant 0 : index
    %c0_2 = arith.constant 0 : index
    %1 = vector.load %arg2[%c0_1, %c0_2] : memref<16x128xbf16, #tpu.memory_space<vmem>>, vector<16x128xbf16>
    %cst = arith.constant dense<0.000000e+00> : vector<16x128xf32>
    %2 = tpu.matmul %0, %1, %cst {dimension_numbers = #tpu.dot_dimension_numbers<[1], [0], [0], [1], [0, 0, 1, 1], [], []>} : vector<16x16xbf16>, vector<16x128xbf16>, vector<16x128xf32> -> vector<16x128xf32>
    %c0_3 = arith.constant 0 : index
    %c0_4 = arith.constant 0 : index
    %3 = vector.load %arg3[%c0_3, %c0_4] : memref<1x128xf32, #tpu.memory_space<vmem>>, vector<1x128xf32>
    %4 = vector.broadcast %3 : vector<1x128xf32> to vector<16x128xf32>
    %5 = arith.addf %2, %4 : vector<16x128xf32>
    %c0_5 = arith.constant 0 : index
    %c0_6 = arith.constant 0 : index
    %6 = vector.load %arg4[%c0_5, %c0_6] : memref<16x128xf32, #tpu.memory_space<vmem>>, vector<16x128xf32>
    tpu.vector_store %arg4[%c0_5, %c0_6], %5 {strides = array<i32>} : memref<16x128xf32, #tpu.memory_space<vmem>>, vector<16x128xf32>,
    return
  }
  func.func @transform_0(%arg0: i32) -> (i32, i32) {
    %c0_i32 = arith.constant 0 : i32
    %c0_i32_0 = arith.constant 0 : i32
    return %arg0, %c0_i32 : i32, i32
  }
  func.func @transform_1(%arg0: i32) -> (i32, i32) {
    %c0_i32 = arith.constant 0 : i32
    %c0_i32_0 = arith.constant 0 : i32
    %c0_i32_1 = arith.constant 0 : i32
    return %c0_i32, %c0_i32_0 : i32, i32
  }
  func.func @transform_2(%arg0: i32) -> (i32, i32) {
    %c0_i32 = arith.constant 0 : i32
    %c0_i32_0 = arith.constant 0 : i32
    %c0_i32_1 = arith.constant 0 : i32
    return %c0_i32, %c0_i32_0 : i32, i32
  }
  func.func @transform_3(%arg0: i32) -> (i32, i32) {
    %c0_i32 = arith.constant 0 : i32
    %c0_i32_0 = arith.constant 0 : i32
    return %arg0, %c0_i32 : i32, i32
  }
}

module attributes {stable_mosaic.version = 11 : i64} {
  func.func @_embed_kernel(%arg0: i32, %arg1: memref<16x24xbf16, #tpu.memory_space<vmem>>, %arg2: memref<6x16x24xbf16, #tpu.memory_space<vmem>>, %arg3: memref<24x16xbf16, #tpu.memory_space<vmem>>, %arg4: memref<1x16xf32, #tpu.memory_space<vmem>>, %arg5: memref<24x16xbf16, #tpu.memory_space<vmem>>, %arg6: memref<16x16xbf16, #tpu.memory_space<vmem>>, %arg7: memref<2x16x32xbf16, #tpu.memory_space<vmem>>, %arg8: memref<2x1x32xf32, #tpu.memory_space<vmem>>, %arg9: memref<16x16xf32, #tpu.memory_space<vmem>>) attributes {dimension_semantics = [#tpu.dimension_semantics<parallel>], iteration_bounds = array<i64: 2>, scalar_prefetch = 0 : i64, scratch_operands = 0 : i64, tpu.core_type = #tpu.core_type<tc>, window_params = [{transform_indices = @transform_0, window_bounds = array<i64: 16, 24>}, {transform_indices = @transform_1, window_bounds = array<i64: 6, 16, 24>}, {pipeline_mode = #tpu.pipeline_mode<synchronous>, transform_indices = @transform_2, window_bounds = array<i64: 24, 16>}, {pipeline_mode = #tpu.pipeline_mode<synchronous>, transform_indices = @transform_3, window_bounds = array<i64: 1, 16>}, {pipeline_mode = #tpu.pipeline_mode<synchronous>, transform_indices = @transform_4, window_bounds = array<i64: 24, 16>}, {pipeline_mode = #tpu.pipeline_mode<synchronous>, transform_indices = @transform_5, window_bounds = array<i64: 16, 16>}, {pipeline_mode = #tpu.pipeline_mode<synchronous>, transform_indices = @transform_6, window_bounds = array<i64: 2, 16, 32>}, {pipeline_mode = #tpu.pipeline_mode<synchronous>, transform_indices = @transform_7, window_bounds = array<i64: 2, 1, 32>}, {transform_indices = @transform_8, window_bounds = array<i64: 16, 16>}]} {
    %c0 = arith.constant 0 : index
    %c0_0 = arith.constant 0 : index
    %c0_1 = arith.constant 0 : index
    %0 = vector.load %arg2[%c0, %c0_0, %c0_1] : memref<6x16x24xbf16, #tpu.memory_space<vmem>>, vector<6x16x24xbf16>
    %1 = vector.shape_cast %0 : vector<6x16x24xbf16> to vector<96x24xbf16>
    %c0_2 = arith.constant 0 : index
    %c0_3 = arith.constant 0 : index
    %2 = vector.load %arg3[%c0_2, %c0_3] : memref<24x16xbf16, #tpu.memory_space<vmem>>, vector<24x16xbf16>
    %cst = arith.constant dense<0.000000e+00> : vector<96x16xf32>
    %3 = tpu.matmul %1, %2, %cst {dimension_numbers = #tpu.dot_dimension_numbers<[1], [0], [0], [1], [0, 0, 1, 1], [], []>} : vector<96x24xbf16>, vector<24x16xbf16>, vector<96x16xf32> -> vector<96x16xf32>
    %c0_4 = arith.constant 0 : index
    %c0_5 = arith.constant 0 : index
    %4 = vector.load %arg4[%c0_4, %c0_5] : memref<1x16xf32, #tpu.memory_space<vmem>>, vector<1x16xf32>
    %5 = vector.broadcast %4 : vector<1x16xf32> to vector<96x16xf32>
    %6 = arith.addf %3, %5 : vector<96x16xf32>
    %cst_6 = arith.constant 0.000000e+00 : f32
    %7 = vector.broadcast %cst_6 : f32 to vector<96x16xf32>
    %8 = arith.maximumf %6, %7 : vector<96x16xf32>
    %9 = vector.shape_cast %8 : vector<96x16xf32> to vector<6x16x16xf32>
    %cst_7 = arith.constant dense<0xFF800000> : vector<16x16xf32>
    %10 = vector.multi_reduction <maximumf>, %9, %cst_7 [0] : vector<6x16x16xf32> to vector<16x16xf32>
    %c0_8 = arith.constant 0 : index
    %c0_9 = arith.constant 0 : index
    %11 = vector.load %arg1[%c0_8, %c0_9] : memref<16x24xbf16, #tpu.memory_space<vmem>>, vector<16x24xbf16>
    %c0_10 = arith.constant 0 : index
    %c0_11 = arith.constant 0 : index
    %12 = vector.load %arg5[%c0_10, %c0_11] : memref<24x16xbf16, #tpu.memory_space<vmem>>, vector<24x16xbf16>
    %cst_12 = arith.constant dense<0.000000e+00> : vector<16x16xf32>
    %13 = tpu.matmul %11, %12, %cst_12 {dimension_numbers = #tpu.dot_dimension_numbers<[1], [0], [0], [1], [0, 0, 1, 1], [], []>} : vector<16x24xbf16>, vector<24x16xbf16>, vector<16x16xf32> -> vector<16x16xf32>
    %14 = arith.truncf %10 : vector<16x16xf32> to vector<16x16xbf16>
    %c0_13 = arith.constant 0 : index
    %c0_14 = arith.constant 0 : index
    %15 = vector.load %arg6[%c0_13, %c0_14] : memref<16x16xbf16, #tpu.memory_space<vmem>>, vector<16x16xbf16>
    %cst_15 = arith.constant dense<0.000000e+00> : vector<16x16xf32>
    %16 = tpu.matmul %14, %15, %cst_15 {dimension_numbers = #tpu.dot_dimension_numbers<[1], [0], [0], [1], [0, 0, 1, 1], [], []>} : vector<16x16xbf16>, vector<16x16xbf16>, vector<16x16xf32> -> vector<16x16xf32>
    %17 = arith.addf %13, %16 : vector<16x16xf32>
    %18 = arith.truncf %17 : vector<16x16xf32> to vector<16x16xbf16>
    %c0_16 = arith.constant 0 : index
    %c0_17 = arith.constant 0 : index
    %c0_18 = arith.constant 0 : index
    %19 = vector.load %arg7[%c0_16, %c0_17, %c0_18] : memref<2x16x32xbf16, #tpu.memory_space<vmem>>, vector<1x16x32xbf16>
    %20 = vector.shape_cast %19 : vector<1x16x32xbf16> to vector<16x32xbf16>
    %cst_19 = arith.constant dense<0.000000e+00> : vector<16x32xf32>
    %21 = tpu.matmul %18, %20, %cst_19 {dimension_numbers = #tpu.dot_dimension_numbers<[1], [0], [0], [1], [0, 0, 1, 1], [], []>} : vector<16x16xbf16>, vector<16x32xbf16>, vector<16x32xf32> -> vector<16x32xf32>
    %c0_20 = arith.constant 0 : index
    %c0_21 = arith.constant 0 : index
    %c0_22 = arith.constant 0 : index
    %22 = vector.load %arg8[%c0_20, %c0_21, %c0_22] : memref<2x1x32xf32, #tpu.memory_space<vmem>>, vector<1x1x32xf32>
    %23 = vector.shape_cast %22 : vector<1x1x32xf32> to vector<1x32xf32>
    %24 = vector.broadcast %23 : vector<1x32xf32> to vector<16x32xf32>
    %25 = arith.addf %21, %24 : vector<16x32xf32>
    %26 = vector.extract_strided_slice %25 {offsets = [0, 0], sizes = [16, 16], strides = [1, 1]} : vector<16x32xf32> to vector<16x16xf32>
    %27 = arith.negf %26 : vector<16x16xf32>
    %28 = math.exp %27 : vector<16x16xf32>
    %cst_23 = arith.constant 1.000000e+00 : f32
    %29 = vector.broadcast %cst_23 : f32 to vector<16x16xf32>
    %30 = arith.addf %29, %28 : vector<16x16xf32>
    %31 = arith.divf %29, %30 : vector<16x16xf32>
    %32 = vector.extract_strided_slice %25 {offsets = [0, 16], sizes = [16, 16], strides = [1, 1]} : vector<16x32xf32> to vector<16x16xf32>
    %cst_24 = arith.constant 0.000000e+00 : f32
    %33 = vector.broadcast %cst_24 : f32 to vector<16x16xf32>
    %34 = arith.maximumf %32, %33 : vector<16x16xf32>
    %35 = arith.mulf %31, %34 : vector<16x16xf32>
    %cst_25 = arith.constant 1.000000e+00 : f32
    %36 = vector.broadcast %cst_25 : f32 to vector<16x16xf32>
    %37 = arith.subf %36, %31 : vector<16x16xf32>
    %38 = arith.mulf %37, %17 : vector<16x16xf32>
    %39 = arith.addf %35, %38 : vector<16x16xf32>
    %40 = arith.truncf %39 : vector<16x16xf32> to vector<16x16xbf16>
    %c1 = arith.constant 1 : index
    %c0_26 = arith.constant 0 : index
    %c0_27 = arith.constant 0 : index
    %41 = vector.load %arg7[%c1, %c0_26, %c0_27] : memref<2x16x32xbf16, #tpu.memory_space<vmem>>, vector<1x16x32xbf16>
    %42 = vector.shape_cast %41 : vector<1x16x32xbf16> to vector<16x32xbf16>
    %cst_28 = arith.constant dense<0.000000e+00> : vector<16x32xf32>
    %43 = tpu.matmul %40, %42, %cst_28 {dimension_numbers = #tpu.dot_dimension_numbers<[1], [0], [0], [1], [0, 0, 1, 1], [], []>} : vector<16x16xbf16>, vector<16x32xbf16>, vector<16x32xf32> -> vector<16x32xf32>
    %c1_29 = arith.constant 1 : index
    %c0_30 = arith.constant 0 : index
    %c0_31 = arith.constant 0 : index
    %44 = vector.load %arg8[%c1_29, %c0_30, %c0_31] : memref<2x1x32xf32, #tpu.memory_space<vmem>>, vector<1x1x32xf32>
    %45 = vector.shape_cast %44 : vector<1x1x32xf32> to vector<1x32xf32>
    %46 = vector.broadcast %45 : vector<1x32xf32> to vector<16x32xf32>
    %47 = arith.addf %43, %46 : vector<16x32xf32>
    %48 = vector.extract_strided_slice %47 {offsets = [0, 0], sizes = [16, 16], strides = [1, 1]} : vector<16x32xf32> to vector<16x16xf32>
    %49 = arith.negf %48 : vector<16x16xf32>
    %50 = math.exp %49 : vector<16x16xf32>
    %cst_32 = arith.constant 1.000000e+00 : f32
    %51 = vector.broadcast %cst_32 : f32 to vector<16x16xf32>
    %52 = arith.addf %51, %50 : vector<16x16xf32>
    %53 = arith.divf %51, %52 : vector<16x16xf32>
    %54 = vector.extract_strided_slice %47 {offsets = [0, 16], sizes = [16, 16], strides = [1, 1]} : vector<16x32xf32> to vector<16x16xf32>
    %cst_33 = arith.constant 0.000000e+00 : f32
    %55 = vector.broadcast %cst_33 : f32 to vector<16x16xf32>
    %56 = arith.maximumf %54, %55 : vector<16x16xf32>
    %57 = arith.mulf %53, %56 : vector<16x16xf32>
    %cst_34 = arith.constant 1.000000e+00 : f32
    %58 = vector.broadcast %cst_34 : f32 to vector<16x16xf32>
    %59 = arith.subf %58, %53 : vector<16x16xf32>
    %60 = arith.mulf %59, %39 : vector<16x16xf32>
    %61 = arith.addf %57, %60 : vector<16x16xf32>
    %c0_35 = arith.constant 0 : index
    %c0_36 = arith.constant 0 : index
    %62 = vector.load %arg9[%c0_35, %c0_36] : memref<16x16xf32, #tpu.memory_space<vmem>>, vector<16x16xf32>
    tpu.vector_store %arg9[%c0_35, %c0_36], %61 {strides = array<i32>} : memref<16x16xf32, #tpu.memory_space<vmem>>, vector<16x16xf32>,
    return
  }
  func.func @transform_0(%arg0: i32) -> (i32, i32) {
    %c0_i32 = arith.constant 0 : i32
    %c0_i32_0 = arith.constant 0 : i32
    return %arg0, %c0_i32 : i32, i32
  }
  func.func @transform_1(%arg0: i32) -> (i32, i32, i32) {
    %c0_i32 = arith.constant 0 : i32
    %c0_i32_0 = arith.constant 0 : i32
    %c0_i32_1 = arith.constant 0 : i32
    return %c0_i32, %arg0, %c0_i32_0 : i32, i32, i32
  }
  func.func @transform_2(%arg0: i32) -> (i32, i32) {
    %c0_i32 = arith.constant 0 : i32
    %c0_i32_0 = arith.constant 0 : i32
    %c0_i32_1 = arith.constant 0 : i32
    return %c0_i32, %c0_i32_0 : i32, i32
  }
  func.func @transform_3(%arg0: i32) -> (i32, i32) {
    %c0_i32 = arith.constant 0 : i32
    %c0_i32_0 = arith.constant 0 : i32
    %c0_i32_1 = arith.constant 0 : i32
    return %c0_i32, %c0_i32_0 : i32, i32
  }
  func.func @transform_4(%arg0: i32) -> (i32, i32) {
    %c0_i32 = arith.constant 0 : i32
    %c0_i32_0 = arith.constant 0 : i32
    %c0_i32_1 = arith.constant 0 : i32
    return %c0_i32, %c0_i32_0 : i32, i32
  }
  func.func @transform_5(%arg0: i32) -> (i32, i32) {
    %c0_i32 = arith.constant 0 : i32
    %c0_i32_0 = arith.constant 0 : i32
    %c0_i32_1 = arith.constant 0 : i32
    return %c0_i32, %c0_i32_0 : i32, i32
  }
  func.func @transform_6(%arg0: i32) -> (i32, i32, i32) {
    %c0_i32 = arith.constant 0 : i32
    %c0_i32_0 = arith.constant 0 : i32
    %c0_i32_1 = arith.constant 0 : i32
    %c0_i32_2 = arith.constant 0 : i32
    return %c0_i32, %c0_i32_0, %c0_i32_1 : i32, i32, i32
  }
  func.func @transform_7(%arg0: i32) -> (i32, i32, i32) {
    %c0_i32 = arith.constant 0 : i32
    %c0_i32_0 = arith.constant 0 : i32
    %c0_i32_1 = arith.constant 0 : i32
    %c0_i32_2 = arith.constant 0 : i32
    return %c0_i32, %c0_i32_0, %c0_i32_1 : i32, i32, i32
  }
  func.func @transform_8(%arg0: i32) -> (i32, i32) {
    %c0_i32 = arith.constant 0 : i32
    %c0_i32_0 = arith.constant 0 : i32
    return %arg0, %c0_i32 : i32, i32
  }
}

module attributes {stable_mosaic.version = 11 : i64} {
  func.func @_bilstm_kernel(%arg0: i32, %arg1: memref<16x4x64xf32, #tpu.memory_space<vmem>>, %arg2: memref<32x64xbf16, #tpu.memory_space<vmem>>, %arg3: memref<16x4x1xf32, #tpu.memory_space<vmem>>, %arg4: memref<4x32xf32, #tpu.memory_space<vmem>>, %arg5: memref<16x4x16xf32, #tpu.memory_space<vmem>>, %arg6: memref<4x32xf32, #tpu.memory_space<vmem>>, %arg7: memref<4x16xf32, #tpu.memory_space<vmem>>) attributes {dimension_semantics = [#tpu.dimension_semantics<arbitrary>], iteration_bounds = array<i64: 1>, scalar_prefetch = 0 : i64, scratch_operands = 2 : i64, tpu.core_type = #tpu.core_type<tc>, window_params = [{pipeline_mode = #tpu.pipeline_mode<synchronous>, transform_indices = @transform_0, window_bounds = array<i64: 16, 4, 64>}, {pipeline_mode = #tpu.pipeline_mode<synchronous>, transform_indices = @transform_1, window_bounds = array<i64: 32, 64>}, {pipeline_mode = #tpu.pipeline_mode<synchronous>, transform_indices = @transform_2, window_bounds = array<i64: 16, 4, 1>}, {pipeline_mode = #tpu.pipeline_mode<synchronous>, transform_indices = @transform_3, window_bounds = array<i64: 4, 32>}, {pipeline_mode = #tpu.pipeline_mode<synchronous>, transform_indices = @transform_4, window_bounds = array<i64: 16, 4, 16>}]} {
    %c0 = arith.constant 0 : index
    %c0_0 = arith.constant 0 : index
    %0 = vector.load %arg2[%c0, %c0_0] : memref<32x64xbf16, #tpu.memory_space<vmem>>, vector<32x64xbf16>
    %c0_1 = arith.constant 0 : index
    %c0_2 = arith.constant 0 : index
    %1 = vector.load %arg4[%c0_1, %c0_2] : memref<4x32xf32, #tpu.memory_space<vmem>>, vector<4x32xf32>
    %cst = arith.constant 0.000000e+00 : f32
    %2 = vector.broadcast %cst : f32 to vector<4x32xf32>
    %c0_3 = arith.constant 0 : index
    %c0_4 = arith.constant 0 : index
    %3 = vector.load %arg6[%c0_3, %c0_4] : memref<4x32xf32, #tpu.memory_space<vmem>>, vector<4x32xf32>
    tpu.vector_store %arg6[%c0_3, %c0_4], %2 {strides = array<i32>} : memref<4x32xf32, #tpu.memory_space<vmem>>, vector<4x32xf32>,
    %cst_5 = arith.constant 0.000000e+00 : f32
    %4 = vector.broadcast %cst_5 : f32 to vector<4x16xf32>
    %c0_6 = arith.constant 0 : index
    %c0_7 = arith.constant 0 : index
    %5 = vector.load %arg7[%c0_6, %c0_7] : memref<4x16xf32, #tpu.memory_space<vmem>>, vector<4x16xf32>
    tpu.vector_store %arg7[%c0_6, %c0_7], %4 {strides = array<i32>} : memref<4x16xf32, #tpu.memory_space<vmem>>, vector<4x16xf32>,
    %c0_i32 = arith.constant 0 : i32
    %6 = arith.index_cast %c0_i32 : i32 to index
    %c0_8 = arith.constant 0 : index
    %c0_9 = arith.constant 0 : index
    %7 = vector.load %arg1[%6, %c0_8, %c0_9] : memref<16x4x64xf32, #tpu.memory_space<vmem>>, vector<1x4x64xf32>
    %8 = vector.shape_cast %7 : vector<1x4x64xf32> to vector<4x64xf32>
    %c0_10 = arith.constant 0 : index
    %c0_11 = arith.constant 0 : index
    %9 = vector.load %arg6[%c0_10, %c0_11] : memref<4x32xf32, #tpu.memory_space<vmem>>, vector<4x32xf32>
    %10 = arith.truncf %9 : vector<4x32xf32> to vector<4x32xbf16>
    %cst_12 = arith.constant dense<0.000000e+00> : vector<4x64xf32>
    %11 = tpu.matmul %10, %0, %cst_12 {dimension_numbers = #tpu.dot_dimension_numbers<[1], [0], [0], [1], [0, 0, 1, 1], [], []>} : vector<4x32xbf16>, vector<32x64xbf16>, vector<4x64xf32> -> vector<4x64xf32>
    %12 = arith.addf %8, %11 : vector<4x64xf32>
    %13 = vector.extract_strided_slice %12 {offsets = [0, 0], sizes = [4, 48], strides = [1, 1]} : vector<4x64xf32> to vector<4x48xf32>
    %14 = arith.negf %13 : vector<4x48xf32>
    %15 = math.exp %14 : vector<4x48xf32>
    %cst_13 = arith.constant 1.000000e+00 : f32
    %16 = vector.broadcast %cst_13 : f32 to vector<4x48xf32>
    %17 = arith.addf %16, %15 : vector<4x48xf32>
    %18 = arith.divf %16, %17 : vector<4x48xf32>
    %19 = vector.extract_strided_slice %18 {offsets = [0, 0], sizes = [4, 16], strides = [1, 1]} : vector<4x48xf32> to vector<4x16xf32>
    %20 = vector.extract_strided_slice %18 {offsets = [0, 16], sizes = [4, 16], strides = [1, 1]} : vector<4x48xf32> to vector<4x16xf32>
    %21 = vector.extract_strided_slice %18 {offsets = [0, 32], sizes = [4, 16], strides = [1, 1]} : vector<4x48xf32> to vector<4x16xf32>
    %22 = vector.extract_strided_slice %12 {offsets = [0, 48], sizes = [4, 16], strides = [1, 1]} : vector<4x64xf32> to vector<4x16xf32>
    %23 = math.tanh %22 : vector<4x16xf32>
    %24 = arith.index_cast %c0_i32 : i32 to index
    %c0_14 = arith.constant 0 : index
    %c0_15 = arith.constant 0 : index
    %25 = vector.load %arg3[%24, %c0_14, %c0_15] : memref<16x4x1xf32, #tpu.memory_space<vmem>>, vector<1x4x1xf32>
    %26 = vector.shape_cast %25 : vector<1x4x1xf32> to vector<4x1xf32>
    %c0_16 = arith.constant 0 : index
    %c0_17 = arith.constant 0 : index
    %27 = vector.load %arg7[%c0_16, %c0_17] : memref<4x16xf32, #tpu.memory_space<vmem>>, vector<4x16xf32>
    %28 = arith.mulf %20, %27 : vector<4x16xf32>
    %29 = arith.mulf %19, %23 : vector<4x16xf32>
    %30 = arith.addf %28, %29 : vector<4x16xf32>
    %31 = math.tanh %30 : vector<4x16xf32>
    %32 = arith.mulf %21, %31 : vector<4x16xf32>
    %33 = vector.broadcast %26 : vector<4x1xf32> to vector<4x16xf32>
    %34 = arith.mulf %33, %30 : vector<4x16xf32>
    %cst_18 = arith.constant 1.000000e+00 : f32
    %35 = vector.broadcast %cst_18 : f32 to vector<4x1xf32>
    %36 = arith.subf %35, %26 : vector<4x1xf32>
    %c0_19 = arith.constant 0 : index
    %c0_20 = arith.constant 0 : index
    %37 = vector.load %arg7[%c0_19, %c0_20] : memref<4x16xf32, #tpu.memory_space<vmem>>, vector<4x16xf32>
    %38 = vector.broadcast %36 : vector<4x1xf32> to vector<4x16xf32>
    %39 = arith.mulf %38, %37 : vector<4x16xf32>
    %40 = arith.addf %34, %39 : vector<4x16xf32>
    %c0_21 = arith.constant 0 : index
    %c0_22 = arith.constant 0 : index
    %41 = vector.load %arg7[%c0_21, %c0_22] : memref<4x16xf32, #tpu.memory_space<vmem>>, vector<4x16xf32>
    tpu.vector_store %arg7[%c0_21, %c0_22], %40 {strides = array<i32>} : memref<4x16xf32, #tpu.memory_space<vmem>>, vector<4x16xf32>,
    %42 = tpu.concatenate %32, %32 in 1 : vector<4x16xf32>, vector<4x16xf32> -> vector<4x32xf32>
    %43 = arith.mulf %42, %1 : vector<4x32xf32>
    %44 = vector.broadcast %26 : vector<4x1xf32> to vector<4x32xf32>
    %45 = arith.mulf %44, %43 : vector<4x32xf32>
    %cst_23 = arith.constant 1.000000e+00 : f32
    %46 = vector.broadcast %cst_23 : f32 to vector<4x1xf32>
    %47 = arith.subf %46, %26 : vector<4x1xf32>
    %c0_24 = arith.constant 0 : index
    %c0_25 = arith.constant 0 : index
    %48 = vector.load %arg6[%c0_24, %c0_25] : memref<4x32xf32, #tpu.memory_space<vmem>>, vector<4x32xf32>
    %49 = vector.broadcast %47 : vector<4x1xf32> to vector<4x32xf32>
    %50 = arith.mulf %49, %48 : vector<4x32xf32>
    %51 = arith.addf %45, %50 : vector<4x32xf32>
    %c0_26 = arith.constant 0 : index
    %c0_27 = arith.constant 0 : index
    %52 = vector.load %arg6[%c0_26, %c0_27] : memref<4x32xf32, #tpu.memory_space<vmem>>, vector<4x32xf32>
    tpu.vector_store %arg6[%c0_26, %c0_27], %51 {strides = array<i32>} : memref<4x32xf32, #tpu.memory_space<vmem>>, vector<4x32xf32>,
    %53 = vector.broadcast %26 : vector<4x1xf32> to vector<4x16xf32>
    %54 = arith.mulf %32, %53 : vector<4x16xf32>
    %55 = arith.index_cast %c0_i32 : i32 to index
    %c0_28 = arith.constant 0 : index
    %c0_29 = arith.constant 0 : index
    %56 = vector.load %arg5[%55, %c0_28, %c0_29] : memref<16x4x16xf32, #tpu.memory_space<vmem>>, vector<1x4x16xf32>
    %57 = vector.shape_cast %56 : vector<1x4x16xf32> to vector<4x16xf32>
    %58 = vector.shape_cast %54 : vector<4x16xf32> to vector<1x4x16xf32>
    tpu.vector_store %arg5[%55, %c0_28, %c0_29], %58 {strides = array<i32>} : memref<16x4x16xf32, #tpu.memory_space<vmem>>, vector<1x4x16xf32>,
    %c1_i32 = arith.constant 1 : i32
    %59 = arith.index_cast %c1_i32 : i32 to index
    %c0_30 = arith.constant 0 : index
    %c0_31 = arith.constant 0 : index
    %60 = vector.load %arg1[%59, %c0_30, %c0_31] : memref<16x4x64xf32, #tpu.memory_space<vmem>>, vector<1x4x64xf32>
    %61 = vector.shape_cast %60 : vector<1x4x64xf32> to vector<4x64xf32>
    %c0_32 = arith.constant 0 : index
    %c0_33 = arith.constant 0 : index
    %62 = vector.load %arg6[%c0_32, %c0_33] : memref<4x32xf32, #tpu.memory_space<vmem>>, vector<4x32xf32>
    %63 = arith.truncf %62 : vector<4x32xf32> to vector<4x32xbf16>
    %cst_34 = arith.constant dense<0.000000e+00> : vector<4x64xf32>
    %64 = tpu.matmul %63, %0, %cst_34 {dimension_numbers = #tpu.dot_dimension_numbers<[1], [0], [0], [1], [0, 0, 1, 1], [], []>} : vector<4x32xbf16>, vector<32x64xbf16>, vector<4x64xf32> -> vector<4x64xf32>
    %65 = arith.addf %61, %64 : vector<4x64xf32>
    %66 = vector.extract_strided_slice %65 {offsets = [0, 0], sizes = [4, 48], strides = [1, 1]} : vector<4x64xf32> to vector<4x48xf32>
    %67 = arith.negf %66 : vector<4x48xf32>
    %68 = math.exp %67 : vector<4x48xf32>
    %cst_35 = arith.constant 1.000000e+00 : f32
    %69 = vector.broadcast %cst_35 : f32 to vector<4x48xf32>
    %70 = arith.addf %69, %68 : vector<4x48xf32>
    %71 = arith.divf %69, %70 : vector<4x48xf32>
    %72 = vector.extract_strided_slice %71 {offsets = [0, 0], sizes = [4, 16], strides = [1, 1]} : vector<4x48xf32> to vector<4x16xf32>
    %73 = vector.extract_strided_slice %71 {offsets = [0, 16], sizes = [4, 16], strides = [1, 1]} : vector<4x48xf32> to vector<4x16xf32>
    %74 = vector.extract_strided_slice %71 {offsets = [0, 32], sizes = [4, 16], strides = [1, 1]} : vector<4x48xf32> to vector<4x16xf32>
    %75 = vector.extract_strided_slice %65 {offsets = [0, 48], sizes = [4, 16], strides = [1, 1]} : vector<4x64xf32> to vector<4x16xf32>
    %76 = math.tanh %75 : vector<4x16xf32>
    %77 = arith.index_cast %c1_i32 : i32 to index
    %c0_36 = arith.constant 0 : index
    %c0_37 = arith.constant 0 : index
    %78 = vector.load %arg3[%77, %c0_36, %c0_37] : memref<16x4x1xf32, #tpu.memory_space<vmem>>, vector<1x4x1xf32>
    %79 = vector.shape_cast %78 : vector<1x4x1xf32> to vector<4x1xf32>
    %c0_38 = arith.constant 0 : index
    %c0_39 = arith.constant 0 : index
    %80 = vector.load %arg7[%c0_38, %c0_39] : memref<4x16xf32, #tpu.memory_space<vmem>>, vector<4x16xf32>
    %81 = arith.mulf %73, %80 : vector<4x16xf32>
    %82 = arith.mulf %72, %76 : vector<4x16xf32>
    %83 = arith.addf %81, %82 : vector<4x16xf32>
    %84 = math.tanh %83 : vector<4x16xf32>
    %85 = arith.mulf %74, %84 : vector<4x16xf32>
    %86 = vector.broadcast %79 : vector<4x1xf32> to vector<4x16xf32>
    %87 = arith.mulf %86, %83 : vector<4x16xf32>
    %cst_40 = arith.constant 1.000000e+00 : f32
    %88 = vector.broadcast %cst_40 : f32 to vector<4x1xf32>
    %89 = arith.subf %88, %79 : vector<4x1xf32>
    %c0_41 = arith.constant 0 : index
    %c0_42 = arith.constant 0 : index
    %90 = vector.load %arg7[%c0_41, %c0_42] : memref<4x16xf32, #tpu.memory_space<vmem>>, vector<4x16xf32>
    %91 = vector.broadcast %89 : vector<4x1xf32> to vector<4x16xf32>
    %92 = arith.mulf %91, %90 : vector<4x16xf32>
    %93 = arith.addf %87, %92 : vector<4x16xf32>
    %c0_43 = arith.constant 0 : index
    %c0_44 = arith.constant 0 : index
    %94 = vector.load %arg7[%c0_43, %c0_44] : memref<4x16xf32, #tpu.memory_space<vmem>>, vector<4x16xf32>
    tpu.vector_store %arg7[%c0_43, %c0_44], %93 {strides = array<i32>} : memref<4x16xf32, #tpu.memory_space<vmem>>, vector<4x16xf32>,
    %95 = tpu.concatenate %85, %85 in 1 : vector<4x16xf32>, vector<4x16xf32> -> vector<4x32xf32>
    %96 = arith.mulf %95, %1 : vector<4x32xf32>
    %97 = vector.broadcast %79 : vector<4x1xf32> to vector<4x32xf32>
    %98 = arith.mulf %97, %96 : vector<4x32xf32>
    %cst_45 = arith.constant 1.000000e+00 : f32
    %99 = vector.broadcast %cst_45 : f32 to vector<4x1xf32>
    %100 = arith.subf %99, %79 : vector<4x1xf32>
    %c0_46 = arith.constant 0 : index
    %c0_47 = arith.constant 0 : index
    %101 = vector.load %arg6[%c0_46, %c0_47] : memref<4x32xf32, #tpu.memory_space<vmem>>, vector<4x32xf32>
    %102 = vector.broadcast %100 : vector<4x1xf32> to vector<4x32xf32>
    %103 = arith.mulf %102, %101 : vector<4x32xf32>
    %104 = arith.addf %98, %103 : vector<4x32xf32>
    %c0_48 = arith.constant 0 : index
    %c0_49 = arith.constant 0 : index
    %105 = vector.load %arg6[%c0_48, %c0_49] : memref<4x32xf32, #tpu.memory_space<vmem>>, vector<4x32xf32>
    tpu.vector_store %arg6[%c0_48, %c0_49], %104 {strides = array<i32>} : memref<4x32xf32, #tpu.memory_space<vmem>>, vector<4x32xf32>,
    %106 = vector.broadcast %79 : vector<4x1xf32> to vector<4x16xf32>
    %107 = arith.mulf %85, %106 : vector<4x16xf32>
    %108 = arith.index_cast %c1_i32 : i32 to index
    %c0_50 = arith.constant 0 : index
    %c0_51 = arith.constant 0 : index
    %109 = vector.load %arg5[%108, %c0_50, %c0_51] : memref<16x4x16xf32, #tpu.memory_space<vmem>>, vector<1x4x16xf32>
    %110 = vector.shape_cast %109 : vector<1x4x16xf32> to vector<4x16xf32>
    %111 = vector.shape_cast %107 : vector<4x16xf32> to vector<1x4x16xf32>
    tpu.vector_store %arg5[%108, %c0_50, %c0_51], %111 {strides = array<i32>} : memref<16x4x16xf32, #tpu.memory_space<vmem>>, vector<1x4x16xf32>,
    %c2_i32 = arith.constant 2 : i32
    %112 = arith.index_cast %c2_i32 : i32 to index
    %c0_52 = arith.constant 0 : index
    %c0_53 = arith.constant 0 : index
    %113 = vector.load %arg1[%112, %c0_52, %c0_53] : memref<16x4x64xf32, #tpu.memory_space<vmem>>, vector<1x4x64xf32>
    %114 = vector.shape_cast %113 : vector<1x4x64xf32> to vector<4x64xf32>
    %c0_54 = arith.constant 0 : index
    %c0_55 = arith.constant 0 : index
    %115 = vector.load %arg6[%c0_54, %c0_55] : memref<4x32xf32, #tpu.memory_space<vmem>>, vector<4x32xf32>
    %116 = arith.truncf %115 : vector<4x32xf32> to vector<4x32xbf16>
    %cst_56 = arith.constant dense<0.000000e+00> : vector<4x64xf32>
    %117 = tpu.matmul %116, %0, %cst_56 {dimension_numbers = #tpu.dot_dimension_numbers<[1], [0], [0], [1], [0, 0, 1, 1], [], []>} : vector<4x32xbf16>, vector<32x64xbf16>, vector<4x64xf32> -> vector<4x64xf32>
    %118 = arith.addf %114, %117 : vector<4x64xf32>
    %119 = vector.extract_strided_slice %118 {offsets = [0, 0], sizes = [4, 48], strides = [1, 1]} : vector<4x64xf32> to vector<4x48xf32>
    %120 = arith.negf %119 : vector<4x48xf32>
    %121 = math.exp %120 : vector<4x48xf32>
    %cst_57 = arith.constant 1.000000e+00 : f32
    %122 = vector.broadcast %cst_57 : f32 to vector<4x48xf32>
    %123 = arith.addf %122, %121 : vector<4x48xf32>
    %124 = arith.divf %122, %123 : vector<4x48xf32>
    %125 = vector.extract_strided_slice %124 {offsets = [0, 0], sizes = [4, 16], strides = [1, 1]} : vector<4x48xf32> to vector<4x16xf32>
    %126 = vector.extract_strided_slice %124 {offsets = [0, 16], sizes = [4, 16], strides = [1, 1]} : vector<4x48xf32> to vector<4x16xf32>
    %127 = vector.extract_strided_slice %124 {offsets = [0, 32], sizes = [4, 16], strides = [1, 1]} : vector<4x48xf32> to vector<4x16xf32>
    %128 = vector.extract_strided_slice %118 {offsets = [0, 48], sizes = [4, 16], strides = [1, 1]} : vector<4x64xf32> to vector<4x16xf32>
    %129 = math.tanh %128 : vector<4x16xf32>
    %130 = arith.index_cast %c2_i32 : i32 to index
    %c0_58 = arith.constant 0 : index
    %c0_59 = arith.constant 0 : index
    %131 = vector.load %arg3[%130, %c0_58, %c0_59] : memref<16x4x1xf32, #tpu.memory_space<vmem>>, vector<1x4x1xf32>
    %132 = vector.shape_cast %131 : vector<1x4x1xf32> to vector<4x1xf32>
    %c0_60 = arith.constant 0 : index
    %c0_61 = arith.constant 0 : index
    %133 = vector.load %arg7[%c0_60, %c0_61] : memref<4x16xf32, #tpu.memory_space<vmem>>, vector<4x16xf32>
    %134 = arith.mulf %126, %133 : vector<4x16xf32>
    %135 = arith.mulf %125, %129 : vector<4x16xf32>
    %136 = arith.addf %134, %135 : vector<4x16xf32>
    %137 = math.tanh %136 : vector<4x16xf32>
    %138 = arith.mulf %127, %137 : vector<4x16xf32>
    %139 = vector.broadcast %132 : vector<4x1xf32> to vector<4x16xf32>
    %140 = arith.mulf %139, %136 : vector<4x16xf32>
    %cst_62 = arith.constant 1.000000e+00 : f32
    %141 = vector.broadcast %cst_62 : f32 to vector<4x1xf32>
    %142 = arith.subf %141, %132 : vector<4x1xf32>
    %c0_63 = arith.constant 0 : index
    %c0_64 = arith.constant 0 : index
    %143 = vector.load %arg7[%c0_63, %c0_64] : memref<4x16xf32, #tpu.memory_space<vmem>>, vector<4x16xf32>
    %144 = vector.broadcast %142 : vector<4x1xf32> to vector<4x16xf32>
    %145 = arith.mulf %144, %143 : vector<4x16xf32>
    %146 = arith.addf %140, %145 : vector<4x16xf32>
    %c0_65 = arith.constant 0 : index
    %c0_66 = arith.constant 0 : index
    %147 = vector.load %arg7[%c0_65, %c0_66] : memref<4x16xf32, #tpu.memory_space<vmem>>, vector<4x16xf32>
    tpu.vector_store %arg7[%c0_65, %c0_66], %146 {strides = array<i32>} : memref<4x16xf32, #tpu.memory_space<vmem>>, vector<4x16xf32>,
    %148 = tpu.concatenate %138, %138 in 1 : vector<4x16xf32>, vector<4x16xf32> -> vector<4x32xf32>
    %149 = arith.mulf %148, %1 : vector<4x32xf32>
    %150 = vector.broadcast %132 : vector<4x1xf32> to vector<4x32xf32>
    %151 = arith.mulf %150, %149 : vector<4x32xf32>
    %cst_67 = arith.constant 1.000000e+00 : f32
    %152 = vector.broadcast %cst_67 : f32 to vector<4x1xf32>
    %153 = arith.subf %152, %132 : vector<4x1xf32>
    %c0_68 = arith.constant 0 : index
    %c0_69 = arith.constant 0 : index
    %154 = vector.load %arg6[%c0_68, %c0_69] : memref<4x32xf32, #tpu.memory_space<vmem>>, vector<4x32xf32>
    %155 = vector.broadcast %153 : vector<4x1xf32> to vector<4x32xf32>
    %156 = arith.mulf %155, %154 : vector<4x32xf32>
    %157 = arith.addf %151, %156 : vector<4x32xf32>
    %c0_70 = arith.constant 0 : index
    %c0_71 = arith.constant 0 : index
    %158 = vector.load %arg6[%c0_70, %c0_71] : memref<4x32xf32, #tpu.memory_space<vmem>>, vector<4x32xf32>
    tpu.vector_store %arg6[%c0_70, %c0_71], %157 {strides = array<i32>} : memref<4x32xf32, #tpu.memory_space<vmem>>, vector<4x32xf32>,
    %159 = vector.broadcast %132 : vector<4x1xf32> to vector<4x16xf32>
    %160 = arith.mulf %138, %159 : vector<4x16xf32>
    %161 = arith.index_cast %c2_i32 : i32 to index
    %c0_72 = arith.constant 0 : index
    %c0_73 = arith.constant 0 : index
    %162 = vector.load %arg5[%161, %c0_72, %c0_73] : memref<16x4x16xf32, #tpu.memory_space<vmem>>, vector<1x4x16xf32>
    %163 = vector.shape_cast %162 : vector<1x4x16xf32> to vector<4x16xf32>
    %164 = vector.shape_cast %160 : vector<4x16xf32> to vector<1x4x16xf32>
    tpu.vector_store %arg5[%161, %c0_72, %c0_73], %164 {strides = array<i32>} : memref<16x4x16xf32, #tpu.memory_space<vmem>>, vector<1x4x16xf32>,
    %c3_i32 = arith.constant 3 : i32
    %165 = arith.index_cast %c3_i32 : i32 to index
    %c0_74 = arith.constant 0 : index
    %c0_75 = arith.constant 0 : index
    %166 = vector.load %arg1[%165, %c0_74, %c0_75] : memref<16x4x64xf32, #tpu.memory_space<vmem>>, vector<1x4x64xf32>
    %167 = vector.shape_cast %166 : vector<1x4x64xf32> to vector<4x64xf32>
    %c0_76 = arith.constant 0 : index
    %c0_77 = arith.constant 0 : index
    %168 = vector.load %arg6[%c0_76, %c0_77] : memref<4x32xf32, #tpu.memory_space<vmem>>, vector<4x32xf32>
    %169 = arith.truncf %168 : vector<4x32xf32> to vector<4x32xbf16>
    %cst_78 = arith.constant dense<0.000000e+00> : vector<4x64xf32>
    %170 = tpu.matmul %169, %0, %cst_78 {dimension_numbers = #tpu.dot_dimension_numbers<[1], [0], [0], [1], [0, 0, 1, 1], [], []>} : vector<4x32xbf16>, vector<32x64xbf16>, vector<4x64xf32> -> vector<4x64xf32>
    %171 = arith.addf %167, %170 : vector<4x64xf32>
    %172 = vector.extract_strided_slice %171 {offsets = [0, 0], sizes = [4, 48], strides = [1, 1]} : vector<4x64xf32> to vector<4x48xf32>
    %173 = arith.negf %172 : vector<4x48xf32>
    %174 = math.exp %173 : vector<4x48xf32>
    %cst_79 = arith.constant 1.000000e+00 : f32
    %175 = vector.broadcast %cst_79 : f32 to vector<4x48xf32>
    %176 = arith.addf %175, %174 : vector<4x48xf32>
    %177 = arith.divf %175, %176 : vector<4x48xf32>
    %178 = vector.extract_strided_slice %177 {offsets = [0, 0], sizes = [4, 16], strides = [1, 1]} : vector<4x48xf32> to vector<4x16xf32>
    %179 = vector.extract_strided_slice %177 {offsets = [0, 16], sizes = [4, 16], strides = [1, 1]} : vector<4x48xf32> to vector<4x16xf32>
    %180 = vector.extract_strided_slice %177 {offsets = [0, 32], sizes = [4, 16], strides = [1, 1]} : vector<4x48xf32> to vector<4x16xf32>
    %181 = vector.extract_strided_slice %171 {offsets = [0, 48], sizes = [4, 16], strides = [1, 1]} : vector<4x64xf32> to vector<4x16xf32>
    %182 = math.tanh %181 : vector<4x16xf32>
    %183 = arith.index_cast %c3_i32 : i32 to index
    %c0_80 = arith.constant 0 : index
    %c0_81 = arith.constant 0 : index
    %184 = vector.load %arg3[%183, %c0_80, %c0_81] : memref<16x4x1xf32, #tpu.memory_space<vmem>>, vector<1x4x1xf32>
    %185 = vector.shape_cast %184 : vector<1x4x1xf32> to vector<4x1xf32>
    %c0_82 = arith.constant 0 : index
    %c0_83 = arith.constant 0 : index
    %186 = vector.load %arg7[%c0_82, %c0_83] : memref<4x16xf32, #tpu.memory_space<vmem>>, vector<4x16xf32>
    %187 = arith.mulf %179, %186 : vector<4x16xf32>
    %188 = arith.mulf %178, %182 : vector<4x16xf32>
    %189 = arith.addf %187, %188 : vector<4x16xf32>
    %190 = math.tanh %189 : vector<4x16xf32>
    %191 = arith.mulf %180, %190 : vector<4x16xf32>
    %192 = vector.broadcast %185 : vector<4x1xf32> to vector<4x16xf32>
    %193 = arith.mulf %192, %189 : vector<4x16xf32>
    %cst_84 = arith.constant 1.000000e+00 : f32
    %194 = vector.broadcast %cst_84 : f32 to vector<4x1xf32>
    %195 = arith.subf %194, %185 : vector<4x1xf32>
    %c0_85 = arith.constant 0 : index
    %c0_86 = arith.constant 0 : index
    %196 = vector.load %arg7[%c0_85, %c0_86] : memref<4x16xf32, #tpu.memory_space<vmem>>, vector<4x16xf32>
    %197 = vector.broadcast %195 : vector<4x1xf32> to vector<4x16xf32>
    %198 = arith.mulf %197, %196 : vector<4x16xf32>
    %199 = arith.addf %193, %198 : vector<4x16xf32>
    %c0_87 = arith.constant 0 : index
    %c0_88 = arith.constant 0 : index
    %200 = vector.load %arg7[%c0_87, %c0_88] : memref<4x16xf32, #tpu.memory_space<vmem>>, vector<4x16xf32>
    tpu.vector_store %arg7[%c0_87, %c0_88], %199 {strides = array<i32>} : memref<4x16xf32, #tpu.memory_space<vmem>>, vector<4x16xf32>,
    %201 = tpu.concatenate %191, %191 in 1 : vector<4x16xf32>, vector<4x16xf32> -> vector<4x32xf32>
    %202 = arith.mulf %201, %1 : vector<4x32xf32>
    %203 = vector.broadcast %185 : vector<4x1xf32> to vector<4x32xf32>
    %204 = arith.mulf %203, %202 : vector<4x32xf32>
    %cst_89 = arith.constant 1.000000e+00 : f32
    %205 = vector.broadcast %cst_89 : f32 to vector<4x1xf32>
    %206 = arith.subf %205, %185 : vector<4x1xf32>
    %c0_90 = arith.constant 0 : index
    %c0_91 = arith.constant 0 : index
    %207 = vector.load %arg6[%c0_90, %c0_91] : memref<4x32xf32, #tpu.memory_space<vmem>>, vector<4x32xf32>
    %208 = vector.broadcast %206 : vector<4x1xf32> to vector<4x32xf32>
    %209 = arith.mulf %208, %207 : vector<4x32xf32>
    %210 = arith.addf %204, %209 : vector<4x32xf32>
    %c0_92 = arith.constant 0 : index
    %c0_93 = arith.constant 0 : index
    %211 = vector.load %arg6[%c0_92, %c0_93] : memref<4x32xf32, #tpu.memory_space<vmem>>, vector<4x32xf32>
    tpu.vector_store %arg6[%c0_92, %c0_93], %210 {strides = array<i32>} : memref<4x32xf32, #tpu.memory_space<vmem>>, vector<4x32xf32>,
    %212 = vector.broadcast %185 : vector<4x1xf32> to vector<4x16xf32>
    %213 = arith.mulf %191, %212 : vector<4x16xf32>
    %214 = arith.index_cast %c3_i32 : i32 to index
    %c0_94 = arith.constant 0 : index
    %c0_95 = arith.constant 0 : index
    %215 = vector.load %arg5[%214, %c0_94, %c0_95] : memref<16x4x16xf32, #tpu.memory_space<vmem>>, vector<1x4x16xf32>
    %216 = vector.shape_cast %215 : vector<1x4x16xf32> to vector<4x16xf32>
    %217 = vector.shape_cast %213 : vector<4x16xf32> to vector<1x4x16xf32>
    tpu.vector_store %arg5[%214, %c0_94, %c0_95], %217 {strides = array<i32>} : memref<16x4x16xf32, #tpu.memory_space<vmem>>, vector<1x4x16xf32>,
    %c4_i32 = arith.constant 4 : i32
    %218 = arith.index_cast %c4_i32 : i32 to index
    %c0_96 = arith.constant 0 : index
    %c0_97 = arith.constant 0 : index
    %219 = vector.load %arg1[%218, %c0_96, %c0_97] : memref<16x4x64xf32, #tpu.memory_space<vmem>>, vector<1x4x64xf32>
    %220 = vector.shape_cast %219 : vector<1x4x64xf32> to vector<4x64xf32>
    %c0_98 = arith.constant 0 : index
    %c0_99 = arith.constant 0 : index
    %221 = vector.load %arg6[%c0_98, %c0_99] : memref<4x32xf32, #tpu.memory_space<vmem>>, vector<4x32xf32>
    %222 = arith.truncf %221 : vector<4x32xf32> to vector<4x32xbf16>
    %cst_100 = arith.constant dense<0.000000e+00> : vector<4x64xf32>
    %223 = tpu.matmul %222, %0, %cst_100 {dimension_numbers = #tpu.dot_dimension_numbers<[1], [0], [0], [1], [0, 0, 1, 1], [], []>} : vector<4x32xbf16>, vector<32x64xbf16>, vector<4x64xf32> -> vector<4x64xf32>
    %224 = arith.addf %220, %223 : vector<4x64xf32>
    %225 = vector.extract_strided_slice %224 {offsets = [0, 0], sizes = [4, 48], strides = [1, 1]} : vector<4x64xf32> to vector<4x48xf32>
    %226 = arith.negf %225 : vector<4x48xf32>
    %227 = math.exp %226 : vector<4x48xf32>
    %cst_101 = arith.constant 1.000000e+00 : f32
    %228 = vector.broadcast %cst_101 : f32 to vector<4x48xf32>
    %229 = arith.addf %228, %227 : vector<4x48xf32>
    %230 = arith.divf %228, %229 : vector<4x48xf32>
    %231 = vector.extract_strided_slice %230 {offsets = [0, 0], sizes = [4, 16], strides = [1, 1]} : vector<4x48xf32> to vector<4x16xf32>
    %232 = vector.extract_strided_slice %230 {offsets = [0, 16], sizes = [4, 16], strides = [1, 1]} : vector<4x48xf32> to vector<4x16xf32>
    %233 = vector.extract_strided_slice %230 {offsets = [0, 32], sizes = [4, 16], strides = [1, 1]} : vector<4x48xf32> to vector<4x16xf32>
    %234 = vector.extract_strided_slice %224 {offsets = [0, 48], sizes = [4, 16], strides = [1, 1]} : vector<4x64xf32> to vector<4x16xf32>
    %235 = math.tanh %234 : vector<4x16xf32>
    %236 = arith.index_cast %c4_i32 : i32 to index
    %c0_102 = arith.constant 0 : index
    %c0_103 = arith.constant 0 : index
    %237 = vector.load %arg3[%236, %c0_102, %c0_103] : memref<16x4x1xf32, #tpu.memory_space<vmem>>, vector<1x4x1xf32>
    %238 = vector.shape_cast %237 : vector<1x4x1xf32> to vector<4x1xf32>
    %c0_104 = arith.constant 0 : index
    %c0_105 = arith.constant 0 : index
    %239 = vector.load %arg7[%c0_104, %c0_105] : memref<4x16xf32, #tpu.memory_space<vmem>>, vector<4x16xf32>
    %240 = arith.mulf %232, %239 : vector<4x16xf32>
    %241 = arith.mulf %231, %235 : vector<4x16xf32>
    %242 = arith.addf %240, %241 : vector<4x16xf32>
    %243 = math.tanh %242 : vector<4x16xf32>
    %244 = arith.mulf %233, %243 : vector<4x16xf32>
    %245 = vector.broadcast %238 : vector<4x1xf32> to vector<4x16xf32>
    %246 = arith.mulf %245, %242 : vector<4x16xf32>
    %cst_106 = arith.constant 1.000000e+00 : f32
    %247 = vector.broadcast %cst_106 : f32 to vector<4x1xf32>
    %248 = arith.subf %247, %238 : vector<4x1xf32>
    %c0_107 = arith.constant 0 : index
    %c0_108 = arith.constant 0 : index
    %249 = vector.load %arg7[%c0_107, %c0_108] : memref<4x16xf32, #tpu.memory_space<vmem>>, vector<4x16xf32>
    %250 = vector.broadcast %248 : vector<4x1xf32> to vector<4x16xf32>
    %251 = arith.mulf %250, %249 : vector<4x16xf32>
    %252 = arith.addf %246, %251 : vector<4x16xf32>
    %c0_109 = arith.constant 0 : index
    %c0_110 = arith.constant 0 : index
    %253 = vector.load %arg7[%c0_109, %c0_110] : memref<4x16xf32, #tpu.memory_space<vmem>>, vector<4x16xf32>
    tpu.vector_store %arg7[%c0_109, %c0_110], %252 {strides = array<i32>} : memref<4x16xf32, #tpu.memory_space<vmem>>, vector<4x16xf32>,
    %254 = tpu.concatenate %244, %244 in 1 : vector<4x16xf32>, vector<4x16xf32> -> vector<4x32xf32>
    %255 = arith.mulf %254, %1 : vector<4x32xf32>
    %256 = vector.broadcast %238 : vector<4x1xf32> to vector<4x32xf32>
    %257 = arith.mulf %256, %255 : vector<4x32xf32>
    %cst_111 = arith.constant 1.000000e+00 : f32
    %258 = vector.broadcast %cst_111 : f32 to vector<4x1xf32>
    %259 = arith.subf %258, %238 : vector<4x1xf32>
    %c0_112 = arith.constant 0 : index
    %c0_113 = arith.constant 0 : index
    %260 = vector.load %arg6[%c0_112, %c0_113] : memref<4x32xf32, #tpu.memory_space<vmem>>, vector<4x32xf32>
    %261 = vector.broadcast %259 : vector<4x1xf32> to vector<4x32xf32>
    %262 = arith.mulf %261, %260 : vector<4x32xf32>
    %263 = arith.addf %257, %262 : vector<4x32xf32>
    %c0_114 = arith.constant 0 : index
    %c0_115 = arith.constant 0 : index
    %264 = vector.load %arg6[%c0_114, %c0_115] : memref<4x32xf32, #tpu.memory_space<vmem>>, vector<4x32xf32>
    tpu.vector_store %arg6[%c0_114, %c0_115], %263 {strides = array<i32>} : memref<4x32xf32, #tpu.memory_space<vmem>>, vector<4x32xf32>,
    %265 = vector.broadcast %238 : vector<4x1xf32> to vector<4x16xf32>
    %266 = arith.mulf %244, %265 : vector<4x16xf32>
    %267 = arith.index_cast %c4_i32 : i32 to index
    %c0_116 = arith.constant 0 : index
    %c0_117 = arith.constant 0 : index
    %268 = vector.load %arg5[%267, %c0_116, %c0_117] : memref<16x4x16xf32, #tpu.memory_space<vmem>>, vector<1x4x16xf32>
    %269 = vector.shape_cast %268 : vector<1x4x16xf32> to vector<4x16xf32>
    %270 = vector.shape_cast %266 : vector<4x16xf32> to vector<1x4x16xf32>
    tpu.vector_store %arg5[%267, %c0_116, %c0_117], %270 {strides = array<i32>} : memref<16x4x16xf32, #tpu.memory_space<vmem>>, vector<1x4x16xf32>,
    %c5_i32 = arith.constant 5 : i32
    %271 = arith.index_cast %c5_i32 : i32 to index
    %c0_118 = arith.constant 0 : index
    %c0_119 = arith.constant 0 : index
    %272 = vector.load %arg1[%271, %c0_118, %c0_119] : memref<16x4x64xf32, #tpu.memory_space<vmem>>, vector<1x4x64xf32>
    %273 = vector.shape_cast %272 : vector<1x4x64xf32> to vector<4x64xf32>
    %c0_120 = arith.constant 0 : index
    %c0_121 = arith.constant 0 : index
    %274 = vector.load %arg6[%c0_120, %c0_121] : memref<4x32xf32, #tpu.memory_space<vmem>>, vector<4x32xf32>
    %275 = arith.truncf %274 : vector<4x32xf32> to vector<4x32xbf16>
    %cst_122 = arith.constant dense<0.000000e+00> : vector<4x64xf32>
    %276 = tpu.matmul %275, %0, %cst_122 {dimension_numbers = #tpu.dot_dimension_numbers<[1], [0], [0], [1], [0, 0, 1, 1], [], []>} : vector<4x32xbf16>, vector<32x64xbf16>, vector<4x64xf32> -> vector<4x64xf32>
    %277 = arith.addf %273, %276 : vector<4x64xf32>
    %278 = vector.extract_strided_slice %277 {offsets = [0, 0], sizes = [4, 48], strides = [1, 1]} : vector<4x64xf32> to vector<4x48xf32>
    %279 = arith.negf %278 : vector<4x48xf32>
    %280 = math.exp %279 : vector<4x48xf32>
    %cst_123 = arith.constant 1.000000e+00 : f32
    %281 = vector.broadcast %cst_123 : f32 to vector<4x48xf32>
    %282 = arith.addf %281, %280 : vector<4x48xf32>
    %283 = arith.divf %281, %282 : vector<4x48xf32>
    %284 = vector.extract_strided_slice %283 {offsets = [0, 0], sizes = [4, 16], strides = [1, 1]} : vector<4x48xf32> to vector<4x16xf32>
    %285 = vector.extract_strided_slice %283 {offsets = [0, 16], sizes = [4, 16], strides = [1, 1]} : vector<4x48xf32> to vector<4x16xf32>
    %286 = vector.extract_strided_slice %283 {offsets = [0, 32], sizes = [4, 16], strides = [1, 1]} : vector<4x48xf32> to vector<4x16xf32>
    %287 = vector.extract_strided_slice %277 {offsets = [0, 48], sizes = [4, 16], strides = [1, 1]} : vector<4x64xf32> to vector<4x16xf32>
    %288 = math.tanh %287 : vector<4x16xf32>
    %289 = arith.index_cast %c5_i32 : i32 to index
    %c0_124 = arith.constant 0 : index
    %c0_125 = arith.constant 0 : index
    %290 = vector.load %arg3[%289, %c0_124, %c0_125] : memref<16x4x1xf32, #tpu.memory_space<vmem>>, vector<1x4x1xf32>
    %291 = vector.shape_cast %290 : vector<1x4x1xf32> to vector<4x1xf32>
    %c0_126 = arith.constant 0 : index
    %c0_127 = arith.constant 0 : index
    %292 = vector.load %arg7[%c0_126, %c0_127] : memref<4x16xf32, #tpu.memory_space<vmem>>, vector<4x16xf32>
    %293 = arith.mulf %285, %292 : vector<4x16xf32>
    %294 = arith.mulf %284, %288 : vector<4x16xf32>
    %295 = arith.addf %293, %294 : vector<4x16xf32>
    %296 = math.tanh %295 : vector<4x16xf32>
    %297 = arith.mulf %286, %296 : vector<4x16xf32>
    %298 = vector.broadcast %291 : vector<4x1xf32> to vector<4x16xf32>
    %299 = arith.mulf %298, %295 : vector<4x16xf32>
    %cst_128 = arith.constant 1.000000e+00 : f32
    %300 = vector.broadcast %cst_128 : f32 to vector<4x1xf32>
    %301 = arith.subf %300, %291 : vector<4x1xf32>
    %c0_129 = arith.constant 0 : index
    %c0_130 = arith.constant 0 : index
    %302 = vector.load %arg7[%c0_129, %c0_130] : memref<4x16xf32, #tpu.memory_space<vmem>>, vector<4x16xf32>
    %303 = vector.broadcast %301 : vector<4x1xf32> to vector<4x16xf32>
    %304 = arith.mulf %303, %302 : vector<4x16xf32>
    %305 = arith.addf %299, %304 : vector<4x16xf32>
    %c0_131 = arith.constant 0 : index
    %c0_132 = arith.constant 0 : index
    %306 = vector.load %arg7[%c0_131, %c0_132] : memref<4x16xf32, #tpu.memory_space<vmem>>, vector<4x16xf32>
    tpu.vector_store %arg7[%c0_131, %c0_132], %305 {strides = array<i32>} : memref<4x16xf32, #tpu.memory_space<vmem>>, vector<4x16xf32>,
    %307 = tpu.concatenate %297, %297 in 1 : vector<4x16xf32>, vector<4x16xf32> -> vector<4x32xf32>
    %308 = arith.mulf %307, %1 : vector<4x32xf32>
    %309 = vector.broadcast %291 : vector<4x1xf32> to vector<4x32xf32>
    %310 = arith.mulf %309, %308 : vector<4x32xf32>
    %cst_133 = arith.constant 1.000000e+00 : f32
    %311 = vector.broadcast %cst_133 : f32 to vector<4x1xf32>
    %312 = arith.subf %311, %291 : vector<4x1xf32>
    %c0_134 = arith.constant 0 : index
    %c0_135 = arith.constant 0 : index
    %313 = vector.load %arg6[%c0_134, %c0_135] : memref<4x32xf32, #tpu.memory_space<vmem>>, vector<4x32xf32>
    %314 = vector.broadcast %312 : vector<4x1xf32> to vector<4x32xf32>
    %315 = arith.mulf %314, %313 : vector<4x32xf32>
    %316 = arith.addf %310, %315 : vector<4x32xf32>
    %c0_136 = arith.constant 0 : index
    %c0_137 = arith.constant 0 : index
    %317 = vector.load %arg6[%c0_136, %c0_137] : memref<4x32xf32, #tpu.memory_space<vmem>>, vector<4x32xf32>
    tpu.vector_store %arg6[%c0_136, %c0_137], %316 {strides = array<i32>} : memref<4x32xf32, #tpu.memory_space<vmem>>, vector<4x32xf32>,
    %318 = vector.broadcast %291 : vector<4x1xf32> to vector<4x16xf32>
    %319 = arith.mulf %297, %318 : vector<4x16xf32>
    %320 = arith.index_cast %c5_i32 : i32 to index
    %c0_138 = arith.constant 0 : index
    %c0_139 = arith.constant 0 : index
    %321 = vector.load %arg5[%320, %c0_138, %c0_139] : memref<16x4x16xf32, #tpu.memory_space<vmem>>, vector<1x4x16xf32>
    %322 = vector.shape_cast %321 : vector<1x4x16xf32> to vector<4x16xf32>
    %323 = vector.shape_cast %319 : vector<4x16xf32> to vector<1x4x16xf32>
    tpu.vector_store %arg5[%320, %c0_138, %c0_139], %323 {strides = array<i32>} : memref<16x4x16xf32, #tpu.memory_space<vmem>>, vector<1x4x16xf32>,
    %c6_i32 = arith.constant 6 : i32
    %324 = arith.index_cast %c6_i32 : i32 to index
    %c0_140 = arith.constant 0 : index
    %c0_141 = arith.constant 0 : index
    %325 = vector.load %arg1[%324, %c0_140, %c0_141] : memref<16x4x64xf32, #tpu.memory_space<vmem>>, vector<1x4x64xf32>
    %326 = vector.shape_cast %325 : vector<1x4x64xf32> to vector<4x64xf32>
    %c0_142 = arith.constant 0 : index
    %c0_143 = arith.constant 0 : index
    %327 = vector.load %arg6[%c0_142, %c0_143] : memref<4x32xf32, #tpu.memory_space<vmem>>, vector<4x32xf32>
    %328 = arith.truncf %327 : vector<4x32xf32> to vector<4x32xbf16>
    %cst_144 = arith.constant dense<0.000000e+00> : vector<4x64xf32>
    %329 = tpu.matmul %328, %0, %cst_144 {dimension_numbers = #tpu.dot_dimension_numbers<[1], [0], [0], [1], [0, 0, 1, 1], [], []>} : vector<4x32xbf16>, vector<32x64xbf16>, vector<4x64xf32> -> vector<4x64xf32>
    %330 = arith.addf %326, %329 : vector<4x64xf32>
    %331 = vector.extract_strided_slice %330 {offsets = [0, 0], sizes = [4, 48], strides = [1, 1]} : vector<4x64xf32> to vector<4x48xf32>
    %332 = arith.negf %331 : vector<4x48xf32>
    %333 = math.exp %332 : vector<4x48xf32>
    %cst_145 = arith.constant 1.000000e+00 : f32
    %334 = vector.broadcast %cst_145 : f32 to vector<4x48xf32>
    %335 = arith.addf %334, %333 : vector<4x48xf32>
    %336 = arith.divf %334, %335 : vector<4x48xf32>
    %337 = vector.extract_strided_slice %336 {offsets = [0, 0], sizes = [4, 16], strides = [1, 1]} : vector<4x48xf32> to vector<4x16xf32>
    %338 = vector.extract_strided_slice %336 {offsets = [0, 16], sizes = [4, 16], strides = [1, 1]} : vector<4x48xf32> to vector<4x16xf32>
    %339 = vector.extract_strided_slice %336 {offsets = [0, 32], sizes = [4, 16], strides = [1, 1]} : vector<4x48xf32> to vector<4x16xf32>
    %340 = vector.extract_strided_slice %330 {offsets = [0, 48], sizes = [4, 16], strides = [1, 1]} : vector<4x64xf32> to vector<4x16xf32>
    %341 = math.tanh %340 : vector<4x16xf32>
    %342 = arith.index_cast %c6_i32 : i32 to index
    %c0_146 = arith.constant 0 : index
    %c0_147 = arith.constant 0 : index
    %343 = vector.load %arg3[%342, %c0_146, %c0_147] : memref<16x4x1xf32, #tpu.memory_space<vmem>>, vector<1x4x1xf32>
    %344 = vector.shape_cast %343 : vector<1x4x1xf32> to vector<4x1xf32>
    %c0_148 = arith.constant 0 : index
    %c0_149 = arith.constant 0 : index
    %345 = vector.load %arg7[%c0_148, %c0_149] : memref<4x16xf32, #tpu.memory_space<vmem>>, vector<4x16xf32>
    %346 = arith.mulf %338, %345 : vector<4x16xf32>
    %347 = arith.mulf %337, %341 : vector<4x16xf32>
    %348 = arith.addf %346, %347 : vector<4x16xf32>
    %349 = math.tanh %348 : vector<4x16xf32>
    %350 = arith.mulf %339, %349 : vector<4x16xf32>
    %351 = vector.broadcast %344 : vector<4x1xf32> to vector<4x16xf32>
    %352 = arith.mulf %351, %348 : vector<4x16xf32>
    %cst_150 = arith.constant 1.000000e+00 : f32
    %353 = vector.broadcast %cst_150 : f32 to vector<4x1xf32>
    %354 = arith.subf %353, %344 : vector<4x1xf32>
    %c0_151 = arith.constant 0 : index
    %c0_152 = arith.constant 0 : index
    %355 = vector.load %arg7[%c0_151, %c0_152] : memref<4x16xf32, #tpu.memory_space<vmem>>, vector<4x16xf32>
    %356 = vector.broadcast %354 : vector<4x1xf32> to vector<4x16xf32>
    %357 = arith.mulf %356, %355 : vector<4x16xf32>
    %358 = arith.addf %352, %357 : vector<4x16xf32>
    %c0_153 = arith.constant 0 : index
    %c0_154 = arith.constant 0 : index
    %359 = vector.load %arg7[%c0_153, %c0_154] : memref<4x16xf32, #tpu.memory_space<vmem>>, vector<4x16xf32>
    tpu.vector_store %arg7[%c0_153, %c0_154], %358 {strides = array<i32>} : memref<4x16xf32, #tpu.memory_space<vmem>>, vector<4x16xf32>,
    %360 = tpu.concatenate %350, %350 in 1 : vector<4x16xf32>, vector<4x16xf32> -> vector<4x32xf32>
    %361 = arith.mulf %360, %1 : vector<4x32xf32>
    %362 = vector.broadcast %344 : vector<4x1xf32> to vector<4x32xf32>
    %363 = arith.mulf %362, %361 : vector<4x32xf32>
    %cst_155 = arith.constant 1.000000e+00 : f32
    %364 = vector.broadcast %cst_155 : f32 to vector<4x1xf32>
    %365 = arith.subf %364, %344 : vector<4x1xf32>
    %c0_156 = arith.constant 0 : index
    %c0_157 = arith.constant 0 : index
    %366 = vector.load %arg6[%c0_156, %c0_157] : memref<4x32xf32, #tpu.memory_space<vmem>>, vector<4x32xf32>
    %367 = vector.broadcast %365 : vector<4x1xf32> to vector<4x32xf32>
    %368 = arith.mulf %367, %366 : vector<4x32xf32>
    %369 = arith.addf %363, %368 : vector<4x32xf32>
    %c0_158 = arith.constant 0 : index
    %c0_159 = arith.constant 0 : index
    %370 = vector.load %arg6[%c0_158, %c0_159] : memref<4x32xf32, #tpu.memory_space<vmem>>, vector<4x32xf32>
    tpu.vector_store %arg6[%c0_158, %c0_159], %369 {strides = array<i32>} : memref<4x32xf32, #tpu.memory_space<vmem>>, vector<4x32xf32>,
    %371 = vector.broadcast %344 : vector<4x1xf32> to vector<4x16xf32>
    %372 = arith.mulf %350, %371 : vector<4x16xf32>
    %373 = arith.index_cast %c6_i32 : i32 to index
    %c0_160 = arith.constant 0 : index
    %c0_161 = arith.constant 0 : index
    %374 = vector.load %arg5[%373, %c0_160, %c0_161] : memref<16x4x16xf32, #tpu.memory_space<vmem>>, vector<1x4x16xf32>
    %375 = vector.shape_cast %374 : vector<1x4x16xf32> to vector<4x16xf32>
    %376 = vector.shape_cast %372 : vector<4x16xf32> to vector<1x4x16xf32>
    tpu.vector_store %arg5[%373, %c0_160, %c0_161], %376 {strides = array<i32>} : memref<16x4x16xf32, #tpu.memory_space<vmem>>, vector<1x4x16xf32>,
    %c7_i32 = arith.constant 7 : i32
    %377 = arith.index_cast %c7_i32 : i32 to index
    %c0_162 = arith.constant 0 : index
    %c0_163 = arith.constant 0 : index
    %378 = vector.load %arg1[%377, %c0_162, %c0_163] : memref<16x4x64xf32, #tpu.memory_space<vmem>>, vector<1x4x64xf32>
    %379 = vector.shape_cast %378 : vector<1x4x64xf32> to vector<4x64xf32>
    %c0_164 = arith.constant 0 : index
    %c0_165 = arith.constant 0 : index
    %380 = vector.load %arg6[%c0_164, %c0_165] : memref<4x32xf32, #tpu.memory_space<vmem>>, vector<4x32xf32>
    %381 = arith.truncf %380 : vector<4x32xf32> to vector<4x32xbf16>
    %cst_166 = arith.constant dense<0.000000e+00> : vector<4x64xf32>
    %382 = tpu.matmul %381, %0, %cst_166 {dimension_numbers = #tpu.dot_dimension_numbers<[1], [0], [0], [1], [0, 0, 1, 1], [], []>} : vector<4x32xbf16>, vector<32x64xbf16>, vector<4x64xf32> -> vector<4x64xf32>
    %383 = arith.addf %379, %382 : vector<4x64xf32>
    %384 = vector.extract_strided_slice %383 {offsets = [0, 0], sizes = [4, 48], strides = [1, 1]} : vector<4x64xf32> to vector<4x48xf32>
    %385 = arith.negf %384 : vector<4x48xf32>
    %386 = math.exp %385 : vector<4x48xf32>
    %cst_167 = arith.constant 1.000000e+00 : f32
    %387 = vector.broadcast %cst_167 : f32 to vector<4x48xf32>
    %388 = arith.addf %387, %386 : vector<4x48xf32>
    %389 = arith.divf %387, %388 : vector<4x48xf32>
    %390 = vector.extract_strided_slice %389 {offsets = [0, 0], sizes = [4, 16], strides = [1, 1]} : vector<4x48xf32> to vector<4x16xf32>
    %391 = vector.extract_strided_slice %389 {offsets = [0, 16], sizes = [4, 16], strides = [1, 1]} : vector<4x48xf32> to vector<4x16xf32>
    %392 = vector.extract_strided_slice %389 {offsets = [0, 32], sizes = [4, 16], strides = [1, 1]} : vector<4x48xf32> to vector<4x16xf32>
    %393 = vector.extract_strided_slice %383 {offsets = [0, 48], sizes = [4, 16], strides = [1, 1]} : vector<4x64xf32> to vector<4x16xf32>
    %394 = math.tanh %393 : vector<4x16xf32>
    %395 = arith.index_cast %c7_i32 : i32 to index
    %c0_168 = arith.constant 0 : index
    %c0_169 = arith.constant 0 : index
    %396 = vector.load %arg3[%395, %c0_168, %c0_169] : memref<16x4x1xf32, #tpu.memory_space<vmem>>, vector<1x4x1xf32>
    %397 = vector.shape_cast %396 : vector<1x4x1xf32> to vector<4x1xf32>
    %c0_170 = arith.constant 0 : index
    %c0_171 = arith.constant 0 : index
    %398 = vector.load %arg7[%c0_170, %c0_171] : memref<4x16xf32, #tpu.memory_space<vmem>>, vector<4x16xf32>
    %399 = arith.mulf %391, %398 : vector<4x16xf32>
    %400 = arith.mulf %390, %394 : vector<4x16xf32>
    %401 = arith.addf %399, %400 : vector<4x16xf32>
    %402 = math.tanh %401 : vector<4x16xf32>
    %403 = arith.mulf %392, %402 : vector<4x16xf32>
    %404 = vector.broadcast %397 : vector<4x1xf32> to vector<4x16xf32>
    %405 = arith.mulf %404, %401 : vector<4x16xf32>
    %cst_172 = arith.constant 1.000000e+00 : f32
    %406 = vector.broadcast %cst_172 : f32 to vector<4x1xf32>
    %407 = arith.subf %406, %397 : vector<4x1xf32>
    %c0_173 = arith.constant 0 : index
    %c0_174 = arith.constant 0 : index
    %408 = vector.load %arg7[%c0_173, %c0_174] : memref<4x16xf32, #tpu.memory_space<vmem>>, vector<4x16xf32>
    %409 = vector.broadcast %407 : vector<4x1xf32> to vector<4x16xf32>
    %410 = arith.mulf %409, %408 : vector<4x16xf32>
    %411 = arith.addf %405, %410 : vector<4x16xf32>
    %c0_175 = arith.constant 0 : index
    %c0_176 = arith.constant 0 : index
    %412 = vector.load %arg7[%c0_175, %c0_176] : memref<4x16xf32, #tpu.memory_space<vmem>>, vector<4x16xf32>
    tpu.vector_store %arg7[%c0_175, %c0_176], %411 {strides = array<i32>} : memref<4x16xf32, #tpu.memory_space<vmem>>, vector<4x16xf32>,
    %413 = tpu.concatenate %403, %403 in 1 : vector<4x16xf32>, vector<4x16xf32> -> vector<4x32xf32>
    %414 = arith.mulf %413, %1 : vector<4x32xf32>
    %415 = vector.broadcast %397 : vector<4x1xf32> to vector<4x32xf32>
    %416 = arith.mulf %415, %414 : vector<4x32xf32>
    %cst_177 = arith.constant 1.000000e+00 : f32
    %417 = vector.broadcast %cst_177 : f32 to vector<4x1xf32>
    %418 = arith.subf %417, %397 : vector<4x1xf32>
    %c0_178 = arith.constant 0 : index
    %c0_179 = arith.constant 0 : index
    %419 = vector.load %arg6[%c0_178, %c0_179] : memref<4x32xf32, #tpu.memory_space<vmem>>, vector<4x32xf32>
    %420 = vector.broadcast %418 : vector<4x1xf32> to vector<4x32xf32>
    %421 = arith.mulf %420, %419 : vector<4x32xf32>
    %422 = arith.addf %416, %421 : vector<4x32xf32>
    %c0_180 = arith.constant 0 : index
    %c0_181 = arith.constant 0 : index
    %423 = vector.load %arg6[%c0_180, %c0_181] : memref<4x32xf32, #tpu.memory_space<vmem>>, vector<4x32xf32>
    tpu.vector_store %arg6[%c0_180, %c0_181], %422 {strides = array<i32>} : memref<4x32xf32, #tpu.memory_space<vmem>>, vector<4x32xf32>,
    %424 = vector.broadcast %397 : vector<4x1xf32> to vector<4x16xf32>
    %425 = arith.mulf %403, %424 : vector<4x16xf32>
    %426 = arith.index_cast %c7_i32 : i32 to index
    %c0_182 = arith.constant 0 : index
    %c0_183 = arith.constant 0 : index
    %427 = vector.load %arg5[%426, %c0_182, %c0_183] : memref<16x4x16xf32, #tpu.memory_space<vmem>>, vector<1x4x16xf32>
    %428 = vector.shape_cast %427 : vector<1x4x16xf32> to vector<4x16xf32>
    %429 = vector.shape_cast %425 : vector<4x16xf32> to vector<1x4x16xf32>
    tpu.vector_store %arg5[%426, %c0_182, %c0_183], %429 {strides = array<i32>} : memref<16x4x16xf32, #tpu.memory_space<vmem>>, vector<1x4x16xf32>,
    %c8_i32 = arith.constant 8 : i32
    %430 = arith.index_cast %c8_i32 : i32 to index
    %c0_184 = arith.constant 0 : index
    %c0_185 = arith.constant 0 : index
    %431 = vector.load %arg1[%430, %c0_184, %c0_185] : memref<16x4x64xf32, #tpu.memory_space<vmem>>, vector<1x4x64xf32>
    %432 = vector.shape_cast %431 : vector<1x4x64xf32> to vector<4x64xf32>
    %c0_186 = arith.constant 0 : index
    %c0_187 = arith.constant 0 : index
    %433 = vector.load %arg6[%c0_186, %c0_187] : memref<4x32xf32, #tpu.memory_space<vmem>>, vector<4x32xf32>
    %434 = arith.truncf %433 : vector<4x32xf32> to vector<4x32xbf16>
    %cst_188 = arith.constant dense<0.000000e+00> : vector<4x64xf32>
    %435 = tpu.matmul %434, %0, %cst_188 {dimension_numbers = #tpu.dot_dimension_numbers<[1], [0], [0], [1], [0, 0, 1, 1], [], []>} : vector<4x32xbf16>, vector<32x64xbf16>, vector<4x64xf32> -> vector<4x64xf32>
    %436 = arith.addf %432, %435 : vector<4x64xf32>
    %437 = vector.extract_strided_slice %436 {offsets = [0, 0], sizes = [4, 48], strides = [1, 1]} : vector<4x64xf32> to vector<4x48xf32>
    %438 = arith.negf %437 : vector<4x48xf32>
    %439 = math.exp %438 : vector<4x48xf32>
    %cst_189 = arith.constant 1.000000e+00 : f32
    %440 = vector.broadcast %cst_189 : f32 to vector<4x48xf32>
    %441 = arith.addf %440, %439 : vector<4x48xf32>
    %442 = arith.divf %440, %441 : vector<4x48xf32>
    %443 = vector.extract_strided_slice %442 {offsets = [0, 0], sizes = [4, 16], strides = [1, 1]} : vector<4x48xf32> to vector<4x16xf32>
    %444 = vector.extract_strided_slice %442 {offsets = [0, 16], sizes = [4, 16], strides = [1, 1]} : vector<4x48xf32> to vector<4x16xf32>
    %445 = vector.extract_strided_slice %442 {offsets = [0, 32], sizes = [4, 16], strides = [1, 1]} : vector<4x48xf32> to vector<4x16xf32>
    %446 = vector.extract_strided_slice %436 {offsets = [0, 48], sizes = [4, 16], strides = [1, 1]} : vector<4x64xf32> to vector<4x16xf32>
    %447 = math.tanh %446 : vector<4x16xf32>
    %448 = arith.index_cast %c8_i32 : i32 to index
    %c0_190 = arith.constant 0 : index
    %c0_191 = arith.constant 0 : index
    %449 = vector.load %arg3[%448, %c0_190, %c0_191] : memref<16x4x1xf32, #tpu.memory_space<vmem>>, vector<1x4x1xf32>
    %450 = vector.shape_cast %449 : vector<1x4x1xf32> to vector<4x1xf32>
    %c0_192 = arith.constant 0 : index
    %c0_193 = arith.constant 0 : index
    %451 = vector.load %arg7[%c0_192, %c0_193] : memref<4x16xf32, #tpu.memory_space<vmem>>, vector<4x16xf32>
    %452 = arith.mulf %444, %451 : vector<4x16xf32>
    %453 = arith.mulf %443, %447 : vector<4x16xf32>
    %454 = arith.addf %452, %453 : vector<4x16xf32>
    %455 = math.tanh %454 : vector<4x16xf32>
    %456 = arith.mulf %445, %455 : vector<4x16xf32>
    %457 = vector.broadcast %450 : vector<4x1xf32> to vector<4x16xf32>
    %458 = arith.mulf %457, %454 : vector<4x16xf32>
    %cst_194 = arith.constant 1.000000e+00 : f32
    %459 = vector.broadcast %cst_194 : f32 to vector<4x1xf32>
    %460 = arith.subf %459, %450 : vector<4x1xf32>
    %c0_195 = arith.constant 0 : index
    %c0_196 = arith.constant 0 : index
    %461 = vector.load %arg7[%c0_195, %c0_196] : memref<4x16xf32, #tpu.memory_space<vmem>>, vector<4x16xf32>
    %462 = vector.broadcast %460 : vector<4x1xf32> to vector<4x16xf32>
    %463 = arith.mulf %462, %461 : vector<4x16xf32>
    %464 = arith.addf %458, %463 : vector<4x16xf32>
    %c0_197 = arith.constant 0 : index
    %c0_198 = arith.constant 0 : index
    %465 = vector.load %arg7[%c0_197, %c0_198] : memref<4x16xf32, #tpu.memory_space<vmem>>, vector<4x16xf32>
    tpu.vector_store %arg7[%c0_197, %c0_198], %464 {strides = array<i32>} : memref<4x16xf32, #tpu.memory_space<vmem>>, vector<4x16xf32>,
    %466 = tpu.concatenate %456, %456 in 1 : vector<4x16xf32>, vector<4x16xf32> -> vector<4x32xf32>
    %467 = arith.mulf %466, %1 : vector<4x32xf32>
    %468 = vector.broadcast %450 : vector<4x1xf32> to vector<4x32xf32>
    %469 = arith.mulf %468, %467 : vector<4x32xf32>
    %cst_199 = arith.constant 1.000000e+00 : f32
    %470 = vector.broadcast %cst_199 : f32 to vector<4x1xf32>
    %471 = arith.subf %470, %450 : vector<4x1xf32>
    %c0_200 = arith.constant 0 : index
    %c0_201 = arith.constant 0 : index
    %472 = vector.load %arg6[%c0_200, %c0_201] : memref<4x32xf32, #tpu.memory_space<vmem>>, vector<4x32xf32>
    %473 = vector.broadcast %471 : vector<4x1xf32> to vector<4x32xf32>
    %474 = arith.mulf %473, %472 : vector<4x32xf32>
    %475 = arith.addf %469, %474 : vector<4x32xf32>
    %c0_202 = arith.constant 0 : index
    %c0_203 = arith.constant 0 : index
    %476 = vector.load %arg6[%c0_202, %c0_203] : memref<4x32xf32, #tpu.memory_space<vmem>>, vector<4x32xf32>
    tpu.vector_store %arg6[%c0_202, %c0_203], %475 {strides = array<i32>} : memref<4x32xf32, #tpu.memory_space<vmem>>, vector<4x32xf32>,
    %477 = vector.broadcast %450 : vector<4x1xf32> to vector<4x16xf32>
    %478 = arith.mulf %456, %477 : vector<4x16xf32>
    %479 = arith.index_cast %c8_i32 : i32 to index
    %c0_204 = arith.constant 0 : index
    %c0_205 = arith.constant 0 : index
    %480 = vector.load %arg5[%479, %c0_204, %c0_205] : memref<16x4x16xf32, #tpu.memory_space<vmem>>, vector<1x4x16xf32>
    %481 = vector.shape_cast %480 : vector<1x4x16xf32> to vector<4x16xf32>
    %482 = vector.shape_cast %478 : vector<4x16xf32> to vector<1x4x16xf32>
    tpu.vector_store %arg5[%479, %c0_204, %c0_205], %482 {strides = array<i32>} : memref<16x4x16xf32, #tpu.memory_space<vmem>>, vector<1x4x16xf32>,
    %c9_i32 = arith.constant 9 : i32
    %483 = arith.index_cast %c9_i32 : i32 to index
    %c0_206 = arith.constant 0 : index
    %c0_207 = arith.constant 0 : index
    %484 = vector.load %arg1[%483, %c0_206, %c0_207] : memref<16x4x64xf32, #tpu.memory_space<vmem>>, vector<1x4x64xf32>
    %485 = vector.shape_cast %484 : vector<1x4x64xf32> to vector<4x64xf32>
    %c0_208 = arith.constant 0 : index
    %c0_209 = arith.constant 0 : index
    %486 = vector.load %arg6[%c0_208, %c0_209] : memref<4x32xf32, #tpu.memory_space<vmem>>, vector<4x32xf32>
    %487 = arith.truncf %486 : vector<4x32xf32> to vector<4x32xbf16>
    %cst_210 = arith.constant dense<0.000000e+00> : vector<4x64xf32>
    %488 = tpu.matmul %487, %0, %cst_210 {dimension_numbers = #tpu.dot_dimension_numbers<[1], [0], [0], [1], [0, 0, 1, 1], [], []>} : vector<4x32xbf16>, vector<32x64xbf16>, vector<4x64xf32> -> vector<4x64xf32>
    %489 = arith.addf %485, %488 : vector<4x64xf32>
    %490 = vector.extract_strided_slice %489 {offsets = [0, 0], sizes = [4, 48], strides = [1, 1]} : vector<4x64xf32> to vector<4x48xf32>
    %491 = arith.negf %490 : vector<4x48xf32>
    %492 = math.exp %491 : vector<4x48xf32>
    %cst_211 = arith.constant 1.000000e+00 : f32
    %493 = vector.broadcast %cst_211 : f32 to vector<4x48xf32>
    %494 = arith.addf %493, %492 : vector<4x48xf32>
    %495 = arith.divf %493, %494 : vector<4x48xf32>
    %496 = vector.extract_strided_slice %495 {offsets = [0, 0], sizes = [4, 16], strides = [1, 1]} : vector<4x48xf32> to vector<4x16xf32>
    %497 = vector.extract_strided_slice %495 {offsets = [0, 16], sizes = [4, 16], strides = [1, 1]} : vector<4x48xf32> to vector<4x16xf32>
    %498 = vector.extract_strided_slice %495 {offsets = [0, 32], sizes = [4, 16], strides = [1, 1]} : vector<4x48xf32> to vector<4x16xf32>
    %499 = vector.extract_strided_slice %489 {offsets = [0, 48], sizes = [4, 16], strides = [1, 1]} : vector<4x64xf32> to vector<4x16xf32>
    %500 = math.tanh %499 : vector<4x16xf32>
    %501 = arith.index_cast %c9_i32 : i32 to index
    %c0_212 = arith.constant 0 : index
    %c0_213 = arith.constant 0 : index
    %502 = vector.load %arg3[%501, %c0_212, %c0_213] : memref<16x4x1xf32, #tpu.memory_space<vmem>>, vector<1x4x1xf32>
    %503 = vector.shape_cast %502 : vector<1x4x1xf32> to vector<4x1xf32>
    %c0_214 = arith.constant 0 : index
    %c0_215 = arith.constant 0 : index
    %504 = vector.load %arg7[%c0_214, %c0_215] : memref<4x16xf32, #tpu.memory_space<vmem>>, vector<4x16xf32>
    %505 = arith.mulf %497, %504 : vector<4x16xf32>
    %506 = arith.mulf %496, %500 : vector<4x16xf32>
    %507 = arith.addf %505, %506 : vector<4x16xf32>
    %508 = math.tanh %507 : vector<4x16xf32>
    %509 = arith.mulf %498, %508 : vector<4x16xf32>
    %510 = vector.broadcast %503 : vector<4x1xf32> to vector<4x16xf32>
    %511 = arith.mulf %510, %507 : vector<4x16xf32>
    %cst_216 = arith.constant 1.000000e+00 : f32
    %512 = vector.broadcast %cst_216 : f32 to vector<4x1xf32>
    %513 = arith.subf %512, %503 : vector<4x1xf32>
    %c0_217 = arith.constant 0 : index
    %c0_218 = arith.constant 0 : index
    %514 = vector.load %arg7[%c0_217, %c0_218] : memref<4x16xf32, #tpu.memory_space<vmem>>, vector<4x16xf32>
    %515 = vector.broadcast %513 : vector<4x1xf32> to vector<4x16xf32>
    %516 = arith.mulf %515, %514 : vector<4x16xf32>
    %517 = arith.addf %511, %516 : vector<4x16xf32>
    %c0_219 = arith.constant 0 : index
    %c0_220 = arith.constant 0 : index
    %518 = vector.load %arg7[%c0_219, %c0_220] : memref<4x16xf32, #tpu.memory_space<vmem>>, vector<4x16xf32>
    tpu.vector_store %arg7[%c0_219, %c0_220], %517 {strides = array<i32>} : memref<4x16xf32, #tpu.memory_space<vmem>>, vector<4x16xf32>,
    %519 = tpu.concatenate %509, %509 in 1 : vector<4x16xf32>, vector<4x16xf32> -> vector<4x32xf32>
    %520 = arith.mulf %519, %1 : vector<4x32xf32>
    %521 = vector.broadcast %503 : vector<4x1xf32> to vector<4x32xf32>
    %522 = arith.mulf %521, %520 : vector<4x32xf32>
    %cst_221 = arith.constant 1.000000e+00 : f32
    %523 = vector.broadcast %cst_221 : f32 to vector<4x1xf32>
    %524 = arith.subf %523, %503 : vector<4x1xf32>
    %c0_222 = arith.constant 0 : index
    %c0_223 = arith.constant 0 : index
    %525 = vector.load %arg6[%c0_222, %c0_223] : memref<4x32xf32, #tpu.memory_space<vmem>>, vector<4x32xf32>
    %526 = vector.broadcast %524 : vector<4x1xf32> to vector<4x32xf32>
    %527 = arith.mulf %526, %525 : vector<4x32xf32>
    %528 = arith.addf %522, %527 : vector<4x32xf32>
    %c0_224 = arith.constant 0 : index
    %c0_225 = arith.constant 0 : index
    %529 = vector.load %arg6[%c0_224, %c0_225] : memref<4x32xf32, #tpu.memory_space<vmem>>, vector<4x32xf32>
    tpu.vector_store %arg6[%c0_224, %c0_225], %528 {strides = array<i32>} : memref<4x32xf32, #tpu.memory_space<vmem>>, vector<4x32xf32>,
    %530 = vector.broadcast %503 : vector<4x1xf32> to vector<4x16xf32>
    %531 = arith.mulf %509, %530 : vector<4x16xf32>
    %532 = arith.index_cast %c9_i32 : i32 to index
    %c0_226 = arith.constant 0 : index
    %c0_227 = arith.constant 0 : index
    %533 = vector.load %arg5[%532, %c0_226, %c0_227] : memref<16x4x16xf32, #tpu.memory_space<vmem>>, vector<1x4x16xf32>
    %534 = vector.shape_cast %533 : vector<1x4x16xf32> to vector<4x16xf32>
    %535 = vector.shape_cast %531 : vector<4x16xf32> to vector<1x4x16xf32>
    tpu.vector_store %arg5[%532, %c0_226, %c0_227], %535 {strides = array<i32>} : memref<16x4x16xf32, #tpu.memory_space<vmem>>, vector<1x4x16xf32>,
    %c10_i32 = arith.constant 10 : i32
    %536 = arith.index_cast %c10_i32 : i32 to index
    %c0_228 = arith.constant 0 : index
    %c0_229 = arith.constant 0 : index
    %537 = vector.load %arg1[%536, %c0_228, %c0_229] : memref<16x4x64xf32, #tpu.memory_space<vmem>>, vector<1x4x64xf32>
    %538 = vector.shape_cast %537 : vector<1x4x64xf32> to vector<4x64xf32>
    %c0_230 = arith.constant 0 : index
    %c0_231 = arith.constant 0 : index
    %539 = vector.load %arg6[%c0_230, %c0_231] : memref<4x32xf32, #tpu.memory_space<vmem>>, vector<4x32xf32>
    %540 = arith.truncf %539 : vector<4x32xf32> to vector<4x32xbf16>
    %cst_232 = arith.constant dense<0.000000e+00> : vector<4x64xf32>
    %541 = tpu.matmul %540, %0, %cst_232 {dimension_numbers = #tpu.dot_dimension_numbers<[1], [0], [0], [1], [0, 0, 1, 1], [], []>} : vector<4x32xbf16>, vector<32x64xbf16>, vector<4x64xf32> -> vector<4x64xf32>
    %542 = arith.addf %538, %541 : vector<4x64xf32>
    %543 = vector.extract_strided_slice %542 {offsets = [0, 0], sizes = [4, 48], strides = [1, 1]} : vector<4x64xf32> to vector<4x48xf32>
    %544 = arith.negf %543 : vector<4x48xf32>
    %545 = math.exp %544 : vector<4x48xf32>
    %cst_233 = arith.constant 1.000000e+00 : f32
    %546 = vector.broadcast %cst_233 : f32 to vector<4x48xf32>
    %547 = arith.addf %546, %545 : vector<4x48xf32>
    %548 = arith.divf %546, %547 : vector<4x48xf32>
    %549 = vector.extract_strided_slice %548 {offsets = [0, 0], sizes = [4, 16], strides = [1, 1]} : vector<4x48xf32> to vector<4x16xf32>
    %550 = vector.extract_strided_slice %548 {offsets = [0, 16], sizes = [4, 16], strides = [1, 1]} : vector<4x48xf32> to vector<4x16xf32>
    %551 = vector.extract_strided_slice %548 {offsets = [0, 32], sizes = [4, 16], strides = [1, 1]} : vector<4x48xf32> to vector<4x16xf32>
    %552 = vector.extract_strided_slice %542 {offsets = [0, 48], sizes = [4, 16], strides = [1, 1]} : vector<4x64xf32> to vector<4x16xf32>
    %553 = math.tanh %552 : vector<4x16xf32>
    %554 = arith.index_cast %c10_i32 : i32 to index
    %c0_234 = arith.constant 0 : index
    %c0_235 = arith.constant 0 : index
    %555 = vector.load %arg3[%554, %c0_234, %c0_235] : memref<16x4x1xf32, #tpu.memory_space<vmem>>, vector<1x4x1xf32>
    %556 = vector.shape_cast %555 : vector<1x4x1xf32> to vector<4x1xf32>
    %c0_236 = arith.constant 0 : index
    %c0_237 = arith.constant 0 : index
    %557 = vector.load %arg7[%c0_236, %c0_237] : memref<4x16xf32, #tpu.memory_space<vmem>>, vector<4x16xf32>
    %558 = arith.mulf %550, %557 : vector<4x16xf32>
    %559 = arith.mulf %549, %553 : vector<4x16xf32>
    %560 = arith.addf %558, %559 : vector<4x16xf32>
    %561 = math.tanh %560 : vector<4x16xf32>
    %562 = arith.mulf %551, %561 : vector<4x16xf32>
    %563 = vector.broadcast %556 : vector<4x1xf32> to vector<4x16xf32>
    %564 = arith.mulf %563, %560 : vector<4x16xf32>
    %cst_238 = arith.constant 1.000000e+00 : f32
    %565 = vector.broadcast %cst_238 : f32 to vector<4x1xf32>
    %566 = arith.subf %565, %556 : vector<4x1xf32>
    %c0_239 = arith.constant 0 : index
    %c0_240 = arith.constant 0 : index
    %567 = vector.load %arg7[%c0_239, %c0_240] : memref<4x16xf32, #tpu.memory_space<vmem>>, vector<4x16xf32>
    %568 = vector.broadcast %566 : vector<4x1xf32> to vector<4x16xf32>
    %569 = arith.mulf %568, %567 : vector<4x16xf32>
    %570 = arith.addf %564, %569 : vector<4x16xf32>
    %c0_241 = arith.constant 0 : index
    %c0_242 = arith.constant 0 : index
    %571 = vector.load %arg7[%c0_241, %c0_242] : memref<4x16xf32, #tpu.memory_space<vmem>>, vector<4x16xf32>
    tpu.vector_store %arg7[%c0_241, %c0_242], %570 {strides = array<i32>} : memref<4x16xf32, #tpu.memory_space<vmem>>, vector<4x16xf32>,
    %572 = tpu.concatenate %562, %562 in 1 : vector<4x16xf32>, vector<4x16xf32> -> vector<4x32xf32>
    %573 = arith.mulf %572, %1 : vector<4x32xf32>
    %574 = vector.broadcast %556 : vector<4x1xf32> to vector<4x32xf32>
    %575 = arith.mulf %574, %573 : vector<4x32xf32>
    %cst_243 = arith.constant 1.000000e+00 : f32
    %576 = vector.broadcast %cst_243 : f32 to vector<4x1xf32>
    %577 = arith.subf %576, %556 : vector<4x1xf32>
    %c0_244 = arith.constant 0 : index
    %c0_245 = arith.constant 0 : index
    %578 = vector.load %arg6[%c0_244, %c0_245] : memref<4x32xf32, #tpu.memory_space<vmem>>, vector<4x32xf32>
    %579 = vector.broadcast %577 : vector<4x1xf32> to vector<4x32xf32>
    %580 = arith.mulf %579, %578 : vector<4x32xf32>
    %581 = arith.addf %575, %580 : vector<4x32xf32>
    %c0_246 = arith.constant 0 : index
    %c0_247 = arith.constant 0 : index
    %582 = vector.load %arg6[%c0_246, %c0_247] : memref<4x32xf32, #tpu.memory_space<vmem>>, vector<4x32xf32>
    tpu.vector_store %arg6[%c0_246, %c0_247], %581 {strides = array<i32>} : memref<4x32xf32, #tpu.memory_space<vmem>>, vector<4x32xf32>,
    %583 = vector.broadcast %556 : vector<4x1xf32> to vector<4x16xf32>
    %584 = arith.mulf %562, %583 : vector<4x16xf32>
    %585 = arith.index_cast %c10_i32 : i32 to index
    %c0_248 = arith.constant 0 : index
    %c0_249 = arith.constant 0 : index
    %586 = vector.load %arg5[%585, %c0_248, %c0_249] : memref<16x4x16xf32, #tpu.memory_space<vmem>>, vector<1x4x16xf32>
    %587 = vector.shape_cast %586 : vector<1x4x16xf32> to vector<4x16xf32>
    %588 = vector.shape_cast %584 : vector<4x16xf32> to vector<1x4x16xf32>
    tpu.vector_store %arg5[%585, %c0_248, %c0_249], %588 {strides = array<i32>} : memref<16x4x16xf32, #tpu.memory_space<vmem>>, vector<1x4x16xf32>,
    %c11_i32 = arith.constant 11 : i32
    %589 = arith.index_cast %c11_i32 : i32 to index
    %c0_250 = arith.constant 0 : index
    %c0_251 = arith.constant 0 : index
    %590 = vector.load %arg1[%589, %c0_250, %c0_251] : memref<16x4x64xf32, #tpu.memory_space<vmem>>, vector<1x4x64xf32>
    %591 = vector.shape_cast %590 : vector<1x4x64xf32> to vector<4x64xf32>
    %c0_252 = arith.constant 0 : index
    %c0_253 = arith.constant 0 : index
    %592 = vector.load %arg6[%c0_252, %c0_253] : memref<4x32xf32, #tpu.memory_space<vmem>>, vector<4x32xf32>
    %593 = arith.truncf %592 : vector<4x32xf32> to vector<4x32xbf16>
    %cst_254 = arith.constant dense<0.000000e+00> : vector<4x64xf32>
    %594 = tpu.matmul %593, %0, %cst_254 {dimension_numbers = #tpu.dot_dimension_numbers<[1], [0], [0], [1], [0, 0, 1, 1], [], []>} : vector<4x32xbf16>, vector<32x64xbf16>, vector<4x64xf32> -> vector<4x64xf32>
    %595 = arith.addf %591, %594 : vector<4x64xf32>
    %596 = vector.extract_strided_slice %595 {offsets = [0, 0], sizes = [4, 48], strides = [1, 1]} : vector<4x64xf32> to vector<4x48xf32>
    %597 = arith.negf %596 : vector<4x48xf32>
    %598 = math.exp %597 : vector<4x48xf32>
    %cst_255 = arith.constant 1.000000e+00 : f32
    %599 = vector.broadcast %cst_255 : f32 to vector<4x48xf32>
    %600 = arith.addf %599, %598 : vector<4x48xf32>
    %601 = arith.divf %599, %600 : vector<4x48xf32>
    %602 = vector.extract_strided_slice %601 {offsets = [0, 0], sizes = [4, 16], strides = [1, 1]} : vector<4x48xf32> to vector<4x16xf32>
    %603 = vector.extract_strided_slice %601 {offsets = [0, 16], sizes = [4, 16], strides = [1, 1]} : vector<4x48xf32> to vector<4x16xf32>
    %604 = vector.extract_strided_slice %601 {offsets = [0, 32], sizes = [4, 16], strides = [1, 1]} : vector<4x48xf32> to vector<4x16xf32>
    %605 = vector.extract_strided_slice %595 {offsets = [0, 48], sizes = [4, 16], strides = [1, 1]} : vector<4x64xf32> to vector<4x16xf32>
    %606 = math.tanh %605 : vector<4x16xf32>
    %607 = arith.index_cast %c11_i32 : i32 to index
    %c0_256 = arith.constant 0 : index
    %c0_257 = arith.constant 0 : index
    %608 = vector.load %arg3[%607, %c0_256, %c0_257] : memref<16x4x1xf32, #tpu.memory_space<vmem>>, vector<1x4x1xf32>
    %609 = vector.shape_cast %608 : vector<1x4x1xf32> to vector<4x1xf32>
    %c0_258 = arith.constant 0 : index
    %c0_259 = arith.constant 0 : index
    %610 = vector.load %arg7[%c0_258, %c0_259] : memref<4x16xf32, #tpu.memory_space<vmem>>, vector<4x16xf32>
    %611 = arith.mulf %603, %610 : vector<4x16xf32>
    %612 = arith.mulf %602, %606 : vector<4x16xf32>
    %613 = arith.addf %611, %612 : vector<4x16xf32>
    %614 = math.tanh %613 : vector<4x16xf32>
    %615 = arith.mulf %604, %614 : vector<4x16xf32>
    %616 = vector.broadcast %609 : vector<4x1xf32> to vector<4x16xf32>
    %617 = arith.mulf %616, %613 : vector<4x16xf32>
    %cst_260 = arith.constant 1.000000e+00 : f32
    %618 = vector.broadcast %cst_260 : f32 to vector<4x1xf32>
    %619 = arith.subf %618, %609 : vector<4x1xf32>
    %c0_261 = arith.constant 0 : index
    %c0_262 = arith.constant 0 : index
    %620 = vector.load %arg7[%c0_261, %c0_262] : memref<4x16xf32, #tpu.memory_space<vmem>>, vector<4x16xf32>
    %621 = vector.broadcast %619 : vector<4x1xf32> to vector<4x16xf32>
    %622 = arith.mulf %621, %620 : vector<4x16xf32>
    %623 = arith.addf %617, %622 : vector<4x16xf32>
    %c0_263 = arith.constant 0 : index
    %c0_264 = arith.constant 0 : index
    %624 = vector.load %arg7[%c0_263, %c0_264] : memref<4x16xf32, #tpu.memory_space<vmem>>, vector<4x16xf32>
    tpu.vector_store %arg7[%c0_263, %c0_264], %623 {strides = array<i32>} : memref<4x16xf32, #tpu.memory_space<vmem>>, vector<4x16xf32>,
    %625 = tpu.concatenate %615, %615 in 1 : vector<4x16xf32>, vector<4x16xf32> -> vector<4x32xf32>
    %626 = arith.mulf %625, %1 : vector<4x32xf32>
    %627 = vector.broadcast %609 : vector<4x1xf32> to vector<4x32xf32>
    %628 = arith.mulf %627, %626 : vector<4x32xf32>
    %cst_265 = arith.constant 1.000000e+00 : f32
    %629 = vector.broadcast %cst_265 : f32 to vector<4x1xf32>
    %630 = arith.subf %629, %609 : vector<4x1xf32>
    %c0_266 = arith.constant 0 : index
    %c0_267 = arith.constant 0 : index
    %631 = vector.load %arg6[%c0_266, %c0_267] : memref<4x32xf32, #tpu.memory_space<vmem>>, vector<4x32xf32>
    %632 = vector.broadcast %630 : vector<4x1xf32> to vector<4x32xf32>
    %633 = arith.mulf %632, %631 : vector<4x32xf32>
    %634 = arith.addf %628, %633 : vector<4x32xf32>
    %c0_268 = arith.constant 0 : index
    %c0_269 = arith.constant 0 : index
    %635 = vector.load %arg6[%c0_268, %c0_269] : memref<4x32xf32, #tpu.memory_space<vmem>>, vector<4x32xf32>
    tpu.vector_store %arg6[%c0_268, %c0_269], %634 {strides = array<i32>} : memref<4x32xf32, #tpu.memory_space<vmem>>, vector<4x32xf32>,
    %636 = vector.broadcast %609 : vector<4x1xf32> to vector<4x16xf32>
    %637 = arith.mulf %615, %636 : vector<4x16xf32>
    %638 = arith.index_cast %c11_i32 : i32 to index
    %c0_270 = arith.constant 0 : index
    %c0_271 = arith.constant 0 : index
    %639 = vector.load %arg5[%638, %c0_270, %c0_271] : memref<16x4x16xf32, #tpu.memory_space<vmem>>, vector<1x4x16xf32>
    %640 = vector.shape_cast %639 : vector<1x4x16xf32> to vector<4x16xf32>
    %641 = vector.shape_cast %637 : vector<4x16xf32> to vector<1x4x16xf32>
    tpu.vector_store %arg5[%638, %c0_270, %c0_271], %641 {strides = array<i32>} : memref<16x4x16xf32, #tpu.memory_space<vmem>>, vector<1x4x16xf32>,
    %c12_i32 = arith.constant 12 : i32
    %642 = arith.index_cast %c12_i32 : i32 to index
    %c0_272 = arith.constant 0 : index
    %c0_273 = arith.constant 0 : index
    %643 = vector.load %arg1[%642, %c0_272, %c0_273] : memref<16x4x64xf32, #tpu.memory_space<vmem>>, vector<1x4x64xf32>
    %644 = vector.shape_cast %643 : vector<1x4x64xf32> to vector<4x64xf32>
    %c0_274 = arith.constant 0 : index
    %c0_275 = arith.constant 0 : index
    %645 = vector.load %arg6[%c0_274, %c0_275] : memref<4x32xf32, #tpu.memory_space<vmem>>, vector<4x32xf32>
    %646 = arith.truncf %645 : vector<4x32xf32> to vector<4x32xbf16>
    %cst_276 = arith.constant dense<0.000000e+00> : vector<4x64xf32>
    %647 = tpu.matmul %646, %0, %cst_276 {dimension_numbers = #tpu.dot_dimension_numbers<[1], [0], [0], [1], [0, 0, 1, 1], [], []>} : vector<4x32xbf16>, vector<32x64xbf16>, vector<4x64xf32> -> vector<4x64xf32>
    %648 = arith.addf %644, %647 : vector<4x64xf32>
    %649 = vector.extract_strided_slice %648 {offsets = [0, 0], sizes = [4, 48], strides = [1, 1]} : vector<4x64xf32> to vector<4x48xf32>
    %650 = arith.negf %649 : vector<4x48xf32>
    %651 = math.exp %650 : vector<4x48xf32>
    %cst_277 = arith.constant 1.000000e+00 : f32
    %652 = vector.broadcast %cst_277 : f32 to vector<4x48xf32>
    %653 = arith.addf %652, %651 : vector<4x48xf32>
    %654 = arith.divf %652, %653 : vector<4x48xf32>
    %655 = vector.extract_strided_slice %654 {offsets = [0, 0], sizes = [4, 16], strides = [1, 1]} : vector<4x48xf32> to vector<4x16xf32>
    %656 = vector.extract_strided_slice %654 {offsets = [0, 16], sizes = [4, 16], strides = [1, 1]} : vector<4x48xf32> to vector<4x16xf32>
    %657 = vector.extract_strided_slice %654 {offsets = [0, 32], sizes = [4, 16], strides = [1, 1]} : vector<4x48xf32> to vector<4x16xf32>
    %658 = vector.extract_strided_slice %648 {offsets = [0, 48], sizes = [4, 16], strides = [1, 1]} : vector<4x64xf32> to vector<4x16xf32>
    %659 = math.tanh %658 : vector<4x16xf32>
    %660 = arith.index_cast %c12_i32 : i32 to index
    %c0_278 = arith.constant 0 : index
    %c0_279 = arith.constant 0 : index
    %661 = vector.load %arg3[%660, %c0_278, %c0_279] : memref<16x4x1xf32, #tpu.memory_space<vmem>>, vector<1x4x1xf32>
    %662 = vector.shape_cast %661 : vector<1x4x1xf32> to vector<4x1xf32>
    %c0_280 = arith.constant 0 : index
    %c0_281 = arith.constant 0 : index
    %663 = vector.load %arg7[%c0_280, %c0_281] : memref<4x16xf32, #tpu.memory_space<vmem>>, vector<4x16xf32>
    %664 = arith.mulf %656, %663 : vector<4x16xf32>
    %665 = arith.mulf %655, %659 : vector<4x16xf32>
    %666 = arith.addf %664, %665 : vector<4x16xf32>
    %667 = math.tanh %666 : vector<4x16xf32>
    %668 = arith.mulf %657, %667 : vector<4x16xf32>
    %669 = vector.broadcast %662 : vector<4x1xf32> to vector<4x16xf32>
    %670 = arith.mulf %669, %666 : vector<4x16xf32>
    %cst_282 = arith.constant 1.000000e+00 : f32
    %671 = vector.broadcast %cst_282 : f32 to vector<4x1xf32>
    %672 = arith.subf %671, %662 : vector<4x1xf32>
    %c0_283 = arith.constant 0 : index
    %c0_284 = arith.constant 0 : index
    %673 = vector.load %arg7[%c0_283, %c0_284] : memref<4x16xf32, #tpu.memory_space<vmem>>, vector<4x16xf32>
    %674 = vector.broadcast %672 : vector<4x1xf32> to vector<4x16xf32>
    %675 = arith.mulf %674, %673 : vector<4x16xf32>
    %676 = arith.addf %670, %675 : vector<4x16xf32>
    %c0_285 = arith.constant 0 : index
    %c0_286 = arith.constant 0 : index
    %677 = vector.load %arg7[%c0_285, %c0_286] : memref<4x16xf32, #tpu.memory_space<vmem>>, vector<4x16xf32>
    tpu.vector_store %arg7[%c0_285, %c0_286], %676 {strides = array<i32>} : memref<4x16xf32, #tpu.memory_space<vmem>>, vector<4x16xf32>,
    %678 = tpu.concatenate %668, %668 in 1 : vector<4x16xf32>, vector<4x16xf32> -> vector<4x32xf32>
    %679 = arith.mulf %678, %1 : vector<4x32xf32>
    %680 = vector.broadcast %662 : vector<4x1xf32> to vector<4x32xf32>
    %681 = arith.mulf %680, %679 : vector<4x32xf32>
    %cst_287 = arith.constant 1.000000e+00 : f32
    %682 = vector.broadcast %cst_287 : f32 to vector<4x1xf32>
    %683 = arith.subf %682, %662 : vector<4x1xf32>
    %c0_288 = arith.constant 0 : index
    %c0_289 = arith.constant 0 : index
    %684 = vector.load %arg6[%c0_288, %c0_289] : memref<4x32xf32, #tpu.memory_space<vmem>>, vector<4x32xf32>
    %685 = vector.broadcast %683 : vector<4x1xf32> to vector<4x32xf32>
    %686 = arith.mulf %685, %684 : vector<4x32xf32>
    %687 = arith.addf %681, %686 : vector<4x32xf32>
    %c0_290 = arith.constant 0 : index
    %c0_291 = arith.constant 0 : index
    %688 = vector.load %arg6[%c0_290, %c0_291] : memref<4x32xf32, #tpu.memory_space<vmem>>, vector<4x32xf32>
    tpu.vector_store %arg6[%c0_290, %c0_291], %687 {strides = array<i32>} : memref<4x32xf32, #tpu.memory_space<vmem>>, vector<4x32xf32>,
    %689 = vector.broadcast %662 : vector<4x1xf32> to vector<4x16xf32>
    %690 = arith.mulf %668, %689 : vector<4x16xf32>
    %691 = arith.index_cast %c12_i32 : i32 to index
    %c0_292 = arith.constant 0 : index
    %c0_293 = arith.constant 0 : index
    %692 = vector.load %arg5[%691, %c0_292, %c0_293] : memref<16x4x16xf32, #tpu.memory_space<vmem>>, vector<1x4x16xf32>
    %693 = vector.shape_cast %692 : vector<1x4x16xf32> to vector<4x16xf32>
    %694 = vector.shape_cast %690 : vector<4x16xf32> to vector<1x4x16xf32>
    tpu.vector_store %arg5[%691, %c0_292, %c0_293], %694 {strides = array<i32>} : memref<16x4x16xf32, #tpu.memory_space<vmem>>, vector<1x4x16xf32>,
    %c13_i32 = arith.constant 13 : i32
    %695 = arith.index_cast %c13_i32 : i32 to index
    %c0_294 = arith.constant 0 : index
    %c0_295 = arith.constant 0 : index
    %696 = vector.load %arg1[%695, %c0_294, %c0_295] : memref<16x4x64xf32, #tpu.memory_space<vmem>>, vector<1x4x64xf32>
    %697 = vector.shape_cast %696 : vector<1x4x64xf32> to vector<4x64xf32>
    %c0_296 = arith.constant 0 : index
    %c0_297 = arith.constant 0 : index
    %698 = vector.load %arg6[%c0_296, %c0_297] : memref<4x32xf32, #tpu.memory_space<vmem>>, vector<4x32xf32>
    %699 = arith.truncf %698 : vector<4x32xf32> to vector<4x32xbf16>
    %cst_298 = arith.constant dense<0.000000e+00> : vector<4x64xf32>
    %700 = tpu.matmul %699, %0, %cst_298 {dimension_numbers = #tpu.dot_dimension_numbers<[1], [0], [0], [1], [0, 0, 1, 1], [], []>} : vector<4x32xbf16>, vector<32x64xbf16>, vector<4x64xf32> -> vector<4x64xf32>
    %701 = arith.addf %697, %700 : vector<4x64xf32>
    %702 = vector.extract_strided_slice %701 {offsets = [0, 0], sizes = [4, 48], strides = [1, 1]} : vector<4x64xf32> to vector<4x48xf32>
    %703 = arith.negf %702 : vector<4x48xf32>
    %704 = math.exp %703 : vector<4x48xf32>
    %cst_299 = arith.constant 1.000000e+00 : f32
    %705 = vector.broadcast %cst_299 : f32 to vector<4x48xf32>
    %706 = arith.addf %705, %704 : vector<4x48xf32>
    %707 = arith.divf %705, %706 : vector<4x48xf32>
    %708 = vector.extract_strided_slice %707 {offsets = [0, 0], sizes = [4, 16], strides = [1, 1]} : vector<4x48xf32> to vector<4x16xf32>
    %709 = vector.extract_strided_slice %707 {offsets = [0, 16], sizes = [4, 16], strides = [1, 1]} : vector<4x48xf32> to vector<4x16xf32>
    %710 = vector.extract_strided_slice %707 {offsets = [0, 32], sizes = [4, 16], strides = [1, 1]} : vector<4x48xf32> to vector<4x16xf32>
    %711 = vector.extract_strided_slice %701 {offsets = [0, 48], sizes = [4, 16], strides = [1, 1]} : vector<4x64xf32> to vector<4x16xf32>
    %712 = math.tanh %711 : vector<4x16xf32>
    %713 = arith.index_cast %c13_i32 : i32 to index
    %c0_300 = arith.constant 0 : index
    %c0_301 = arith.constant 0 : index
    %714 = vector.load %arg3[%713, %c0_300, %c0_301] : memref<16x4x1xf32, #tpu.memory_space<vmem>>, vector<1x4x1xf32>
    %715 = vector.shape_cast %714 : vector<1x4x1xf32> to vector<4x1xf32>
    %c0_302 = arith.constant 0 : index
    %c0_303 = arith.constant 0 : index
    %716 = vector.load %arg7[%c0_302, %c0_303] : memref<4x16xf32, #tpu.memory_space<vmem>>, vector<4x16xf32>
    %717 = arith.mulf %709, %716 : vector<4x16xf32>
    %718 = arith.mulf %708, %712 : vector<4x16xf32>
    %719 = arith.addf %717, %718 : vector<4x16xf32>
    %720 = math.tanh %719 : vector<4x16xf32>
    %721 = arith.mulf %710, %720 : vector<4x16xf32>
    %722 = vector.broadcast %715 : vector<4x1xf32> to vector<4x16xf32>
    %723 = arith.mulf %722, %719 : vector<4x16xf32>
    %cst_304 = arith.constant 1.000000e+00 : f32
    %724 = vector.broadcast %cst_304 : f32 to vector<4x1xf32>
    %725 = arith.subf %724, %715 : vector<4x1xf32>
    %c0_305 = arith.constant 0 : index
    %c0_306 = arith.constant 0 : index
    %726 = vector.load %arg7[%c0_305, %c0_306] : memref<4x16xf32, #tpu.memory_space<vmem>>, vector<4x16xf32>
    %727 = vector.broadcast %725 : vector<4x1xf32> to vector<4x16xf32>
    %728 = arith.mulf %727, %726 : vector<4x16xf32>
    %729 = arith.addf %723, %728 : vector<4x16xf32>
    %c0_307 = arith.constant 0 : index
    %c0_308 = arith.constant 0 : index
    %730 = vector.load %arg7[%c0_307, %c0_308] : memref<4x16xf32, #tpu.memory_space<vmem>>, vector<4x16xf32>
    tpu.vector_store %arg7[%c0_307, %c0_308], %729 {strides = array<i32>} : memref<4x16xf32, #tpu.memory_space<vmem>>, vector<4x16xf32>,
    %731 = tpu.concatenate %721, %721 in 1 : vector<4x16xf32>, vector<4x16xf32> -> vector<4x32xf32>
    %732 = arith.mulf %731, %1 : vector<4x32xf32>
    %733 = vector.broadcast %715 : vector<4x1xf32> to vector<4x32xf32>
    %734 = arith.mulf %733, %732 : vector<4x32xf32>
    %cst_309 = arith.constant 1.000000e+00 : f32
    %735 = vector.broadcast %cst_309 : f32 to vector<4x1xf32>
    %736 = arith.subf %735, %715 : vector<4x1xf32>
    %c0_310 = arith.constant 0 : index
    %c0_311 = arith.constant 0 : index
    %737 = vector.load %arg6[%c0_310, %c0_311] : memref<4x32xf32, #tpu.memory_space<vmem>>, vector<4x32xf32>
    %738 = vector.broadcast %736 : vector<4x1xf32> to vector<4x32xf32>
    %739 = arith.mulf %738, %737 : vector<4x32xf32>
    %740 = arith.addf %734, %739 : vector<4x32xf32>
    %c0_312 = arith.constant 0 : index
    %c0_313 = arith.constant 0 : index
    %741 = vector.load %arg6[%c0_312, %c0_313] : memref<4x32xf32, #tpu.memory_space<vmem>>, vector<4x32xf32>
    tpu.vector_store %arg6[%c0_312, %c0_313], %740 {strides = array<i32>} : memref<4x32xf32, #tpu.memory_space<vmem>>, vector<4x32xf32>,
    %742 = vector.broadcast %715 : vector<4x1xf32> to vector<4x16xf32>
    %743 = arith.mulf %721, %742 : vector<4x16xf32>
    %744 = arith.index_cast %c13_i32 : i32 to index
    %c0_314 = arith.constant 0 : index
    %c0_315 = arith.constant 0 : index
    %745 = vector.load %arg5[%744, %c0_314, %c0_315] : memref<16x4x16xf32, #tpu.memory_space<vmem>>, vector<1x4x16xf32>
    %746 = vector.shape_cast %745 : vector<1x4x16xf32> to vector<4x16xf32>
    %747 = vector.shape_cast %743 : vector<4x16xf32> to vector<1x4x16xf32>
    tpu.vector_store %arg5[%744, %c0_314, %c0_315], %747 {strides = array<i32>} : memref<16x4x16xf32, #tpu.memory_space<vmem>>, vector<1x4x16xf32>,
    %c14_i32 = arith.constant 14 : i32
    %748 = arith.index_cast %c14_i32 : i32 to index
    %c0_316 = arith.constant 0 : index
    %c0_317 = arith.constant 0 : index
    %749 = vector.load %arg1[%748, %c0_316, %c0_317] : memref<16x4x64xf32, #tpu.memory_space<vmem>>, vector<1x4x64xf32>
    %750 = vector.shape_cast %749 : vector<1x4x64xf32> to vector<4x64xf32>
    %c0_318 = arith.constant 0 : index
    %c0_319 = arith.constant 0 : index
    %751 = vector.load %arg6[%c0_318, %c0_319] : memref<4x32xf32, #tpu.memory_space<vmem>>, vector<4x32xf32>
    %752 = arith.truncf %751 : vector<4x32xf32> to vector<4x32xbf16>
    %cst_320 = arith.constant dense<0.000000e+00> : vector<4x64xf32>
    %753 = tpu.matmul %752, %0, %cst_320 {dimension_numbers = #tpu.dot_dimension_numbers<[1], [0], [0], [1], [0, 0, 1, 1], [], []>} : vector<4x32xbf16>, vector<32x64xbf16>, vector<4x64xf32> -> vector<4x64xf32>
    %754 = arith.addf %750, %753 : vector<4x64xf32>
    %755 = vector.extract_strided_slice %754 {offsets = [0, 0], sizes = [4, 48], strides = [1, 1]} : vector<4x64xf32> to vector<4x48xf32>
    %756 = arith.negf %755 : vector<4x48xf32>
    %757 = math.exp %756 : vector<4x48xf32>
    %cst_321 = arith.constant 1.000000e+00 : f32
    %758 = vector.broadcast %cst_321 : f32 to vector<4x48xf32>
    %759 = arith.addf %758, %757 : vector<4x48xf32>
    %760 = arith.divf %758, %759 : vector<4x48xf32>
    %761 = vector.extract_strided_slice %760 {offsets = [0, 0], sizes = [4, 16], strides = [1, 1]} : vector<4x48xf32> to vector<4x16xf32>
    %762 = vector.extract_strided_slice %760 {offsets = [0, 16], sizes = [4, 16], strides = [1, 1]} : vector<4x48xf32> to vector<4x16xf32>
    %763 = vector.extract_strided_slice %760 {offsets = [0, 32], sizes = [4, 16], strides = [1, 1]} : vector<4x48xf32> to vector<4x16xf32>
    %764 = vector.extract_strided_slice %754 {offsets = [0, 48], sizes = [4, 16], strides = [1, 1]} : vector<4x64xf32> to vector<4x16xf32>
    %765 = math.tanh %764 : vector<4x16xf32>
    %766 = arith.index_cast %c14_i32 : i32 to index
    %c0_322 = arith.constant 0 : index
    %c0_323 = arith.constant 0 : index
    %767 = vector.load %arg3[%766, %c0_322, %c0_323] : memref<16x4x1xf32, #tpu.memory_space<vmem>>, vector<1x4x1xf32>
    %768 = vector.shape_cast %767 : vector<1x4x1xf32> to vector<4x1xf32>
    %c0_324 = arith.constant 0 : index
    %c0_325 = arith.constant 0 : index
    %769 = vector.load %arg7[%c0_324, %c0_325] : memref<4x16xf32, #tpu.memory_space<vmem>>, vector<4x16xf32>
    %770 = arith.mulf %762, %769 : vector<4x16xf32>
    %771 = arith.mulf %761, %765 : vector<4x16xf32>
    %772 = arith.addf %770, %771 : vector<4x16xf32>
    %773 = math.tanh %772 : vector<4x16xf32>
    %774 = arith.mulf %763, %773 : vector<4x16xf32>
    %775 = vector.broadcast %768 : vector<4x1xf32> to vector<4x16xf32>
    %776 = arith.mulf %775, %772 : vector<4x16xf32>
    %cst_326 = arith.constant 1.000000e+00 : f32
    %777 = vector.broadcast %cst_326 : f32 to vector<4x1xf32>
    %778 = arith.subf %777, %768 : vector<4x1xf32>
    %c0_327 = arith.constant 0 : index
    %c0_328 = arith.constant 0 : index
    %779 = vector.load %arg7[%c0_327, %c0_328] : memref<4x16xf32, #tpu.memory_space<vmem>>, vector<4x16xf32>
    %780 = vector.broadcast %778 : vector<4x1xf32> to vector<4x16xf32>
    %781 = arith.mulf %780, %779 : vector<4x16xf32>
    %782 = arith.addf %776, %781 : vector<4x16xf32>
    %c0_329 = arith.constant 0 : index
    %c0_330 = arith.constant 0 : index
    %783 = vector.load %arg7[%c0_329, %c0_330] : memref<4x16xf32, #tpu.memory_space<vmem>>, vector<4x16xf32>
    tpu.vector_store %arg7[%c0_329, %c0_330], %782 {strides = array<i32>} : memref<4x16xf32, #tpu.memory_space<vmem>>, vector<4x16xf32>,
    %784 = tpu.concatenate %774, %774 in 1 : vector<4x16xf32>, vector<4x16xf32> -> vector<4x32xf32>
    %785 = arith.mulf %784, %1 : vector<4x32xf32>
    %786 = vector.broadcast %768 : vector<4x1xf32> to vector<4x32xf32>
    %787 = arith.mulf %786, %785 : vector<4x32xf32>
    %cst_331 = arith.constant 1.000000e+00 : f32
    %788 = vector.broadcast %cst_331 : f32 to vector<4x1xf32>
    %789 = arith.subf %788, %768 : vector<4x1xf32>
    %c0_332 = arith.constant 0 : index
    %c0_333 = arith.constant 0 : index
    %790 = vector.load %arg6[%c0_332, %c0_333] : memref<4x32xf32, #tpu.memory_space<vmem>>, vector<4x32xf32>
    %791 = vector.broadcast %789 : vector<4x1xf32> to vector<4x32xf32>
    %792 = arith.mulf %791, %790 : vector<4x32xf32>
    %793 = arith.addf %787, %792 : vector<4x32xf32>
    %c0_334 = arith.constant 0 : index
    %c0_335 = arith.constant 0 : index
    %794 = vector.load %arg6[%c0_334, %c0_335] : memref<4x32xf32, #tpu.memory_space<vmem>>, vector<4x32xf32>
    tpu.vector_store %arg6[%c0_334, %c0_335], %793 {strides = array<i32>} : memref<4x32xf32, #tpu.memory_space<vmem>>, vector<4x32xf32>,
    %795 = vector.broadcast %768 : vector<4x1xf32> to vector<4x16xf32>
    %796 = arith.mulf %774, %795 : vector<4x16xf32>
    %797 = arith.index_cast %c14_i32 : i32 to index
    %c0_336 = arith.constant 0 : index
    %c0_337 = arith.constant 0 : index
    %798 = vector.load %arg5[%797, %c0_336, %c0_337] : memref<16x4x16xf32, #tpu.memory_space<vmem>>, vector<1x4x16xf32>
    %799 = vector.shape_cast %798 : vector<1x4x16xf32> to vector<4x16xf32>
    %800 = vector.shape_cast %796 : vector<4x16xf32> to vector<1x4x16xf32>
    tpu.vector_store %arg5[%797, %c0_336, %c0_337], %800 {strides = array<i32>} : memref<16x4x16xf32, #tpu.memory_space<vmem>>, vector<1x4x16xf32>,
    %c15_i32 = arith.constant 15 : i32
    %801 = arith.index_cast %c15_i32 : i32 to index
    %c0_338 = arith.constant 0 : index
    %c0_339 = arith.constant 0 : index
    %802 = vector.load %arg1[%801, %c0_338, %c0_339] : memref<16x4x64xf32, #tpu.memory_space<vmem>>, vector<1x4x64xf32>
    %803 = vector.shape_cast %802 : vector<1x4x64xf32> to vector<4x64xf32>
    %c0_340 = arith.constant 0 : index
    %c0_341 = arith.constant 0 : index
    %804 = vector.load %arg6[%c0_340, %c0_341] : memref<4x32xf32, #tpu.memory_space<vmem>>, vector<4x32xf32>
    %805 = arith.truncf %804 : vector<4x32xf32> to vector<4x32xbf16>
    %cst_342 = arith.constant dense<0.000000e+00> : vector<4x64xf32>
    %806 = tpu.matmul %805, %0, %cst_342 {dimension_numbers = #tpu.dot_dimension_numbers<[1], [0], [0], [1], [0, 0, 1, 1], [], []>} : vector<4x32xbf16>, vector<32x64xbf16>, vector<4x64xf32> -> vector<4x64xf32>
    %807 = arith.addf %803, %806 : vector<4x64xf32>
    %808 = vector.extract_strided_slice %807 {offsets = [0, 0], sizes = [4, 48], strides = [1, 1]} : vector<4x64xf32> to vector<4x48xf32>
    %809 = arith.negf %808 : vector<4x48xf32>
    %810 = math.exp %809 : vector<4x48xf32>
    %cst_343 = arith.constant 1.000000e+00 : f32
    %811 = vector.broadcast %cst_343 : f32 to vector<4x48xf32>
    %812 = arith.addf %811, %810 : vector<4x48xf32>
    %813 = arith.divf %811, %812 : vector<4x48xf32>
    %814 = vector.extract_strided_slice %813 {offsets = [0, 0], sizes = [4, 16], strides = [1, 1]} : vector<4x48xf32> to vector<4x16xf32>
    %815 = vector.extract_strided_slice %813 {offsets = [0, 16], sizes = [4, 16], strides = [1, 1]} : vector<4x48xf32> to vector<4x16xf32>
    %816 = vector.extract_strided_slice %813 {offsets = [0, 32], sizes = [4, 16], strides = [1, 1]} : vector<4x48xf32> to vector<4x16xf32>
    %817 = vector.extract_strided_slice %807 {offsets = [0, 48], sizes = [4, 16], strides = [1, 1]} : vector<4x64xf32> to vector<4x16xf32>
    %818 = math.tanh %817 : vector<4x16xf32>
    %819 = arith.index_cast %c15_i32 : i32 to index
    %c0_344 = arith.constant 0 : index
    %c0_345 = arith.constant 0 : index
    %820 = vector.load %arg3[%819, %c0_344, %c0_345] : memref<16x4x1xf32, #tpu.memory_space<vmem>>, vector<1x4x1xf32>
    %821 = vector.shape_cast %820 : vector<1x4x1xf32> to vector<4x1xf32>
    %c0_346 = arith.constant 0 : index
    %c0_347 = arith.constant 0 : index
    %822 = vector.load %arg7[%c0_346, %c0_347] : memref<4x16xf32, #tpu.memory_space<vmem>>, vector<4x16xf32>
    %823 = arith.mulf %815, %822 : vector<4x16xf32>
    %824 = arith.mulf %814, %818 : vector<4x16xf32>
    %825 = arith.addf %823, %824 : vector<4x16xf32>
    %826 = math.tanh %825 : vector<4x16xf32>
    %827 = arith.mulf %816, %826 : vector<4x16xf32>
    %828 = vector.broadcast %821 : vector<4x1xf32> to vector<4x16xf32>
    %829 = arith.mulf %828, %825 : vector<4x16xf32>
    %cst_348 = arith.constant 1.000000e+00 : f32
    %830 = vector.broadcast %cst_348 : f32 to vector<4x1xf32>
    %831 = arith.subf %830, %821 : vector<4x1xf32>
    %c0_349 = arith.constant 0 : index
    %c0_350 = arith.constant 0 : index
    %832 = vector.load %arg7[%c0_349, %c0_350] : memref<4x16xf32, #tpu.memory_space<vmem>>, vector<4x16xf32>
    %833 = vector.broadcast %831 : vector<4x1xf32> to vector<4x16xf32>
    %834 = arith.mulf %833, %832 : vector<4x16xf32>
    %835 = arith.addf %829, %834 : vector<4x16xf32>
    %c0_351 = arith.constant 0 : index
    %c0_352 = arith.constant 0 : index
    %836 = vector.load %arg7[%c0_351, %c0_352] : memref<4x16xf32, #tpu.memory_space<vmem>>, vector<4x16xf32>
    tpu.vector_store %arg7[%c0_351, %c0_352], %835 {strides = array<i32>} : memref<4x16xf32, #tpu.memory_space<vmem>>, vector<4x16xf32>,
    %837 = tpu.concatenate %827, %827 in 1 : vector<4x16xf32>, vector<4x16xf32> -> vector<4x32xf32>
    %838 = arith.mulf %837, %1 : vector<4x32xf32>
    %839 = vector.broadcast %821 : vector<4x1xf32> to vector<4x32xf32>
    %840 = arith.mulf %839, %838 : vector<4x32xf32>
    %cst_353 = arith.constant 1.000000e+00 : f32
    %841 = vector.broadcast %cst_353 : f32 to vector<4x1xf32>
    %842 = arith.subf %841, %821 : vector<4x1xf32>
    %c0_354 = arith.constant 0 : index
    %c0_355 = arith.constant 0 : index
    %843 = vector.load %arg6[%c0_354, %c0_355] : memref<4x32xf32, #tpu.memory_space<vmem>>, vector<4x32xf32>
    %844 = vector.broadcast %842 : vector<4x1xf32> to vector<4x32xf32>
    %845 = arith.mulf %844, %843 : vector<4x32xf32>
    %846 = arith.addf %840, %845 : vector<4x32xf32>
    %c0_356 = arith.constant 0 : index
    %c0_357 = arith.constant 0 : index
    %847 = vector.load %arg6[%c0_356, %c0_357] : memref<4x32xf32, #tpu.memory_space<vmem>>, vector<4x32xf32>
    tpu.vector_store %arg6[%c0_356, %c0_357], %846 {strides = array<i32>} : memref<4x32xf32, #tpu.memory_space<vmem>>, vector<4x32xf32>,
    %848 = vector.broadcast %821 : vector<4x1xf32> to vector<4x16xf32>
    %849 = arith.mulf %827, %848 : vector<4x16xf32>
    %850 = arith.index_cast %c15_i32 : i32 to index
    %c0_358 = arith.constant 0 : index
    %c0_359 = arith.constant 0 : index
    %851 = vector.load %arg5[%850, %c0_358, %c0_359] : memref<16x4x16xf32, #tpu.memory_space<vmem>>, vector<1x4x16xf32>
    %852 = vector.shape_cast %851 : vector<1x4x16xf32> to vector<4x16xf32>
    %853 = vector.shape_cast %849 : vector<4x16xf32> to vector<1x4x16xf32>
    tpu.vector_store %arg5[%850, %c0_358, %c0_359], %853 {strides = array<i32>} : memref<16x4x16xf32, #tpu.memory_space<vmem>>, vector<1x4x16xf32>,
    %c16_i32 = arith.constant 16 : i32
    return
  }
  func.func @transform_0(%arg0: i32) -> (i32, i32, i32) {
    %c0_i32 = arith.constant 0 : i32
    %c0_i32_0 = arith.constant 0 : i32
    %c0_i32_1 = arith.constant 0 : i32
    %c0_i32_2 = arith.constant 0 : i32
    return %c0_i32, %c0_i32_0, %c0_i32_1 : i32, i32, i32
  }
  func.func @transform_1(%arg0: i32) -> (i32, i32) {
    %c0_i32 = arith.constant 0 : i32
    %c0_i32_0 = arith.constant 0 : i32
    %c0_i32_1 = arith.constant 0 : i32
    return %c0_i32, %c0_i32_0 : i32, i32
  }
  func.func @transform_2(%arg0: i32) -> (i32, i32, i32) {
    %c0_i32 = arith.constant 0 : i32
    %c0_i32_0 = arith.constant 0 : i32
    %c0_i32_1 = arith.constant 0 : i32
    %c0_i32_2 = arith.constant 0 : i32
    return %c0_i32, %c0_i32_0, %c0_i32_1 : i32, i32, i32
  }
  func.func @transform_3(%arg0: i32) -> (i32, i32) {
    %c0_i32 = arith.constant 0 : i32
    %c0_i32_0 = arith.constant 0 : i32
    %c0_i32_1 = arith.constant 0 : i32
    return %c0_i32, %c0_i32_0 : i32, i32
  }
  func.func @transform_4(%arg0: i32) -> (i32, i32, i32) {
    %c0_i32 = arith.constant 0 : i32
    %c0_i32_0 = arith.constant 0 : i32
    %c0_i32_1 = arith.constant 0 : i32
    %c0_i32_2 = arith.constant 0 : i32
    return %c0_i32, %c0_i32_0, %c0_i32_1 : i32, i32, i32
  }
}

module attributes {stable_mosaic.version = 11 : i64} {
  func.func @_embed_kernel(%arg0: i32, %arg1: memref<16x24xbf16, #tpu.memory_space<vmem>>, %arg2: memref<6x16x24xbf16, #tpu.memory_space<vmem>>, %arg3: memref<24x16xbf16, #tpu.memory_space<vmem>>, %arg4: memref<1x16xf32, #tpu.memory_space<vmem>>, %arg5: memref<24x16xbf16, #tpu.memory_space<vmem>>, %arg6: memref<16x16xbf16, #tpu.memory_space<vmem>>, %arg7: memref<2x16x32xbf16, #tpu.memory_space<vmem>>, %arg8: memref<2x1x32xf32, #tpu.memory_space<vmem>>, %arg9: memref<16x16xf32, #tpu.memory_space<vmem>>) attributes {dimension_semantics = [#tpu.dimension_semantics<parallel>], iteration_bounds = array<i64: 1>, scalar_prefetch = 0 : i64, scratch_operands = 0 : i64, tpu.core_type = #tpu.core_type<tc>, window_params = [{transform_indices = @transform_0, window_bounds = array<i64: 16, 24>}, {transform_indices = @transform_1, window_bounds = array<i64: 6, 16, 24>}, {pipeline_mode = #tpu.pipeline_mode<synchronous>, transform_indices = @transform_2, window_bounds = array<i64: 24, 16>}, {pipeline_mode = #tpu.pipeline_mode<synchronous>, transform_indices = @transform_3, window_bounds = array<i64: 1, 16>}, {pipeline_mode = #tpu.pipeline_mode<synchronous>, transform_indices = @transform_4, window_bounds = array<i64: 24, 16>}, {pipeline_mode = #tpu.pipeline_mode<synchronous>, transform_indices = @transform_5, window_bounds = array<i64: 16, 16>}, {pipeline_mode = #tpu.pipeline_mode<synchronous>, transform_indices = @transform_6, window_bounds = array<i64: 2, 16, 32>}, {pipeline_mode = #tpu.pipeline_mode<synchronous>, transform_indices = @transform_7, window_bounds = array<i64: 2, 1, 32>}, {transform_indices = @transform_8, window_bounds = array<i64: 16, 16>}]} {
    %c0 = arith.constant 0 : index
    %c0_0 = arith.constant 0 : index
    %c0_1 = arith.constant 0 : index
    %0 = vector.load %arg2[%c0, %c0_0, %c0_1] : memref<6x16x24xbf16, #tpu.memory_space<vmem>>, vector<6x16x24xbf16>
    %1 = vector.shape_cast %0 : vector<6x16x24xbf16> to vector<96x24xbf16>
    %c0_2 = arith.constant 0 : index
    %c0_3 = arith.constant 0 : index
    %2 = vector.load %arg3[%c0_2, %c0_3] : memref<24x16xbf16, #tpu.memory_space<vmem>>, vector<24x16xbf16>
    %cst = arith.constant dense<0.000000e+00> : vector<96x16xf32>
    %3 = tpu.matmul %1, %2, %cst {dimension_numbers = #tpu.dot_dimension_numbers<[1], [0], [0], [1], [0, 0, 1, 1], [], []>} : vector<96x24xbf16>, vector<24x16xbf16>, vector<96x16xf32> -> vector<96x16xf32>
    %c0_4 = arith.constant 0 : index
    %c0_5 = arith.constant 0 : index
    %4 = vector.load %arg4[%c0_4, %c0_5] : memref<1x16xf32, #tpu.memory_space<vmem>>, vector<1x16xf32>
    %5 = vector.broadcast %4 : vector<1x16xf32> to vector<96x16xf32>
    %6 = arith.addf %3, %5 : vector<96x16xf32>
    %cst_6 = arith.constant 0.000000e+00 : f32
    %7 = vector.broadcast %cst_6 : f32 to vector<96x16xf32>
    %8 = arith.maximumf %6, %7 : vector<96x16xf32>
    %9 = vector.shape_cast %8 : vector<96x16xf32> to vector<6x16x16xf32>
    %cst_7 = arith.constant dense<0xFF800000> : vector<16x16xf32>
    %10 = vector.multi_reduction <maximumf>, %9, %cst_7 [0] : vector<6x16x16xf32> to vector<16x16xf32>
    %c0_8 = arith.constant 0 : index
    %c0_9 = arith.constant 0 : index
    %11 = vector.load %arg1[%c0_8, %c0_9] : memref<16x24xbf16, #tpu.memory_space<vmem>>, vector<16x24xbf16>
    %c0_10 = arith.constant 0 : index
    %c0_11 = arith.constant 0 : index
    %12 = vector.load %arg5[%c0_10, %c0_11] : memref<24x16xbf16, #tpu.memory_space<vmem>>, vector<24x16xbf16>
    %cst_12 = arith.constant dense<0.000000e+00> : vector<16x16xf32>
    %13 = tpu.matmul %11, %12, %cst_12 {dimension_numbers = #tpu.dot_dimension_numbers<[1], [0], [0], [1], [0, 0, 1, 1], [], []>} : vector<16x24xbf16>, vector<24x16xbf16>, vector<16x16xf32> -> vector<16x16xf32>
    %14 = arith.truncf %10 : vector<16x16xf32> to vector<16x16xbf16>
    %c0_13 = arith.constant 0 : index
    %c0_14 = arith.constant 0 : index
    %15 = vector.load %arg6[%c0_13, %c0_14] : memref<16x16xbf16, #tpu.memory_space<vmem>>, vector<16x16xbf16>
    %cst_15 = arith.constant dense<0.000000e+00> : vector<16x16xf32>
    %16 = tpu.matmul %14, %15, %cst_15 {dimension_numbers = #tpu.dot_dimension_numbers<[1], [0], [0], [1], [0, 0, 1, 1], [], []>} : vector<16x16xbf16>, vector<16x16xbf16>, vector<16x16xf32> -> vector<16x16xf32>
    %17 = arith.addf %13, %16 : vector<16x16xf32>
    %18 = arith.truncf %17 : vector<16x16xf32> to vector<16x16xbf16>
    %c0_16 = arith.constant 0 : index
    %c0_17 = arith.constant 0 : index
    %c0_18 = arith.constant 0 : index
    %19 = vector.load %arg7[%c0_16, %c0_17, %c0_18] : memref<2x16x32xbf16, #tpu.memory_space<vmem>>, vector<1x16x32xbf16>
    %20 = vector.shape_cast %19 : vector<1x16x32xbf16> to vector<16x32xbf16>
    %cst_19 = arith.constant dense<0.000000e+00> : vector<16x32xf32>
    %21 = tpu.matmul %18, %20, %cst_19 {dimension_numbers = #tpu.dot_dimension_numbers<[1], [0], [0], [1], [0, 0, 1, 1], [], []>} : vector<16x16xbf16>, vector<16x32xbf16>, vector<16x32xf32> -> vector<16x32xf32>
    %c0_20 = arith.constant 0 : index
    %c0_21 = arith.constant 0 : index
    %c0_22 = arith.constant 0 : index
    %22 = vector.load %arg8[%c0_20, %c0_21, %c0_22] : memref<2x1x32xf32, #tpu.memory_space<vmem>>, vector<1x1x32xf32>
    %23 = vector.shape_cast %22 : vector<1x1x32xf32> to vector<1x32xf32>
    %24 = vector.broadcast %23 : vector<1x32xf32> to vector<16x32xf32>
    %25 = arith.addf %21, %24 : vector<16x32xf32>
    %26 = vector.extract_strided_slice %25 {offsets = [0, 0], sizes = [16, 16], strides = [1, 1]} : vector<16x32xf32> to vector<16x16xf32>
    %27 = arith.negf %26 : vector<16x16xf32>
    %28 = math.exp %27 : vector<16x16xf32>
    %cst_23 = arith.constant 1.000000e+00 : f32
    %29 = vector.broadcast %cst_23 : f32 to vector<16x16xf32>
    %30 = arith.addf %29, %28 : vector<16x16xf32>
    %31 = arith.divf %29, %30 : vector<16x16xf32>
    %32 = vector.extract_strided_slice %25 {offsets = [0, 16], sizes = [16, 16], strides = [1, 1]} : vector<16x32xf32> to vector<16x16xf32>
    %cst_24 = arith.constant 0.000000e+00 : f32
    %33 = vector.broadcast %cst_24 : f32 to vector<16x16xf32>
    %34 = arith.maximumf %32, %33 : vector<16x16xf32>
    %35 = arith.mulf %31, %34 : vector<16x16xf32>
    %cst_25 = arith.constant 1.000000e+00 : f32
    %36 = vector.broadcast %cst_25 : f32 to vector<16x16xf32>
    %37 = arith.subf %36, %31 : vector<16x16xf32>
    %38 = arith.mulf %37, %17 : vector<16x16xf32>
    %39 = arith.addf %35, %38 : vector<16x16xf32>
    %40 = arith.truncf %39 : vector<16x16xf32> to vector<16x16xbf16>
    %c1 = arith.constant 1 : index
    %c0_26 = arith.constant 0 : index
    %c0_27 = arith.constant 0 : index
    %41 = vector.load %arg7[%c1, %c0_26, %c0_27] : memref<2x16x32xbf16, #tpu.memory_space<vmem>>, vector<1x16x32xbf16>
    %42 = vector.shape_cast %41 : vector<1x16x32xbf16> to vector<16x32xbf16>
    %cst_28 = arith.constant dense<0.000000e+00> : vector<16x32xf32>
    %43 = tpu.matmul %40, %42, %cst_28 {dimension_numbers = #tpu.dot_dimension_numbers<[1], [0], [0], [1], [0, 0, 1, 1], [], []>} : vector<16x16xbf16>, vector<16x32xbf16>, vector<16x32xf32> -> vector<16x32xf32>
    %c1_29 = arith.constant 1 : index
    %c0_30 = arith.constant 0 : index
    %c0_31 = arith.constant 0 : index
    %44 = vector.load %arg8[%c1_29, %c0_30, %c0_31] : memref<2x1x32xf32, #tpu.memory_space<vmem>>, vector<1x1x32xf32>
    %45 = vector.shape_cast %44 : vector<1x1x32xf32> to vector<1x32xf32>
    %46 = vector.broadcast %45 : vector<1x32xf32> to vector<16x32xf32>
    %47 = arith.addf %43, %46 : vector<16x32xf32>
    %48 = vector.extract_strided_slice %47 {offsets = [0, 0], sizes = [16, 16], strides = [1, 1]} : vector<16x32xf32> to vector<16x16xf32>
    %49 = arith.negf %48 : vector<16x16xf32>
    %50 = math.exp %49 : vector<16x16xf32>
    %cst_32 = arith.constant 1.000000e+00 : f32
    %51 = vector.broadcast %cst_32 : f32 to vector<16x16xf32>
    %52 = arith.addf %51, %50 : vector<16x16xf32>
    %53 = arith.divf %51, %52 : vector<16x16xf32>
    %54 = vector.extract_strided_slice %47 {offsets = [0, 16], sizes = [16, 16], strides = [1, 1]} : vector<16x32xf32> to vector<16x16xf32>
    %cst_33 = arith.constant 0.000000e+00 : f32
    %55 = vector.broadcast %cst_33 : f32 to vector<16x16xf32>
    %56 = arith.maximumf %54, %55 : vector<16x16xf32>
    %57 = arith.mulf %53, %56 : vector<16x16xf32>
    %cst_34 = arith.constant 1.000000e+00 : f32
    %58 = vector.broadcast %cst_34 : f32 to vector<16x16xf32>
    %59 = arith.subf %58, %53 : vector<16x16xf32>
    %60 = arith.mulf %59, %39 : vector<16x16xf32>
    %61 = arith.addf %57, %60 : vector<16x16xf32>
    %c0_35 = arith.constant 0 : index
    %c0_36 = arith.constant 0 : index
    %62 = vector.load %arg9[%c0_35, %c0_36] : memref<16x16xf32, #tpu.memory_space<vmem>>, vector<16x16xf32>
    tpu.vector_store %arg9[%c0_35, %c0_36], %61 {strides = array<i32>} : memref<16x16xf32, #tpu.memory_space<vmem>>, vector<16x16xf32>,
    return
  }
  func.func @transform_0(%arg0: i32) -> (i32, i32) {
    %c0_i32 = arith.constant 0 : i32
    %c0_i32_0 = arith.constant 0 : i32
    return %arg0, %c0_i32 : i32, i32
  }
  func.func @transform_1(%arg0: i32) -> (i32, i32, i32) {
    %c0_i32 = arith.constant 0 : i32
    %c0_i32_0 = arith.constant 0 : i32
    %c0_i32_1 = arith.constant 0 : i32
    return %c0_i32, %arg0, %c0_i32_0 : i32, i32, i32
  }
  func.func @transform_2(%arg0: i32) -> (i32, i32) {
    %c0_i32 = arith.constant 0 : i32
    %c0_i32_0 = arith.constant 0 : i32
    %c0_i32_1 = arith.constant 0 : i32
    return %c0_i32, %c0_i32_0 : i32, i32
  }
  func.func @transform_3(%arg0: i32) -> (i32, i32) {
    %c0_i32 = arith.constant 0 : i32
    %c0_i32_0 = arith.constant 0 : i32
    %c0_i32_1 = arith.constant 0 : i32
    return %c0_i32, %c0_i32_0 : i32, i32
  }
  func.func @transform_4(%arg0: i32) -> (i32, i32) {
    %c0_i32 = arith.constant 0 : i32
    %c0_i32_0 = arith.constant 0 : i32
    %c0_i32_1 = arith.constant 0 : i32
    return %c0_i32, %c0_i32_0 : i32, i32
  }
  func.func @transform_5(%arg0: i32) -> (i32, i32) {
    %c0_i32 = arith.constant 0 : i32
    %c0_i32_0 = arith.constant 0 : i32
    %c0_i32_1 = arith.constant 0 : i32
    return %c0_i32, %c0_i32_0 : i32, i32
  }
  func.func @transform_6(%arg0: i32) -> (i32, i32, i32) {
    %c0_i32 = arith.constant 0 : i32
    %c0_i32_0 = arith.constant 0 : i32
    %c0_i32_1 = arith.constant 0 : i32
    %c0_i32_2 = arith.constant 0 : i32
    return %c0_i32, %c0_i32_0, %c0_i32_1 : i32, i32, i32
  }
  func.func @transform_7(%arg0: i32) -> (i32, i32, i32) {
    %c0_i32 = arith.constant 0 : i32
    %c0_i32_0 = arith.constant 0 : i32
    %c0_i32_1 = arith.constant 0 : i32
    %c0_i32_2 = arith.constant 0 : i32
    return %c0_i32, %c0_i32_0, %c0_i32_1 : i32, i32, i32
  }
  func.func @transform_8(%arg0: i32) -> (i32, i32) {
    %c0_i32 = arith.constant 0 : i32
    %c0_i32_0 = arith.constant 0 : i32
    return %arg0, %c0_i32 : i32, i32
  }
}

module attributes {stable_mosaic.version = 11 : i64} {
  func.func @_linear_kernel(%arg0: i32, %arg1: memref<16x16xbf16, #tpu.memory_space<vmem>>, %arg2: memref<16x128xbf16, #tpu.memory_space<vmem>>, %arg3: memref<1x128xf32, #tpu.memory_space<vmem>>, %arg4: memref<16x128xf32, #tpu.memory_space<vmem>>) attributes {dimension_semantics = [#tpu.dimension_semantics<parallel>], iteration_bounds = array<i64: 1>, scalar_prefetch = 0 : i64, scratch_operands = 0 : i64, tpu.core_type = #tpu.core_type<tc>, window_params = [{transform_indices = @transform_0, window_bounds = array<i64: 16, 16>}, {pipeline_mode = #tpu.pipeline_mode<synchronous>, transform_indices = @transform_1, window_bounds = array<i64: 16, 128>}, {pipeline_mode = #tpu.pipeline_mode<synchronous>, transform_indices = @transform_2, window_bounds = array<i64: 1, 128>}, {transform_indices = @transform_3, window_bounds = array<i64: 16, 128>}]} {
    %c0 = arith.constant 0 : index
    %c0_0 = arith.constant 0 : index
    %0 = vector.load %arg1[%c0, %c0_0] : memref<16x16xbf16, #tpu.memory_space<vmem>>, vector<16x16xbf16>
    %c0_1 = arith.constant 0 : index
    %c0_2 = arith.constant 0 : index
    %1 = vector.load %arg2[%c0_1, %c0_2] : memref<16x128xbf16, #tpu.memory_space<vmem>>, vector<16x128xbf16>
    %cst = arith.constant dense<0.000000e+00> : vector<16x128xf32>
    %2 = tpu.matmul %0, %1, %cst {dimension_numbers = #tpu.dot_dimension_numbers<[1], [0], [0], [1], [0, 0, 1, 1], [], []>} : vector<16x16xbf16>, vector<16x128xbf16>, vector<16x128xf32> -> vector<16x128xf32>
    %c0_3 = arith.constant 0 : index
    %c0_4 = arith.constant 0 : index
    %3 = vector.load %arg3[%c0_3, %c0_4] : memref<1x128xf32, #tpu.memory_space<vmem>>, vector<1x128xf32>
    %4 = vector.broadcast %3 : vector<1x128xf32> to vector<16x128xf32>
    %5 = arith.addf %2, %4 : vector<16x128xf32>
    %c0_5 = arith.constant 0 : index
    %c0_6 = arith.constant 0 : index
    %6 = vector.load %arg4[%c0_5, %c0_6] : memref<16x128xf32, #tpu.memory_space<vmem>>, vector<16x128xf32>
    tpu.vector_store %arg4[%c0_5, %c0_6], %5 {strides = array<i32>} : memref<16x128xf32, #tpu.memory_space<vmem>>, vector<16x128xf32>,
    return
  }
  func.func @transform_0(%arg0: i32) -> (i32, i32) {
    %c0_i32 = arith.constant 0 : i32
    %c0_i32_0 = arith.constant 0 : i32
    return %arg0, %c0_i32 : i32, i32
  }
  func.func @transform_1(%arg0: i32) -> (i32, i32) {
    %c0_i32 = arith.constant 0 : i32
    %c0_i32_0 = arith.constant 0 : i32
    %c0_i32_1 = arith.constant 0 : i32
    return %c0_i32, %c0_i32_0 : i32, i32
  }
  func.func @transform_2(%arg0: i32) -> (i32, i32) {
    %c0_i32 = arith.constant 0 : i32
    %c0_i32_0 = arith.constant 0 : i32
    %c0_i32_1 = arith.constant 0 : i32
    return %c0_i32, %c0_i32_0 : i32, i32
  }
  func.func @transform_3(%arg0: i32) -> (i32, i32) {
    %c0_i32 = arith.constant 0 : i32
    %c0_i32_0 = arith.constant 0 : i32
    return %arg0, %c0_i32 : i32, i32
  }
}

module attributes {stable_mosaic.version = 11 : i64} {
  func.func @_bilstm_kernel(%arg0: i32, %arg1: memref<8x4x64xf32, #tpu.memory_space<vmem>>, %arg2: memref<32x64xbf16, #tpu.memory_space<vmem>>, %arg3: memref<8x4x1xf32, #tpu.memory_space<vmem>>, %arg4: memref<4x32xf32, #tpu.memory_space<vmem>>, %arg5: memref<8x4x16xf32, #tpu.memory_space<vmem>>, %arg6: memref<4x32xf32, #tpu.memory_space<vmem>>, %arg7: memref<4x16xf32, #tpu.memory_space<vmem>>) attributes {dimension_semantics = [#tpu.dimension_semantics<arbitrary>], iteration_bounds = array<i64: 1>, scalar_prefetch = 0 : i64, scratch_operands = 2 : i64, tpu.core_type = #tpu.core_type<tc>, window_params = [{pipeline_mode = #tpu.pipeline_mode<synchronous>, transform_indices = @transform_0, window_bounds = array<i64: 8, 4, 64>}, {pipeline_mode = #tpu.pipeline_mode<synchronous>, transform_indices = @transform_1, window_bounds = array<i64: 32, 64>}, {pipeline_mode = #tpu.pipeline_mode<synchronous>, transform_indices = @transform_2, window_bounds = array<i64: 8, 4, 1>}, {pipeline_mode = #tpu.pipeline_mode<synchronous>, transform_indices = @transform_3, window_bounds = array<i64: 4, 32>}, {pipeline_mode = #tpu.pipeline_mode<synchronous>, transform_indices = @transform_4, window_bounds = array<i64: 8, 4, 16>}]} {
    %c0 = arith.constant 0 : index
    %c0_0 = arith.constant 0 : index
    %0 = vector.load %arg2[%c0, %c0_0] : memref<32x64xbf16, #tpu.memory_space<vmem>>, vector<32x64xbf16>
    %c0_1 = arith.constant 0 : index
    %c0_2 = arith.constant 0 : index
    %1 = vector.load %arg4[%c0_1, %c0_2] : memref<4x32xf32, #tpu.memory_space<vmem>>, vector<4x32xf32>
    %cst = arith.constant 0.000000e+00 : f32
    %2 = vector.broadcast %cst : f32 to vector<4x32xf32>
    %c0_3 = arith.constant 0 : index
    %c0_4 = arith.constant 0 : index
    %3 = vector.load %arg6[%c0_3, %c0_4] : memref<4x32xf32, #tpu.memory_space<vmem>>, vector<4x32xf32>
    tpu.vector_store %arg6[%c0_3, %c0_4], %2 {strides = array<i32>} : memref<4x32xf32, #tpu.memory_space<vmem>>, vector<4x32xf32>,
    %cst_5 = arith.constant 0.000000e+00 : f32
    %4 = vector.broadcast %cst_5 : f32 to vector<4x16xf32>
    %c0_6 = arith.constant 0 : index
    %c0_7 = arith.constant 0 : index
    %5 = vector.load %arg7[%c0_6, %c0_7] : memref<4x16xf32, #tpu.memory_space<vmem>>, vector<4x16xf32>
    tpu.vector_store %arg7[%c0_6, %c0_7], %4 {strides = array<i32>} : memref<4x16xf32, #tpu.memory_space<vmem>>, vector<4x16xf32>,
    %c0_i32 = arith.constant 0 : i32
    %6 = arith.index_cast %c0_i32 : i32 to index
    %c0_8 = arith.constant 0 : index
    %c0_9 = arith.constant 0 : index
    %7 = vector.load %arg1[%6, %c0_8, %c0_9] : memref<8x4x64xf32, #tpu.memory_space<vmem>>, vector<1x4x64xf32>
    %8 = vector.shape_cast %7 : vector<1x4x64xf32> to vector<4x64xf32>
    %c0_10 = arith.constant 0 : index
    %c0_11 = arith.constant 0 : index
    %9 = vector.load %arg6[%c0_10, %c0_11] : memref<4x32xf32, #tpu.memory_space<vmem>>, vector<4x32xf32>
    %10 = arith.truncf %9 : vector<4x32xf32> to vector<4x32xbf16>
    %cst_12 = arith.constant dense<0.000000e+00> : vector<4x64xf32>
    %11 = tpu.matmul %10, %0, %cst_12 {dimension_numbers = #tpu.dot_dimension_numbers<[1], [0], [0], [1], [0, 0, 1, 1], [], []>} : vector<4x32xbf16>, vector<32x64xbf16>, vector<4x64xf32> -> vector<4x64xf32>
    %12 = arith.addf %8, %11 : vector<4x64xf32>
    %13 = vector.extract_strided_slice %12 {offsets = [0, 0], sizes = [4, 48], strides = [1, 1]} : vector<4x64xf32> to vector<4x48xf32>
    %14 = arith.negf %13 : vector<4x48xf32>
    %15 = math.exp %14 : vector<4x48xf32>
    %cst_13 = arith.constant 1.000000e+00 : f32
    %16 = vector.broadcast %cst_13 : f32 to vector<4x48xf32>
    %17 = arith.addf %16, %15 : vector<4x48xf32>
    %18 = arith.divf %16, %17 : vector<4x48xf32>
    %19 = vector.extract_strided_slice %18 {offsets = [0, 0], sizes = [4, 16], strides = [1, 1]} : vector<4x48xf32> to vector<4x16xf32>
    %20 = vector.extract_strided_slice %18 {offsets = [0, 16], sizes = [4, 16], strides = [1, 1]} : vector<4x48xf32> to vector<4x16xf32>
    %21 = vector.extract_strided_slice %18 {offsets = [0, 32], sizes = [4, 16], strides = [1, 1]} : vector<4x48xf32> to vector<4x16xf32>
    %22 = vector.extract_strided_slice %12 {offsets = [0, 48], sizes = [4, 16], strides = [1, 1]} : vector<4x64xf32> to vector<4x16xf32>
    %23 = math.tanh %22 : vector<4x16xf32>
    %24 = arith.index_cast %c0_i32 : i32 to index
    %c0_14 = arith.constant 0 : index
    %c0_15 = arith.constant 0 : index
    %25 = vector.load %arg3[%24, %c0_14, %c0_15] : memref<8x4x1xf32, #tpu.memory_space<vmem>>, vector<1x4x1xf32>
    %26 = vector.shape_cast %25 : vector<1x4x1xf32> to vector<4x1xf32>
    %c0_16 = arith.constant 0 : index
    %c0_17 = arith.constant 0 : index
    %27 = vector.load %arg7[%c0_16, %c0_17] : memref<4x16xf32, #tpu.memory_space<vmem>>, vector<4x16xf32>
    %28 = arith.mulf %20, %27 : vector<4x16xf32>
    %29 = arith.mulf %19, %23 : vector<4x16xf32>
    %30 = arith.addf %28, %29 : vector<4x16xf32>
    %31 = math.tanh %30 : vector<4x16xf32>
    %32 = arith.mulf %21, %31 : vector<4x16xf32>
    %33 = vector.broadcast %26 : vector<4x1xf32> to vector<4x16xf32>
    %34 = arith.mulf %33, %30 : vector<4x16xf32>
    %cst_18 = arith.constant 1.000000e+00 : f32
    %35 = vector.broadcast %cst_18 : f32 to vector<4x1xf32>
    %36 = arith.subf %35, %26 : vector<4x1xf32>
    %c0_19 = arith.constant 0 : index
    %c0_20 = arith.constant 0 : index
    %37 = vector.load %arg7[%c0_19, %c0_20] : memref<4x16xf32, #tpu.memory_space<vmem>>, vector<4x16xf32>
    %38 = vector.broadcast %36 : vector<4x1xf32> to vector<4x16xf32>
    %39 = arith.mulf %38, %37 : vector<4x16xf32>
    %40 = arith.addf %34, %39 : vector<4x16xf32>
    %c0_21 = arith.constant 0 : index
    %c0_22 = arith.constant 0 : index
    %41 = vector.load %arg7[%c0_21, %c0_22] : memref<4x16xf32, #tpu.memory_space<vmem>>, vector<4x16xf32>
    tpu.vector_store %arg7[%c0_21, %c0_22], %40 {strides = array<i32>} : memref<4x16xf32, #tpu.memory_space<vmem>>, vector<4x16xf32>,
    %42 = tpu.concatenate %32, %32 in 1 : vector<4x16xf32>, vector<4x16xf32> -> vector<4x32xf32>
    %43 = arith.mulf %42, %1 : vector<4x32xf32>
    %44 = vector.broadcast %26 : vector<4x1xf32> to vector<4x32xf32>
    %45 = arith.mulf %44, %43 : vector<4x32xf32>
    %cst_23 = arith.constant 1.000000e+00 : f32
    %46 = vector.broadcast %cst_23 : f32 to vector<4x1xf32>
    %47 = arith.subf %46, %26 : vector<4x1xf32>
    %c0_24 = arith.constant 0 : index
    %c0_25 = arith.constant 0 : index
    %48 = vector.load %arg6[%c0_24, %c0_25] : memref<4x32xf32, #tpu.memory_space<vmem>>, vector<4x32xf32>
    %49 = vector.broadcast %47 : vector<4x1xf32> to vector<4x32xf32>
    %50 = arith.mulf %49, %48 : vector<4x32xf32>
    %51 = arith.addf %45, %50 : vector<4x32xf32>
    %c0_26 = arith.constant 0 : index
    %c0_27 = arith.constant 0 : index
    %52 = vector.load %arg6[%c0_26, %c0_27] : memref<4x32xf32, #tpu.memory_space<vmem>>, vector<4x32xf32>
    tpu.vector_store %arg6[%c0_26, %c0_27], %51 {strides = array<i32>} : memref<4x32xf32, #tpu.memory_space<vmem>>, vector<4x32xf32>,
    %53 = vector.broadcast %26 : vector<4x1xf32> to vector<4x16xf32>
    %54 = arith.mulf %32, %53 : vector<4x16xf32>
    %55 = arith.index_cast %c0_i32 : i32 to index
    %c0_28 = arith.constant 0 : index
    %c0_29 = arith.constant 0 : index
    %56 = vector.load %arg5[%55, %c0_28, %c0_29] : memref<8x4x16xf32, #tpu.memory_space<vmem>>, vector<1x4x16xf32>
    %57 = vector.shape_cast %56 : vector<1x4x16xf32> to vector<4x16xf32>
    %58 = vector.shape_cast %54 : vector<4x16xf32> to vector<1x4x16xf32>
    tpu.vector_store %arg5[%55, %c0_28, %c0_29], %58 {strides = array<i32>} : memref<8x4x16xf32, #tpu.memory_space<vmem>>, vector<1x4x16xf32>,
    %c1_i32 = arith.constant 1 : i32
    %59 = arith.index_cast %c1_i32 : i32 to index
    %c0_30 = arith.constant 0 : index
    %c0_31 = arith.constant 0 : index
    %60 = vector.load %arg1[%59, %c0_30, %c0_31] : memref<8x4x64xf32, #tpu.memory_space<vmem>>, vector<1x4x64xf32>
    %61 = vector.shape_cast %60 : vector<1x4x64xf32> to vector<4x64xf32>
    %c0_32 = arith.constant 0 : index
    %c0_33 = arith.constant 0 : index
    %62 = vector.load %arg6[%c0_32, %c0_33] : memref<4x32xf32, #tpu.memory_space<vmem>>, vector<4x32xf32>
    %63 = arith.truncf %62 : vector<4x32xf32> to vector<4x32xbf16>
    %cst_34 = arith.constant dense<0.000000e+00> : vector<4x64xf32>
    %64 = tpu.matmul %63, %0, %cst_34 {dimension_numbers = #tpu.dot_dimension_numbers<[1], [0], [0], [1], [0, 0, 1, 1], [], []>} : vector<4x32xbf16>, vector<32x64xbf16>, vector<4x64xf32> -> vector<4x64xf32>
    %65 = arith.addf %61, %64 : vector<4x64xf32>
    %66 = vector.extract_strided_slice %65 {offsets = [0, 0], sizes = [4, 48], strides = [1, 1]} : vector<4x64xf32> to vector<4x48xf32>
    %67 = arith.negf %66 : vector<4x48xf32>
    %68 = math.exp %67 : vector<4x48xf32>
    %cst_35 = arith.constant 1.000000e+00 : f32
    %69 = vector.broadcast %cst_35 : f32 to vector<4x48xf32>
    %70 = arith.addf %69, %68 : vector<4x48xf32>
    %71 = arith.divf %69, %70 : vector<4x48xf32>
    %72 = vector.extract_strided_slice %71 {offsets = [0, 0], sizes = [4, 16], strides = [1, 1]} : vector<4x48xf32> to vector<4x16xf32>
    %73 = vector.extract_strided_slice %71 {offsets = [0, 16], sizes = [4, 16], strides = [1, 1]} : vector<4x48xf32> to vector<4x16xf32>
    %74 = vector.extract_strided_slice %71 {offsets = [0, 32], sizes = [4, 16], strides = [1, 1]} : vector<4x48xf32> to vector<4x16xf32>
    %75 = vector.extract_strided_slice %65 {offsets = [0, 48], sizes = [4, 16], strides = [1, 1]} : vector<4x64xf32> to vector<4x16xf32>
    %76 = math.tanh %75 : vector<4x16xf32>
    %77 = arith.index_cast %c1_i32 : i32 to index
    %c0_36 = arith.constant 0 : index
    %c0_37 = arith.constant 0 : index
    %78 = vector.load %arg3[%77, %c0_36, %c0_37] : memref<8x4x1xf32, #tpu.memory_space<vmem>>, vector<1x4x1xf32>
    %79 = vector.shape_cast %78 : vector<1x4x1xf32> to vector<4x1xf32>
    %c0_38 = arith.constant 0 : index
    %c0_39 = arith.constant 0 : index
    %80 = vector.load %arg7[%c0_38, %c0_39] : memref<4x16xf32, #tpu.memory_space<vmem>>, vector<4x16xf32>
    %81 = arith.mulf %73, %80 : vector<4x16xf32>
    %82 = arith.mulf %72, %76 : vector<4x16xf32>
    %83 = arith.addf %81, %82 : vector<4x16xf32>
    %84 = math.tanh %83 : vector<4x16xf32>
    %85 = arith.mulf %74, %84 : vector<4x16xf32>
    %86 = vector.broadcast %79 : vector<4x1xf32> to vector<4x16xf32>
    %87 = arith.mulf %86, %83 : vector<4x16xf32>
    %cst_40 = arith.constant 1.000000e+00 : f32
    %88 = vector.broadcast %cst_40 : f32 to vector<4x1xf32>
    %89 = arith.subf %88, %79 : vector<4x1xf32>
    %c0_41 = arith.constant 0 : index
    %c0_42 = arith.constant 0 : index
    %90 = vector.load %arg7[%c0_41, %c0_42] : memref<4x16xf32, #tpu.memory_space<vmem>>, vector<4x16xf32>
    %91 = vector.broadcast %89 : vector<4x1xf32> to vector<4x16xf32>
    %92 = arith.mulf %91, %90 : vector<4x16xf32>
    %93 = arith.addf %87, %92 : vector<4x16xf32>
    %c0_43 = arith.constant 0 : index
    %c0_44 = arith.constant 0 : index
    %94 = vector.load %arg7[%c0_43, %c0_44] : memref<4x16xf32, #tpu.memory_space<vmem>>, vector<4x16xf32>
    tpu.vector_store %arg7[%c0_43, %c0_44], %93 {strides = array<i32>} : memref<4x16xf32, #tpu.memory_space<vmem>>, vector<4x16xf32>,
    %95 = tpu.concatenate %85, %85 in 1 : vector<4x16xf32>, vector<4x16xf32> -> vector<4x32xf32>
    %96 = arith.mulf %95, %1 : vector<4x32xf32>
    %97 = vector.broadcast %79 : vector<4x1xf32> to vector<4x32xf32>
    %98 = arith.mulf %97, %96 : vector<4x32xf32>
    %cst_45 = arith.constant 1.000000e+00 : f32
    %99 = vector.broadcast %cst_45 : f32 to vector<4x1xf32>
    %100 = arith.subf %99, %79 : vector<4x1xf32>
    %c0_46 = arith.constant 0 : index
    %c0_47 = arith.constant 0 : index
    %101 = vector.load %arg6[%c0_46, %c0_47] : memref<4x32xf32, #tpu.memory_space<vmem>>, vector<4x32xf32>
    %102 = vector.broadcast %100 : vector<4x1xf32> to vector<4x32xf32>
    %103 = arith.mulf %102, %101 : vector<4x32xf32>
    %104 = arith.addf %98, %103 : vector<4x32xf32>
    %c0_48 = arith.constant 0 : index
    %c0_49 = arith.constant 0 : index
    %105 = vector.load %arg6[%c0_48, %c0_49] : memref<4x32xf32, #tpu.memory_space<vmem>>, vector<4x32xf32>
    tpu.vector_store %arg6[%c0_48, %c0_49], %104 {strides = array<i32>} : memref<4x32xf32, #tpu.memory_space<vmem>>, vector<4x32xf32>,
    %106 = vector.broadcast %79 : vector<4x1xf32> to vector<4x16xf32>
    %107 = arith.mulf %85, %106 : vector<4x16xf32>
    %108 = arith.index_cast %c1_i32 : i32 to index
    %c0_50 = arith.constant 0 : index
    %c0_51 = arith.constant 0 : index
    %109 = vector.load %arg5[%108, %c0_50, %c0_51] : memref<8x4x16xf32, #tpu.memory_space<vmem>>, vector<1x4x16xf32>
    %110 = vector.shape_cast %109 : vector<1x4x16xf32> to vector<4x16xf32>
    %111 = vector.shape_cast %107 : vector<4x16xf32> to vector<1x4x16xf32>
    tpu.vector_store %arg5[%108, %c0_50, %c0_51], %111 {strides = array<i32>} : memref<8x4x16xf32, #tpu.memory_space<vmem>>, vector<1x4x16xf32>,
    %c2_i32 = arith.constant 2 : i32
    %112 = arith.index_cast %c2_i32 : i32 to index
    %c0_52 = arith.constant 0 : index
    %c0_53 = arith.constant 0 : index
    %113 = vector.load %arg1[%112, %c0_52, %c0_53] : memref<8x4x64xf32, #tpu.memory_space<vmem>>, vector<1x4x64xf32>
    %114 = vector.shape_cast %113 : vector<1x4x64xf32> to vector<4x64xf32>
    %c0_54 = arith.constant 0 : index
    %c0_55 = arith.constant 0 : index
    %115 = vector.load %arg6[%c0_54, %c0_55] : memref<4x32xf32, #tpu.memory_space<vmem>>, vector<4x32xf32>
    %116 = arith.truncf %115 : vector<4x32xf32> to vector<4x32xbf16>
    %cst_56 = arith.constant dense<0.000000e+00> : vector<4x64xf32>
    %117 = tpu.matmul %116, %0, %cst_56 {dimension_numbers = #tpu.dot_dimension_numbers<[1], [0], [0], [1], [0, 0, 1, 1], [], []>} : vector<4x32xbf16>, vector<32x64xbf16>, vector<4x64xf32> -> vector<4x64xf32>
    %118 = arith.addf %114, %117 : vector<4x64xf32>
    %119 = vector.extract_strided_slice %118 {offsets = [0, 0], sizes = [4, 48], strides = [1, 1]} : vector<4x64xf32> to vector<4x48xf32>
    %120 = arith.negf %119 : vector<4x48xf32>
    %121 = math.exp %120 : vector<4x48xf32>
    %cst_57 = arith.constant 1.000000e+00 : f32
    %122 = vector.broadcast %cst_57 : f32 to vector<4x48xf32>
    %123 = arith.addf %122, %121 : vector<4x48xf32>
    %124 = arith.divf %122, %123 : vector<4x48xf32>
    %125 = vector.extract_strided_slice %124 {offsets = [0, 0], sizes = [4, 16], strides = [1, 1]} : vector<4x48xf32> to vector<4x16xf32>
    %126 = vector.extract_strided_slice %124 {offsets = [0, 16], sizes = [4, 16], strides = [1, 1]} : vector<4x48xf32> to vector<4x16xf32>
    %127 = vector.extract_strided_slice %124 {offsets = [0, 32], sizes = [4, 16], strides = [1, 1]} : vector<4x48xf32> to vector<4x16xf32>
    %128 = vector.extract_strided_slice %118 {offsets = [0, 48], sizes = [4, 16], strides = [1, 1]} : vector<4x64xf32> to vector<4x16xf32>
    %129 = math.tanh %128 : vector<4x16xf32>
    %130 = arith.index_cast %c2_i32 : i32 to index
    %c0_58 = arith.constant 0 : index
    %c0_59 = arith.constant 0 : index
    %131 = vector.load %arg3[%130, %c0_58, %c0_59] : memref<8x4x1xf32, #tpu.memory_space<vmem>>, vector<1x4x1xf32>
    %132 = vector.shape_cast %131 : vector<1x4x1xf32> to vector<4x1xf32>
    %c0_60 = arith.constant 0 : index
    %c0_61 = arith.constant 0 : index
    %133 = vector.load %arg7[%c0_60, %c0_61] : memref<4x16xf32, #tpu.memory_space<vmem>>, vector<4x16xf32>
    %134 = arith.mulf %126, %133 : vector<4x16xf32>
    %135 = arith.mulf %125, %129 : vector<4x16xf32>
    %136 = arith.addf %134, %135 : vector<4x16xf32>
    %137 = math.tanh %136 : vector<4x16xf32>
    %138 = arith.mulf %127, %137 : vector<4x16xf32>
    %139 = vector.broadcast %132 : vector<4x1xf32> to vector<4x16xf32>
    %140 = arith.mulf %139, %136 : vector<4x16xf32>
    %cst_62 = arith.constant 1.000000e+00 : f32
    %141 = vector.broadcast %cst_62 : f32 to vector<4x1xf32>
    %142 = arith.subf %141, %132 : vector<4x1xf32>
    %c0_63 = arith.constant 0 : index
    %c0_64 = arith.constant 0 : index
    %143 = vector.load %arg7[%c0_63, %c0_64] : memref<4x16xf32, #tpu.memory_space<vmem>>, vector<4x16xf32>
    %144 = vector.broadcast %142 : vector<4x1xf32> to vector<4x16xf32>
    %145 = arith.mulf %144, %143 : vector<4x16xf32>
    %146 = arith.addf %140, %145 : vector<4x16xf32>
    %c0_65 = arith.constant 0 : index
    %c0_66 = arith.constant 0 : index
    %147 = vector.load %arg7[%c0_65, %c0_66] : memref<4x16xf32, #tpu.memory_space<vmem>>, vector<4x16xf32>
    tpu.vector_store %arg7[%c0_65, %c0_66], %146 {strides = array<i32>} : memref<4x16xf32, #tpu.memory_space<vmem>>, vector<4x16xf32>,
    %148 = tpu.concatenate %138, %138 in 1 : vector<4x16xf32>, vector<4x16xf32> -> vector<4x32xf32>
    %149 = arith.mulf %148, %1 : vector<4x32xf32>
    %150 = vector.broadcast %132 : vector<4x1xf32> to vector<4x32xf32>
    %151 = arith.mulf %150, %149 : vector<4x32xf32>
    %cst_67 = arith.constant 1.000000e+00 : f32
    %152 = vector.broadcast %cst_67 : f32 to vector<4x1xf32>
    %153 = arith.subf %152, %132 : vector<4x1xf32>
    %c0_68 = arith.constant 0 : index
    %c0_69 = arith.constant 0 : index
    %154 = vector.load %arg6[%c0_68, %c0_69] : memref<4x32xf32, #tpu.memory_space<vmem>>, vector<4x32xf32>
    %155 = vector.broadcast %153 : vector<4x1xf32> to vector<4x32xf32>
    %156 = arith.mulf %155, %154 : vector<4x32xf32>
    %157 = arith.addf %151, %156 : vector<4x32xf32>
    %c0_70 = arith.constant 0 : index
    %c0_71 = arith.constant 0 : index
    %158 = vector.load %arg6[%c0_70, %c0_71] : memref<4x32xf32, #tpu.memory_space<vmem>>, vector<4x32xf32>
    tpu.vector_store %arg6[%c0_70, %c0_71], %157 {strides = array<i32>} : memref<4x32xf32, #tpu.memory_space<vmem>>, vector<4x32xf32>,
    %159 = vector.broadcast %132 : vector<4x1xf32> to vector<4x16xf32>
    %160 = arith.mulf %138, %159 : vector<4x16xf32>
    %161 = arith.index_cast %c2_i32 : i32 to index
    %c0_72 = arith.constant 0 : index
    %c0_73 = arith.constant 0 : index
    %162 = vector.load %arg5[%161, %c0_72, %c0_73] : memref<8x4x16xf32, #tpu.memory_space<vmem>>, vector<1x4x16xf32>
    %163 = vector.shape_cast %162 : vector<1x4x16xf32> to vector<4x16xf32>
    %164 = vector.shape_cast %160 : vector<4x16xf32> to vector<1x4x16xf32>
    tpu.vector_store %arg5[%161, %c0_72, %c0_73], %164 {strides = array<i32>} : memref<8x4x16xf32, #tpu.memory_space<vmem>>, vector<1x4x16xf32>,
    %c3_i32 = arith.constant 3 : i32
    %165 = arith.index_cast %c3_i32 : i32 to index
    %c0_74 = arith.constant 0 : index
    %c0_75 = arith.constant 0 : index
    %166 = vector.load %arg1[%165, %c0_74, %c0_75] : memref<8x4x64xf32, #tpu.memory_space<vmem>>, vector<1x4x64xf32>
    %167 = vector.shape_cast %166 : vector<1x4x64xf32> to vector<4x64xf32>
    %c0_76 = arith.constant 0 : index
    %c0_77 = arith.constant 0 : index
    %168 = vector.load %arg6[%c0_76, %c0_77] : memref<4x32xf32, #tpu.memory_space<vmem>>, vector<4x32xf32>
    %169 = arith.truncf %168 : vector<4x32xf32> to vector<4x32xbf16>
    %cst_78 = arith.constant dense<0.000000e+00> : vector<4x64xf32>
    %170 = tpu.matmul %169, %0, %cst_78 {dimension_numbers = #tpu.dot_dimension_numbers<[1], [0], [0], [1], [0, 0, 1, 1], [], []>} : vector<4x32xbf16>, vector<32x64xbf16>, vector<4x64xf32> -> vector<4x64xf32>
    %171 = arith.addf %167, %170 : vector<4x64xf32>
    %172 = vector.extract_strided_slice %171 {offsets = [0, 0], sizes = [4, 48], strides = [1, 1]} : vector<4x64xf32> to vector<4x48xf32>
    %173 = arith.negf %172 : vector<4x48xf32>
    %174 = math.exp %173 : vector<4x48xf32>
    %cst_79 = arith.constant 1.000000e+00 : f32
    %175 = vector.broadcast %cst_79 : f32 to vector<4x48xf32>
    %176 = arith.addf %175, %174 : vector<4x48xf32>
    %177 = arith.divf %175, %176 : vector<4x48xf32>
    %178 = vector.extract_strided_slice %177 {offsets = [0, 0], sizes = [4, 16], strides = [1, 1]} : vector<4x48xf32> to vector<4x16xf32>
    %179 = vector.extract_strided_slice %177 {offsets = [0, 16], sizes = [4, 16], strides = [1, 1]} : vector<4x48xf32> to vector<4x16xf32>
    %180 = vector.extract_strided_slice %177 {offsets = [0, 32], sizes = [4, 16], strides = [1, 1]} : vector<4x48xf32> to vector<4x16xf32>
    %181 = vector.extract_strided_slice %171 {offsets = [0, 48], sizes = [4, 16], strides = [1, 1]} : vector<4x64xf32> to vector<4x16xf32>
    %182 = math.tanh %181 : vector<4x16xf32>
    %183 = arith.index_cast %c3_i32 : i32 to index
    %c0_80 = arith.constant 0 : index
    %c0_81 = arith.constant 0 : index
    %184 = vector.load %arg3[%183, %c0_80, %c0_81] : memref<8x4x1xf32, #tpu.memory_space<vmem>>, vector<1x4x1xf32>
    %185 = vector.shape_cast %184 : vector<1x4x1xf32> to vector<4x1xf32>
    %c0_82 = arith.constant 0 : index
    %c0_83 = arith.constant 0 : index
    %186 = vector.load %arg7[%c0_82, %c0_83] : memref<4x16xf32, #tpu.memory_space<vmem>>, vector<4x16xf32>
    %187 = arith.mulf %179, %186 : vector<4x16xf32>
    %188 = arith.mulf %178, %182 : vector<4x16xf32>
    %189 = arith.addf %187, %188 : vector<4x16xf32>
    %190 = math.tanh %189 : vector<4x16xf32>
    %191 = arith.mulf %180, %190 : vector<4x16xf32>
    %192 = vector.broadcast %185 : vector<4x1xf32> to vector<4x16xf32>
    %193 = arith.mulf %192, %189 : vector<4x16xf32>
    %cst_84 = arith.constant 1.000000e+00 : f32
    %194 = vector.broadcast %cst_84 : f32 to vector<4x1xf32>
    %195 = arith.subf %194, %185 : vector<4x1xf32>
    %c0_85 = arith.constant 0 : index
    %c0_86 = arith.constant 0 : index
    %196 = vector.load %arg7[%c0_85, %c0_86] : memref<4x16xf32, #tpu.memory_space<vmem>>, vector<4x16xf32>
    %197 = vector.broadcast %195 : vector<4x1xf32> to vector<4x16xf32>
    %198 = arith.mulf %197, %196 : vector<4x16xf32>
    %199 = arith.addf %193, %198 : vector<4x16xf32>
    %c0_87 = arith.constant 0 : index
    %c0_88 = arith.constant 0 : index
    %200 = vector.load %arg7[%c0_87, %c0_88] : memref<4x16xf32, #tpu.memory_space<vmem>>, vector<4x16xf32>
    tpu.vector_store %arg7[%c0_87, %c0_88], %199 {strides = array<i32>} : memref<4x16xf32, #tpu.memory_space<vmem>>, vector<4x16xf32>,
    %201 = tpu.concatenate %191, %191 in 1 : vector<4x16xf32>, vector<4x16xf32> -> vector<4x32xf32>
    %202 = arith.mulf %201, %1 : vector<4x32xf32>
    %203 = vector.broadcast %185 : vector<4x1xf32> to vector<4x32xf32>
    %204 = arith.mulf %203, %202 : vector<4x32xf32>
    %cst_89 = arith.constant 1.000000e+00 : f32
    %205 = vector.broadcast %cst_89 : f32 to vector<4x1xf32>
    %206 = arith.subf %205, %185 : vector<4x1xf32>
    %c0_90 = arith.constant 0 : index
    %c0_91 = arith.constant 0 : index
    %207 = vector.load %arg6[%c0_90, %c0_91] : memref<4x32xf32, #tpu.memory_space<vmem>>, vector<4x32xf32>
    %208 = vector.broadcast %206 : vector<4x1xf32> to vector<4x32xf32>
    %209 = arith.mulf %208, %207 : vector<4x32xf32>
    %210 = arith.addf %204, %209 : vector<4x32xf32>
    %c0_92 = arith.constant 0 : index
    %c0_93 = arith.constant 0 : index
    %211 = vector.load %arg6[%c0_92, %c0_93] : memref<4x32xf32, #tpu.memory_space<vmem>>, vector<4x32xf32>
    tpu.vector_store %arg6[%c0_92, %c0_93], %210 {strides = array<i32>} : memref<4x32xf32, #tpu.memory_space<vmem>>, vector<4x32xf32>,
    %212 = vector.broadcast %185 : vector<4x1xf32> to vector<4x16xf32>
    %213 = arith.mulf %191, %212 : vector<4x16xf32>
    %214 = arith.index_cast %c3_i32 : i32 to index
    %c0_94 = arith.constant 0 : index
    %c0_95 = arith.constant 0 : index
    %215 = vector.load %arg5[%214, %c0_94, %c0_95] : memref<8x4x16xf32, #tpu.memory_space<vmem>>, vector<1x4x16xf32>
    %216 = vector.shape_cast %215 : vector<1x4x16xf32> to vector<4x16xf32>
    %217 = vector.shape_cast %213 : vector<4x16xf32> to vector<1x4x16xf32>
    tpu.vector_store %arg5[%214, %c0_94, %c0_95], %217 {strides = array<i32>} : memref<8x4x16xf32, #tpu.memory_space<vmem>>, vector<1x4x16xf32>,
    %c4_i32 = arith.constant 4 : i32
    %218 = arith.index_cast %c4_i32 : i32 to index
    %c0_96 = arith.constant 0 : index
    %c0_97 = arith.constant 0 : index
    %219 = vector.load %arg1[%218, %c0_96, %c0_97] : memref<8x4x64xf32, #tpu.memory_space<vmem>>, vector<1x4x64xf32>
    %220 = vector.shape_cast %219 : vector<1x4x64xf32> to vector<4x64xf32>
    %c0_98 = arith.constant 0 : index
    %c0_99 = arith.constant 0 : index
    %221 = vector.load %arg6[%c0_98, %c0_99] : memref<4x32xf32, #tpu.memory_space<vmem>>, vector<4x32xf32>
    %222 = arith.truncf %221 : vector<4x32xf32> to vector<4x32xbf16>
    %cst_100 = arith.constant dense<0.000000e+00> : vector<4x64xf32>
    %223 = tpu.matmul %222, %0, %cst_100 {dimension_numbers = #tpu.dot_dimension_numbers<[1], [0], [0], [1], [0, 0, 1, 1], [], []>} : vector<4x32xbf16>, vector<32x64xbf16>, vector<4x64xf32> -> vector<4x64xf32>
    %224 = arith.addf %220, %223 : vector<4x64xf32>
    %225 = vector.extract_strided_slice %224 {offsets = [0, 0], sizes = [4, 48], strides = [1, 1]} : vector<4x64xf32> to vector<4x48xf32>
    %226 = arith.negf %225 : vector<4x48xf32>
    %227 = math.exp %226 : vector<4x48xf32>
    %cst_101 = arith.constant 1.000000e+00 : f32
    %228 = vector.broadcast %cst_101 : f32 to vector<4x48xf32>
    %229 = arith.addf %228, %227 : vector<4x48xf32>
    %230 = arith.divf %228, %229 : vector<4x48xf32>
    %231 = vector.extract_strided_slice %230 {offsets = [0, 0], sizes = [4, 16], strides = [1, 1]} : vector<4x48xf32> to vector<4x16xf32>
    %232 = vector.extract_strided_slice %230 {offsets = [0, 16], sizes = [4, 16], strides = [1, 1]} : vector<4x48xf32> to vector<4x16xf32>
    %233 = vector.extract_strided_slice %230 {offsets = [0, 32], sizes = [4, 16], strides = [1, 1]} : vector<4x48xf32> to vector<4x16xf32>
    %234 = vector.extract_strided_slice %224 {offsets = [0, 48], sizes = [4, 16], strides = [1, 1]} : vector<4x64xf32> to vector<4x16xf32>
    %235 = math.tanh %234 : vector<4x16xf32>
    %236 = arith.index_cast %c4_i32 : i32 to index
    %c0_102 = arith.constant 0 : index
    %c0_103 = arith.constant 0 : index
    %237 = vector.load %arg3[%236, %c0_102, %c0_103] : memref<8x4x1xf32, #tpu.memory_space<vmem>>, vector<1x4x1xf32>
    %238 = vector.shape_cast %237 : vector<1x4x1xf32> to vector<4x1xf32>
    %c0_104 = arith.constant 0 : index
    %c0_105 = arith.constant 0 : index
    %239 = vector.load %arg7[%c0_104, %c0_105] : memref<4x16xf32, #tpu.memory_space<vmem>>, vector<4x16xf32>
    %240 = arith.mulf %232, %239 : vector<4x16xf32>
    %241 = arith.mulf %231, %235 : vector<4x16xf32>
    %242 = arith.addf %240, %241 : vector<4x16xf32>
    %243 = math.tanh %242 : vector<4x16xf32>
    %244 = arith.mulf %233, %243 : vector<4x16xf32>
    %245 = vector.broadcast %238 : vector<4x1xf32> to vector<4x16xf32>
    %246 = arith.mulf %245, %242 : vector<4x16xf32>
    %cst_106 = arith.constant 1.000000e+00 : f32
    %247 = vector.broadcast %cst_106 : f32 to vector<4x1xf32>
    %248 = arith.subf %247, %238 : vector<4x1xf32>
    %c0_107 = arith.constant 0 : index
    %c0_108 = arith.constant 0 : index
    %249 = vector.load %arg7[%c0_107, %c0_108] : memref<4x16xf32, #tpu.memory_space<vmem>>, vector<4x16xf32>
    %250 = vector.broadcast %248 : vector<4x1xf32> to vector<4x16xf32>
    %251 = arith.mulf %250, %249 : vector<4x16xf32>
    %252 = arith.addf %246, %251 : vector<4x16xf32>
    %c0_109 = arith.constant 0 : index
    %c0_110 = arith.constant 0 : index
    %253 = vector.load %arg7[%c0_109, %c0_110] : memref<4x16xf32, #tpu.memory_space<vmem>>, vector<4x16xf32>
    tpu.vector_store %arg7[%c0_109, %c0_110], %252 {strides = array<i32>} : memref<4x16xf32, #tpu.memory_space<vmem>>, vector<4x16xf32>,
    %254 = tpu.concatenate %244, %244 in 1 : vector<4x16xf32>, vector<4x16xf32> -> vector<4x32xf32>
    %255 = arith.mulf %254, %1 : vector<4x32xf32>
    %256 = vector.broadcast %238 : vector<4x1xf32> to vector<4x32xf32>
    %257 = arith.mulf %256, %255 : vector<4x32xf32>
    %cst_111 = arith.constant 1.000000e+00 : f32
    %258 = vector.broadcast %cst_111 : f32 to vector<4x1xf32>
    %259 = arith.subf %258, %238 : vector<4x1xf32>
    %c0_112 = arith.constant 0 : index
    %c0_113 = arith.constant 0 : index
    %260 = vector.load %arg6[%c0_112, %c0_113] : memref<4x32xf32, #tpu.memory_space<vmem>>, vector<4x32xf32>
    %261 = vector.broadcast %259 : vector<4x1xf32> to vector<4x32xf32>
    %262 = arith.mulf %261, %260 : vector<4x32xf32>
    %263 = arith.addf %257, %262 : vector<4x32xf32>
    %c0_114 = arith.constant 0 : index
    %c0_115 = arith.constant 0 : index
    %264 = vector.load %arg6[%c0_114, %c0_115] : memref<4x32xf32, #tpu.memory_space<vmem>>, vector<4x32xf32>
    tpu.vector_store %arg6[%c0_114, %c0_115], %263 {strides = array<i32>} : memref<4x32xf32, #tpu.memory_space<vmem>>, vector<4x32xf32>,
    %265 = vector.broadcast %238 : vector<4x1xf32> to vector<4x16xf32>
    %266 = arith.mulf %244, %265 : vector<4x16xf32>
    %267 = arith.index_cast %c4_i32 : i32 to index
    %c0_116 = arith.constant 0 : index
    %c0_117 = arith.constant 0 : index
    %268 = vector.load %arg5[%267, %c0_116, %c0_117] : memref<8x4x16xf32, #tpu.memory_space<vmem>>, vector<1x4x16xf32>
    %269 = vector.shape_cast %268 : vector<1x4x16xf32> to vector<4x16xf32>
    %270 = vector.shape_cast %266 : vector<4x16xf32> to vector<1x4x16xf32>
    tpu.vector_store %arg5[%267, %c0_116, %c0_117], %270 {strides = array<i32>} : memref<8x4x16xf32, #tpu.memory_space<vmem>>, vector<1x4x16xf32>,
    %c5_i32 = arith.constant 5 : i32
    %271 = arith.index_cast %c5_i32 : i32 to index
    %c0_118 = arith.constant 0 : index
    %c0_119 = arith.constant 0 : index
    %272 = vector.load %arg1[%271, %c0_118, %c0_119] : memref<8x4x64xf32, #tpu.memory_space<vmem>>, vector<1x4x64xf32>
    %273 = vector.shape_cast %272 : vector<1x4x64xf32> to vector<4x64xf32>
    %c0_120 = arith.constant 0 : index
    %c0_121 = arith.constant 0 : index
    %274 = vector.load %arg6[%c0_120, %c0_121] : memref<4x32xf32, #tpu.memory_space<vmem>>, vector<4x32xf32>
    %275 = arith.truncf %274 : vector<4x32xf32> to vector<4x32xbf16>
    %cst_122 = arith.constant dense<0.000000e+00> : vector<4x64xf32>
    %276 = tpu.matmul %275, %0, %cst_122 {dimension_numbers = #tpu.dot_dimension_numbers<[1], [0], [0], [1], [0, 0, 1, 1], [], []>} : vector<4x32xbf16>, vector<32x64xbf16>, vector<4x64xf32> -> vector<4x64xf32>
    %277 = arith.addf %273, %276 : vector<4x64xf32>
    %278 = vector.extract_strided_slice %277 {offsets = [0, 0], sizes = [4, 48], strides = [1, 1]} : vector<4x64xf32> to vector<4x48xf32>
    %279 = arith.negf %278 : vector<4x48xf32>
    %280 = math.exp %279 : vector<4x48xf32>
    %cst_123 = arith.constant 1.000000e+00 : f32
    %281 = vector.broadcast %cst_123 : f32 to vector<4x48xf32>
    %282 = arith.addf %281, %280 : vector<4x48xf32>
    %283 = arith.divf %281, %282 : vector<4x48xf32>
    %284 = vector.extract_strided_slice %283 {offsets = [0, 0], sizes = [4, 16], strides = [1, 1]} : vector<4x48xf32> to vector<4x16xf32>
    %285 = vector.extract_strided_slice %283 {offsets = [0, 16], sizes = [4, 16], strides = [1, 1]} : vector<4x48xf32> to vector<4x16xf32>
    %286 = vector.extract_strided_slice %283 {offsets = [0, 32], sizes = [4, 16], strides = [1, 1]} : vector<4x48xf32> to vector<4x16xf32>
    %287 = vector.extract_strided_slice %277 {offsets = [0, 48], sizes = [4, 16], strides = [1, 1]} : vector<4x64xf32> to vector<4x16xf32>
    %288 = math.tanh %287 : vector<4x16xf32>
    %289 = arith.index_cast %c5_i32 : i32 to index
    %c0_124 = arith.constant 0 : index
    %c0_125 = arith.constant 0 : index
    %290 = vector.load %arg3[%289, %c0_124, %c0_125] : memref<8x4x1xf32, #tpu.memory_space<vmem>>, vector<1x4x1xf32>
    %291 = vector.shape_cast %290 : vector<1x4x1xf32> to vector<4x1xf32>
    %c0_126 = arith.constant 0 : index
    %c0_127 = arith.constant 0 : index
    %292 = vector.load %arg7[%c0_126, %c0_127] : memref<4x16xf32, #tpu.memory_space<vmem>>, vector<4x16xf32>
    %293 = arith.mulf %285, %292 : vector<4x16xf32>
    %294 = arith.mulf %284, %288 : vector<4x16xf32>
    %295 = arith.addf %293, %294 : vector<4x16xf32>
    %296 = math.tanh %295 : vector<4x16xf32>
    %297 = arith.mulf %286, %296 : vector<4x16xf32>
    %298 = vector.broadcast %291 : vector<4x1xf32> to vector<4x16xf32>
    %299 = arith.mulf %298, %295 : vector<4x16xf32>
    %cst_128 = arith.constant 1.000000e+00 : f32
    %300 = vector.broadcast %cst_128 : f32 to vector<4x1xf32>
    %301 = arith.subf %300, %291 : vector<4x1xf32>
    %c0_129 = arith.constant 0 : index
    %c0_130 = arith.constant 0 : index
    %302 = vector.load %arg7[%c0_129, %c0_130] : memref<4x16xf32, #tpu.memory_space<vmem>>, vector<4x16xf32>
    %303 = vector.broadcast %301 : vector<4x1xf32> to vector<4x16xf32>
    %304 = arith.mulf %303, %302 : vector<4x16xf32>
    %305 = arith.addf %299, %304 : vector<4x16xf32>
    %c0_131 = arith.constant 0 : index
    %c0_132 = arith.constant 0 : index
    %306 = vector.load %arg7[%c0_131, %c0_132] : memref<4x16xf32, #tpu.memory_space<vmem>>, vector<4x16xf32>
    tpu.vector_store %arg7[%c0_131, %c0_132], %305 {strides = array<i32>} : memref<4x16xf32, #tpu.memory_space<vmem>>, vector<4x16xf32>,
    %307 = tpu.concatenate %297, %297 in 1 : vector<4x16xf32>, vector<4x16xf32> -> vector<4x32xf32>
    %308 = arith.mulf %307, %1 : vector<4x32xf32>
    %309 = vector.broadcast %291 : vector<4x1xf32> to vector<4x32xf32>
    %310 = arith.mulf %309, %308 : vector<4x32xf32>
    %cst_133 = arith.constant 1.000000e+00 : f32
    %311 = vector.broadcast %cst_133 : f32 to vector<4x1xf32>
    %312 = arith.subf %311, %291 : vector<4x1xf32>
    %c0_134 = arith.constant 0 : index
    %c0_135 = arith.constant 0 : index
    %313 = vector.load %arg6[%c0_134, %c0_135] : memref<4x32xf32, #tpu.memory_space<vmem>>, vector<4x32xf32>
    %314 = vector.broadcast %312 : vector<4x1xf32> to vector<4x32xf32>
    %315 = arith.mulf %314, %313 : vector<4x32xf32>
    %316 = arith.addf %310, %315 : vector<4x32xf32>
    %c0_136 = arith.constant 0 : index
    %c0_137 = arith.constant 0 : index
    %317 = vector.load %arg6[%c0_136, %c0_137] : memref<4x32xf32, #tpu.memory_space<vmem>>, vector<4x32xf32>
    tpu.vector_store %arg6[%c0_136, %c0_137], %316 {strides = array<i32>} : memref<4x32xf32, #tpu.memory_space<vmem>>, vector<4x32xf32>,
    %318 = vector.broadcast %291 : vector<4x1xf32> to vector<4x16xf32>
    %319 = arith.mulf %297, %318 : vector<4x16xf32>
    %320 = arith.index_cast %c5_i32 : i32 to index
    %c0_138 = arith.constant 0 : index
    %c0_139 = arith.constant 0 : index
    %321 = vector.load %arg5[%320, %c0_138, %c0_139] : memref<8x4x16xf32, #tpu.memory_space<vmem>>, vector<1x4x16xf32>
    %322 = vector.shape_cast %321 : vector<1x4x16xf32> to vector<4x16xf32>
    %323 = vector.shape_cast %319 : vector<4x16xf32> to vector<1x4x16xf32>
    tpu.vector_store %arg5[%320, %c0_138, %c0_139], %323 {strides = array<i32>} : memref<8x4x16xf32, #tpu.memory_space<vmem>>, vector<1x4x16xf32>,
    %c6_i32 = arith.constant 6 : i32
    %324 = arith.index_cast %c6_i32 : i32 to index
    %c0_140 = arith.constant 0 : index
    %c0_141 = arith.constant 0 : index
    %325 = vector.load %arg1[%324, %c0_140, %c0_141] : memref<8x4x64xf32, #tpu.memory_space<vmem>>, vector<1x4x64xf32>
    %326 = vector.shape_cast %325 : vector<1x4x64xf32> to vector<4x64xf32>
    %c0_142 = arith.constant 0 : index
    %c0_143 = arith.constant 0 : index
    %327 = vector.load %arg6[%c0_142, %c0_143] : memref<4x32xf32, #tpu.memory_space<vmem>>, vector<4x32xf32>
    %328 = arith.truncf %327 : vector<4x32xf32> to vector<4x32xbf16>
    %cst_144 = arith.constant dense<0.000000e+00> : vector<4x64xf32>
    %329 = tpu.matmul %328, %0, %cst_144 {dimension_numbers = #tpu.dot_dimension_numbers<[1], [0], [0], [1], [0, 0, 1, 1], [], []>} : vector<4x32xbf16>, vector<32x64xbf16>, vector<4x64xf32> -> vector<4x64xf32>
    %330 = arith.addf %326, %329 : vector<4x64xf32>
    %331 = vector.extract_strided_slice %330 {offsets = [0, 0], sizes = [4, 48], strides = [1, 1]} : vector<4x64xf32> to vector<4x48xf32>
    %332 = arith.negf %331 : vector<4x48xf32>
    %333 = math.exp %332 : vector<4x48xf32>
    %cst_145 = arith.constant 1.000000e+00 : f32
    %334 = vector.broadcast %cst_145 : f32 to vector<4x48xf32>
    %335 = arith.addf %334, %333 : vector<4x48xf32>
    %336 = arith.divf %334, %335 : vector<4x48xf32>
    %337 = vector.extract_strided_slice %336 {offsets = [0, 0], sizes = [4, 16], strides = [1, 1]} : vector<4x48xf32> to vector<4x16xf32>
    %338 = vector.extract_strided_slice %336 {offsets = [0, 16], sizes = [4, 16], strides = [1, 1]} : vector<4x48xf32> to vector<4x16xf32>
    %339 = vector.extract_strided_slice %336 {offsets = [0, 32], sizes = [4, 16], strides = [1, 1]} : vector<4x48xf32> to vector<4x16xf32>
    %340 = vector.extract_strided_slice %330 {offsets = [0, 48], sizes = [4, 16], strides = [1, 1]} : vector<4x64xf32> to vector<4x16xf32>
    %341 = math.tanh %340 : vector<4x16xf32>
    %342 = arith.index_cast %c6_i32 : i32 to index
    %c0_146 = arith.constant 0 : index
    %c0_147 = arith.constant 0 : index
    %343 = vector.load %arg3[%342, %c0_146, %c0_147] : memref<8x4x1xf32, #tpu.memory_space<vmem>>, vector<1x4x1xf32>
    %344 = vector.shape_cast %343 : vector<1x4x1xf32> to vector<4x1xf32>
    %c0_148 = arith.constant 0 : index
    %c0_149 = arith.constant 0 : index
    %345 = vector.load %arg7[%c0_148, %c0_149] : memref<4x16xf32, #tpu.memory_space<vmem>>, vector<4x16xf32>
    %346 = arith.mulf %338, %345 : vector<4x16xf32>
    %347 = arith.mulf %337, %341 : vector<4x16xf32>
    %348 = arith.addf %346, %347 : vector<4x16xf32>
    %349 = math.tanh %348 : vector<4x16xf32>
    %350 = arith.mulf %339, %349 : vector<4x16xf32>
    %351 = vector.broadcast %344 : vector<4x1xf32> to vector<4x16xf32>
    %352 = arith.mulf %351, %348 : vector<4x16xf32>
    %cst_150 = arith.constant 1.000000e+00 : f32
    %353 = vector.broadcast %cst_150 : f32 to vector<4x1xf32>
    %354 = arith.subf %353, %344 : vector<4x1xf32>
    %c0_151 = arith.constant 0 : index
    %c0_152 = arith.constant 0 : index
    %355 = vector.load %arg7[%c0_151, %c0_152] : memref<4x16xf32, #tpu.memory_space<vmem>>, vector<4x16xf32>
    %356 = vector.broadcast %354 : vector<4x1xf32> to vector<4x16xf32>
    %357 = arith.mulf %356, %355 : vector<4x16xf32>
    %358 = arith.addf %352, %357 : vector<4x16xf32>
    %c0_153 = arith.constant 0 : index
    %c0_154 = arith.constant 0 : index
    %359 = vector.load %arg7[%c0_153, %c0_154] : memref<4x16xf32, #tpu.memory_space<vmem>>, vector<4x16xf32>
    tpu.vector_store %arg7[%c0_153, %c0_154], %358 {strides = array<i32>} : memref<4x16xf32, #tpu.memory_space<vmem>>, vector<4x16xf32>,
    %360 = tpu.concatenate %350, %350 in 1 : vector<4x16xf32>, vector<4x16xf32> -> vector<4x32xf32>
    %361 = arith.mulf %360, %1 : vector<4x32xf32>
    %362 = vector.broadcast %344 : vector<4x1xf32> to vector<4x32xf32>
    %363 = arith.mulf %362, %361 : vector<4x32xf32>
    %cst_155 = arith.constant 1.000000e+00 : f32
    %364 = vector.broadcast %cst_155 : f32 to vector<4x1xf32>
    %365 = arith.subf %364, %344 : vector<4x1xf32>
    %c0_156 = arith.constant 0 : index
    %c0_157 = arith.constant 0 : index
    %366 = vector.load %arg6[%c0_156, %c0_157] : memref<4x32xf32, #tpu.memory_space<vmem>>, vector<4x32xf32>
    %367 = vector.broadcast %365 : vector<4x1xf32> to vector<4x32xf32>
    %368 = arith.mulf %367, %366 : vector<4x32xf32>
    %369 = arith.addf %363, %368 : vector<4x32xf32>
    %c0_158 = arith.constant 0 : index
    %c0_159 = arith.constant 0 : index
    %370 = vector.load %arg6[%c0_158, %c0_159] : memref<4x32xf32, #tpu.memory_space<vmem>>, vector<4x32xf32>
    tpu.vector_store %arg6[%c0_158, %c0_159], %369 {strides = array<i32>} : memref<4x32xf32, #tpu.memory_space<vmem>>, vector<4x32xf32>,
    %371 = vector.broadcast %344 : vector<4x1xf32> to vector<4x16xf32>
    %372 = arith.mulf %350, %371 : vector<4x16xf32>
    %373 = arith.index_cast %c6_i32 : i32 to index
    %c0_160 = arith.constant 0 : index
    %c0_161 = arith.constant 0 : index
    %374 = vector.load %arg5[%373, %c0_160, %c0_161] : memref<8x4x16xf32, #tpu.memory_space<vmem>>, vector<1x4x16xf32>
    %375 = vector.shape_cast %374 : vector<1x4x16xf32> to vector<4x16xf32>
    %376 = vector.shape_cast %372 : vector<4x16xf32> to vector<1x4x16xf32>
    tpu.vector_store %arg5[%373, %c0_160, %c0_161], %376 {strides = array<i32>} : memref<8x4x16xf32, #tpu.memory_space<vmem>>, vector<1x4x16xf32>,
    %c7_i32 = arith.constant 7 : i32
    %377 = arith.index_cast %c7_i32 : i32 to index
    %c0_162 = arith.constant 0 : index
    %c0_163 = arith.constant 0 : index
    %378 = vector.load %arg1[%377, %c0_162, %c0_163] : memref<8x4x64xf32, #tpu.memory_space<vmem>>, vector<1x4x64xf32>
    %379 = vector.shape_cast %378 : vector<1x4x64xf32> to vector<4x64xf32>
    %c0_164 = arith.constant 0 : index
    %c0_165 = arith.constant 0 : index
    %380 = vector.load %arg6[%c0_164, %c0_165] : memref<4x32xf32, #tpu.memory_space<vmem>>, vector<4x32xf32>
    %381 = arith.truncf %380 : vector<4x32xf32> to vector<4x32xbf16>
    %cst_166 = arith.constant dense<0.000000e+00> : vector<4x64xf32>
    %382 = tpu.matmul %381, %0, %cst_166 {dimension_numbers = #tpu.dot_dimension_numbers<[1], [0], [0], [1], [0, 0, 1, 1], [], []>} : vector<4x32xbf16>, vector<32x64xbf16>, vector<4x64xf32> -> vector<4x64xf32>
    %383 = arith.addf %379, %382 : vector<4x64xf32>
    %384 = vector.extract_strided_slice %383 {offsets = [0, 0], sizes = [4, 48], strides = [1, 1]} : vector<4x64xf32> to vector<4x48xf32>
    %385 = arith.negf %384 : vector<4x48xf32>
    %386 = math.exp %385 : vector<4x48xf32>
    %cst_167 = arith.constant 1.000000e+00 : f32
    %387 = vector.broadcast %cst_167 : f32 to vector<4x48xf32>
    %388 = arith.addf %387, %386 : vector<4x48xf32>
    %389 = arith.divf %387, %388 : vector<4x48xf32>
    %390 = vector.extract_strided_slice %389 {offsets = [0, 0], sizes = [4, 16], strides = [1, 1]} : vector<4x48xf32> to vector<4x16xf32>
    %391 = vector.extract_strided_slice %389 {offsets = [0, 16], sizes = [4, 16], strides = [1, 1]} : vector<4x48xf32> to vector<4x16xf32>
    %392 = vector.extract_strided_slice %389 {offsets = [0, 32], sizes = [4, 16], strides = [1, 1]} : vector<4x48xf32> to vector<4x16xf32>
    %393 = vector.extract_strided_slice %383 {offsets = [0, 48], sizes = [4, 16], strides = [1, 1]} : vector<4x64xf32> to vector<4x16xf32>
    %394 = math.tanh %393 : vector<4x16xf32>
    %395 = arith.index_cast %c7_i32 : i32 to index
    %c0_168 = arith.constant 0 : index
    %c0_169 = arith.constant 0 : index
    %396 = vector.load %arg3[%395, %c0_168, %c0_169] : memref<8x4x1xf32, #tpu.memory_space<vmem>>, vector<1x4x1xf32>
    %397 = vector.shape_cast %396 : vector<1x4x1xf32> to vector<4x1xf32>
    %c0_170 = arith.constant 0 : index
    %c0_171 = arith.constant 0 : index
    %398 = vector.load %arg7[%c0_170, %c0_171] : memref<4x16xf32, #tpu.memory_space<vmem>>, vector<4x16xf32>
    %399 = arith.mulf %391, %398 : vector<4x16xf32>
    %400 = arith.mulf %390, %394 : vector<4x16xf32>
    %401 = arith.addf %399, %400 : vector<4x16xf32>
    %402 = math.tanh %401 : vector<4x16xf32>
    %403 = arith.mulf %392, %402 : vector<4x16xf32>
    %404 = vector.broadcast %397 : vector<4x1xf32> to vector<4x16xf32>
    %405 = arith.mulf %404, %401 : vector<4x16xf32>
    %cst_172 = arith.constant 1.000000e+00 : f32
    %406 = vector.broadcast %cst_172 : f32 to vector<4x1xf32>
    %407 = arith.subf %406, %397 : vector<4x1xf32>
    %c0_173 = arith.constant 0 : index
    %c0_174 = arith.constant 0 : index
    %408 = vector.load %arg7[%c0_173, %c0_174] : memref<4x16xf32, #tpu.memory_space<vmem>>, vector<4x16xf32>
    %409 = vector.broadcast %407 : vector<4x1xf32> to vector<4x16xf32>
    %410 = arith.mulf %409, %408 : vector<4x16xf32>
    %411 = arith.addf %405, %410 : vector<4x16xf32>
    %c0_175 = arith.constant 0 : index
    %c0_176 = arith.constant 0 : index
    %412 = vector.load %arg7[%c0_175, %c0_176] : memref<4x16xf32, #tpu.memory_space<vmem>>, vector<4x16xf32>
    tpu.vector_store %arg7[%c0_175, %c0_176], %411 {strides = array<i32>} : memref<4x16xf32, #tpu.memory_space<vmem>>, vector<4x16xf32>,
    %413 = tpu.concatenate %403, %403 in 1 : vector<4x16xf32>, vector<4x16xf32> -> vector<4x32xf32>
    %414 = arith.mulf %413, %1 : vector<4x32xf32>
    %415 = vector.broadcast %397 : vector<4x1xf32> to vector<4x32xf32>
    %416 = arith.mulf %415, %414 : vector<4x32xf32>
    %cst_177 = arith.constant 1.000000e+00 : f32
    %417 = vector.broadcast %cst_177 : f32 to vector<4x1xf32>
    %418 = arith.subf %417, %397 : vector<4x1xf32>
    %c0_178 = arith.constant 0 : index
    %c0_179 = arith.constant 0 : index
    %419 = vector.load %arg6[%c0_178, %c0_179] : memref<4x32xf32, #tpu.memory_space<vmem>>, vector<4x32xf32>
    %420 = vector.broadcast %418 : vector<4x1xf32> to vector<4x32xf32>
    %421 = arith.mulf %420, %419 : vector<4x32xf32>
    %422 = arith.addf %416, %421 : vector<4x32xf32>
    %c0_180 = arith.constant 0 : index
    %c0_181 = arith.constant 0 : index
    %423 = vector.load %arg6[%c0_180, %c0_181] : memref<4x32xf32, #tpu.memory_space<vmem>>, vector<4x32xf32>
    tpu.vector_store %arg6[%c0_180, %c0_181], %422 {strides = array<i32>} : memref<4x32xf32, #tpu.memory_space<vmem>>, vector<4x32xf32>,
    %424 = vector.broadcast %397 : vector<4x1xf32> to vector<4x16xf32>
    %425 = arith.mulf %403, %424 : vector<4x16xf32>
    %426 = arith.index_cast %c7_i32 : i32 to index
    %c0_182 = arith.constant 0 : index
    %c0_183 = arith.constant 0 : index
    %427 = vector.load %arg5[%426, %c0_182, %c0_183] : memref<8x4x16xf32, #tpu.memory_space<vmem>>, vector<1x4x16xf32>
    %428 = vector.shape_cast %427 : vector<1x4x16xf32> to vector<4x16xf32>
    %429 = vector.shape_cast %425 : vector<4x16xf32> to vector<1x4x16xf32>
    tpu.vector_store %arg5[%426, %c0_182, %c0_183], %429 {strides = array<i32>} : memref<8x4x16xf32, #tpu.memory_space<vmem>>, vector<1x4x16xf32>,
    %c8_i32 = arith.constant 8 : i32
    return
  }
  func.func @transform_0(%arg0: i32) -> (i32, i32, i32) {
    %c0_i32 = arith.constant 0 : i32
    %c0_i32_0 = arith.constant 0 : i32
    %c0_i32_1 = arith.constant 0 : i32
    %c0_i32_2 = arith.constant 0 : i32
    return %c0_i32, %c0_i32_0, %c0_i32_1 : i32, i32, i32
  }
  func.func @transform_1(%arg0: i32) -> (i32, i32) {
    %c0_i32 = arith.constant 0 : i32
    %c0_i32_0 = arith.constant 0 : i32
    %c0_i32_1 = arith.constant 0 : i32
    return %c0_i32, %c0_i32_0 : i32, i32
  }
  func.func @transform_2(%arg0: i32) -> (i32, i32, i32) {
    %c0_i32 = arith.constant 0 : i32
    %c0_i32_0 = arith.constant 0 : i32
    %c0_i32_1 = arith.constant 0 : i32
    %c0_i32_2 = arith.constant 0 : i32
    return %c0_i32, %c0_i32_0, %c0_i32_1 : i32, i32, i32
  }
  func.func @transform_3(%arg0: i32) -> (i32, i32) {
    %c0_i32 = arith.constant 0 : i32
    %c0_i32_0 = arith.constant 0 : i32
    %c0_i32_1 = arith.constant 0 : i32
    return %c0_i32, %c0_i32_0 : i32, i32
  }
  func.func @transform_4(%arg0: i32) -> (i32, i32, i32) {
    %c0_i32 = arith.constant 0 : i32
    %c0_i32_0 = arith.constant 0 : i32
    %c0_i32_1 = arith.constant 0 : i32
    %c0_i32_2 = arith.constant 0 : i32
    return %c0_i32, %c0_i32_0, %c0_i32_1 : i32, i32, i32
  }
}

module attributes {stable_mosaic.version = 11 : i64} {
  func.func @_bidaf_att_kernel(%arg0: i32, %arg1: memref<1x16x32xf32, #tpu.memory_space<vmem>>, %arg2: memref<1x8x32xf32, #tpu.memory_space<vmem>>, %arg3: memref<1x1x16xf32, #tpu.memory_space<vmem>>, %arg4: memref<1x1x8xf32, #tpu.memory_space<vmem>>, %arg5: memref<1x32xf32, #tpu.memory_space<vmem>>, %arg6: memref<1x32xf32, #tpu.memory_space<vmem>>, %arg7: memref<1x32xf32, #tpu.memory_space<vmem>>, %arg8: memref<1x16x128xf32, #tpu.memory_space<vmem>>) attributes {dimension_semantics = [#tpu.dimension_semantics<parallel>], iteration_bounds = array<i64: 2>, scalar_prefetch = 0 : i64, scratch_operands = 0 : i64, tpu.core_type = #tpu.core_type<tc>, window_params = [{transform_indices = @transform_0, window_bounds = array<i64: 1, 16, 32>}, {transform_indices = @transform_1, window_bounds = array<i64: 1, 8, 32>}, {transform_indices = @transform_2, window_bounds = array<i64: 1, 1, 16>}, {transform_indices = @transform_3, window_bounds = array<i64: 1, 1, 8>}, {pipeline_mode = #tpu.pipeline_mode<synchronous>, transform_indices = @transform_4, window_bounds = array<i64: 1, 32>}, {pipeline_mode = #tpu.pipeline_mode<synchronous>, transform_indices = @transform_5, window_bounds = array<i64: 1, 32>}, {pipeline_mode = #tpu.pipeline_mode<synchronous>, transform_indices = @transform_6, window_bounds = array<i64: 1, 32>}, {transform_indices = @transform_7, window_bounds = array<i64: 1, 16, 128>}]} {
    %c0 = arith.constant 0 : index
    %c0_0 = arith.constant 0 : index
    %c0_1 = arith.constant 0 : index
    %0 = vector.load %arg1[%c0, %c0_0, %c0_1] : memref<1x16x32xf32, #tpu.memory_space<vmem>>, vector<1x16x32xf32>
    %1 = vector.shape_cast %0 : vector<1x16x32xf32> to vector<16x32xf32>
    %c0_2 = arith.constant 0 : index
    %c0_3 = arith.constant 0 : index
    %c0_4 = arith.constant 0 : index
    %2 = vector.load %arg2[%c0_2, %c0_3, %c0_4] : memref<1x8x32xf32, #tpu.memory_space<vmem>>, vector<1x8x32xf32>
    %3 = vector.shape_cast %2 : vector<1x8x32xf32> to vector<8x32xf32>
    %c0_5 = arith.constant 0 : index
    %c0_6 = arith.constant 0 : index
    %4 = vector.load %arg7[%c0_5, %c0_6] : memref<1x32xf32, #tpu.memory_space<vmem>>, vector<1x32xf32>
    %5 = arith.truncf %1 : vector<16x32xf32> to vector<16x32xbf16>
    %6 = arith.truncf %3 : vector<8x32xf32> to vector<8x32xbf16>
    %7 = vector.broadcast %4 : vector<1x32xf32> to vector<16x32xf32>
    %8 = arith.mulf %1, %7 : vector<16x32xf32>
    %c0_7 = arith.constant 0 : index
    %c0_8 = arith.constant 0 : index
    %9 = vector.load %arg6[%c0_7, %c0_8] : memref<1x32xf32, #tpu.memory_space<vmem>>, vector<1x32xf32>
    %10 = vector.broadcast %9 : vector<1x32xf32> to vector<16x32xf32>
    %11 = arith.addf %8, %10 : vector<16x32xf32>
    %12 = arith.truncf %11 : vector<16x32xf32> to vector<16x32xbf16>
    %13 = vector.broadcast %4 : vector<1x32xf32> to vector<8x32xf32>
    %14 = arith.mulf %3, %13 : vector<8x32xf32>
    %c0_9 = arith.constant 0 : index
    %c0_10 = arith.constant 0 : index
    %15 = vector.load %arg5[%c0_9, %c0_10] : memref<1x32xf32, #tpu.memory_space<vmem>>, vector<1x32xf32>
    %16 = vector.broadcast %15 : vector<1x32xf32> to vector<8x32xf32>
    %17 = arith.addf %14, %16 : vector<8x32xf32>
    %18 = arith.truncf %17 : vector<8x32xf32> to vector<8x32xbf16>
    "tpu.trace_start"() <{level = 10 : i32, message = "id,jd->ij"}> : () -> ()
    %cst = arith.constant dense<0.000000e+00> : vector<16x8xf32>
    %19 = tpu.matmul %12, %6, %cst {dimension_numbers = #tpu.dot_dimension_numbers<[1], [1], [0], [0], [0, 0, 1, 0], [], []>} : vector<16x32xbf16>, vector<8x32xbf16>, vector<16x8xf32> -> vector<16x8xf32>
    "tpu.trace_stop"() : () -> ()
    "tpu.trace_start"() <{level = 10 : i32, message = "jd,id->ji"}> : () -> ()
    %cst_11 = arith.constant dense<0.000000e+00> : vector<8x16xf32>
    %20 = tpu.matmul %18, %5, %cst_11 {dimension_numbers = #tpu.dot_dimension_numbers<[1], [1], [0], [0], [0, 0, 1, 0], [], []>} : vector<8x32xbf16>, vector<16x32xbf16>, vector<8x16xf32> -> vector<8x16xf32>
    "tpu.trace_stop"() : () -> ()
    %c0_12 = arith.constant 0 : index
    %c0_13 = arith.constant 0 : index
    %c0_14 = arith.constant 0 : index
    %21 = vector.load %arg4[%c0_12, %c0_13, %c0_14] : memref<1x1x8xf32, #tpu.memory_space<vmem>>, vector<1x1x8xf32>
    %22 = vector.shape_cast %21 : vector<1x1x8xf32> to vector<1x8xf32>
    %cst_15 = arith.constant 0.000000e+00 : f32
    %23 = vector.broadcast %cst_15 : f32 to vector<1x8xf32>
    %24 = arith.cmpf ogt, %22, %23 : vector<1x8xf32>
    %cst_16 = arith.constant -1.000000e+30 : f32
    %25 = vector.shape_cast %24 : vector<1x8xi1> to vector<1x8xi1>
    %26 = vector.broadcast %25 : vector<1x8xi1> to vector<16x8xi1>
    %27 = vector.broadcast %cst_16 : f32 to vector<16x8xf32>
    %28 = arith.select %26, %19, %27 : vector<16x8xi1>, vector<16x8xf32>
    %cst_17 = arith.constant dense<0xFF800000> : vector<16xf32>
    %29 = vector.multi_reduction <maximumf>, %28, %cst_17 [1] : vector<16x8xf32> to vector<16xf32>
    %30 = vector.shape_cast %29 : vector<16xf32> to vector<16x1xf32>
    %31 = vector.broadcast %30 : vector<16x1xf32> to vector<16x8xf32>
    %32 = arith.subf %28, %31 : vector<16x8xf32>
    %33 = math.exp %32 : vector<16x8xf32>
    %cst_18 = arith.constant dense<0.000000e+00> : vector<16xf32>
    %34 = vector.multi_reduction <add>, %33, %cst_18 [1] : vector<16x8xf32> to vector<16xf32>
    %35 = vector.shape_cast %34 : vector<16xf32> to vector<16x1xf32>
    %36 = tpu.reciprocal %35 {approx = true} : vector<16x1xf32> -> vector<16x1xf32>
    %37 = vector.broadcast %36 : vector<16x1xf32> to vector<16x8xf32>
    %38 = arith.mulf %33, %37 : vector<16x8xf32>
    %c0_19 = arith.constant 0 : index
    %c0_20 = arith.constant 0 : index
    %c0_21 = arith.constant 0 : index
    %39 = vector.load %arg3[%c0_19, %c0_20, %c0_21] : memref<1x1x16xf32, #tpu.memory_space<vmem>>, vector<1x1x16xf32>
    %40 = vector.shape_cast %39 : vector<1x1x16xf32> to vector<1x16xf32>
    %cst_22 = arith.constant 0.000000e+00 : f32
    %41 = vector.broadcast %cst_22 : f32 to vector<1x16xf32>
    %42 = arith.cmpf ogt, %40, %41 : vector<1x16xf32>
    %cst_23 = arith.constant -1.000000e+30 : f32
    %43 = vector.shape_cast %42 : vector<1x16xi1> to vector<1x16xi1>
    %44 = vector.broadcast %43 : vector<1x16xi1> to vector<8x16xi1>
    %45 = vector.broadcast %cst_23 : f32 to vector<8x16xf32>
    %46 = arith.select %44, %20, %45 : vector<8x16xi1>, vector<8x16xf32>
    %cst_24 = arith.constant dense<0xFF800000> : vector<8xf32>
    %47 = vector.multi_reduction <maximumf>, %46, %cst_24 [1] : vector<8x16xf32> to vector<8xf32>
    %48 = vector.shape_cast %47 : vector<8xf32> to vector<8x1xf32>
    %49 = vector.broadcast %48 : vector<8x1xf32> to vector<8x16xf32>
    %50 = arith.subf %46, %49 : vector<8x16xf32>
    %51 = math.exp %50 : vector<8x16xf32>
    %cst_25 = arith.constant dense<0.000000e+00> : vector<8xf32>
    %52 = vector.multi_reduction <add>, %51, %cst_25 [1] : vector<8x16xf32> to vector<8xf32>
    %53 = vector.shape_cast %52 : vector<8xf32> to vector<8x1xf32>
    %54 = tpu.reciprocal %53 {approx = true} : vector<8x1xf32> -> vector<8x1xf32>
    %55 = vector.broadcast %54 : vector<8x1xf32> to vector<8x16xf32>
    %56 = arith.mulf %51, %55 : vector<8x16xf32>
    %57 = arith.truncf %38 : vector<16x8xf32> to vector<16x8xbf16>
    "tpu.trace_start"() <{level = 10 : i32, message = "ij,jd->id"}> : () -> ()
    %cst_26 = arith.constant dense<0.000000e+00> : vector<16x32xf32>
    %58 = tpu.matmul %57, %6, %cst_26 {dimension_numbers = #tpu.dot_dimension_numbers<[1], [0], [0], [1], [0, 0, 1, 1], [], []>} : vector<16x8xbf16>, vector<8x32xbf16>, vector<16x32xf32> -> vector<16x32xf32>
    "tpu.trace_stop"() : () -> ()
    %59 = arith.truncf %56 : vector<8x16xf32> to vector<8x16xbf16>
    "tpu.trace_start"() <{level = 10 : i32, message = "ji,id->jd"}> : () -> ()
    %cst_27 = arith.constant dense<0.000000e+00> : vector<8x32xf32>
    %60 = tpu.matmul %59, %5, %cst_27 {dimension_numbers = #tpu.dot_dimension_numbers<[1], [0], [0], [1], [0, 0, 1, 1], [], []>} : vector<8x16xbf16>, vector<16x32xbf16>, vector<8x32xf32> -> vector<8x32xf32>
    "tpu.trace_stop"() : () -> ()
    %61 = arith.truncf %60 : vector<8x32xf32> to vector<8x32xbf16>
    "tpu.trace_start"() <{level = 10 : i32, message = "ij,jd->id"}> : () -> ()
    %cst_28 = arith.constant dense<0.000000e+00> : vector<16x32xf32>
    %62 = tpu.matmul %57, %61, %cst_28 {dimension_numbers = #tpu.dot_dimension_numbers<[1], [0], [0], [1], [0, 0, 1, 1], [], []>} : vector<16x8xbf16>, vector<8x32xbf16>, vector<16x32xf32> -> vector<16x32xf32>
    "tpu.trace_stop"() : () -> ()
    %63 = arith.mulf %1, %58 : vector<16x32xf32>
    %64 = arith.mulf %1, %62 : vector<16x32xf32>
    %65 = tpu.concatenate %1, %58, %63, %64 in 1 : vector<16x32xf32>, vector<16x32xf32>, vector<16x32xf32>, vector<16x32xf32> -> vector<16x128xf32>
    %c0_29 = arith.constant 0 : index
    %c0_30 = arith.constant 0 : index
    %c0_31 = arith.constant 0 : index
    %66 = vector.load %arg8[%c0_29, %c0_30, %c0_31] : memref<1x16x128xf32, #tpu.memory_space<vmem>>, vector<1x16x128xf32>
    %67 = vector.shape_cast %66 : vector<1x16x128xf32> to vector<16x128xf32>
    %68 = vector.shape_cast %65 : vector<16x128xf32> to vector<1x16x128xf32>
    tpu.vector_store %arg8[%c0_29, %c0_30, %c0_31], %68 {strides = array<i32>} : memref<1x16x128xf32, #tpu.memory_space<vmem>>, vector<1x16x128xf32>,
    return
  }
  func.func @transform_0(%arg0: i32) -> (i32, i32, i32) {
    %c0_i32 = arith.constant 0 : i32
    %c0_i32_0 = arith.constant 0 : i32
    %c0_i32_1 = arith.constant 0 : i32
    return %arg0, %c0_i32, %c0_i32_0 : i32, i32, i32
  }
  func.func @transform_1(%arg0: i32) -> (i32, i32, i32) {
    %c0_i32 = arith.constant 0 : i32
    %c0_i32_0 = arith.constant 0 : i32
    %c0_i32_1 = arith.constant 0 : i32
    return %arg0, %c0_i32, %c0_i32_0 : i32, i32, i32
  }
  func.func @transform_2(%arg0: i32) -> (i32, i32, i32) {
    %c0_i32 = arith.constant 0 : i32
    %c0_i32_0 = arith.constant 0 : i32
    %c0_i32_1 = arith.constant 0 : i32
    return %arg0, %c0_i32, %c0_i32_0 : i32, i32, i32
  }
  func.func @transform_3(%arg0: i32) -> (i32, i32, i32) {
    %c0_i32 = arith.constant 0 : i32
    %c0_i32_0 = arith.constant 0 : i32
    %c0_i32_1 = arith.constant 0 : i32
    return %arg0, %c0_i32, %c0_i32_0 : i32, i32, i32
  }
  func.func @transform_4(%arg0: i32) -> (i32, i32) {
    %c0_i32 = arith.constant 0 : i32
    %c0_i32_0 = arith.constant 0 : i32
    %c0_i32_1 = arith.constant 0 : i32
    return %c0_i32, %c0_i32_0 : i32, i32
  }
  func.func @transform_5(%arg0: i32) -> (i32, i32) {
    %c0_i32 = arith.constant 0 : i32
    %c0_i32_0 = arith.constant 0 : i32
    %c0_i32_1 = arith.constant 0 : i32
    return %c0_i32, %c0_i32_0 : i32, i32
  }
  func.func @transform_6(%arg0: i32) -> (i32, i32) {
    %c0_i32 = arith.constant 0 : i32
    %c0_i32_0 = arith.constant 0 : i32
    %c0_i32_1 = arith.constant 0 : i32
    return %c0_i32, %c0_i32_0 : i32, i32
  }
  func.func @transform_7(%arg0: i32) -> (i32, i32, i32) {
    %c0_i32 = arith.constant 0 : i32
    %c0_i32_0 = arith.constant 0 : i32
    %c0_i32_1 = arith.constant 0 : i32
    return %arg0, %c0_i32, %c0_i32_0 : i32, i32, i32
  }
}

module attributes {stable_mosaic.version = 11 : i64} {
  func.func @_linear_kernel(%arg0: i32, %arg1: memref<16x128xbf16, #tpu.memory_space<vmem>>, %arg2: memref<128x128xbf16, #tpu.memory_space<vmem>>, %arg3: memref<1x128xf32, #tpu.memory_space<vmem>>, %arg4: memref<16x128xf32, #tpu.memory_space<vmem>>) attributes {dimension_semantics = [#tpu.dimension_semantics<parallel>], iteration_bounds = array<i64: 2>, scalar_prefetch = 0 : i64, scratch_operands = 0 : i64, tpu.core_type = #tpu.core_type<tc>, window_params = [{transform_indices = @transform_0, window_bounds = array<i64: 16, 128>}, {pipeline_mode = #tpu.pipeline_mode<synchronous>, transform_indices = @transform_1, window_bounds = array<i64: 128, 128>}, {pipeline_mode = #tpu.pipeline_mode<synchronous>, transform_indices = @transform_2, window_bounds = array<i64: 1, 128>}, {transform_indices = @transform_3, window_bounds = array<i64: 16, 128>}]} {
    %c0 = arith.constant 0 : index
    %c0_0 = arith.constant 0 : index
    %0 = vector.load %arg1[%c0, %c0_0] : memref<16x128xbf16, #tpu.memory_space<vmem>>, vector<16x128xbf16>
    %c0_1 = arith.constant 0 : index
    %c0_2 = arith.constant 0 : index
    %1 = vector.load %arg2[%c0_1, %c0_2] : memref<128x128xbf16, #tpu.memory_space<vmem>>, vector<128x128xbf16>
    %cst = arith.constant dense<0.000000e+00> : vector<16x128xf32>
    %2 = tpu.matmul %0, %1, %cst {dimension_numbers = #tpu.dot_dimension_numbers<[1], [0], [0], [1], [0, 0, 1, 1], [], []>} : vector<16x128xbf16>, vector<128x128xbf16>, vector<16x128xf32> -> vector<16x128xf32>
    %c0_3 = arith.constant 0 : index
    %c0_4 = arith.constant 0 : index
    %3 = vector.load %arg3[%c0_3, %c0_4] : memref<1x128xf32, #tpu.memory_space<vmem>>, vector<1x128xf32>
    %4 = vector.broadcast %3 : vector<1x128xf32> to vector<16x128xf32>
    %5 = arith.addf %2, %4 : vector<16x128xf32>
    %c0_5 = arith.constant 0 : index
    %c0_6 = arith.constant 0 : index
    %6 = vector.load %arg4[%c0_5, %c0_6] : memref<16x128xf32, #tpu.memory_space<vmem>>, vector<16x128xf32>
    tpu.vector_store %arg4[%c0_5, %c0_6], %5 {strides = array<i32>} : memref<16x128xf32, #tpu.memory_space<vmem>>, vector<16x128xf32>,
    return
  }
  func.func @transform_0(%arg0: i32) -> (i32, i32) {
    %c0_i32 = arith.constant 0 : i32
    %c0_i32_0 = arith.constant 0 : i32
    return %arg0, %c0_i32 : i32, i32
  }
  func.func @transform_1(%arg0: i32) -> (i32, i32) {
    %c0_i32 = arith.constant 0 : i32
    %c0_i32_0 = arith.constant 0 : i32
    %c0_i32_1 = arith.constant 0 : i32
    return %c0_i32, %c0_i32_0 : i32, i32
  }
  func.func @transform_2(%arg0: i32) -> (i32, i32) {
    %c0_i32 = arith.constant 0 : i32
    %c0_i32_0 = arith.constant 0 : i32
    %c0_i32_1 = arith.constant 0 : i32
    return %c0_i32, %c0_i32_0 : i32, i32
  }
  func.func @transform_3(%arg0: i32) -> (i32, i32) {
    %c0_i32 = arith.constant 0 : i32
    %c0_i32_0 = arith.constant 0 : i32
    return %arg0, %c0_i32 : i32, i32
  }
}

module attributes {stable_mosaic.version = 11 : i64} {
  func.func @_linear_kernel(%arg0: i32, %arg1: memref<16x32xbf16, #tpu.memory_space<vmem>>, %arg2: memref<32x128xbf16, #tpu.memory_space<vmem>>, %arg3: memref<1x128xf32, #tpu.memory_space<vmem>>, %arg4: memref<16x128xf32, #tpu.memory_space<vmem>>) attributes {dimension_semantics = [#tpu.dimension_semantics<parallel>], iteration_bounds = array<i64: 2>, scalar_prefetch = 0 : i64, scratch_operands = 0 : i64, tpu.core_type = #tpu.core_type<tc>, window_params = [{transform_indices = @transform_0, window_bounds = array<i64: 16, 32>}, {pipeline_mode = #tpu.pipeline_mode<synchronous>, transform_indices = @transform_1, window_bounds = array<i64: 32, 128>}, {pipeline_mode = #tpu.pipeline_mode<synchronous>, transform_indices = @transform_2, window_bounds = array<i64: 1, 128>}, {transform_indices = @transform_3, window_bounds = array<i64: 16, 128>}]} {
    %c0 = arith.constant 0 : index
    %c0_0 = arith.constant 0 : index
    %0 = vector.load %arg1[%c0, %c0_0] : memref<16x32xbf16, #tpu.memory_space<vmem>>, vector<16x32xbf16>
    %c0_1 = arith.constant 0 : index
    %c0_2 = arith.constant 0 : index
    %1 = vector.load %arg2[%c0_1, %c0_2] : memref<32x128xbf16, #tpu.memory_space<vmem>>, vector<32x128xbf16>
    %cst = arith.constant dense<0.000000e+00> : vector<16x128xf32>
    %2 = tpu.matmul %0, %1, %cst {dimension_numbers = #tpu.dot_dimension_numbers<[1], [0], [0], [1], [0, 0, 1, 1], [], []>} : vector<16x32xbf16>, vector<32x128xbf16>, vector<16x128xf32> -> vector<16x128xf32>
    %c0_3 = arith.constant 0 : index
    %c0_4 = arith.constant 0 : index
    %3 = vector.load %arg3[%c0_3, %c0_4] : memref<1x128xf32, #tpu.memory_space<vmem>>, vector<1x128xf32>
    %4 = vector.broadcast %3 : vector<1x128xf32> to vector<16x128xf32>
    %5 = arith.addf %2, %4 : vector<16x128xf32>
    %c0_5 = arith.constant 0 : index
    %c0_6 = arith.constant 0 : index
    %6 = vector.load %arg4[%c0_5, %c0_6] : memref<16x128xf32, #tpu.memory_space<vmem>>, vector<16x128xf32>
    tpu.vector_store %arg4[%c0_5, %c0_6], %5 {strides = array<i32>} : memref<16x128xf32, #tpu.memory_space<vmem>>, vector<16x128xf32>,
    return
  }
  func.func @transform_0(%arg0: i32) -> (i32, i32) {
    %c0_i32 = arith.constant 0 : i32
    %c0_i32_0 = arith.constant 0 : i32
    return %arg0, %c0_i32 : i32, i32
  }
  func.func @transform_1(%arg0: i32) -> (i32, i32) {
    %c0_i32 = arith.constant 0 : i32
    %c0_i32_0 = arith.constant 0 : i32
    %c0_i32_1 = arith.constant 0 : i32
    return %c0_i32, %c0_i32_0 : i32, i32
  }
  func.func @transform_2(%arg0: i32) -> (i32, i32) {
    %c0_i32 = arith.constant 0 : i32
    %c0_i32_0 = arith.constant 0 : i32
    %c0_i32_1 = arith.constant 0 : i32
    return %c0_i32, %c0_i32_0 : i32, i32
  }
  func.func @transform_3(%arg0: i32) -> (i32, i32) {
    %c0_i32 = arith.constant 0 : i32
    %c0_i32_0 = arith.constant 0 : i32
    return %arg0, %c0_i32 : i32, i32
  }
}

module attributes {stable_mosaic.version = 11 : i64} {
  func.func @_selfatt_kernel(%arg0: i32, %arg1: memref<1x16x128xbf16, #tpu.memory_space<vmem>>, %arg2: memref<1x16x32xf32, #tpu.memory_space<vmem>>, %arg3: memref<1x1x16xf32, #tpu.memory_space<vmem>>, %arg4: memref<128x32xbf16, #tpu.memory_space<vmem>>, %arg5: memref<1x32xf32, #tpu.memory_space<vmem>>, %arg6: memref<32x32xbf16, #tpu.memory_space<vmem>>, %arg7: memref<32x32xbf16, #tpu.memory_space<vmem>>, %arg8: memref<32x32xbf16, #tpu.memory_space<vmem>>, %arg9: memref<1x32xf32, #tpu.memory_space<vmem>>, %arg10: memref<1x32xf32, #tpu.memory_space<vmem>>, %arg11: memref<1x32xf32, #tpu.memory_space<vmem>>, %arg12: memref<1x16x32xf32, #tpu.memory_space<vmem>>) attributes {dimension_semantics = [#tpu.dimension_semantics<parallel>], iteration_bounds = array<i64: 2>, scalar_prefetch = 0 : i64, scratch_operands = 0 : i64, tpu.core_type = #tpu.core_type<tc>, window_params = [{transform_indices = @transform_0, window_bounds = array<i64: 1, 16, 128>}, {transform_indices = @transform_1, window_bounds = array<i64: 1, 16, 32>}, {transform_indices = @transform_2, window_bounds = array<i64: 1, 1, 16>}, {pipeline_mode = #tpu.pipeline_mode<synchronous>, transform_indices = @transform_3, window_bounds = array<i64: 128, 32>}, {pipeline_mode = #tpu.pipeline_mode<synchronous>, transform_indices = @transform_4, window_bounds = array<i64: 1, 32>}, {pipeline_mode = #tpu.pipeline_mode<synchronous>, transform_indices = @transform_5, window_bounds = array<i64: 32, 32>}, {pipeline_mode = #tpu.pipeline_mode<synchronous>, transform_indices = @transform_6, window_bounds = array<i64: 32, 32>}, {pipeline_mode = #tpu.pipeline_mode<synchronous>, transform_indices = @transform_7, window_bounds = array<i64: 32, 32>}, {pipeline_mode = #tpu.pipeline_mode<synchronous>, transform_indices = @transform_8, window_bounds = array<i64: 1, 32>}, {pipeline_mode = #tpu.pipeline_mode<synchronous>, transform_indices = @transform_9, window_bounds = array<i64: 1, 32>}, {pipeline_mode = #tpu.pipeline_mode<synchronous>, transform_indices = @transform_10, window_bounds = array<i64: 1, 32>}, {transform_indices = @transform_11, window_bounds = array<i64: 1, 16, 32>}]} {
    %c0 = arith.constant 0 : index
    %c0_0 = arith.constant 0 : index
    %c0_1 = arith.constant 0 : index
    %0 = vector.load %arg1[%c0, %c0_0, %c0_1] : memref<1x16x128xbf16, #tpu.memory_space<vmem>>, vector<1x16x128xbf16>
    %1 = vector.shape_cast %0 : vector<1x16x128xbf16> to vector<16x128xbf16>
    %c0_2 = arith.constant 0 : index
    %c0_3 = arith.constant 0 : index
    %2 = vector.load %arg4[%c0_2, %c0_3] : memref<128x32xbf16, #tpu.memory_space<vmem>>, vector<128x32xbf16>
    %cst = arith.constant dense<0.000000e+00> : vector<16x32xf32>
    %3 = tpu.matmul %1, %2, %cst {dimension_numbers = #tpu.dot_dimension_numbers<[1], [0], [0], [1], [0, 0, 1, 1], [], []>} : vector<16x128xbf16>, vector<128x32xbf16>, vector<16x32xf32> -> vector<16x32xf32>
    %c0_4 = arith.constant 0 : index
    %c0_5 = arith.constant 0 : index
    %4 = vector.load %arg5[%c0_4, %c0_5] : memref<1x32xf32, #tpu.memory_space<vmem>>, vector<1x32xf32>
    %5 = vector.broadcast %4 : vector<1x32xf32> to vector<16x32xf32>
    %6 = arith.addf %3, %5 : vector<16x32xf32>
    %c0_6 = arith.constant 0 : index
    %c0_7 = arith.constant 0 : index
    %c0_8 = arith.constant 0 : index
    %7 = vector.load %arg2[%c0_6, %c0_7, %c0_8] : memref<1x16x32xf32, #tpu.memory_space<vmem>>, vector<1x16x32xf32>
    %8 = vector.shape_cast %7 : vector<1x16x32xf32> to vector<16x32xf32>
    %9 = arith.addf %6, %8 : vector<16x32xf32>
    %10 = arith.truncf %9 : vector<16x32xf32> to vector<16x32xbf16>
    %c0_9 = arith.constant 0 : index
    %c0_10 = arith.constant 0 : index
    %11 = vector.load %arg6[%c0_9, %c0_10] : memref<32x32xbf16, #tpu.memory_space<vmem>>, vector<32x32xbf16>
    %cst_11 = arith.constant dense<0.000000e+00> : vector<16x32xf32>
    %12 = tpu.matmul %10, %11, %cst_11 {dimension_numbers = #tpu.dot_dimension_numbers<[1], [0], [0], [1], [0, 0, 1, 1], [], []>} : vector<16x32xbf16>, vector<32x32xbf16>, vector<16x32xf32> -> vector<16x32xf32>
    %c0_12 = arith.constant 0 : index
    %c0_13 = arith.constant 0 : index
    %13 = vector.load %arg9[%c0_12, %c0_13] : memref<1x32xf32, #tpu.memory_space<vmem>>, vector<1x32xf32>
    %14 = vector.broadcast %13 : vector<1x32xf32> to vector<16x32xf32>
    %15 = arith.addf %12, %14 : vector<16x32xf32>
    %c0_14 = arith.constant 0 : index
    %c0_15 = arith.constant 0 : index
    %16 = vector.load %arg7[%c0_14, %c0_15] : memref<32x32xbf16, #tpu.memory_space<vmem>>, vector<32x32xbf16>
    %cst_16 = arith.constant dense<0.000000e+00> : vector<16x32xf32>
    %17 = tpu.matmul %10, %16, %cst_16 {dimension_numbers = #tpu.dot_dimension_numbers<[1], [0], [0], [1], [0, 0, 1, 1], [], []>} : vector<16x32xbf16>, vector<32x32xbf16>, vector<16x32xf32> -> vector<16x32xf32>
    %c0_17 = arith.constant 0 : index
    %c0_18 = arith.constant 0 : index
    %18 = vector.load %arg10[%c0_17, %c0_18] : memref<1x32xf32, #tpu.memory_space<vmem>>, vector<1x32xf32>
    %19 = vector.broadcast %18 : vector<1x32xf32> to vector<16x32xf32>
    %20 = arith.addf %17, %19 : vector<16x32xf32>
    %c0_19 = arith.constant 0 : index
    %c0_20 = arith.constant 0 : index
    %21 = vector.load %arg8[%c0_19, %c0_20] : memref<32x32xbf16, #tpu.memory_space<vmem>>, vector<32x32xbf16>
    %cst_21 = arith.constant dense<0.000000e+00> : vector<16x32xf32>
    %22 = tpu.matmul %10, %21, %cst_21 {dimension_numbers = #tpu.dot_dimension_numbers<[1], [0], [0], [1], [0, 0, 1, 1], [], []>} : vector<16x32xbf16>, vector<32x32xbf16>, vector<16x32xf32> -> vector<16x32xf32>
    %c0_22 = arith.constant 0 : index
    %c0_23 = arith.constant 0 : index
    %23 = vector.load %arg11[%c0_22, %c0_23] : memref<1x32xf32, #tpu.memory_space<vmem>>, vector<1x32xf32>
    %24 = vector.broadcast %23 : vector<1x32xf32> to vector<16x32xf32>
    %25 = arith.addf %22, %24 : vector<16x32xf32>
    %26 = arith.truncf %15 : vector<16x32xf32> to vector<16x32xbf16>
    %27 = arith.truncf %20 : vector<16x32xf32> to vector<16x32xbf16>
    "tpu.trace_start"() <{level = 10 : i32, message = "id,jd->ij"}> : () -> ()
    %cst_24 = arith.constant dense<0.000000e+00> : vector<16x16xf32>
    %28 = tpu.matmul %26, %27, %cst_24 {dimension_numbers = #tpu.dot_dimension_numbers<[1], [1], [0], [0], [0, 0, 1, 0], [], []>} : vector<16x32xbf16>, vector<16x32xbf16>, vector<16x16xf32> -> vector<16x16xf32>
    "tpu.trace_stop"() : () -> ()
    %cst_25 = arith.constant 0.176776692 : f32
    %29 = vector.broadcast %cst_25 : f32 to vector<16x16xf32>
    %30 = arith.mulf %28, %29 : vector<16x16xf32>
    %c0_26 = arith.constant 0 : index
    %c0_27 = arith.constant 0 : index
    %c0_28 = arith.constant 0 : index
    %31 = vector.load %arg3[%c0_26, %c0_27, %c0_28] : memref<1x1x16xf32, #tpu.memory_space<vmem>>, vector<1x1x16xf32>
    %32 = vector.shape_cast %31 : vector<1x1x16xf32> to vector<1x16xf32>
    %cst_29 = arith.constant 0.000000e+00 : f32
    %33 = vector.broadcast %cst_29 : f32 to vector<1x16xf32>
    %34 = arith.cmpf ogt, %32, %33 : vector<1x16xf32>
    %cst_30 = arith.constant -1.000000e+30 : f32
    %35 = vector.shape_cast %34 : vector<1x16xi1> to vector<1x16xi1>
    %36 = vector.broadcast %35 : vector<1x16xi1> to vector<16x16xi1>
    %37 = vector.broadcast %cst_30 : f32 to vector<16x16xf32>
    %38 = arith.select %36, %30, %37 : vector<16x16xi1>, vector<16x16xf32>
    %cst_31 = arith.constant dense<0xFF800000> : vector<16xf32>
    %39 = vector.multi_reduction <maximumf>, %38, %cst_31 [1] : vector<16x16xf32> to vector<16xf32>
    %40 = vector.shape_cast %39 : vector<16xf32> to vector<16x1xf32>
    %41 = vector.broadcast %40 : vector<16x1xf32> to vector<16x16xf32>
    %42 = arith.subf %38, %41 : vector<16x16xf32>
    %43 = math.exp %42 : vector<16x16xf32>
    %cst_32 = arith.constant dense<0.000000e+00> : vector<16xf32>
    %44 = vector.multi_reduction <add>, %43, %cst_32 [1] : vector<16x16xf32> to vector<16xf32>
    %45 = vector.shape_cast %44 : vector<16xf32> to vector<16x1xf32>
    %46 = tpu.reciprocal %45 {approx = true} : vector<16x1xf32> -> vector<16x1xf32>
    %47 = vector.broadcast %46 : vector<16x1xf32> to vector<16x16xf32>
    %48 = arith.mulf %43, %47 : vector<16x16xf32>
    %49 = arith.truncf %48 : vector<16x16xf32> to vector<16x16xbf16>
    %50 = arith.truncf %25 : vector<16x32xf32> to vector<16x32xbf16>
    "tpu.trace_start"() <{level = 10 : i32, message = "ij,jd->id"}> : () -> ()
    %cst_33 = arith.constant dense<0.000000e+00> : vector<16x32xf32>
    %51 = tpu.matmul %49, %50, %cst_33 {dimension_numbers = #tpu.dot_dimension_numbers<[1], [0], [0], [1], [0, 0, 1, 1], [], []>} : vector<16x16xbf16>, vector<16x32xbf16>, vector<16x32xf32> -> vector<16x32xf32>
    "tpu.trace_stop"() : () -> ()
    %52 = arith.addf %9, %51 : vector<16x32xf32>
    %c0_34 = arith.constant 0 : index
    %c0_35 = arith.constant 0 : index
    %c0_36 = arith.constant 0 : index
    %53 = vector.load %arg12[%c0_34, %c0_35, %c0_36] : memref<1x16x32xf32, #tpu.memory_space<vmem>>, vector<1x16x32xf32>
    %54 = vector.shape_cast %53 : vector<1x16x32xf32> to vector<16x32xf32>
    %55 = vector.shape_cast %52 : vector<16x32xf32> to vector<1x16x32xf32>
    tpu.vector_store %arg12[%c0_34, %c0_35, %c0_36], %55 {strides = array<i32>} : memref<1x16x32xf32, #tpu.memory_space<vmem>>, vector<1x16x32xf32>,
    return
  }
  func.func @transform_0(%arg0: i32) -> (i32, i32, i32) {
    %c0_i32 = arith.constant 0 : i32
    %c0_i32_0 = arith.constant 0 : i32
    %c0_i32_1 = arith.constant 0 : i32
    return %arg0, %c0_i32, %c0_i32_0 : i32, i32, i32
  }
  func.func @transform_1(%arg0: i32) -> (i32, i32, i32) {
    %c0_i32 = arith.constant 0 : i32
    %c0_i32_0 = arith.constant 0 : i32
    %c0_i32_1 = arith.constant 0 : i32
    return %arg0, %c0_i32, %c0_i32_0 : i32, i32, i32
  }
  func.func @transform_2(%arg0: i32) -> (i32, i32, i32) {
    %c0_i32 = arith.constant 0 : i32
    %c0_i32_0 = arith.constant 0 : i32
    %c0_i32_1 = arith.constant 0 : i32
    return %arg0, %c0_i32, %c0_i32_0 : i32, i32, i32
  }
  func.func @transform_3(%arg0: i32) -> (i32, i32) {
    %c0_i32 = arith.constant 0 : i32
    %c0_i32_0 = arith.constant 0 : i32
    %c0_i32_1 = arith.constant 0 : i32
    return %c0_i32, %c0_i32_0 : i32, i32
  }
  func.func @transform_4(%arg0: i32) -> (i32, i32) {
    %c0_i32 = arith.constant 0 : i32
    %c0_i32_0 = arith.constant 0 : i32
    %c0_i32_1 = arith.constant 0 : i32
    return %c0_i32, %c0_i32_0 : i32, i32
  }
  func.func @transform_5(%arg0: i32) -> (i32, i32) {
    %c0_i32 = arith.constant 0 : i32
    %c0_i32_0 = arith.constant 0 : i32
    %c0_i32_1 = arith.constant 0 : i32
    return %c0_i32, %c0_i32_0 : i32, i32
  }
  func.func @transform_6(%arg0: i32) -> (i32, i32) {
    %c0_i32 = arith.constant 0 : i32
    %c0_i32_0 = arith.constant 0 : i32
    %c0_i32_1 = arith.constant 0 : i32
    return %c0_i32, %c0_i32_0 : i32, i32
  }
  func.func @transform_7(%arg0: i32) -> (i32, i32) {
    %c0_i32 = arith.constant 0 : i32
    %c0_i32_0 = arith.constant 0 : i32
    %c0_i32_1 = arith.constant 0 : i32
    return %c0_i32, %c0_i32_0 : i32, i32
  }
  func.func @transform_8(%arg0: i32) -> (i32, i32) {
    %c0_i32 = arith.constant 0 : i32
    %c0_i32_0 = arith.constant 0 : i32
    %c0_i32_1 = arith.constant 0 : i32
    return %c0_i32, %c0_i32_0 : i32, i32
  }
  func.func @transform_9(%arg0: i32) -> (i32, i32) {
    %c0_i32 = arith.constant 0 : i32
    %c0_i32_0 = arith.constant 0 : i32
    %c0_i32_1 = arith.constant 0 : i32
    return %c0_i32, %c0_i32_0 : i32, i32
  }
  func.func @transform_10(%arg0: i32) -> (i32, i32) {
    %c0_i32 = arith.constant 0 : i32
    %c0_i32_0 = arith.constant 0 : i32
    %c0_i32_1 = arith.constant 0 : i32
    return %c0_i32, %c0_i32_0 : i32, i32
  }
  func.func @transform_11(%arg0: i32) -> (i32, i32, i32) {
    %c0_i32 = arith.constant 0 : i32
    %c0_i32_0 = arith.constant 0 : i32
    %c0_i32_1 = arith.constant 0 : i32
    return %arg0, %c0_i32, %c0_i32_0 : i32, i32, i32
  }
}

module attributes {stable_mosaic.version = 11 : i64} {
  func.func @_out_kernel(%arg0: i32, %arg1: memref<1x16x192xbf16, #tpu.memory_space<vmem>>, %arg2: memref<1x1x16xf32, #tpu.memory_space<vmem>>, %arg3: memref<192x2xbf16, #tpu.memory_space<vmem>>, %arg4: memref<2x1xf32, #tpu.memory_space<vmem>>, %arg5: memref<1x2x16xf32, #tpu.memory_space<vmem>>) attributes {dimension_semantics = [#tpu.dimension_semantics<parallel>], iteration_bounds = array<i64: 2>, scalar_prefetch = 0 : i64, scratch_operands = 0 : i64, tpu.core_type = #tpu.core_type<tc>, window_params = [{transform_indices = @transform_0, window_bounds = array<i64: 1, 16, 192>}, {transform_indices = @transform_1, window_bounds = array<i64: 1, 1, 16>}, {pipeline_mode = #tpu.pipeline_mode<synchronous>, transform_indices = @transform_2, window_bounds = array<i64: 192, 2>}, {pipeline_mode = #tpu.pipeline_mode<synchronous>, transform_indices = @transform_3, window_bounds = array<i64: 2, 1>}, {transform_indices = @transform_4, window_bounds = array<i64: 1, 2, 16>}]} {
    %c0 = arith.constant 0 : index
    %c0_0 = arith.constant 0 : index
    %c0_1 = arith.constant 0 : index
    %0 = vector.load %arg1[%c0, %c0_0, %c0_1] : memref<1x16x192xbf16, #tpu.memory_space<vmem>>, vector<1x16x192xbf16>
    %1 = vector.shape_cast %0 : vector<1x16x192xbf16> to vector<16x192xbf16>
    %c0_2 = arith.constant 0 : index
    %c0_3 = arith.constant 0 : index
    %2 = vector.load %arg3[%c0_2, %c0_3] : memref<192x2xbf16, #tpu.memory_space<vmem>>, vector<192x2xbf16>
    "tpu.trace_start"() <{level = 10 : i32, message = "dk,ld->kl"}> : () -> ()
    %cst = arith.constant dense<0.000000e+00> : vector<2x16xf32>
    %3 = tpu.matmul %2, %1, %cst {dimension_numbers = #tpu.dot_dimension_numbers<[0], [1], [1], [0], [0, 1, 1, 0], [], []>} : vector<192x2xbf16>, vector<16x192xbf16>, vector<2x16xf32> -> vector<2x16xf32>
    "tpu.trace_stop"() : () -> ()
    %c0_4 = arith.constant 0 : index
    %c0_5 = arith.constant 0 : index
    %4 = vector.load %arg4[%c0_4, %c0_5] : memref<2x1xf32, #tpu.memory_space<vmem>>, vector<2x1xf32>
    %5 = vector.broadcast %4 : vector<2x1xf32> to vector<2x16xf32>
    %6 = arith.addf %3, %5 : vector<2x16xf32>
    %c0_6 = arith.constant 0 : index
    %c0_7 = arith.constant 0 : index
    %c0_8 = arith.constant 0 : index
    %7 = vector.load %arg2[%c0_6, %c0_7, %c0_8] : memref<1x1x16xf32, #tpu.memory_space<vmem>>, vector<1x1x16xf32>
    %8 = vector.shape_cast %7 : vector<1x1x16xf32> to vector<1x16xf32>
    %cst_9 = arith.constant 0.000000e+00 : f32
    %9 = vector.broadcast %cst_9 : f32 to vector<1x16xf32>
    %10 = arith.cmpf ogt, %8, %9 : vector<1x16xf32>
    %cst_10 = arith.constant -1.000000e+30 : f32
    %11 = vector.shape_cast %10 : vector<1x16xi1> to vector<1x16xi1>
    %12 = vector.broadcast %11 : vector<1x16xi1> to vector<2x16xi1>
    %13 = vector.broadcast %cst_10 : f32 to vector<2x16xf32>
    %14 = arith.select %12, %6, %13 : vector<2x16xi1>, vector<2x16xf32>
    %cst_11 = arith.constant dense<0xFF800000> : vector<2xf32>
    %15 = vector.multi_reduction <maximumf>, %14, %cst_11 [1] : vector<2x16xf32> to vector<2xf32>
    %16 = vector.shape_cast %15 : vector<2xf32> to vector<2x1xf32>
    %17 = vector.broadcast %16 : vector<2x1xf32> to vector<2x16xf32>
    %18 = arith.subf %14, %17 : vector<2x16xf32>
    %19 = math.exp %18 : vector<2x16xf32>
    %cst_12 = arith.constant dense<0.000000e+00> : vector<2xf32>
    %20 = vector.multi_reduction <add>, %19, %cst_12 [1] : vector<2x16xf32> to vector<2xf32>
    %21 = vector.shape_cast %20 : vector<2xf32> to vector<2x1xf32>
    %22 = math.log %21 : vector<2x1xf32>
    %23 = vector.broadcast %22 : vector<2x1xf32> to vector<2x16xf32>
    %24 = arith.subf %18, %23 : vector<2x16xf32>
    %c0_13 = arith.constant 0 : index
    %c0_14 = arith.constant 0 : index
    %c0_15 = arith.constant 0 : index
    %25 = vector.load %arg5[%c0_13, %c0_14, %c0_15] : memref<1x2x16xf32, #tpu.memory_space<vmem>>, vector<1x2x16xf32>
    %26 = vector.shape_cast %25 : vector<1x2x16xf32> to vector<2x16xf32>
    %27 = vector.shape_cast %24 : vector<2x16xf32> to vector<1x2x16xf32>
    tpu.vector_store %arg5[%c0_13, %c0_14, %c0_15], %27 {strides = array<i32>} : memref<1x2x16xf32, #tpu.memory_space<vmem>>, vector<1x2x16xf32>,
    return
  }
  func.func @transform_0(%arg0: i32) -> (i32, i32, i32) {
    %c0_i32 = arith.constant 0 : i32
    %c0_i32_0 = arith.constant 0 : i32
    %c0_i32_1 = arith.constant 0 : i32
    return %arg0, %c0_i32, %c0_i32_0 : i32, i32, i32
  }
  func.func @transform_1(%arg0: i32) -> (i32, i32, i32) {
    %c0_i32 = arith.constant 0 : i32
    %c0_i32_0 = arith.constant 0 : i32
    %c0_i32_1 = arith.constant 0 : i32
    return %arg0, %c0_i32, %c0_i32_0 : i32, i32, i32
  }
  func.func @transform_2(%arg0: i32) -> (i32, i32) {
    %c0_i32 = arith.constant 0 : i32
    %c0_i32_0 = arith.constant 0 : i32
    %c0_i32_1 = arith.constant 0 : i32
    return %c0_i32, %c0_i32_0 : i32, i32
  }
  func.func @transform_3(%arg0: i32) -> (i32, i32) {
    %c0_i32 = arith.constant 0 : i32
    %c0_i32_0 = arith.constant 0 : i32
    %c0_i32_1 = arith.constant 0 : i32
    return %c0_i32, %c0_i32_0 : i32, i32
  }
  func.func @transform_4(%arg0: i32) -> (i32, i32, i32) {
    %c0_i32 = arith.constant 0 : i32
    %c0_i32_0 = arith.constant 0 : i32
    %c0_i32_1 = arith.constant 0 : i32
    return %arg0, %c0_i32, %c0_i32_0 : i32, i32, i32
  }
}

</mosaic_0001>

<bundles_post_ra>
// kernel: bidaf_forward.21
= control target key start
LH: loop header
LB: loop body
LE: loop exit
PB: predicated region body
PF: predicated region fallthrough
CT: control target
= control target key end

     0   :  { %s365_s12 = smov 0   ;;  %s388_s0 = inlined_call_operand.vmem [shape: bf16[32,16], index: 0, kind: input, shape index: {}]   ;;  %s389_s1 = inlined_call_operand.vmem [shape: bf16[16,128], index: 1, kind: input, shape index: {}]   ;;  %s390_s2 = inlined_call_operand.vmem [shape: f32[1,128], index: 2, kind: input, shape index: {}]   ;;  %s391_s3 = inlined_call_operand.vmem [shape: f32[32,128], index: 3, kind: output, shape index: {}]  }
   0x1 LB: > { %s300_s13 = sadd.s32 4294967295, %s341_s12   ;;  %p304_p0 = scmp.ge.s32.totalorder %s341_s12, 1  ;;  %s341_s12 = sphi %s365_s12, %s13_s12  }
   0x2   : > { %p138_p1 = scmp.lt.s32.totalorder %s341_s12, 3 }
   0x4   : > { %p139_p2 = pnand %p304_p0, %p138_p1 }
   0x5   : > { %v333_v0 = vld [vmem:[%s389_s1] sm:$0xff] (!%p139_p2)   ;;  %v343_v1 = vmov (!%p139_p2), 0.0   ;;  %s305_s16 = sshll.u32 (!%p139_p2), %s300_s13, 1  ;;  %vm344_vm0 = vmmov (!%p139_p2), 0   ;;  %vm197_vm1 = vcmask (!%p139_p2), 130048  }
   0x6   : > { %142 = sbr.rel (%p139_p2) target bundleno = 234 (0xea), region = 32  ;;  %317 = vmatprep.subr.bf16.mxu0 (!%p139_p2), %v343_v1  ;;  %319 = vmatprep.mubr.msk.bf16.mxu0 (!%p139_p2), %vm344_vm0, %v343_v1  ;;  %p163_p3 = scmp.lt.s32.totalorder (!%p139_p2), %s305_s16, 3  ;;  %v309_v3 = vld [vmem:[%s390_s2] ss:$0 sm:$0xff] (!%p139_p2) }
   0x7   : > { %318 = vmatpush3.bf16.msra.mxu0 (!%p139_p2), %v333_v0 }
   0xd   : > { %s393_s16 = smov (!%p163_p3, %s305_s16), 3 }
   0xe   : > { %s306_s17 = sshll.u32 %s393_s16, 2  ;;  %s308_s21 = sshll.u32 %s393_s16, 3 }
   0xf   : > { %s166_s20 = scalar_lea.vmem %s388_s0, %s306_s17  ;;  %s172_s26 = scalar_lea.vmem %s391_s3, %s308_s21 }
  0x10   : > { %v334_v2 = vld [vmem:[%s166_s20] sm:$0xff]  }
  0x11   : > { %320 = vmatmul.mubr.msk.bf16.vlgmr.msra.gmra.mrb[0].mxu0 %vm197_vm1, %v334_v2 }
  0xe4   : > { %v235_v4 = vpop.f32.mrb[0].mxu0 }
  0xe5   : > { %v236_v5 = vadd.f32 %v309_v3, %v235_v4  ;;  %v321_v6 = vpop.f32.mrb[1].mxu0 }
  0xe6   : > { %v238_v7 = vpop.f32.mrb[2].mxu0 }
  0xe7   : > { %242 = vst [vmem:[%s172_s26] sm:$0xff] %v236_v5  ;;  %v239_v8 = vadd.f32 %v309_v3, %v238_v7  ;;  %v322_v9 = vpop.f32.mrb[3].mxu0 }
  0xe9   : > { %243 = vst [vmem:[%s172_s26 + $0x8] sm:$0xff] %v239_v8 }
  0xea PF: > { %s13_s12 = sadd.s32 1, %s341_s12  }
  0xeb   : > { %p10_p4 = scmp.ge.s32.totalorder %s13_s12, 4  }
  0xed   :  { %12 = sbr.rel (!%p10_p4) target bundleno = 1 (0x1), region = 62 }

// kernel: bidaf_forward.19
= control target key start
LH: loop header
LB: loop body
LE: loop exit
PB: predicated region body
PF: predicated region fallthrough
CT: control target
= control target key end

     0   :  { %s1237_s27 = smov 0   ;;  %s1239_s28 = smov 0   ;;  %s1373_s0 = inlined_call_operand.vmem [shape: bf16[32,24], index: 0, kind: input, shape index: {}]   ;;  %s1374_s1 = inlined_call_operand.vmem [shape: bf16[6,32,24], index: 1, kind: input, shape index: {}]   ;;  %s1375_s2 = inlined_call_operand.vmem [shape: bf16[24,16], index: 2, kind: input, shape index: {}]   ;;  %s1376_s3 = inlined_call_operand.vmem [shape: f32[1,16], index: 3, kind: input, shape index: {}]   ;;  %s1377_s4 = inlined_call_operand.vmem [shape: bf16[24,16], index: 4, kind: input, shape index: {}]   ;;  %s1378_s5 = inlined_call_operand.vmem [shape: bf16[16,16], index: 5, kind: input, shape index: {}]   ;;  %s1379_s6 = inlined_call_operand.vmem [shape: bf16[2,16,32], index: 6, kind: input, shape index: {}]   ;;  %s1380_s7 = inlined_call_operand.vmem [shape: f32[2,1,32], index: 7, kind: input, shape index: {}]   ;;  %s1381_s8 = inlined_call_operand.vmem [shape: f32[32,16], index: 8, kind: output, shape index: {}]  }
   0x1   :  { %s1241_s29 = smov 0  }
   0x2 LB: > { %s994_s30 = sadd.s32 4294967295, %s1187_s29   ;;  %s1254_s9 = sadd.s32 1, %s1187_s29   ;;  %s1187_s29 = sphi %s1241_s29, %s1384_s29   ;;  %s1183_s28 = sphi %s1239_s28, %s1383_s28   ;;  %s1179_s27 = sphi %s1237_s27, %s1382_s27  }
   0x3   : > { %s48_s10 = ssub.s32 %s1187_s29, %s1254_s9  ;;  %s51_s11 = sadd.s32 1, %s1183_s28 }
   0x4   : > { %p49_p0 = scmp.eq.s32.totalorder %s48_s10, 0  ;;  %p58_p1 = scmp.ne.s32.totalorder %s1183_s28, %s1179_s27 }
   0x5   : > { %p59_p2 = scmp.eq.s32.totalorder %s1187_s29, 0  ;;  %p997_p4 = scmp.ge.s32.totalorder %s1187_s29, 2 }
   0x6   : > { %s1263_s12 = scalar_select %p49_p0, %s1183_s28, %s51_s11  }
   0x7   : > { %p60_p3 = por %p59_p2, %p58_p1  ;;  %254 = sbr.rel (%p997_p4) target bundleno = 21 (0x15), region = 40 }
   0xe   : > { %266 = sbr.rel (!%p60_p3) target bundleno = 21 (0x15), region = 48  ;;  %s268_s13 = sand.u32 (%p60_p3), 1, %s1183_s28  }
   0xf   : > { %s1041_s14 = sshll.u32 (%p60_p3), %s1187_s29, 3  ;;  %s1106_s15 = smul.u32 (%p60_p3), 48, %s268_s13 }
  0x10   : > { %s273_s18 = scalar_lea.vmem (%p60_p3), %s1374_s1, %s1041_s14 }
  0x11   : > { %v289_v0 = vld [vmem:[%s273_s18] sm:$0xff] (%p60_p3)   ;;  %v293_v1 = vld [vmem:[%s273_s18 + $0x10] sm:$0xff] (%p60_p3)   ;;  %s270_s19 = scalar_lea.vmem (%p60_p3), [#allocation2], %s1106_s15 }
  0x12   : > { %v297_v2 = vld [vmem:[%s273_s18 + $0x20] sm:$0xff] (%p60_p3)   ;;  %v301_v3 = vld [vmem:[%s273_s18 + $0x30] sm:$0xff] (%p60_p3)   ;;  %290 = vst [vmem:[%s270_s19] sm:$0xff] (%p60_p3), %v289_v0   ;;  %294 = vst [vmem:[%s270_s19 + $0x8] sm:$0xff] (%p60_p3), %v293_v1  }
  0x13   : > { %v305_v4 = vld [vmem:[%s273_s18 + $0x40] sm:$0xff] (%p60_p3)   ;;  %v309_v5 = vld [vmem:[%s273_s18 + $0x50] sm:$0xff] (%p60_p3)   ;;  %298 = vst [vmem:[%s270_s19 + $0x10] sm:$0xff] (%p60_p3), %v297_v2   ;;  %302 = vst [vmem:[%s270_s19 + $0x18] sm:$0xff] (%p60_p3), %v301_v3  }
  0x14   : > { %306 = vst [vmem:[%s270_s19 + $0x20] sm:$0xff] (%p60_p3), %v305_v4   ;;  %310 = vst [vmem:[%s270_s19 + $0x28] sm:$0xff] (%p60_p3), %v309_v5  }
  0x15 PF: > { %p1000_p5 = scmp.ge.s32.totalorder %s1187_s29, 1  ;;  %p358_p6 = scmp.lt.s32.totalorder %s1187_s29, 3 }
  0x17   : > { %p359_p7 = pnand %p1000_p5, %p358_p6 }
  0x18   : > { %v1135_v6 = vld [vmem:[%s1375_s2] sm:$0xff] (!%p359_p7)   ;;  %v1136_v7 = vld [vmem:[%s1375_s2 + $0x8] ss:$0 sps:$4 sm:$0xff] (!%p359_p7)   ;;  %vm497_vm0 = vcmask (!%p359_p7), 1043456   ;;  %s365_s24 = sand.u32 (!%p359_p7), 1, %s1179_s27   ;;  %vm478_vm1 = vcmask (!%p359_p7), 195584  }
  0x19   : > { %362 = sbr.rel (%p359_p7) target bundleno = 1184 (0x4a0), region = 89  ;;  %1059 = vmatprep.subr.bf16.mxu0 (!%p359_p7), %v1135_v6  ;;  %v499_v8 = vsel (!%p359_p7), %vm497_vm0, %v1136_v7, 0  ;;  %v1143_v15 = vld [vmem:[%s1378_s5] sm:$0xff] (!%p359_p7)   ;;  %v1189_v16 = vmov (!%p359_p7), 0.0   ;;  %vm1190_vm2 = vmmov (!%p359_p7), 0   ;;  %s1001_s11 = sshll.u32 (!%p359_p7), %s994_s30, 1 }
  0x1a   : > { %s1107_s25 = smul.u32 (!%p359_p7), 48, %s365_s24  ;;  %1060 = vmatpush3.bf16.msra.mxu0 (!%p359_p7), %v1135_v6  ;;  %1075 = vmatprep.subr.bf16.mxu1 (!%p359_p7), %v1189_v16  ;;  %p404_p8 = scmp.lt.s32.totalorder (!%p359_p7), %s1001_s11, 3  ;;  %v1005_v19 = vld [vmem:[%s1376_s3] ss:$0 sm:$0xff] (!%p359_p7)  ;;  %vm594_vm3 = vcmask (!%p359_p7), 130048  }
  0x1b   : > { %1105 = vmatprep.subr.msk.bf16.mxu0 (!%p359_p7), %vm497_vm0, %v1136_v7  ;;  %1076 = vmatpush3.bf16.msra.mxu1 (!%p359_p7), %v1143_v15  ;;  %s1191_s27 = smov (!%p359_p7), 112  }
  0x1c   : > { %s367_s26 = scalar_lea.vmem (!%p359_p7), [#allocation2], %s1107_s25  ;;  %1077 = vmatprep.mubr.msk.bf16.mxu1 (!%p359_p7), %vm1190_vm2, %v1189_v16  ;;  %1081 = vmatprep.subr.bf16.mxu1 (!%p359_p7), %v1189_v16 }
  0x1d   : > { %v1137_v9 = vld [vmem:[%s367_s26] sm:$0xff] (!%p359_p7)   ;;  %v1138_v10 = vld [vmem:[%s367_s26 + $0x8] sm:$0xff] (!%p359_p7)   ;;  %v1139_v11 = vld [vmem:[%s367_s26 + $0x10] sm:$0xff] (!%p359_p7)  }
  0x1e   : > { %1062 = vmatpush3.bf16.msra.mxu0 (!%p359_p7), %v499_v8  ;;  %1063 = vmatprep.mubr.msk.bf16.mxu0 (!%p359_p7), %vm478_vm1, %v1137_v9  ;;  %v1140_v12 = vld [vmem:[%s367_s26 + $0x18] sm:$0xff] (!%p359_p7)   ;;  %v1141_v13 = vld [vmem:[%s367_s26 + $0x20] sm:$0xff] (!%p359_p7)   ;;  %v1142_v14 = vld [vmem:[%s367_s26 + $0x28] sm:$0xff] (!%p359_p7)  }
  0x20   : > { %s1386_s11 = smov (!%p404_p8, %s1001_s11), 3 }
  0x21   : > { %1064 = vmatmul.mubr.msk.bf16.vlgmr.msra.gmra.mrb[0].mxu0 %vm478_vm1, %v1138_v10  ;;  %s1002_s13 = sshll.u32 %s1386_s11, 2  ;;  %s1004_s14 = sshll.u32 %s1386_s11, 3 }
  0x22   : > { %1067 = vmatprep.mubr.msk.bf16.mxu0 %vm478_vm1, %v1139_v11  ;;  %s1303_s16 = scalar_lea.vmem %s1373_s0, %s1002_s13  ;;  %s414_s17 = scalar_lea.vmem %s1381_s8, %s1004_s14 }
  0x29   : > { %1068 = vmatmul.mubr.msk.bf16.gmra.mrb[4].mxu0 %vm478_vm1, %v1140_v12  ;;  %v1144_v12 = vld [vmem:[%s1377_s4] sm:$0xff]  }
  0x2a   : > { %1071 = vmatprep.mubr.msk.bf16.mxu0 %vm478_vm1, %v1141_v13 }
  0x31   : > { %1072 = vmatmul.mubr.msk.bf16.gmra.mrb[8].mxu0 %vm478_vm1, %v1142_v14  ;;  %v1145_v14 = vld [vmem:[%s1377_s4 + $0x8] ss:$0 sps:$4 sm:$0xff]  }
  0x32   : > { %v693_v15 = vsel %vm497_vm0, %v1145_v14, 0 }
  0xf4   : > { %v1065_v17 = vpop.f32.mrb[0].mxu0 }
  0xf5   : > { %v535_v18 = vpop.f32.mrb[1].mxu0  ;;  %v544_v22 = vadd.f32 %v1065_v17, %v1005_v19  ;;  %v1146_v17 = vld [vmem:[%s1303_s16] sm:$0xff]  }
  0xf6   : > { %v1066_v20 = vpop.f32.mrb[2].mxu0  ;;  %v536_v23 = vadd.f32 %v1005_v19, %v535_v18  ;;  %v1147_v18 = vld [vmem:[%s1379_s6] sm:$0xff]  }
  0xf7   : > { %v538_v21 = vpop.f32.mrb[3].mxu0  ;;  %v547_v24 = vadd.f32 %v1066_v20, %v1005_v19  ;;  %v584_v27 = vmax.f32 %v544_v22, 0.0 }
  0xf8   : > { %v539_v25 = vadd.f32 %v1005_v19, %v538_v21  ;;  %v582_v30 = vmax.f32 %v536_v23, 0.0 }
  0xf9   : > { %v585_v33 = vmax.f32 %v547_v24, 0.0  ;;  %v596_v40 = vsel %vm594_vm3, %v584_v27, -inf  ;;  %v1148_v24 = vld [vmem:[%s1379_s6 + $0x8] sm:$0xff]  }
  0xfa   : > { %v583_v37 = vmax.f32 %v539_v25, 0.0  ;;  %v595_v43 = vsel %vm594_vm3, %v582_v30, -inf  ;;  %v1026_v25 = vld [vmem:[%s1380_s7] ss:$0 sm:$0xff] }
  0xfb   : > { %v607_v47 = vsel %vm594_vm3, %v585_v33, -inf }
  0xfc   : > { %v1069_v26 = vpop.f32.mrb[4].mxu0  ;;  %v606_v50 = vsel %vm594_vm3, %v583_v37, -inf }
  0xfd   : > { %v560_v28 = vadd.f32 %v1069_v26, %v1005_v19  ;;  %v551_v29 = vpop.f32.mrb[5].mxu0 }
  0xfe   : > { %v552_v31 = vadd.f32 %v1005_v19, %v551_v29  ;;  %v1070_v32 = vpop.f32.mrb[6].mxu0 }
  0xff   : > { %v588_v34 = vmax.f32 %v560_v28, 0.0  ;;  %v563_v35 = vadd.f32 %v1070_v32, %v1005_v19  ;;  %v554_v36 = vpop.f32.mrb[7].mxu0 }
 0x100   : > { %v586_v38 = vmax.f32 %v552_v31, 0.0  ;;  %v555_v39 = vadd.f32 %v1005_v19, %v554_v36 }
 0x101   : > { %v599_v41 = vsel %vm594_vm3, %v588_v34, -inf  ;;  %v589_v42 = vmax.f32 %v563_v35, 0.0 }
 0x102   : > { %v600_v44 = vmax.f32 %v596_v40, %v599_v41  ;;  %v597_v45 = vsel %vm594_vm3, %v586_v38, -inf  ;;  %v587_v46 = vmax.f32 %v555_v39, 0.0 }
 0x103   : > { %v598_v48 = vmax.f32 %v595_v43, %v597_v45  ;;  %v610_v49 = vsel %vm594_vm3, %v589_v42, -inf }
 0x104   : > { %v611_v51 = vmax.f32 %v607_v47, %v610_v49  ;;  %v608_v52 = vsel %vm594_vm3, %v587_v46, -inf  ;;  %v1073_v53 = vpop.f32.mrb[8].mxu0 }
 0x105   : > { %v609_v54 = vmax.f32 %v606_v50, %v608_v52  ;;  %v576_v55 = vadd.f32 %v1073_v53, %v1005_v19  ;;  %v567_v56 = vpop.f32.mrb[9].mxu0  ;;  %v1034_v52 = vld [vmem:[%s1380_s7 + $0x1] ss:$0 sm:$0xff] }
 0x106   : > { %v568_v57 = vadd.f32 %v1005_v19, %v567_v56  ;;  %v1074_v58 = vpop.f32.mrb[10].mxu0 }
 0x107   : > { %v592_v59 = vmax.f32 %v576_v55, 0.0  ;;  %v579_v60 = vadd.f32 %v1074_v58, %v1005_v19  ;;  %v570_v61 = vpop.f32.mrb[11].mxu0 }
 0x108   : > { %v590_v62 = vmax.f32 %v568_v57, 0.0  ;;  %v571_v63 = vadd.f32 %v1005_v19, %v570_v61 }
 0x109   : > { %v603_v0 = vsel %vm594_vm3, %v592_v59, -inf  ;;  %v593_v1 = vmax.f32 %v579_v60, 0.0 }
 0x10a   : > { %v604_v2 = vmax.f32 %v600_v44, %v603_v0  ;;  %v601_v3 = vsel %vm594_vm3, %v590_v62, -inf  ;;  %v591_v4 = vmax.f32 %v571_v63, 0.0 }
 0x10b   : > { %v602_v5 = vmax.f32 %v598_v48, %v601_v3  ;;  %v614_v6 = vsel %vm594_vm3, %v593_v1, -inf }
 0x10c   : > { %v615_v7 = vmax.f32 %v611_v51, %v614_v6  ;;  %v612_v8 = vsel %vm594_vm3, %v591_v4, -inf }
 0x10d   : > { %v605_v9 = vmax.f32 %v602_v5, %v604_v2  ;;  %v613_v10 = vmax.f32 %v609_v54, %v612_v8 }
 0x10f   : > { %v616_v11 = vmax.f32 %v613_v10, %v615_v7 }
 0x111   : > { %v622_v13 = vpack.c.bf16 %v616_v11, %v605_v9 }
 0x113   : > { %1078 = vmatmul.mubr.msk.bf16.vlgmr.msra.gmra.mrb[0].mxu1 %vm594_vm3, %v622_v13 }
 0x114   : > { %1082 = vmatpush3.bf16.msra.mxu1 %v1144_v12  ;;  %1085 = vmatprep.mubr.msk.bf16.mxu1 %vm1190_vm2, %v1189_v16 }
 0x115   : > { %1083 = vmatprep.subr.bf16.mxu1 %v1189_v16 }
 0x118   : > { %1084 = vmatpush3.bf16.msra.mxu1 %v693_v15 }
 0x119   : > { %1089 = vmatprep.subr.bf16.mxu1 %v1189_v16 }
 0x11f   : > { %1086 = vmatmul.mubr.msk.bf16.vlgmr.msra.gmra.mrb[0].mxu1 %vm478_vm1, %v1146_v17 }
 0x120   : > { %1090 = vmatpush3.bf16.msra.mxu1 %v1147_v18  ;;  %1091 = vmatprep.mubr.msk.bf16.mxu1 %vm1190_vm2, %v1189_v16 }
 0x121   : > { %1095 = vmatprep.subr.bf16.mxu1 %v1189_v16 }
 0x1f2   : > { %v729_v19 = vpop.f32.mrb[0].mxu1 }
 0x1f3   : > { %v1087_v20 = vpop.f32.mrb[1].mxu1 }
 0x1f4   : > { %v732_v21 = vpop.f32.mrb[2].mxu1 }
 0x1f5   : > { %v736_v22 = vpack.c.bf16 %v732_v21, %v729_v19  ;;  %v1088_v23 = vpop.f32.mrb[3].mxu1 }
 0x1f7   : > { %1092 = vmatmul.mubr.msk.bf16.vlgmr.msra.gmra.mrb[4].mxu1 %vm594_vm3, %v736_v22 }
 0x1f8   : > { %1097 = vmatprep.mubr.msk.bf16.mxu1 %vm1190_vm2, %v1189_v16  ;;  %1096 = vmatpush3.bf16.msra.mxu1 %v1148_v24 }
 0x2ca   : > { %v789_v26 = vpop.f32.mrb[4].mxu1 }
 0x2cb   : > { %v790_v27 = vadd.f32 %v1026_v25, %v789_v26  ;;  %v1093_v28 = vpop.f32.mrb[5].mxu1 }
 0x2cc   : > { %v792_v29 = vpop.f32.mrb[6].mxu1 }
 0x2cd   : > { %v1029_v30 = vmul.f32 -1.442695, %v790_v27  ;;  %v793_v31 = vadd.f32 %v1026_v25, %v792_v29  ;;  %v1094_v32 = vpop.f32.mrb[7].mxu1  ;;  %v808_v33 = vmax.f32 %v790_v27, 0.0 }
 0x2cf   : > { %1149 = vpow2.f32 %v1029_v30  ;;  %v1030_v34 = vmul.f32 -1.442695, %v793_v31  ;;  %812 = vrot.lane.b32.xlu0 %v808_v33, %s1191_s27  ;;  %v809_v16 = vmax.f32 %v793_v31, 0.0 }
 0x2d1   : > { %1151 = vpow2.f32 %v1030_v34 }
 0x2d3   : > { %814 = vrot.lane.b32.xlu0 %v809_v16, %s1191_s27 }
 0x2d9   : > { %v1150_v35 = vpop.eup %1149 }
 0x2da   : > { %v802_v36 = vadd.f32 1.0, %v1150_v35 }
 0x2db   : > { %v1152_v37 = vpop.eup %1151 }
 0x2dc   : > { %1153 = vrcp.f32 %v802_v36  ;;  %v803_v38 = vadd.f32 1.0, %v1152_v37 }
 0x2de   : > { %1155 = vrcp.f32 %v803_v38 }
 0x2e6   : > { %v1154_v39 = vpop.eup %1153 }
 0x2e7   : > { %v820_v40 = vsub.f32 1.0, %v1154_v39 }
 0x2e8   : > { %v1156_v41 = vpop.eup %1155 }
 0x2e9   : > { %v822_v42 = vmul.f32 %v820_v40, %v729_v19  ;;  %v821_v43 = vsub.f32 1.0, %v1156_v41 }
 0x2eb   : > { %v823_v44 = vmul.f32 %v821_v43, %v732_v21 }
 0x341   : > { %v813_v45 = vpop.permute.xlu0 %812 }
 0x342   : > { %v818_v46 = vmul.f32 %v1154_v39, %v813_v45 }
 0x344   : > { %v824_v47 = vadd.f32 %v822_v42, %v818_v46 }
 0x345   : > { %v815_v48 = vpop.permute.xlu0 %814 }
 0x346   : > { %v819_v49 = vmul.f32 %v1156_v41, %v815_v48 }
 0x348   : > { %v825_v50 = vadd.f32 %v823_v44, %v819_v49 }
 0x34a   : > { %v826_v51 = vpack.c.bf16 %v825_v50, %v824_v47 }
 0x34c   : > { %1098 = vmatmul.mubr.msk.bf16.vlgmr.msra.gmra.mrb[8].mxu1 %vm594_vm3, %v826_v51 }
 0x41f   : > { %v881_v53 = vpop.f32.mrb[8].mxu1 }
 0x420   : > { %v882_v54 = vadd.f32 %v1034_v52, %v881_v53  ;;  %v1099_v55 = vpop.f32.mrb[9].mxu1 }
 0x421   : > { %v884_v56 = vpop.f32.mrb[10].mxu1 }
 0x422   : > { %v885_v57 = vadd.f32 %v1034_v52, %v884_v56  ;;  %v1100_v58 = vpop.f32.mrb[11].mxu1  ;;  %v900_v59 = vmax.f32 %v882_v54, 0.0  ;;  %v1037_v61 = vmul.f32 -1.442695, %v882_v54 }
 0x424   : > { %904 = vrot.lane.b32.xlu1 %v900_v59, %s1191_s27  ;;  %v901_v60 = vmax.f32 %v885_v57, 0.0  ;;  %1157 = vpow2.f32 %v1037_v61  ;;  %v1038_v62 = vmul.f32 -1.442695, %v885_v57 }
 0x426   : > { %1159 = vpow2.f32 %v1038_v62 }
 0x428   : > { %906 = vrot.lane.b32.xlu1 %v901_v60, %s1191_s27 }
 0x42e   : > { %v1158_v63 = vpop.eup %1157 }
 0x42f   : > { %v894_v0 = vadd.f32 1.0, %v1158_v63 }
 0x430   : > { %v1160_v1 = vpop.eup %1159 }
 0x431   : > { %1161 = vrcp.f32 %v894_v0  ;;  %v895_v2 = vadd.f32 1.0, %v1160_v1 }
 0x433   : > { %1163 = vrcp.f32 %v895_v2 }
 0x43b   : > { %v1162_v3 = vpop.eup %1161 }
 0x43c   : > { %v912_v4 = vsub.f32 1.0, %v1162_v3 }
 0x43d   : > { %v1164_v5 = vpop.eup %1163 }
 0x43e   : > { %v914_v8 = vmul.f32 %v912_v4, %v824_v47  ;;  %v913_v9 = vsub.f32 1.0, %v1164_v5 }
 0x440   : > { %v915_v13 = vmul.f32 %v913_v9, %v825_v50 }
 0x496   : > { %v905_v6 = vpop.permute.xlu1 %904 }
 0x497   : > { %v910_v7 = vmul.f32 %v1162_v3, %v905_v6 }
 0x499   : > { %v916_v10 = vadd.f32 %v914_v8, %v910_v7 }
 0x49a   : > { %v907_v11 = vpop.permute.xlu1 %906 }
 0x49b   : > { %918 = vst.msk [vmem:[%s414_s17] sm:$0xff] %vm594_vm3, %v916_v10  ;;  %v911_v12 = vmul.f32 %v1164_v5, %v907_v11 }
 0x49d   : > { %v917_v14 = vadd.f32 %v915_v13, %v911_v12 }
 0x49f   : > { %919 = vst.msk [vmem:[%s414_s17 + $0x8] sm:$0xff] %vm594_vm3, %v917_v14 }
 0x4a0 PF: > { %p15_p9 = scmp.ge.s32.totalorder %s1254_s9, 4   ;;  %s1382_s27 = smov %s1183_s28 }
 0x4a1   : > { %s1383_s28 = smov %s1263_s12  ;;  %s1384_s29 = smov %s1254_s9 }
 0x4a2   :  { %17 = sbr.rel (!%p15_p9) target bundleno = 2 (0x2), region = 133 }

// kernel: bidaf_forward.23
= control target key start
LH: loop header
LB: loop body
LE: loop exit
PB: predicated region body
PF: predicated region fallthrough
CT: control target
= control target key end

     0   :  { %v104_v0 = vmov 0.0   ;;  %vm105_vm0 = vmmov 0   ;;  %vm37_vm1 = vcmask 130048   ;;  %s141_s1 = inlined_call_operand.vmem [shape: bf16[16,128], index: 1, kind: input, shape index: {}]   ;;  %s142_s0 = inlined_call_operand.vmem [shape: bf16[16,16], index: 0, kind: input, shape index: {}]   ;;  %s143_s2 = inlined_call_operand.vmem [shape: f32[1,128], index: 2, kind: input, shape index: {}]   ;;  %s144_s3 = inlined_call_operand.vmem [shape: f32[16,128], index: 3, kind: output, shape index: {}]  }
   0x1   :  { %94 = vmatprep.subr.bf16.mxu0 %v104_v0  ;;  %v102_v1 = vld [vmem:[%s141_s1] sm:$0xff]   ;;  %96 = vmatprep.mubr.msk.bf16.mxu0 %vm105_vm0, %v104_v0 }
   0x2   :  { %v103_v2 = vld [vmem:[%s142_s0] sm:$0xff]   ;;  %95 = vmatpush3.bf16.msra.mxu0 %v102_v1 }
   0x3   :  { %v88_v3 = vld [vmem:[%s143_s2] ss:$0 sm:$0xff] }
   0x5   :  { %97 = vmatmul.mubr.msk.bf16.vlgmr.msra.gmra.mrb[0].mxu0 %vm37_vm1, %v103_v2 }
  0xd8   :  { %v75_v4 = vpop.f32.mrb[0].mxu0 }
  0xd9   :  { %v76_v5 = vadd.f32 %v88_v3, %v75_v4  ;;  %v98_v6 = vpop.f32.mrb[1].mxu0 }
  0xda   :  { %v78_v7 = vpop.f32.mrb[2].mxu0 }
  0xdb   :  { %82 = vst [vmem:[%s144_s3] sm:$0xff] %v76_v5  ;;  %v79_v8 = vadd.f32 %v88_v3, %v78_v7  ;;  %v99_v9 = vpop.f32.mrb[3].mxu0 }
  0xdd   :  { %83 = vst [vmem:[%s144_s3 + $0x8] sm:$0xff] %v79_v8 }

// kernel: bidaf_forward.20
= control target key start
LH: loop header
LB: loop body
LE: loop exit
PB: predicated region body
PF: predicated region fallthrough
CT: control target
= control target key end

     0   :  { %vm91_vm0 = vcmask 195584   ;;  %vm110_vm1 = vcmask 1043456   ;;  %v668_v10 = vmov 0.0   ;;  %vm669_vm2 = vmmov 0   ;;  %s670_s9 = smov 112   ;;  %s817_s2 = inlined_call_operand.vmem [shape: bf16[24,16], index: 2, kind: input, shape index: {}]   ;;  %s818_s1 = inlined_call_operand.vmem [shape: bf16[6,16,24], index: 1, kind: input, shape index: {}]   ;;  %s819_s5 = inlined_call_operand.vmem [shape: bf16[16,16], index: 5, kind: input, shape index: {}]   ;;  %s820_s4 = inlined_call_operand.vmem [shape: bf16[24,16], index: 4, kind: input, shape index: {}]   ;;  %s821_s0 = inlined_call_operand.vmem [shape: bf16[16,24], index: 0, kind: input, shape index: {}]   ;;  %s822_s6 = inlined_call_operand.vmem [shape: bf16[2,16,32], index: 6, kind: input, shape index: {}]   ;;  %s823_s3 = inlined_call_operand.vmem [shape: f32[1,16], index: 3, kind: input, shape index: {}]   ;;  %s824_s7 = inlined_call_operand.vmem [shape: f32[2,1,32], index: 7, kind: input, shape index: {}]   ;;  %s825_s8 = inlined_call_operand.vmem [shape: f32[16,16], index: 8, kind: output, shape index: {}]  }
   0x1   :  { %v638_v0 = vld [vmem:[%s817_s2] sm:$0xff]   ;;  %v639_v1 = vld [vmem:[%s817_s2 + $0x8] ss:$0 sps:$4 sm:$0xff]   ;;  %v642_v5 = vld [vmem:[%s818_s1 + $0x10] sm:$0xff]   ;;  %604 = vmatprep.subr.bf16.mxu1 %v668_v10  ;;  %606 = vmatprep.mubr.msk.bf16.mxu1 %vm669_vm2, %v668_v10  ;;  %vm207_vm3 = vcmask 130048  }
   0x2   :  { %v640_v2 = vld [vmem:[%s818_s1] sm:$0xff]   ;;  %588 = vmatprep.subr.bf16.mxu0 %v638_v0  ;;  %v112_v3 = vsel %vm110_vm1, %v639_v1, 0  ;;  %v641_v4 = vld [vmem:[%s818_s1 + $0x8] sm:$0xff]   ;;  %v643_v6 = vld [vmem:[%s818_s1 + $0x18] sm:$0xff]  }
   0x3   :  { %589 = vmatpush3.bf16.msra.mxu0 %v638_v0  ;;  %592 = vmatprep.mubr.msk.bf16.mxu0 %vm91_vm0, %v640_v2  ;;  %v644_v7 = vld [vmem:[%s818_s1 + $0x20] sm:$0xff]   ;;  %v645_v8 = vld [vmem:[%s818_s1 + $0x28] sm:$0xff]  }
   0x4   :  { %634 = vmatprep.subr.msk.bf16.mxu0 %vm110_vm1, %v639_v1  ;;  %v646_v9 = vld [vmem:[%s819_s5] sm:$0xff]  }
   0x5   :  { %605 = vmatpush3.bf16.msra.mxu1 %v646_v9  ;;  %v537_v13 = vld [vmem:[%s823_s3] ss:$0 sm:$0xff] }
   0x6   :  { %610 = vmatprep.subr.bf16.mxu1 %v668_v10 }
   0x7   :  { %591 = vmatpush3.bf16.msra.mxu0 %v112_v3 }
   0xa   :  { %593 = vmatmul.mubr.msk.bf16.vlgmr.msra.gmra.mrb[0].mxu0 %vm91_vm0, %v641_v4 }
   0xb   :  { %596 = vmatprep.mubr.msk.bf16.mxu0 %vm91_vm0, %v642_v5 }
  0x12   :  { %597 = vmatmul.mubr.msk.bf16.gmra.mrb[4].mxu0 %vm91_vm0, %v643_v6  ;;  %v647_v6 = vld [vmem:[%s820_s4] sm:$0xff]  }
  0x13   :  { %600 = vmatprep.mubr.msk.bf16.mxu0 %vm91_vm0, %v644_v7 }
  0x1a   :  { %601 = vmatmul.mubr.msk.bf16.gmra.mrb[8].mxu0 %vm91_vm0, %v645_v8  ;;  %v648_v8 = vld [vmem:[%s820_s4 + $0x8] ss:$0 sps:$4 sm:$0xff]  }
  0x1b   :  { %v306_v9 = vsel %vm110_vm1, %v648_v8, 0 }
  0xdd   :  { %v594_v11 = vpop.f32.mrb[0].mxu0 }
  0xde   :  { %v148_v12 = vpop.f32.mrb[1].mxu0  ;;  %v157_v16 = vadd.f32 %v594_v11, %v537_v13  ;;  %v649_v11 = vld [vmem:[%s821_s0] sm:$0xff]  }
  0xdf   :  { %v595_v14 = vpop.f32.mrb[2].mxu0  ;;  %v149_v17 = vadd.f32 %v537_v13, %v148_v12  ;;  %v650_v12 = vld [vmem:[%s822_s6] sm:$0xff]  }
  0xe0   :  { %v151_v15 = vpop.f32.mrb[3].mxu0  ;;  %v160_v18 = vadd.f32 %v595_v14, %v537_v13  ;;  %v197_v21 = vmax.f32 %v157_v16, 0.0 }
  0xe1   :  { %v152_v19 = vadd.f32 %v537_v13, %v151_v15  ;;  %v195_v24 = vmax.f32 %v149_v17, 0.0 }
  0xe2   :  { %v198_v27 = vmax.f32 %v160_v18, 0.0  ;;  %v209_v34 = vsel %vm207_vm3, %v197_v21, -inf  ;;  %v651_v18 = vld [vmem:[%s822_s6 + $0x8] sm:$0xff]  }
  0xe3   :  { %v196_v31 = vmax.f32 %v152_v19, 0.0  ;;  %v208_v37 = vsel %vm207_vm3, %v195_v24, -inf  ;;  %v558_v19 = vld [vmem:[%s824_s7] ss:$0 sm:$0xff] }
  0xe4   :  { %v220_v41 = vsel %vm207_vm3, %v198_v27, -inf }
  0xe5   :  { %v598_v20 = vpop.f32.mrb[4].mxu0  ;;  %v219_v44 = vsel %vm207_vm3, %v196_v31, -inf }
  0xe6   :  { %v173_v22 = vadd.f32 %v598_v20, %v537_v13  ;;  %v164_v23 = vpop.f32.mrb[5].mxu0 }
  0xe7   :  { %v165_v25 = vadd.f32 %v537_v13, %v164_v23  ;;  %v599_v26 = vpop.f32.mrb[6].mxu0 }
  0xe8   :  { %v201_v28 = vmax.f32 %v173_v22, 0.0  ;;  %v176_v29 = vadd.f32 %v599_v26, %v537_v13  ;;  %v167_v30 = vpop.f32.mrb[7].mxu0 }
  0xe9   :  { %v199_v32 = vmax.f32 %v165_v25, 0.0  ;;  %v168_v33 = vadd.f32 %v537_v13, %v167_v30 }
  0xea   :  { %v212_v35 = vsel %vm207_vm3, %v201_v28, -inf  ;;  %v202_v36 = vmax.f32 %v176_v29, 0.0 }
  0xeb   :  { %v213_v38 = vmax.f32 %v209_v34, %v212_v35  ;;  %v210_v39 = vsel %vm207_vm3, %v199_v32, -inf  ;;  %v200_v40 = vmax.f32 %v168_v33, 0.0 }
  0xec   :  { %v211_v42 = vmax.f32 %v208_v37, %v210_v39  ;;  %v223_v43 = vsel %vm207_vm3, %v202_v36, -inf }
  0xed   :  { %v224_v45 = vmax.f32 %v220_v41, %v223_v43  ;;  %v221_v46 = vsel %vm207_vm3, %v200_v40, -inf  ;;  %v602_v47 = vpop.f32.mrb[8].mxu0 }
  0xee   :  { %v222_v48 = vmax.f32 %v219_v44, %v221_v46  ;;  %v189_v49 = vadd.f32 %v602_v47, %v537_v13  ;;  %v180_v50 = vpop.f32.mrb[9].mxu0  ;;  %v566_v46 = vld [vmem:[%s824_s7 + $0x1] ss:$0 sm:$0xff] }
  0xef   :  { %v181_v51 = vadd.f32 %v537_v13, %v180_v50  ;;  %v603_v52 = vpop.f32.mrb[10].mxu0 }
  0xf0   :  { %v205_v53 = vmax.f32 %v189_v49, 0.0  ;;  %v192_v54 = vadd.f32 %v603_v52, %v537_v13  ;;  %v183_v55 = vpop.f32.mrb[11].mxu0 }
  0xf1   :  { %v203_v56 = vmax.f32 %v181_v51, 0.0  ;;  %v184_v57 = vadd.f32 %v537_v13, %v183_v55 }
  0xf2   :  { %v216_v58 = vsel %vm207_vm3, %v205_v53, -inf  ;;  %v206_v59 = vmax.f32 %v192_v54, 0.0 }
  0xf3   :  { %v217_v60 = vmax.f32 %v213_v38, %v216_v58  ;;  %v214_v61 = vsel %vm207_vm3, %v203_v56, -inf  ;;  %v204_v62 = vmax.f32 %v184_v57, 0.0 }
  0xf4   :  { %v215_v63 = vmax.f32 %v211_v42, %v214_v61  ;;  %v227_v0 = vsel %vm207_vm3, %v206_v59, -inf }
  0xf5   :  { %v228_v1 = vmax.f32 %v224_v45, %v227_v0  ;;  %v225_v2 = vsel %vm207_vm3, %v204_v62, -inf }
  0xf6   :  { %v218_v3 = vmax.f32 %v215_v63, %v217_v60  ;;  %v226_v4 = vmax.f32 %v222_v48, %v225_v2 }
  0xf8   :  { %v229_v5 = vmax.f32 %v226_v4, %v228_v1 }
  0xfa   :  { %v235_v7 = vpack.c.bf16 %v229_v5, %v218_v3 }
  0xfc   :  { %607 = vmatmul.mubr.msk.bf16.vlgmr.msra.gmra.mrb[0].mxu1 %vm207_vm3, %v235_v7 }
  0xfd   :  { %611 = vmatpush3.bf16.msra.mxu1 %v647_v6  ;;  %614 = vmatprep.mubr.msk.bf16.mxu1 %vm669_vm2, %v668_v10 }
  0xfe   :  { %612 = vmatprep.subr.bf16.mxu1 %v668_v10 }
 0x101   :  { %613 = vmatpush3.bf16.msra.mxu1 %v306_v9 }
 0x102   :  { %618 = vmatprep.subr.bf16.mxu1 %v668_v10 }
 0x108   :  { %615 = vmatmul.mubr.msk.bf16.vlgmr.msra.gmra.mrb[0].mxu1 %vm91_vm0, %v649_v11 }
 0x109   :  { %619 = vmatpush3.bf16.msra.mxu1 %v650_v12  ;;  %620 = vmatprep.mubr.msk.bf16.mxu1 %vm669_vm2, %v668_v10 }
 0x10a   :  { %624 = vmatprep.subr.bf16.mxu1 %v668_v10 }
 0x1db   :  { %v342_v13 = vpop.f32.mrb[0].mxu1 }
 0x1dc   :  { %v616_v14 = vpop.f32.mrb[1].mxu1 }
 0x1dd   :  { %v345_v15 = vpop.f32.mrb[2].mxu1 }
 0x1de   :  { %v349_v16 = vpack.c.bf16 %v345_v15, %v342_v13  ;;  %v617_v17 = vpop.f32.mrb[3].mxu1 }
 0x1e0   :  { %621 = vmatmul.mubr.msk.bf16.vlgmr.msra.gmra.mrb[4].mxu1 %vm207_vm3, %v349_v16 }
 0x1e1   :  { %626 = vmatprep.mubr.msk.bf16.mxu1 %vm669_vm2, %v668_v10  ;;  %625 = vmatpush3.bf16.msra.mxu1 %v651_v18 }
 0x2b3   :  { %v402_v20 = vpop.f32.mrb[4].mxu1 }
 0x2b4   :  { %v403_v21 = vadd.f32 %v558_v19, %v402_v20  ;;  %v622_v22 = vpop.f32.mrb[5].mxu1 }
 0x2b5   :  { %v405_v23 = vpop.f32.mrb[6].mxu1 }
 0x2b6   :  { %v561_v24 = vmul.f32 -1.442695, %v403_v21  ;;  %v406_v25 = vadd.f32 %v558_v19, %v405_v23  ;;  %v623_v26 = vpop.f32.mrb[7].mxu1  ;;  %v421_v27 = vmax.f32 %v403_v21, 0.0 }
 0x2b8   :  { %652 = vpow2.f32 %v561_v24  ;;  %v562_v28 = vmul.f32 -1.442695, %v406_v25  ;;  %425 = vrot.lane.b32.xlu0 %v421_v27, %s670_s9  ;;  %v422_v10 = vmax.f32 %v406_v25, 0.0 }
 0x2ba   :  { %654 = vpow2.f32 %v562_v28 }
 0x2bc   :  { %427 = vrot.lane.b32.xlu0 %v422_v10, %s670_s9 }
 0x2c2   :  { %v653_v29 = vpop.eup %652 }
 0x2c3   :  { %v415_v30 = vadd.f32 1.0, %v653_v29 }
 0x2c4   :  { %v655_v31 = vpop.eup %654 }
 0x2c5   :  { %656 = vrcp.f32 %v415_v30  ;;  %v416_v32 = vadd.f32 1.0, %v655_v31 }
 0x2c7   :  { %658 = vrcp.f32 %v416_v32 }
 0x2cf   :  { %v657_v33 = vpop.eup %656 }
 0x2d0   :  { %v433_v34 = vsub.f32 1.0, %v657_v33 }
 0x2d1   :  { %v659_v35 = vpop.eup %658 }
 0x2d2   :  { %v435_v36 = vmul.f32 %v433_v34, %v342_v13  ;;  %v434_v37 = vsub.f32 1.0, %v659_v35 }
 0x2d4   :  { %v436_v38 = vmul.f32 %v434_v37, %v345_v15 }
 0x32a   :  { %v426_v39 = vpop.permute.xlu0 %425 }
 0x32b   :  { %v431_v40 = vmul.f32 %v657_v33, %v426_v39 }
 0x32d   :  { %v437_v41 = vadd.f32 %v435_v36, %v431_v40 }
 0x32e   :  { %v428_v42 = vpop.permute.xlu0 %427 }
 0x32f   :  { %v432_v43 = vmul.f32 %v659_v35, %v428_v42 }
 0x331   :  { %v438_v44 = vadd.f32 %v436_v38, %v432_v43 }
 0x333   :  { %v439_v45 = vpack.c.bf16 %v438_v44, %v437_v41 }
 0x335   :  { %627 = vmatmul.mubr.msk.bf16.vlgmr.msra.gmra.mrb[8].mxu1 %vm207_vm3, %v439_v45 }
 0x408   :  { %v494_v47 = vpop.f32.mrb[8].mxu1 }
 0x409   :  { %v495_v48 = vadd.f32 %v566_v46, %v494_v47  ;;  %v628_v49 = vpop.f32.mrb[9].mxu1 }
 0x40a   :  { %v497_v50 = vpop.f32.mrb[10].mxu1 }
 0x40b   :  { %v498_v51 = vadd.f32 %v566_v46, %v497_v50  ;;  %v629_v52 = vpop.f32.mrb[11].mxu1  ;;  %v513_v53 = vmax.f32 %v495_v48, 0.0  ;;  %v569_v55 = vmul.f32 -1.442695, %v495_v48 }
 0x40d   :  { %517 = vrot.lane.b32.xlu1 %v513_v53, %s670_s9  ;;  %v514_v54 = vmax.f32 %v498_v51, 0.0  ;;  %660 = vpow2.f32 %v569_v55  ;;  %v570_v56 = vmul.f32 -1.442695, %v498_v51 }
 0x40f   :  { %662 = vpow2.f32 %v570_v56 }
 0x411   :  { %519 = vrot.lane.b32.xlu1 %v514_v54, %s670_s9 }
 0x417   :  { %v661_v57 = vpop.eup %660 }
 0x418   :  { %v507_v58 = vadd.f32 1.0, %v661_v57 }
 0x419   :  { %v663_v59 = vpop.eup %662 }
 0x41a   :  { %664 = vrcp.f32 %v507_v58  ;;  %v508_v60 = vadd.f32 1.0, %v663_v59 }
 0x41c   :  { %666 = vrcp.f32 %v508_v60 }
 0x424   :  { %v665_v61 = vpop.eup %664 }
 0x425   :  { %v525_v62 = vsub.f32 1.0, %v665_v61 }
 0x426   :  { %v667_v63 = vpop.eup %666 }
 0x427   :  { %v527_v2 = vmul.f32 %v525_v62, %v437_v41  ;;  %v526_v3 = vsub.f32 1.0, %v667_v63 }
 0x429   :  { %v528_v7 = vmul.f32 %v526_v3, %v438_v44 }
 0x47f   :  { %v518_v0 = vpop.permute.xlu1 %517 }
 0x480   :  { %v523_v1 = vmul.f32 %v665_v61, %v518_v0 }
 0x482   :  { %v529_v4 = vadd.f32 %v527_v2, %v523_v1 }
 0x483   :  { %v520_v5 = vpop.permute.xlu1 %519 }
 0x484   :  { %531 = vst.msk [vmem:[%s825_s8] sm:$0xff] %vm207_vm3, %v529_v4  ;;  %v524_v6 = vmul.f32 %v667_v63, %v520_v5 }
 0x486   :  { %v530_v8 = vadd.f32 %v528_v7, %v524_v6 }
 0x488   :  { %532 = vst.msk [vmem:[%s825_s8 + $0x8] sm:$0xff] %vm207_vm3, %v530_v8 }

// kernel: bidaf_forward.22
= control target key start
LH: loop header
LB: loop body
LE: loop exit
PB: predicated region body
PF: predicated region fallthrough
CT: control target
= control target key end

     0   :  { %vm23_vm0 = vcmask 257024   ;;  %v2407_v0 = vmov 0.0   ;;  %vm2408_vm1 = vmmov 0   ;;  %vm42_vm2 = vcmask 261120   ;;  %s2410_s21 = smov 80   ;;  %s2411_s22 = smov 16   ;;  %s3107_s1 = inlined_call_operand.vmem [shape: bf16[32,64], index: 1, kind: input, shape index: {}]   ;;  %s3108_s0 = inlined_call_operand.vmem [shape: f32[16,4,64], index: 0, kind: input, shape index: {}]   ;;  %s3109_s2 = inlined_call_operand.vmem [shape: f32[16,4,1], index: 2, kind: input, shape index: {}]   ;;  %s3110_s3 = inlined_call_operand.vmem [shape: f32[4,32], index: 3, kind: input, shape index: {}]   ;;  %s3111_s4 = inlined_call_operand.vmem [shape: f32[16,4,16], index: 4, kind: output, shape index: {}]  }
   0x1   :  { %2137 = vmatprep.subr.bf16.mxu0 %v2407_v0  ;;  %v2443_v1 = vld [vmem:[%s3107_s1] sm:$0xff]   ;;  %2141 = vmatprep.mubr.msk.bf16.mxu0 %vm2408_vm1, %v2407_v0  ;;  %24 = vst.msk [vmem:[#allocation2] sm:$0xf] %vm23_vm0, %v2407_v0  ;;  %v2456_v2 = vld [vmem:[%s3107_s1 + $0x8] sm:$0xff]   ;;  %vm25_vm3 = vcmask 125952   ;;  %v2409_v5 = vmov 0  }
   0x2   :  { %2145 = vmatprep.subr.bf16.mxu1 %v2407_v0  ;;  %2149 = vmatprep.mubr.msk.bf16.mxu1 %vm2408_vm1, %v2407_v0  ;;  %26 = vst.msk [vmem:[#allocation3] sm:$0xf] %vm25_vm3, %v2407_v0  ;;  %v27_v6 = vld [vmem:[%s3108_s0] sm:$0xf]  ;;  %s2412_s25 = smov 112   ;;  %s2413_s26 = smov 96  }
   0x3   :  { %2138 = vmatpush3.bf16.msra.mxu0 %v2443_v1  ;;  %2146 = vmatpush3.bf16.msra.mxu1 %v2443_v1  ;;  %v94_v14 = vld [vmem:[%s3109_s2] sm:$0xf]  ;;  %vm147_vm4 = vcmask 130048   ;;  %v2014_v48 = vld [vmem:[%s3108_s0 + $0x4] sm:$0xf] }
   0x4   :  { %2139 = vmatprep.subr.bf16.mxu0 %v2407_v0  ;;  %2147 = vmatprep.subr.bf16.mxu1 %v2407_v0  ;;  %v123_v26 = vsub.f32 1.0, %v94_v14  ;;  %v2496_v32 = vld [vmem:[%s3110_s3] sm:$0xf]  ;;  %v2017_v61 = vld [vmem:[%s3109_s2 + $0x4] sm:$0xf] }
   0x5   :  { %2272 = vset.pattern.permute.xlu0 %v2409_v5  ;;  %2273 = vset.pattern.permute.xlu1 %v2409_v5 }
   0x7   :  { %2140 = vmatpush3.bf16.msra.mxu0 %v2456_v2  ;;  %2148 = vmatpush3.bf16.msra.mxu1 %v2456_v2 }
   0x8   :  { %v28_v3 = vld [vmem:[#allocation2] sm:$0xf]  ;;  %2153 = vmatprep.subr.bf16.mxu0 %v2407_v0  ;;  %2161 = vmatprep.subr.bf16.mxu1 %v2407_v0 }
   0x9   :  { %v29_v4 = vpack.c.bf16 %v28_v3, %v28_v3  ;;  %v95_v13 = vld [vmem:[#allocation3] sm:$0xf]  ;;  %v151_v35 = vld [vmem:[#allocation2] sm:$0xf] }
   0xb   :  { %2142 = vmatmul.mubr.msk.bf16.vlgmr.msra.gmra.mrb[0].mxu0 %vm42_vm2, %v29_v4 }
   0xc   :  { %2154 = vmatpush3.bf16.msra.mxu0 %v2443_v1  ;;  %2157 = vmatprep.mubr.msk.bf16.mxu0 %vm2408_vm1, %v2407_v0 }
   0xd   :  { %2155 = vmatprep.subr.bf16.mxu0 %v2407_v0 }
  0x10   :  { %2156 = vmatpush3.bf16.msra.mxu0 %v2456_v2 }
  0x11   :  { %2169 = vmatprep.subr.bf16.mxu0 %v2407_v0 }
  0xde   :  { %v80_v7 = vpop.f32.mrb[0].mxu0 }
  0xdf   :  { %v86_v8 = vadd.f32 %v80_v7, %v27_v6  ;;  %v2143_v9 = vpop.f32.mrb[1].mxu0  ;;  %v246_v6 = vsub.f32 1.0, %v2017_v61 }
  0xe0   :  { %v83_v10 = vpop.f32.mrb[2].mxu0 }
  0xe1   :  { %2276 = vtanh.f32 %v86_v8  ;;  %v2144_v11 = vpop.f32.mrb[3].mxu0  ;;  %v2013_v15 = vmul.f32 -1.442695, %v86_v8 }
  0xe3   :  { %2278 = vpow2.f32 %v2013_v15 }
  0xeb   :  { %v2277_v12 = vpop.eup %2276 }
  0xec   :  { %102 = vrot.lane.b32.xlu0 %v2277_v12, %s2410_s21 }
  0xed   :  { %v2279_v16 = vpop.eup %2278 }
  0xee   :  { %v90_v17 = vadd.f32 1.0, %v2279_v16 }
  0xf0   :  { %97 = vrot.lane.b32.xlu0 %v95_v13, %s2411_s22  ;;  %2280 = vrcp.f32 %v90_v17 }
  0xf4   :  { %119 = vperm.xlu0 %2272, %v94_v14  }
  0xfa   :  { %v2281_v18 = vpop.eup %2280 }
 0x15e   :  { %v103_v19 = vpop.permute.xlu0 %102 }
 0x15f   :  { %v105_v20 = vmul.f32 %v2281_v18, %v103_v19 }
 0x161   :  { %107 = vrot.lane.b32.xlu1 %v105_v20, %s2411_s22 }
 0x162   :  { %v98_v21 = vpop.permute.xlu0 %97 }
 0x163   :  { %v100_v22 = vmul.f32 %v2281_v18, %v98_v21 }
 0x173   :  { %v2491_v31 = vpop.permute.xlu0 %119 }
 0x1d3   :  { %v108_v23 = vpop.permute.xlu1 %107 }
 0x1d4   :  { %v110_v24 = vadd.f32 %v108_v23, %v100_v22 }
 0x1d6   :  { %2282 = vtanh.f32 %v110_v24  ;;  %v122_v42 = vmul.f32 %v2491_v31, %v110_v24 }
 0x1e0   :  { %v2283_v25 = vpop.eup %2282 }
 0x1e1   :  { %113 = vrot.lane.b32.xlu1 %v2283_v25, %s2411_s22 }
 0x1e5   :  { %126 = vperm.xlu1 %2273, %v123_v26  }
 0x253   :  { %v114_v27 = vpop.permute.xlu1 %113 }
 0x254   :  { %v2484_v28 = vmul.f32 %v2281_v18, %v114_v27  ;;  %v2019_v27 = vld [vmem:[%s3108_s0 + $0x8] sm:$0xf] }
 0x256   :  { %144 = vrot.lane.b32.xlu0 %v2484_v28, %s2412_s25  ;;  %141 = vrot.lane.b32.xlu1 %v2484_v28, %s2413_s26 }
 0x264   :  { %v127_v29 = vpop.permute.xlu1 %126 }
 0x265   :  { %v129_v30 = vmul.f32 %v127_v29, %v95_v13  ;;  %v152_v38 = vmul.f32 %v151_v35, %v127_v29 }
 0x267   :  { %131 = vrot.lane.b32.xlu1 %v129_v30, %s2411_s22 }
 0x2c8   :  { %v145_v33 = vpop.permute.xlu0 %144  ;;  %v142_v34 = vpop.permute.xlu1 %141 }
 0x2c9   :  { %v148_v36 = vsel %vm147_vm4, %v142_v34, %v145_v33 }
 0x2ca   :  { %v149_v37 = vmul.f32 %v148_v36, %v2496_v32 }
 0x2cc   :  { %v150_v39 = vmul.f32 %v149_v37, %v2491_v31 }
 0x2ce   :  { %v153_v40 = vadd.f32 %v152_v38, %v150_v39 }
 0x2d0   :  { %154 = vst.msk [vmem:[#allocation2] sm:$0xf] %vm23_vm0, %v153_v40 }
 0x2d7   :  { %v163_v41 = vld [vmem:[#allocation2] sm:$0xf] }
 0x2d8   :  { %v164_v43 = vpack.c.bf16 %v163_v41, %v163_v41  ;;  %v273_v16 = vld [vmem:[#allocation2] sm:$0xf] }
 0x2d9   :  { %v132_v44 = vpop.permute.xlu1 %131 }
 0x2da   :  { %v134_v45 = vadd.f32 %v132_v44, %v122_v42  ;;  %2150 = vmatmul.mubr.msk.bf16.vlgmr.msra.gmra.mrb[0].mxu1 %vm42_vm2, %v164_v43  ;;  %v2022_v43 = vld [vmem:[%s3109_s2 + $0x8] sm:$0xf] }
 0x2db   :  { %2162 = vmatpush3.bf16.msra.mxu1 %v2443_v1  ;;  %2165 = vmatprep.mubr.msk.bf16.mxu1 %vm2408_vm1, %v2407_v0 }
 0x2dc   :  { %136 = vrot.lane.b32.xlu0 %v134_v45, %s2412_s25  ;;  %2163 = vmatprep.subr.bf16.mxu1 %v2407_v0 }
 0x2df   :  { %2164 = vmatpush3.bf16.msra.mxu1 %v2456_v2 }
 0x2e0   :  { %2177 = vmatprep.subr.bf16.mxu1 %v2407_v0 }
 0x34e   :  { %v137_v46 = vpop.permute.xlu0 %136 }
 0x34f   :  { %139 = vst.msk [vmem:[#allocation3] sm:$0xf] %vm25_vm3, %v137_v46 }
 0x356   :  { %v218_v47 = vld [vmem:[#allocation3] sm:$0xf] }
 0x357   :  { %220 = vrot.lane.b32.xlu0 %v218_v47, %s2411_s22 }
 0x3ad   :  { %v202_v49 = vpop.f32.mrb[0].mxu1 }
 0x3ae   :  { %v208_v50 = vadd.f32 %v2014_v48, %v202_v49  ;;  %v2151_v51 = vpop.f32.mrb[1].mxu1  ;;  %v369_v49 = vsub.f32 1.0, %v2022_v43 }
 0x3af   :  { %v205_v52 = vpop.f32.mrb[2].mxu1 }
 0x3b0   :  { %2284 = vtanh.f32 %v208_v50  ;;  %v2152_v53 = vpop.f32.mrb[3].mxu1  ;;  %v2016_v55 = vmul.f32 -1.442695, %v208_v50 }
 0x3b2   :  { %2286 = vpow2.f32 %v2016_v55 }
 0x3ba   :  { %v2285_v54 = vpop.eup %2284 }
 0x3bb   :  { %225 = vrot.lane.b32.xlu1 %v2285_v54, %s2410_s21 }
 0x3bc   :  { %v2287_v56 = vpop.eup %2286 }
 0x3bd   :  { %v212_v57 = vadd.f32 1.0, %v2287_v56 }
 0x3bf   :  { %2288 = vrcp.f32 %v212_v57 }
 0x3c9   :  { %v2289_v58 = vpop.eup %2288  ;;  %v221_v62 = vpop.permute.xlu0 %220 }
 0x3ca   :  { %v223_v63 = vmul.f32 %v2289_v58, %v221_v62 }
 0x42d   :  { %v226_v59 = vpop.permute.xlu1 %225 }
 0x42e   :  { %v228_v60 = vmul.f32 %v2289_v58, %v226_v59 }
 0x430   :  { %230 = vrot.lane.b32.xlu1 %v228_v60, %s2411_s22 }
 0x434   :  { %242 = vperm.xlu1 %2273, %v2017_v61  }
 0x4a2   :  { %v231_v3 = vpop.permute.xlu1 %230 }
 0x4a3   :  { %v233_v4 = vadd.f32 %v231_v3, %v223_v63 }
 0x4a5   :  { %2290 = vtanh.f32 %v233_v4 }
 0x4af   :  { %v2291_v5 = vpop.eup %2290 }
 0x4b0   :  { %236 = vrot.lane.b32.xlu0 %v2291_v5, %s2411_s22 }
 0x4b3   :  { %v2529_v11 = vpop.permute.xlu1 %242 }
 0x4b4   :  { %249 = vperm.xlu0 %2272, %v246_v6   ;;  %v245_v21 = vmul.f32 %v2529_v11, %v233_v4 }
 0x522   :  { %v237_v7 = vpop.permute.xlu0 %236 }
 0x523   :  { %v2522_v8 = vmul.f32 %v2289_v58, %v237_v7 }
 0x525   :  { %267 = vrot.lane.b32.xlu0 %v2522_v8, %s2412_s25  ;;  %264 = vrot.lane.b32.xlu1 %v2522_v8, %s2413_s26 }
 0x533   :  { %v250_v9 = vpop.permute.xlu0 %249 }
 0x534   :  { %v252_v10 = vmul.f32 %v250_v9, %v218_v47  ;;  %v274_v17 = vmul.f32 %v273_v16, %v250_v9 }
 0x536   :  { %254 = vrot.lane.b32.xlu1 %v252_v10, %s2411_s22  ;;  %v2024_v10 = vld [vmem:[%s3108_s0 + $0xc] sm:$0xf] }
 0x597   :  { %v268_v12 = vpop.permute.xlu0 %267  ;;  %v265_v13 = vpop.permute.xlu1 %264 }
 0x598   :  { %v270_v14 = vsel %vm147_vm4, %v265_v13, %v268_v12 }
 0x599   :  { %v271_v15 = vmul.f32 %v270_v14, %v2496_v32 }
 0x59b   :  { %v272_v18 = vmul.f32 %v271_v15, %v2529_v11 }
 0x59d   :  { %v275_v19 = vadd.f32 %v274_v17, %v272_v18 }
 0x59f   :  { %276 = vst.msk [vmem:[#allocation2] sm:$0xf] %vm23_vm0, %v275_v19 }
 0x5a6   :  { %v286_v20 = vld [vmem:[#allocation2] sm:$0xf] }
 0x5a7   :  { %v287_v22 = vpack.c.bf16 %v286_v20, %v286_v20  ;;  %v396_v59 = vld [vmem:[#allocation2] sm:$0xf] }
 0x5a8   :  { %v255_v23 = vpop.permute.xlu1 %254 }
 0x5a9   :  { %v257_v24 = vadd.f32 %v255_v23, %v245_v21  ;;  %2158 = vmatmul.mubr.msk.bf16.vlgmr.msra.gmra.mrb[4].mxu0 %vm42_vm2, %v287_v22 }
 0x5aa   :  { %2170 = vmatpush3.bf16.msra.mxu0 %v2443_v1  ;;  %2173 = vmatprep.mubr.msk.bf16.mxu0 %vm2408_vm1, %v2407_v0 }
 0x5ab   :  { %259 = vrot.lane.b32.xlu0 %v257_v24, %s2412_s25  ;;  %2171 = vmatprep.subr.bf16.mxu0 %v2407_v0  ;;  %v2027_v24 = vld [vmem:[%s3109_s2 + $0xc] sm:$0xf] }
 0x5ae   :  { %2172 = vmatpush3.bf16.msra.mxu0 %v2456_v2 }
 0x5af   :  { %2185 = vmatprep.subr.bf16.mxu0 %v2407_v0 }
 0x61d   :  { %v260_v25 = vpop.permute.xlu0 %259 }
 0x61e   :  { %262 = vst.msk [vmem:[#allocation3] sm:$0xf] %vm25_vm3, %v260_v25 }
 0x625   :  { %v341_v26 = vld [vmem:[#allocation3] sm:$0xf] }
 0x626   :  { %343 = vrot.lane.b32.xlu0 %v341_v26, %s2411_s22 }
 0x67c   :  { %v325_v29 = vpop.f32.mrb[4].mxu0 }
 0x67d   :  { %v331_v30 = vadd.f32 %v2019_v27, %v325_v29  ;;  %v2159_v33 = vpop.f32.mrb[5].mxu0 }
 0x67e   :  { %v328_v34 = vpop.f32.mrb[6].mxu0  ;;  %v492_v33 = vsub.f32 1.0, %v2027_v24 }
 0x67f   :  { %2292 = vtanh.f32 %v331_v30  ;;  %v2160_v35 = vpop.f32.mrb[7].mxu0  ;;  %v2021_v37 = vmul.f32 -1.442695, %v331_v30 }
 0x681   :  { %2294 = vpow2.f32 %v2021_v37 }
 0x689   :  { %v2293_v36 = vpop.eup %2292 }
 0x68a   :  { %348 = vrot.lane.b32.xlu1 %v2293_v36, %s2410_s21 }
 0x68b   :  { %v2295_v38 = vpop.eup %2294 }
 0x68c   :  { %v335_v39 = vadd.f32 1.0, %v2295_v38 }
 0x68e   :  { %2296 = vrcp.f32 %v335_v39 }
 0x698   :  { %v2297_v40 = vpop.eup %2296  ;;  %v344_v44 = vpop.permute.xlu0 %343 }
 0x699   :  { %v346_v45 = vmul.f32 %v2297_v40, %v344_v44 }
 0x6fc   :  { %v349_v41 = vpop.permute.xlu1 %348 }
 0x6fd   :  { %v351_v42 = vmul.f32 %v2297_v40, %v349_v41 }
 0x6ff   :  { %353 = vrot.lane.b32.xlu1 %v351_v42, %s2411_s22 }
 0x703   :  { %365 = vperm.xlu1 %2273, %v2022_v43  }
 0x771   :  { %v354_v46 = vpop.permute.xlu1 %353 }
 0x772   :  { %v356_v47 = vadd.f32 %v354_v46, %v346_v45 }
 0x774   :  { %2298 = vtanh.f32 %v356_v47 }
 0x77e   :  { %v2299_v48 = vpop.eup %2298 }
 0x77f   :  { %359 = vrot.lane.b32.xlu0 %v2299_v48, %s2411_s22 }
 0x782   :  { %v2562_v54 = vpop.permute.xlu1 %365 }
 0x783   :  { %372 = vperm.xlu0 %2272, %v369_v49   ;;  %v368_v3 = vmul.f32 %v2562_v54, %v356_v47 }
 0x7f1   :  { %v360_v50 = vpop.permute.xlu0 %359 }
 0x7f2   :  { %v2555_v51 = vmul.f32 %v2297_v40, %v360_v50 }
 0x7f4   :  { %390 = vrot.lane.b32.xlu0 %v2555_v51, %s2412_s25  ;;  %387 = vrot.lane.b32.xlu1 %v2555_v51, %s2413_s26 }
 0x802   :  { %v373_v52 = vpop.permute.xlu0 %372 }
 0x803   :  { %v375_v53 = vmul.f32 %v373_v52, %v341_v26  ;;  %v397_v60 = vmul.f32 %v396_v59, %v373_v52 }
 0x805   :  { %377 = vrot.lane.b32.xlu1 %v375_v53, %s2411_s22 }
 0x866   :  { %v391_v55 = vpop.permute.xlu0 %390  ;;  %v388_v56 = vpop.permute.xlu1 %387 }
 0x867   :  { %v393_v57 = vsel %vm147_vm4, %v388_v56, %v391_v55  ;;  %v2029_v56 = vld [vmem:[%s3108_s0 + $0x10] sm:$0xf] }
 0x868   :  { %v394_v58 = vmul.f32 %v393_v57, %v2496_v32 }
 0x86a   :  { %v395_v61 = vmul.f32 %v394_v58, %v2562_v54 }
 0x86c   :  { %v398_v62 = vadd.f32 %v397_v60, %v395_v61 }
 0x86e   :  { %399 = vst.msk [vmem:[#allocation2] sm:$0xf] %vm23_vm0, %v398_v62 }
 0x875   :  { %v409_v63 = vld [vmem:[#allocation2] sm:$0xf] }
 0x876   :  { %v410_v4 = vpack.c.bf16 %v409_v63, %v409_v63  ;;  %v519_v43 = vld [vmem:[#allocation2] sm:$0xf] }
 0x877   :  { %v378_v5 = vpop.permute.xlu1 %377 }
 0x878   :  { %v380_v6 = vadd.f32 %v378_v5, %v368_v3  ;;  %2166 = vmatmul.mubr.msk.bf16.vlgmr.msra.gmra.mrb[4].mxu1 %vm42_vm2, %v410_v4 }
 0x879   :  { %2178 = vmatpush3.bf16.msra.mxu1 %v2443_v1  ;;  %2181 = vmatprep.mubr.msk.bf16.mxu1 %vm2408_vm1, %v2407_v0 }
 0x87a   :  { %382 = vrot.lane.b32.xlu0 %v380_v6, %s2412_s25  ;;  %2179 = vmatprep.subr.bf16.mxu1 %v2407_v0 }
 0x87d   :  { %2180 = vmatpush3.bf16.msra.mxu1 %v2456_v2 }
 0x87e   :  { %2193 = vmatprep.subr.bf16.mxu1 %v2407_v0 }
 0x8ec   :  { %v383_v7 = vpop.permute.xlu0 %382 }
 0x8ed   :  { %385 = vst.msk [vmem:[#allocation3] sm:$0xf] %vm25_vm3, %v383_v7 }
 0x8f4   :  { %v464_v9 = vld [vmem:[#allocation3] sm:$0xf] }
 0x8f5   :  { %466 = vrot.lane.b32.xlu0 %v464_v9, %s2411_s22 }
 0x94b   :  { %v448_v12 = vpop.f32.mrb[4].mxu1 }
 0x94c   :  { %v454_v13 = vadd.f32 %v2024_v10, %v448_v12  ;;  %v2167_v14 = vpop.f32.mrb[5].mxu1 }
 0x94d   :  { %v451_v15 = vpop.f32.mrb[6].mxu1 }
 0x94e   :  { %2300 = vtanh.f32 %v454_v13  ;;  %v2168_v16 = vpop.f32.mrb[7].mxu1  ;;  %v2026_v18 = vmul.f32 -1.442695, %v454_v13 }
 0x950   :  { %2302 = vpow2.f32 %v2026_v18 }
 0x958   :  { %v2301_v17 = vpop.eup %2300 }
 0x959   :  { %471 = vrot.lane.b32.xlu1 %v2301_v17, %s2410_s21 }
 0x95a   :  { %v2303_v19 = vpop.eup %2302 }
 0x95b   :  { %v458_v20 = vadd.f32 1.0, %v2303_v19 }
 0x95d   :  { %2304 = vrcp.f32 %v458_v20 }
 0x967   :  { %v2305_v21 = vpop.eup %2304  ;;  %v467_v25 = vpop.permute.xlu0 %466 }
 0x968   :  { %v469_v26 = vmul.f32 %v2305_v21, %v467_v25 }
 0x9cb   :  { %v472_v22 = vpop.permute.xlu1 %471 }
 0x9cc   :  { %v474_v23 = vmul.f32 %v2305_v21, %v472_v22 }
 0x9ce   :  { %476 = vrot.lane.b32.xlu1 %v474_v23, %s2411_s22 }
 0x9d2   :  { %488 = vperm.xlu1 %2273, %v2027_v24  }
 0xa40   :  { %v477_v27 = vpop.permute.xlu1 %476 }
 0xa41   :  { %v479_v29 = vadd.f32 %v477_v27, %v469_v26 }
 0xa43   :  { %2306 = vtanh.f32 %v479_v29 }
 0xa4d   :  { %v2307_v30 = vpop.eup %2306 }
 0xa4e   :  { %482 = vrot.lane.b32.xlu0 %v2307_v30, %s2411_s22 }
 0xa51   :  { %v2595_v38 = vpop.permute.xlu1 %488 }
 0xa52   :  { %495 = vperm.xlu0 %2272, %v492_v33   ;;  %v491_v48 = vmul.f32 %v2595_v38, %v479_v29 }
 0xac0   :  { %v483_v34 = vpop.permute.xlu0 %482 }
 0xac1   :  { %v2588_v35 = vmul.f32 %v2305_v21, %v483_v34 }
 0xac3   :  { %513 = vrot.lane.b32.xlu0 %v2588_v35, %s2412_s25  ;;  %510 = vrot.lane.b32.xlu1 %v2588_v35, %s2413_s26 }
 0xad1   :  { %v496_v36 = vpop.permute.xlu0 %495 }
 0xad2   :  { %v498_v37 = vmul.f32 %v496_v36, %v464_v9  ;;  %v520_v44 = vmul.f32 %v519_v43, %v496_v36  ;;  %v2032_v9 = vld [vmem:[%s3109_s2 + $0x10] sm:$0xf] }
 0xad3   :  { %v615_v16 = vsub.f32 1.0, %v2032_v9 }
 0xad4   :  { %500 = vrot.lane.b32.xlu1 %v498_v37, %s2411_s22 }
 0xb35   :  { %v514_v39 = vpop.permute.xlu0 %513  ;;  %v511_v40 = vpop.permute.xlu1 %510 }
 0xb36   :  { %v516_v41 = vsel %vm147_vm4, %v511_v40, %v514_v39 }
 0xb37   :  { %v517_v42 = vmul.f32 %v516_v41, %v2496_v32 }
 0xb39   :  { %v518_v45 = vmul.f32 %v517_v42, %v2595_v38  ;;  %v2034_v42 = vld [vmem:[%s3108_s0 + $0x14] sm:$0xf] }
 0xb3b   :  { %v521_v46 = vadd.f32 %v520_v44, %v518_v45 }
 0xb3d   :  { %522 = vst.msk [vmem:[#allocation2] sm:$0xf] %vm23_vm0, %v521_v46 }
 0xb44   :  { %v532_v47 = vld [vmem:[#allocation2] sm:$0xf] }
 0xb45   :  { %v533_v49 = vpack.c.bf16 %v532_v47, %v532_v47  ;;  %v642_v26 = vld [vmem:[#allocation2] sm:$0xf] }
 0xb46   :  { %v501_v50 = vpop.permute.xlu1 %500 }
 0xb47   :  { %v503_v52 = vadd.f32 %v501_v50, %v491_v48  ;;  %2174 = vmatmul.mubr.msk.bf16.vlgmr.msra.gmra.mrb[8].mxu0 %vm42_vm2, %v533_v49 }
 0xb48   :  { %2186 = vmatpush3.bf16.msra.mxu0 %v2443_v1  ;;  %2189 = vmatprep.mubr.msk.bf16.mxu0 %vm2408_vm1, %v2407_v0 }
 0xb49   :  { %505 = vrot.lane.b32.xlu0 %v503_v52, %s2412_s25  ;;  %2187 = vmatprep.subr.bf16.mxu0 %v2407_v0 }
 0xb4c   :  { %2188 = vmatpush3.bf16.msra.mxu0 %v2456_v2 }
 0xb4d   :  { %2201 = vmatprep.subr.bf16.mxu0 %v2407_v0 }
 0xbbb   :  { %v506_v53 = vpop.permute.xlu0 %505 }
 0xbbc   :  { %508 = vst.msk [vmem:[#allocation3] sm:$0xf] %vm25_vm3, %v506_v53 }
 0xbc3   :  { %v587_v55 = vld [vmem:[#allocation3] sm:$0xf] }
 0xbc4   :  { %589 = vrot.lane.b32.xlu0 %v587_v55, %s2411_s22 }
 0xc1a   :  { %v571_v57 = vpop.f32.mrb[8].mxu0 }
 0xc1b   :  { %v577_v58 = vadd.f32 %v2029_v56, %v571_v57  ;;  %v2175_v59 = vpop.f32.mrb[9].mxu0  ;;  %v2037_v57 = vld [vmem:[%s3109_s2 + $0x14] sm:$0xf] }
 0xc1c   :  { %v574_v60 = vpop.f32.mrb[10].mxu0 }
 0xc1d   :  { %2308 = vtanh.f32 %v577_v58  ;;  %v2176_v61 = vpop.f32.mrb[11].mxu0  ;;  %v2031_v63 = vmul.f32 -1.442695, %v577_v58 }
 0xc1f   :  { %2310 = vpow2.f32 %v2031_v63  ;;  %v738_v63 = vsub.f32 1.0, %v2037_v57 }
 0xc27   :  { %v2309_v62 = vpop.eup %2308 }
 0xc28   :  { %594 = vrot.lane.b32.xlu1 %v2309_v62, %s2410_s21 }
 0xc29   :  { %v2311_v3 = vpop.eup %2310 }
 0xc2a   :  { %v581_v4 = vadd.f32 1.0, %v2311_v3 }
 0xc2c   :  { %2312 = vrcp.f32 %v581_v4 }
 0xc36   :  { %v2313_v5 = vpop.eup %2312  ;;  %v590_v10 = vpop.permute.xlu0 %589 }
 0xc37   :  { %v592_v12 = vmul.f32 %v2313_v5, %v590_v10 }
 0xc9a   :  { %v595_v6 = vpop.permute.xlu1 %594 }
 0xc9b   :  { %v597_v7 = vmul.f32 %v2313_v5, %v595_v6 }
 0xc9d   :  { %599 = vrot.lane.b32.xlu1 %v597_v7, %s2411_s22 }
 0xca1   :  { %611 = vperm.xlu1 %2273, %v2032_v9  }
 0xd0f   :  { %v600_v13 = vpop.permute.xlu1 %599 }
 0xd10   :  { %v602_v14 = vadd.f32 %v600_v13, %v592_v12 }
 0xd12   :  { %2314 = vtanh.f32 %v602_v14 }
 0xd1c   :  { %v2315_v15 = vpop.eup %2314 }
 0xd1d   :  { %605 = vrot.lane.b32.xlu0 %v2315_v15, %s2411_s22 }
 0xd20   :  { %v2628_v21 = vpop.permute.xlu1 %611 }
 0xd21   :  { %618 = vperm.xlu0 %2272, %v615_v16   ;;  %v614_v34 = vmul.f32 %v2628_v21, %v602_v14 }
 0xd8f   :  { %v606_v17 = vpop.permute.xlu0 %605 }
 0xd90   :  { %v2621_v18 = vmul.f32 %v2313_v5, %v606_v17 }
 0xd92   :  { %636 = vrot.lane.b32.xlu0 %v2621_v18, %s2412_s25  ;;  %633 = vrot.lane.b32.xlu1 %v2621_v18, %s2413_s26 }
 0xda0   :  { %v619_v19 = vpop.permute.xlu0 %618 }
 0xda1   :  { %v621_v20 = vmul.f32 %v619_v19, %v587_v55  ;;  %v643_v27 = vmul.f32 %v642_v26, %v619_v19 }
 0xda3   :  { %623 = vrot.lane.b32.xlu1 %v621_v20, %s2411_s22 }
 0xe04   :  { %v637_v22 = vpop.permute.xlu0 %636  ;;  %v634_v23 = vpop.permute.xlu1 %633 }
 0xe05   :  { %v639_v24 = vsel %vm147_vm4, %v634_v23, %v637_v22 }
 0xe06   :  { %v640_v25 = vmul.f32 %v639_v24, %v2496_v32 }
 0xe08   :  { %v641_v29 = vmul.f32 %v640_v25, %v2628_v21 }
 0xe0a   :  { %v644_v30 = vadd.f32 %v643_v27, %v641_v29  ;;  %v2039_v27 = vld [vmem:[%s3108_s0 + $0x18] sm:$0xf] }
 0xe0c   :  { %645 = vst.msk [vmem:[#allocation2] sm:$0xf] %vm23_vm0, %v644_v30 }
 0xe13   :  { %v655_v33 = vld [vmem:[#allocation2] sm:$0xf] }
 0xe14   :  { %v656_v36 = vpack.c.bf16 %v655_v33, %v655_v33  ;;  %v765_v14 = vld [vmem:[#allocation2] sm:$0xf] }
 0xe15   :  { %v624_v37 = vpop.permute.xlu1 %623 }
 0xe16   :  { %v626_v39 = vadd.f32 %v624_v37, %v614_v34  ;;  %2182 = vmatmul.mubr.msk.bf16.vlgmr.msra.gmra.mrb[8].mxu1 %vm42_vm2, %v656_v36 }
 0xe17   :  { %2194 = vmatpush3.bf16.msra.mxu1 %v2443_v1  ;;  %2197 = vmatprep.mubr.msk.bf16.mxu1 %vm2408_vm1, %v2407_v0 }
 0xe18   :  { %628 = vrot.lane.b32.xlu0 %v626_v39, %s2412_s25  ;;  %2195 = vmatprep.subr.bf16.mxu1 %v2407_v0 }
 0xe1b   :  { %2196 = vmatpush3.bf16.msra.mxu1 %v2456_v2 }
 0xe1c   :  { %2209 = vmatprep.subr.bf16.mxu1 %v2407_v0 }
 0xe8a   :  { %v629_v40 = vpop.permute.xlu0 %628 }
 0xe8b   :  { %631 = vst.msk [vmem:[#allocation3] sm:$0xf] %vm25_vm3, %v629_v40 }
 0xe92   :  { %v710_v41 = vld [vmem:[#allocation3] sm:$0xf] }
 0xe93   :  { %712 = vrot.lane.b32.xlu0 %v710_v41, %s2411_s22 }
 0xee9   :  { %v694_v43 = vpop.f32.mrb[8].mxu1 }
 0xeea   :  { %v700_v44 = vadd.f32 %v2034_v42, %v694_v43  ;;  %v2183_v45 = vpop.f32.mrb[9].mxu1 }
 0xeeb   :  { %v697_v46 = vpop.f32.mrb[10].mxu1  ;;  %v2042_v45 = vld [vmem:[%s3109_s2 + $0x18] sm:$0xf] }
 0xeec   :  { %2316 = vtanh.f32 %v700_v44  ;;  %v2184_v47 = vpop.f32.mrb[11].mxu1  ;;  %v2036_v49 = vmul.f32 -1.442695, %v700_v44 }
 0xeee   :  { %2318 = vpow2.f32 %v2036_v49 }
 0xef6   :  { %v2317_v48 = vpop.eup %2316 }
 0xef7   :  { %717 = vrot.lane.b32.xlu1 %v2317_v48, %s2410_s21 }
 0xef8   :  { %v2319_v50 = vpop.eup %2318 }
 0xef9   :  { %v704_v52 = vadd.f32 1.0, %v2319_v50 }
 0xefb   :  { %2320 = vrcp.f32 %v704_v52  ;;  %v861_v52 = vsub.f32 1.0, %v2042_v45 }
 0xf05   :  { %v2321_v53 = vpop.eup %2320  ;;  %v713_v58 = vpop.permute.xlu0 %712 }
 0xf06   :  { %v715_v59 = vmul.f32 %v2321_v53, %v713_v58 }
 0xf69   :  { %v718_v55 = vpop.permute.xlu1 %717 }
 0xf6a   :  { %v720_v56 = vmul.f32 %v2321_v53, %v718_v55 }
 0xf6c   :  { %722 = vrot.lane.b32.xlu1 %v720_v56, %s2411_s22 }
 0xf70   :  { %734 = vperm.xlu1 %2273, %v2037_v57  }
 0xfde   :  { %v723_v60 = vpop.permute.xlu1 %722 }
 0xfdf   :  { %v725_v61 = vadd.f32 %v723_v60, %v715_v59 }
 0xfe1   :  { %2322 = vtanh.f32 %v725_v61 }
 0xfeb   :  { %v2323_v62 = vpop.eup %2322 }
 0xfec   :  { %728 = vrot.lane.b32.xlu0 %v2323_v62, %s2411_s22 }
 0xfef   :  { %v2661_v7 = vpop.permute.xlu1 %734 }
 0xff0   :  { %741 = vperm.xlu0 %2272, %v738_v63   ;;  %v737_v20 = vmul.f32 %v2661_v7, %v725_v61 }
0x105e   :  { %v729_v3 = vpop.permute.xlu0 %728 }
0x105f   :  { %v2654_v4 = vmul.f32 %v2321_v53, %v729_v3 }
0x1061   :  { %759 = vrot.lane.b32.xlu0 %v2654_v4, %s2412_s25  ;;  %756 = vrot.lane.b32.xlu1 %v2654_v4, %s2413_s26 }
0x106f   :  { %v742_v5 = vpop.permute.xlu0 %741 }
0x1070   :  { %v744_v6 = vmul.f32 %v742_v5, %v710_v41  ;;  %v766_v15 = vmul.f32 %v765_v14, %v742_v5 }
0x1072   :  { %746 = vrot.lane.b32.xlu1 %v744_v6, %s2411_s22 }
0x10d3   :  { %v760_v9 = vpop.permute.xlu0 %759  ;;  %v757_v10 = vpop.permute.xlu1 %756 }
0x10d4   :  { %v762_v12 = vsel %vm147_vm4, %v757_v10, %v760_v9 }
0x10d5   :  { %v763_v13 = vmul.f32 %v762_v12, %v2496_v32 }
0x10d7   :  { %v764_v16 = vmul.f32 %v763_v13, %v2661_v7 }
0x10d9   :  { %v767_v17 = vadd.f32 %v766_v15, %v764_v16 }
0x10db   :  { %768 = vst.msk [vmem:[#allocation2] sm:$0xf] %vm23_vm0, %v767_v17 }
0x10e2   :  { %v778_v19 = vld [vmem:[#allocation2] sm:$0xf] }
0x10e3   :  { %v779_v22 = vpack.c.bf16 %v778_v19, %v778_v19  ;;  %v888_v63 = vld [vmem:[#allocation2] sm:$0xf] }
0x10e4   :  { %v747_v23 = vpop.permute.xlu1 %746 }
0x10e5   :  { %v749_v24 = vadd.f32 %v747_v23, %v737_v20  ;;  %2190 = vmatmul.mubr.msk.bf16.vlgmr.msra.gmra.mrb[12].mxu0 %vm42_vm2, %v779_v22 }
0x10e6   :  { %2202 = vmatpush3.bf16.msra.mxu0 %v2443_v1  ;;  %2205 = vmatprep.mubr.msk.bf16.mxu0 %vm2408_vm1, %v2407_v0 }
0x10e7   :  { %751 = vrot.lane.b32.xlu0 %v749_v24, %s2412_s25  ;;  %2203 = vmatprep.subr.bf16.mxu0 %v2407_v0 }
0x10ea   :  { %2204 = vmatpush3.bf16.msra.mxu0 %v2456_v2 }
0x10eb   :  { %2217 = vmatprep.subr.bf16.mxu0 %v2407_v0 }
0x1159   :  { %v752_v25 = vpop.permute.xlu0 %751 }
0x115a   :  { %754 = vst.msk [vmem:[#allocation3] sm:$0xf] %vm25_vm3, %v752_v25 }
0x1161   :  { %v833_v26 = vld [vmem:[#allocation3] sm:$0xf] }
0x1162   :  { %835 = vrot.lane.b32.xlu0 %v833_v26, %s2411_s22 }
0x11b8   :  { %v817_v29 = vpop.f32.mrb[12].mxu0 }
0x11b9   :  { %v823_v30 = vadd.f32 %v2039_v27, %v817_v29  ;;  %v2191_v33 = vpop.f32.mrb[13].mxu0 }
0x11ba   :  { %v820_v34 = vpop.f32.mrb[14].mxu0  ;;  %v2047_v33 = vld [vmem:[%s3109_s2 + $0x1c] sm:$0xf] }
0x11bb   :  { %2324 = vtanh.f32 %v823_v30  ;;  %v2192_v36 = vpop.f32.mrb[15].mxu0  ;;  %v2041_v39 = vmul.f32 -1.442695, %v823_v30 }
0x11bd   :  { %2326 = vpow2.f32 %v2041_v39 }
0x11c5   :  { %v2325_v37 = vpop.eup %2324 }
0x11c6   :  { %840 = vrot.lane.b32.xlu1 %v2325_v37, %s2410_s21 }
0x11c7   :  { %v2327_v40 = vpop.eup %2326 }
0x11c8   :  { %v827_v41 = vadd.f32 1.0, %v2327_v40 }
0x11ca   :  { %2328 = vrcp.f32 %v827_v41  ;;  %v984_v41 = vsub.f32 1.0, %v2047_v33 }
0x11d4   :  { %v2329_v42 = vpop.eup %2328  ;;  %v836_v46 = vpop.permute.xlu0 %835 }
0x11d5   :  { %v838_v47 = vmul.f32 %v2329_v42, %v836_v46 }
0x1238   :  { %v841_v43 = vpop.permute.xlu1 %840 }
0x1239   :  { %v843_v44 = vmul.f32 %v2329_v42, %v841_v43 }
0x123b   :  { %845 = vrot.lane.b32.xlu1 %v843_v44, %s2411_s22 }
0x123f   :  { %857 = vperm.xlu1 %2273, %v2042_v45  }
0x12ad   :  { %v846_v48 = vpop.permute.xlu1 %845 }
0x12ae   :  { %v848_v49 = vadd.f32 %v846_v48, %v838_v47 }
0x12b0   :  { %2330 = vtanh.f32 %v848_v49 }
0x12ba   :  { %v2331_v50 = vpop.eup %2330 }
0x12bb   :  { %851 = vrot.lane.b32.xlu0 %v2331_v50, %s2411_s22 }
0x12be   :  { %v2694_v58 = vpop.permute.xlu1 %857 }
0x12bf   :  { %864 = vperm.xlu0 %2272, %v861_v52   ;;  %v860_v10 = vmul.f32 %v2694_v58, %v848_v49 }
0x132d   :  { %v852_v53 = vpop.permute.xlu0 %851 }
0x132e   :  { %v2687_v55 = vmul.f32 %v2329_v42, %v852_v53 }
0x1330   :  { %882 = vrot.lane.b32.xlu0 %v2687_v55, %s2412_s25  ;;  %879 = vrot.lane.b32.xlu1 %v2687_v55, %s2413_s26 }
0x133e   :  { %v865_v56 = vpop.permute.xlu0 %864 }
0x133f   :  { %v867_v57 = vmul.f32 %v865_v56, %v833_v26  ;;  %v889_v3 = vmul.f32 %v888_v63, %v865_v56 }
0x1341   :  { %869 = vrot.lane.b32.xlu1 %v867_v57, %s2411_s22 }
0x13a2   :  { %v883_v59 = vpop.permute.xlu0 %882  ;;  %v880_v60 = vpop.permute.xlu1 %879 }
0x13a3   :  { %v885_v61 = vsel %vm147_vm4, %v880_v60, %v883_v59 }
0x13a4   :  { %v886_v62 = vmul.f32 %v885_v61, %v2496_v32 }
0x13a6   :  { %v887_v5 = vmul.f32 %v886_v62, %v2694_v58 }
0x13a8   :  { %v890_v6 = vadd.f32 %v889_v3, %v887_v5  ;;  %v2738_v3 = vld [vmem:[%s3107_s1] sm:$0xff]   ;;  %v2748_v5 = vld [vmem:[%s3107_s1 + $0x8] sm:$0xff]  }
0x13aa   :  { %891 = vst.msk [vmem:[#allocation2] sm:$0xf] %vm23_vm0, %v890_v6 }
0x13b1   :  { %v901_v9 = vld [vmem:[#allocation2] sm:$0xf] }
0x13b2   :  { %v902_v12 = vpack.c.bf16 %v901_v9, %v901_v9  ;;  %v1011_v52 = vld [vmem:[#allocation2] sm:$0xf] }
0x13b3   :  { %v870_v13 = vpop.permute.xlu1 %869 }
0x13b4   :  { %v872_v14 = vadd.f32 %v870_v13, %v860_v10  ;;  %2198 = vmatmul.mubr.msk.bf16.vlgmr.msra.gmra.mrb[12].mxu1 %vm42_vm2, %v902_v12  ;;  %v2049_v10 = vld [vmem:[%s3108_s0 + $0x20] sm:$0xf] }
0x13b5   :  { %2210 = vmatpush3.bf16.msra.mxu1 %v2443_v1  ;;  %2213 = vmatprep.mubr.msk.bf16.mxu1 %vm2408_vm1, %v2407_v0  ;;  %v2044_v1 = vld [vmem:[%s3108_s0 + $0x1c] sm:$0xf] }
0x13b6   :  { %874 = vrot.lane.b32.xlu0 %v872_v14, %s2412_s25  ;;  %2211 = vmatprep.subr.bf16.mxu1 %v2407_v0 }
0x13b9   :  { %2212 = vmatpush3.bf16.msra.mxu1 %v2456_v2 }
0x13ba   :  { %2225 = vmatprep.subr.bf16.mxu1 %v2407_v0 }
0x1428   :  { %v875_v15 = vpop.permute.xlu0 %874 }
0x1429   :  { %877 = vst.msk [vmem:[#allocation3] sm:$0xf] %vm25_vm3, %v875_v15 }
0x1430   :  { %v956_v16 = vld [vmem:[#allocation3] sm:$0xf] }
0x1431   :  { %958 = vrot.lane.b32.xlu0 %v956_v16, %s2411_s22 }
0x1487   :  { %v940_v17 = vpop.f32.mrb[12].mxu1 }
0x1488   :  { %v946_v19 = vadd.f32 %v2044_v1, %v940_v17  ;;  %v2199_v20 = vpop.f32.mrb[13].mxu1 }
0x1489   :  { %v943_v22 = vpop.f32.mrb[14].mxu1 }
0x148a   :  { %2332 = vtanh.f32 %v946_v19  ;;  %v2200_v23 = vpop.f32.mrb[15].mxu1  ;;  %v2046_v2 = vmul.f32 -1.442695, %v946_v19 }
0x148c   :  { %2334 = vpow2.f32 %v2046_v2  ;;  %v2052_v2 = vld [vmem:[%s3109_s2 + $0x20] sm:$0xf] }
0x1494   :  { %v2333_v24 = vpop.eup %2332 }
0x1495   :  { %963 = vrot.lane.b32.xlu1 %v2333_v24, %s2410_s21 }
0x1496   :  { %v2335_v25 = vpop.eup %2334 }
0x1497   :  { %v950_v26 = vadd.f32 1.0, %v2335_v25 }
0x1499   :  { %2336 = vrcp.f32 %v950_v26 }
0x14a3   :  { %v2337_v27 = vpop.eup %2336  ;;  %v959_v34 = vpop.permute.xlu0 %958 }
0x14a4   :  { %v961_v36 = vmul.f32 %v2337_v27, %v959_v34 }
0x1507   :  { %v964_v29 = vpop.permute.xlu1 %963 }
0x1508   :  { %v966_v30 = vmul.f32 %v2337_v27, %v964_v29 }
0x150a   :  { %968 = vrot.lane.b32.xlu1 %v966_v30, %s2411_s22 }
0x150e   :  { %980 = vperm.xlu1 %2273, %v2047_v33   ;;  %v1107_v33 = vsub.f32 1.0, %v2052_v2 }
0x157c   :  { %v969_v37 = vpop.permute.xlu1 %968 }
0x157d   :  { %v971_v39 = vadd.f32 %v969_v37, %v961_v36 }
0x157f   :  { %2338 = vtanh.f32 %v971_v39 }
0x1589   :  { %v2339_v40 = vpop.eup %2338 }
0x158a   :  { %974 = vrot.lane.b32.xlu0 %v2339_v40, %s2411_s22 }
0x158d   :  { %v2727_v46 = vpop.permute.xlu1 %980 }
0x158e   :  { %987 = vperm.xlu0 %2272, %v984_v41   ;;  %v983_v60 = vmul.f32 %v2727_v46, %v971_v39 }
0x15fc   :  { %v975_v42 = vpop.permute.xlu0 %974 }
0x15fd   :  { %v2720_v43 = vmul.f32 %v2337_v27, %v975_v42 }
0x15ff   :  { %1005 = vrot.lane.b32.xlu0 %v2720_v43, %s2412_s25  ;;  %1002 = vrot.lane.b32.xlu1 %v2720_v43, %s2413_s26 }
0x160d   :  { %v988_v44 = vpop.permute.xlu0 %987 }
0x160e   :  { %v990_v45 = vmul.f32 %v988_v44, %v956_v16  ;;  %v1012_v53 = vmul.f32 %v1011_v52, %v988_v44 }
0x1610   :  { %992 = vrot.lane.b32.xlu1 %v990_v45, %s2411_s22 }
0x1671   :  { %v1006_v47 = vpop.permute.xlu0 %1005  ;;  %v1003_v48 = vpop.permute.xlu1 %1002 }
0x1672   :  { %v1008_v49 = vsel %vm147_vm4, %v1003_v48, %v1006_v47 }
0x1673   :  { %v1009_v50 = vmul.f32 %v1008_v49, %v2496_v32 }
0x1675   :  { %v1010_v56 = vmul.f32 %v1009_v50, %v2727_v46 }
0x1677   :  { %v1013_v57 = vadd.f32 %v1012_v53, %v1010_v56 }
0x1679   :  { %1014 = vst.msk [vmem:[#allocation2] sm:$0xf] %vm23_vm0, %v1013_v57 }
0x1680   :  { %v1024_v59 = vld [vmem:[#allocation2] sm:$0xf] }
0x1681   :  { %v1025_v61 = vpack.c.bf16 %v1024_v59, %v1024_v59  ;;  %v1134_v47 = vld [vmem:[#allocation2] sm:$0xf] }
0x1682   :  { %v993_v62 = vpop.permute.xlu1 %992 }
0x1683   :  { %v995_v63 = vadd.f32 %v993_v62, %v983_v60  ;;  %2206 = vmatmul.mubr.msk.bf16.vlgmr.msra.gmra.mrb[16].mxu0 %vm42_vm2, %v1025_v61  ;;  %v2054_v61 = vld [vmem:[%s3108_s0 + $0x24] sm:$0xf] }
0x1684   :  { %2218 = vmatpush3.bf16.msra.mxu0 %v2738_v3  ;;  %2221 = vmatprep.mubr.msk.bf16.mxu0 %vm2408_vm1, %v2407_v0 }
0x1685   :  { %997 = vrot.lane.b32.xlu0 %v995_v63, %s2412_s25  ;;  %2219 = vmatprep.subr.bf16.mxu0 %v2407_v0 }
0x1688   :  { %2220 = vmatpush3.bf16.msra.mxu0 %v2748_v5 }
0x1689   :  { %2233 = vmatprep.subr.bf16.mxu0 %v2407_v0 }
0x16f7   :  { %v998_v6 = vpop.permute.xlu0 %997 }
0x16f8   :  { %1000 = vst.msk [vmem:[#allocation3] sm:$0xf] %vm25_vm3, %v998_v6 }
0x16ff   :  { %v1079_v9 = vld [vmem:[#allocation3] sm:$0xf] }
0x1700   :  { %1081 = vrot.lane.b32.xlu0 %v1079_v9, %s2411_s22 }
0x1756   :  { %v1063_v12 = vpop.f32.mrb[16].mxu0 }
0x1757   :  { %v1069_v13 = vadd.f32 %v2049_v10, %v1063_v12  ;;  %v2207_v14 = vpop.f32.mrb[17].mxu0 }
0x1758   :  { %v1066_v15 = vpop.f32.mrb[18].mxu0 }
0x1759   :  { %2340 = vtanh.f32 %v1069_v13  ;;  %v2208_v16 = vpop.f32.mrb[19].mxu0  ;;  %v2051_v17 = vmul.f32 -1.442695, %v1069_v13 }
0x175b   :  { %2342 = vpow2.f32 %v2051_v17 }
0x1763   :  { %v2341_v1 = vpop.eup %2340 }
0x1764   :  { %1086 = vrot.lane.b32.xlu1 %v2341_v1, %s2410_s21 }
0x1765   :  { %v2343_v19 = vpop.eup %2342 }
0x1766   :  { %v1073_v20 = vadd.f32 1.0, %v2343_v19  ;;  %v2057_v19 = vld [vmem:[%s3109_s2 + $0x24] sm:$0xf] }
0x1768   :  { %2344 = vrcp.f32 %v1073_v20 }
0x1772   :  { %v2345_v22 = vpop.eup %2344  ;;  %v1082_v25 = vpop.permute.xlu0 %1081 }
0x1773   :  { %v1084_v26 = vmul.f32 %v2345_v22, %v1082_v25  ;;  %v1230_v25 = vsub.f32 1.0, %v2057_v19 }
0x17d6   :  { %v1087_v23 = vpop.permute.xlu1 %1086 }
0x17d7   :  { %v1089_v24 = vmul.f32 %v2345_v22, %v1087_v23 }
0x17d9   :  { %1091 = vrot.lane.b32.xlu1 %v1089_v24, %s2411_s22 }
0x17dd   :  { %1103 = vperm.xlu1 %2273, %v2052_v2  }
0x184b   :  { %v1092_v27 = vpop.permute.xlu1 %1091 }
0x184c   :  { %v1094_v29 = vadd.f32 %v1092_v27, %v1084_v26 }
0x184e   :  { %2346 = vtanh.f32 %v1094_v29 }
0x1858   :  { %v2347_v30 = vpop.eup %2346 }
0x1859   :  { %1097 = vrot.lane.b32.xlu0 %v2347_v30, %s2411_s22 }
0x185c   :  { %v2770_v40 = vpop.permute.xlu1 %1103 }
0x185d   :  { %1110 = vperm.xlu0 %2272, %v1107_v33   ;;  %v1106_v53 = vmul.f32 %v2770_v40, %v1094_v29 }
0x18cb   :  { %v1098_v34 = vpop.permute.xlu0 %1097 }
0x18cc   :  { %v2763_v36 = vmul.f32 %v2345_v22, %v1098_v34 }
0x18ce   :  { %1128 = vrot.lane.b32.xlu0 %v2763_v36, %s2412_s25  ;;  %1125 = vrot.lane.b32.xlu1 %v2763_v36, %s2413_s26 }
0x18dc   :  { %v1111_v37 = vpop.permute.xlu0 %1110 }
0x18dd   :  { %v1113_v39 = vmul.f32 %v1111_v37, %v1079_v9  ;;  %v1135_v48 = vmul.f32 %v1134_v47, %v1111_v37 }
0x18df   :  { %1115 = vrot.lane.b32.xlu1 %v1113_v39, %s2411_s22 }
0x1940   :  { %v1129_v41 = vpop.permute.xlu0 %1128  ;;  %v1126_v42 = vpop.permute.xlu1 %1125 }
0x1941   :  { %v1131_v44 = vsel %vm147_vm4, %v1126_v42, %v1129_v41  ;;  %v2809_v41 = vld [vmem:[%s3110_s3] sm:$0xf] }
0x1942   :  { %v1132_v45 = vmul.f32 %v1131_v44, %v2496_v32 }
0x1944   :  { %v1133_v49 = vmul.f32 %v1132_v45, %v2770_v40 }
0x1946   :  { %v1136_v50 = vadd.f32 %v1135_v48, %v1133_v49 }
0x1948   :  { %1137 = vst.msk [vmem:[#allocation2] sm:$0xf] %vm23_vm0, %v1136_v50 }
0x194f   :  { %v1147_v52 = vld [vmem:[#allocation2] sm:$0xf] }
0x1950   :  { %v1148_v56 = vpack.c.bf16 %v1147_v52, %v1147_v52  ;;  %v1257_v44 = vld [vmem:[#allocation2] sm:$0xf] }
0x1951   :  { %v1116_v57 = vpop.permute.xlu1 %1115 }
0x1952   :  { %v1118_v59 = vadd.f32 %v1116_v57, %v1106_v53  ;;  %2214 = vmatmul.mubr.msk.bf16.vlgmr.msra.gmra.mrb[16].mxu1 %vm42_vm2, %v1148_v56 }
0x1953   :  { %2226 = vmatpush3.bf16.msra.mxu1 %v2738_v3  ;;  %2229 = vmatprep.mubr.msk.bf16.mxu1 %vm2408_vm1, %v2407_v0 }
0x1954   :  { %1120 = vrot.lane.b32.xlu0 %v1118_v59, %s2412_s25  ;;  %2227 = vmatprep.subr.bf16.mxu1 %v2407_v0 }
0x1957   :  { %2228 = vmatpush3.bf16.msra.mxu1 %v2748_v5 }
0x1958   :  { %2241 = vmatprep.subr.bf16.mxu1 %v2407_v0 }
0x19c6   :  { %v1121_v32 = vpop.permute.xlu0 %1120 }
0x19c7   :  { %1123 = vst.msk [vmem:[#allocation3] sm:$0xf] %vm25_vm3, %v1121_v32  ;;  %v2059_v32 = vld [vmem:[%s3108_s0 + $0x28] sm:$0xf] }
0x19ce   :  { %v1202_v60 = vld [vmem:[#allocation3] sm:$0xf] }
0x19cf   :  { %1204 = vrot.lane.b32.xlu0 %v1202_v60, %s2411_s22 }
0x1a25   :  { %v1186_v62 = vpop.f32.mrb[16].mxu1 }
0x1a26   :  { %v1192_v63 = vadd.f32 %v2054_v61, %v1186_v62  ;;  %v2215_v6 = vpop.f32.mrb[17].mxu1 }
0x1a27   :  { %v1189_v9 = vpop.f32.mrb[18].mxu1 }
0x1a28   :  { %2348 = vtanh.f32 %v1192_v63  ;;  %v2216_v10 = vpop.f32.mrb[19].mxu1  ;;  %v2056_v13 = vmul.f32 -1.442695, %v1192_v63 }
0x1a2a   :  { %2350 = vpow2.f32 %v2056_v13 }
0x1a32   :  { %v2349_v12 = vpop.eup %2348 }
0x1a33   :  { %1209 = vrot.lane.b32.xlu1 %v2349_v12, %s2410_s21 }
0x1a34   :  { %v2351_v14 = vpop.eup %2350 }
0x1a35   :  { %v1196_v15 = vadd.f32 1.0, %v2351_v14 }
0x1a37   :  { %2352 = vrcp.f32 %v1196_v15 }
0x1a41   :  { %v2353_v16 = vpop.eup %2352  ;;  %v1205_v20 = vpop.permute.xlu0 %1204 }
0x1a42   :  { %v1207_v22 = vmul.f32 %v2353_v16, %v1205_v20 }
0x1aa5   :  { %v1210_v1 = vpop.permute.xlu1 %1209 }
0x1aa6   :  { %v1212_v17 = vmul.f32 %v2353_v16, %v1210_v1  ;;  %v2062_v1 = vld [vmem:[%s3109_s2 + $0x28] sm:$0xf] }
0x1aa8   :  { %1214 = vrot.lane.b32.xlu1 %v1212_v17, %s2411_s22 }
0x1aac   :  { %1226 = vperm.xlu1 %2273, %v2057_v19  }
0x1b1a   :  { %v1215_v23 = vpop.permute.xlu1 %1214 }
0x1b1b   :  { %v1217_v24 = vadd.f32 %v1215_v23, %v1207_v22 }
0x1b1d   :  { %2354 = vtanh.f32 %v1217_v24 }
0x1b27   :  { %v2355_v2 = vpop.eup %2354 }
0x1b28   :  { %1220 = vrot.lane.b32.xlu0 %v2355_v2, %s2411_s22 }
0x1b2b   :  { %v2803_v33 = vpop.permute.xlu1 %1226 }
0x1b2c   :  { %1233 = vperm.xlu0 %2272, %v1230_v25   ;;  %v1229_v50 = vmul.f32 %v2803_v33, %v1217_v24  ;;  %v1353_v24 = vsub.f32 1.0, %v2062_v1 }
0x1b9a   :  { %v1221_v26 = vpop.permute.xlu0 %1220 }
0x1b9b   :  { %v2796_v27 = vmul.f32 %v2353_v16, %v1221_v26 }
0x1b9d   :  { %1251 = vrot.lane.b32.xlu0 %v2796_v27, %s2412_s25  ;;  %1248 = vrot.lane.b32.xlu1 %v2796_v27, %s2413_s26 }
0x1bab   :  { %v1234_v29 = vpop.permute.xlu0 %1233 }
0x1bac   :  { %v1236_v30 = vmul.f32 %v1234_v29, %v1202_v60  ;;  %v1258_v45 = vmul.f32 %v1257_v44, %v1234_v29 }
0x1bae   :  { %1238 = vrot.lane.b32.xlu1 %v1236_v30, %s2411_s22 }
0x1c0f   :  { %v1252_v34 = vpop.permute.xlu0 %1251  ;;  %v1249_v37 = vpop.permute.xlu1 %1248 }
0x1c10   :  { %v1254_v39 = vsel %vm147_vm4, %v1249_v37, %v1252_v34 }
0x1c11   :  { %v1255_v42 = vmul.f32 %v2809_v41, %v1254_v39 }
0x1c13   :  { %v1256_v47 = vmul.f32 %v1255_v42, %v2803_v33 }
0x1c15   :  { %v1259_v48 = vadd.f32 %v1258_v45, %v1256_v47 }
0x1c17   :  { %1260 = vst.msk [vmem:[#allocation2] sm:$0xf] %vm23_vm0, %v1259_v48 }
0x1c1e   :  { %v1270_v49 = vld [vmem:[#allocation2] sm:$0xf] }
0x1c1f   :  { %v1271_v52 = vpack.c.bf16 %v1270_v49, %v1270_v49  ;;  %v1380_v44 = vld [vmem:[#allocation2] sm:$0xf] }
0x1c20   :  { %v1239_v53 = vpop.permute.xlu1 %1238 }
0x1c21   :  { %v1241_v56 = vadd.f32 %v1239_v53, %v1229_v50  ;;  %2222 = vmatmul.mubr.msk.bf16.vlgmr.msra.gmra.mrb[20].mxu0 %vm42_vm2, %v1271_v52 }
0x1c22   :  { %2234 = vmatpush3.bf16.msra.mxu0 %v2738_v3  ;;  %2237 = vmatprep.mubr.msk.bf16.mxu0 %vm2408_vm1, %v2407_v0 }
0x1c23   :  { %1243 = vrot.lane.b32.xlu0 %v1241_v56, %s2412_s25  ;;  %2235 = vmatprep.subr.bf16.mxu0 %v2407_v0 }
0x1c26   :  { %2236 = vmatpush3.bf16.msra.mxu0 %v2748_v5 }
0x1c27   :  { %2249 = vmatprep.subr.bf16.mxu0 %v2407_v0 }
0x1c95   :  { %v1244_v57 = vpop.permute.xlu0 %1243 }
0x1c96   :  { %1246 = vst.msk [vmem:[#allocation3] sm:$0xf] %vm25_vm3, %v1244_v57 }
0x1c9d   :  { %v1325_v59 = vld [vmem:[#allocation3] sm:$0xf] }
0x1c9e   :  { %1327 = vrot.lane.b32.xlu0 %v1325_v59, %s2411_s22 }
0x1cf4   :  { %v1309_v60 = vpop.f32.mrb[20].mxu0 }
0x1cf5   :  { %v1315_v61 = vadd.f32 %v2059_v32, %v1309_v60  ;;  %v2223_v62 = vpop.f32.mrb[21].mxu0  ;;  %v2064_v32 = vld [vmem:[%s3108_s0 + $0x2c] sm:$0xf] }
0x1cf6   :  { %v1312_v63 = vpop.f32.mrb[22].mxu0 }
0x1cf7   :  { %2356 = vtanh.f32 %v1315_v61  ;;  %v2224_v6 = vpop.f32.mrb[23].mxu0  ;;  %v2061_v10 = vmul.f32 -1.442695, %v1315_v61 }
0x1cf9   :  { %2358 = vpow2.f32 %v2061_v10 }
0x1d01   :  { %v2357_v9 = vpop.eup %2356 }
0x1d02   :  { %1332 = vrot.lane.b32.xlu1 %v2357_v9, %s2410_s21 }
0x1d03   :  { %v2359_v12 = vpop.eup %2358 }
0x1d04   :  { %v1319_v13 = vadd.f32 1.0, %v2359_v12 }
0x1d06   :  { %2360 = vrcp.f32 %v1319_v13 }
0x1d10   :  { %v2361_v14 = vpop.eup %2360  ;;  %v1328_v17 = vpop.permute.xlu0 %1327 }
0x1d11   :  { %v1330_v19 = vmul.f32 %v2361_v14, %v1328_v17 }
0x1d74   :  { %v1333_v15 = vpop.permute.xlu1 %1332 }
0x1d75   :  { %v1335_v16 = vmul.f32 %v2361_v14, %v1333_v15 }
0x1d77   :  { %1337 = vrot.lane.b32.xlu1 %v1335_v16, %s2411_s22 }
0x1d7b   :  { %1349 = vperm.xlu1 %2273, %v2062_v1   ;;  %v2067_v1 = vld [vmem:[%s3109_s2 + $0x2c] sm:$0xf] }
0x1de9   :  { %v1338_v20 = vpop.permute.xlu1 %1337 }
0x1dea   :  { %v1340_v22 = vadd.f32 %v1338_v20, %v1330_v19 }
0x1dec   :  { %2362 = vtanh.f32 %v1340_v22 }
0x1df6   :  { %v2363_v23 = vpop.eup %2362 }
0x1df7   :  { %1343 = vrot.lane.b32.xlu0 %v2363_v23, %s2411_s22 }
0x1dfa   :  { %v2841_v30 = vpop.permute.xlu1 %1349 }
0x1dfb   :  { %1356 = vperm.xlu0 %2272, %v1353_v24   ;;  %v1352_v50 = vmul.f32 %v2841_v30, %v1340_v22  ;;  %v1476_v24 = vsub.f32 1.0, %v2067_v1 }
0x1e69   :  { %v1344_v2 = vpop.permute.xlu0 %1343 }
0x1e6a   :  { %v2834_v25 = vmul.f32 %v2361_v14, %v1344_v2 }
0x1e6c   :  { %1374 = vrot.lane.b32.xlu0 %v2834_v25, %s2412_s25  ;;  %1371 = vrot.lane.b32.xlu1 %v2834_v25, %s2413_s26 }
0x1e7a   :  { %v1357_v26 = vpop.permute.xlu0 %1356 }
0x1e7b   :  { %v1359_v29 = vmul.f32 %v1357_v26, %v1325_v59  ;;  %v1381_v45 = vmul.f32 %v1380_v44, %v1357_v26 }
0x1e7d   :  { %1361 = vrot.lane.b32.xlu1 %v1359_v29, %s2411_s22 }
0x1ede   :  { %v1375_v34 = vpop.permute.xlu0 %1374  ;;  %v1372_v37 = vpop.permute.xlu1 %1371 }
0x1edf   :  { %v1377_v39 = vsel %vm147_vm4, %v1372_v37, %v1375_v34 }
0x1ee0   :  { %v1378_v42 = vmul.f32 %v2809_v41, %v1377_v39 }
0x1ee2   :  { %v1379_v47 = vmul.f32 %v1378_v42, %v2841_v30 }
0x1ee4   :  { %v1382_v48 = vadd.f32 %v1381_v45, %v1379_v47 }
0x1ee6   :  { %1383 = vst.msk [vmem:[#allocation2] sm:$0xf] %vm23_vm0, %v1382_v48 }
0x1eed   :  { %v1393_v49 = vld [vmem:[#allocation2] sm:$0xf] }
0x1eee   :  { %v1394_v52 = vpack.c.bf16 %v1393_v49, %v1393_v49  ;;  %v1503_v47 = vld [vmem:[#allocation2] sm:$0xf] }
0x1eef   :  { %v1362_v53 = vpop.permute.xlu1 %1361 }
0x1ef0   :  { %v1364_v56 = vadd.f32 %v1362_v53, %v1352_v50  ;;  %2230 = vmatmul.mubr.msk.bf16.vlgmr.msra.gmra.mrb[20].mxu1 %vm42_vm2, %v1394_v52 }
0x1ef1   :  { %2242 = vmatpush3.bf16.msra.mxu1 %v2738_v3  ;;  %2245 = vmatprep.mubr.msk.bf16.mxu1 %vm2408_vm1, %v2407_v0 }
0x1ef2   :  { %1366 = vrot.lane.b32.xlu0 %v1364_v56, %s2412_s25  ;;  %2243 = vmatprep.subr.bf16.mxu1 %v2407_v0 }
0x1ef5   :  { %2244 = vmatpush3.bf16.msra.mxu1 %v2748_v5 }
0x1ef6   :  { %2257 = vmatprep.subr.bf16.mxu1 %v2407_v0 }
0x1f64   :  { %v1367_v57 = vpop.permute.xlu0 %1366 }
0x1f65   :  { %1369 = vst.msk [vmem:[#allocation3] sm:$0xf] %vm25_vm3, %v1367_v57 }
0x1f6c   :  { %v1448_v59 = vld [vmem:[#allocation3] sm:$0xf] }
0x1f6d   :  { %1450 = vrot.lane.b32.xlu0 %v1448_v59, %s2411_s22 }
0x1fc3   :  { %v1432_v60 = vpop.f32.mrb[20].mxu1 }
0x1fc4   :  { %v1438_v61 = vadd.f32 %v2064_v32, %v1432_v60  ;;  %v2231_v62 = vpop.f32.mrb[21].mxu1 }
0x1fc5   :  { %v1435_v63 = vpop.f32.mrb[22].mxu1 }
0x1fc6   :  { %2364 = vtanh.f32 %v1438_v61  ;;  %v2232_v6 = vpop.f32.mrb[23].mxu1  ;;  %v2066_v10 = vmul.f32 -1.442695, %v1438_v61  ;;  %v2069_v61 = vld [vmem:[%s3108_s0 + $0x30] sm:$0xf] }
0x1fc8   :  { %2366 = vpow2.f32 %v2066_v10 }
0x1fd0   :  { %v2365_v9 = vpop.eup %2364 }
0x1fd1   :  { %1455 = vrot.lane.b32.xlu1 %v2365_v9, %s2410_s21 }
0x1fd2   :  { %v2367_v12 = vpop.eup %2366 }
0x1fd3   :  { %v1442_v13 = vadd.f32 1.0, %v2367_v12 }
0x1fd5   :  { %2368 = vrcp.f32 %v1442_v13 }
0x1fdf   :  { %v2369_v14 = vpop.eup %2368  ;;  %v1451_v17 = vpop.permute.xlu0 %1450 }
0x1fe0   :  { %v1453_v19 = vmul.f32 %v2369_v14, %v1451_v17 }
0x2043   :  { %v1456_v15 = vpop.permute.xlu1 %1455 }
0x2044   :  { %v1458_v16 = vmul.f32 %v2369_v14, %v1456_v15 }
0x2046   :  { %1460 = vrot.lane.b32.xlu1 %v1458_v16, %s2411_s22 }
0x204a   :  { %1472 = vperm.xlu1 %2273, %v2067_v1  }
0x20b8   :  { %v1461_v20 = vpop.permute.xlu1 %1460 }
0x20b9   :  { %v1463_v22 = vadd.f32 %v1461_v20, %v1453_v19  ;;  %v2072_v19 = vld [vmem:[%s3109_s2 + $0x30] sm:$0xf] }
0x20bb   :  { %2370 = vtanh.f32 %v1463_v22 }
0x20c5   :  { %v2371_v23 = vpop.eup %2370 }
0x20c6   :  { %1466 = vrot.lane.b32.xlu0 %v2371_v23, %s2411_s22 }
0x20c9   :  { %v2874_v37 = vpop.permute.xlu1 %1472 }
0x20ca   :  { %1479 = vperm.xlu0 %2272, %v1476_v24   ;;  %v1475_v53 = vmul.f32 %v2874_v37, %v1463_v22 }
0x2138   :  { %v1467_v2 = vpop.permute.xlu0 %1466 }
0x2139   :  { %v2867_v26 = vmul.f32 %v2369_v14, %v1467_v2 }
0x213b   :  { %1497 = vrot.lane.b32.xlu0 %v2867_v26, %s2412_s25  ;;  %1494 = vrot.lane.b32.xlu1 %v2867_v26, %s2413_s26 }
0x2149   :  { %v1480_v29 = vpop.permute.xlu0 %1479 }
0x214a   :  { %v1482_v34 = vmul.f32 %v1480_v29, %v1448_v59  ;;  %v1504_v48 = vmul.f32 %v1503_v47, %v1480_v29  ;;  %v1599_v29 = vsub.f32 1.0, %v2072_v19 }
0x214c   :  { %1484 = vrot.lane.b32.xlu1 %v1482_v34, %s2411_s22 }
0x21ad   :  { %v1498_v39 = vpop.permute.xlu0 %1497  ;;  %v1495_v42 = vpop.permute.xlu1 %1494 }
0x21ae   :  { %v1500_v44 = vsel %vm147_vm4, %v1495_v42, %v1498_v39 }
0x21af   :  { %v1501_v45 = vmul.f32 %v2809_v41, %v1500_v44 }
0x21b1   :  { %v1502_v49 = vmul.f32 %v1501_v45, %v2874_v37 }
0x21b3   :  { %v1505_v50 = vadd.f32 %v1504_v48, %v1502_v49 }
0x21b5   :  { %1506 = vst.msk [vmem:[#allocation2] sm:$0xf] %vm23_vm0, %v1505_v50 }
0x21bc   :  { %v1516_v52 = vld [vmem:[#allocation2] sm:$0xf] }
0x21bd   :  { %v1517_v56 = vpack.c.bf16 %v1516_v52, %v1516_v52  ;;  %v1626_v52 = vld [vmem:[#allocation2] sm:$0xf] }
0x21be   :  { %v1485_v57 = vpop.permute.xlu1 %1484 }
0x21bf   :  { %v1487_v59 = vadd.f32 %v1485_v57, %v1475_v53  ;;  %2238 = vmatmul.mubr.msk.bf16.vlgmr.msra.gmra.mrb[24].mxu0 %vm42_vm2, %v1517_v56 }
0x21c0   :  { %2250 = vmatpush3.bf16.msra.mxu0 %v2738_v3  ;;  %2253 = vmatprep.mubr.msk.bf16.mxu0 %vm2408_vm1, %v2407_v0 }
0x21c1   :  { %1489 = vrot.lane.b32.xlu0 %v1487_v59, %s2412_s25  ;;  %2251 = vmatprep.subr.bf16.mxu0 %v2407_v0 }
0x21c4   :  { %2252 = vmatpush3.bf16.msra.mxu0 %v2748_v5 }
0x2233   :  { %v1490_v32 = vpop.permute.xlu0 %1489 }
0x2234   :  { %1492 = vst.msk [vmem:[#allocation3] sm:$0xf] %vm25_vm3, %v1490_v32 }
0x223b   :  { %v1571_v60 = vld [vmem:[#allocation3] sm:$0xf] }
0x223c   :  { %1573 = vrot.lane.b32.xlu0 %v1571_v60, %s2411_s22 }
0x2292   :  { %v1555_v62 = vpop.f32.mrb[24].mxu0 }
0x2293   :  { %v1561_v63 = vadd.f32 %v2069_v61, %v1555_v62  ;;  %v2239_v6 = vpop.f32.mrb[25].mxu0 }
0x2294   :  { %v1558_v9 = vpop.f32.mrb[26].mxu0 }
0x2295   :  { %2372 = vtanh.f32 %v1561_v63  ;;  %v2240_v10 = vpop.f32.mrb[27].mxu0  ;;  %v2071_v13 = vmul.f32 -1.442695, %v1561_v63  ;;  %v2074_v9 = vld [vmem:[%s3108_s0 + $0x34] sm:$0xf] }
0x2297   :  { %2374 = vpow2.f32 %v2071_v13 }
0x229f   :  { %v2373_v12 = vpop.eup %2372 }
0x22a0   :  { %1578 = vrot.lane.b32.xlu1 %v2373_v12, %s2410_s21 }
0x22a1   :  { %v2375_v14 = vpop.eup %2374 }
0x22a2   :  { %v1565_v15 = vadd.f32 1.0, %v2375_v14 }
0x22a4   :  { %2376 = vrcp.f32 %v1565_v15 }
0x22ae   :  { %v2377_v16 = vpop.eup %2376  ;;  %v1574_v20 = vpop.permute.xlu0 %1573 }
0x22af   :  { %v1576_v22 = vmul.f32 %v2377_v16, %v1574_v20  ;;  %v2077_v20 = vld [vmem:[%s3109_s2 + $0x34] sm:$0xf] }
0x2312   :  { %v1579_v1 = vpop.permute.xlu1 %1578 }
0x2313   :  { %v1581_v17 = vmul.f32 %v2377_v16, %v1579_v1 }
0x2315   :  { %1583 = vrot.lane.b32.xlu1 %v1581_v17, %s2411_s22 }
0x2319   :  { %1595 = vperm.xlu1 %2273, %v2072_v19  }
0x2387   :  { %v1584_v23 = vpop.permute.xlu1 %1583 }
0x2388   :  { %v1586_v24 = vadd.f32 %v1584_v23, %v1576_v22 }
0x238a   :  { %2378 = vtanh.f32 %v1586_v24 }
0x2394   :  { %v2379_v2 = vpop.eup %2378 }
0x2395   :  { %1589 = vrot.lane.b32.xlu0 %v2379_v2, %s2411_s22 }
0x2398   :  { %v2906_v45 = vpop.permute.xlu1 %1595 }
0x2399   :  { %1602 = vperm.xlu0 %2272, %v1599_v29   ;;  %v1598_v32 = vmul.f32 %v2906_v45, %v1586_v24 }
0x2407   :  { %v1590_v34 = vpop.permute.xlu0 %1589 }
0x2408   :  { %v2899_v39 = vmul.f32 %v2377_v16, %v1590_v34  ;;  %v1722_v34 = vsub.f32 1.0, %v2077_v20 }
0x240a   :  { %1620 = vrot.lane.b32.xlu0 %v2899_v39, %s2412_s25  ;;  %1617 = vrot.lane.b32.xlu1 %v2899_v39, %s2413_s26 }
0x2418   :  { %v1603_v42 = vpop.permute.xlu0 %1602 }
0x2419   :  { %v1605_v44 = vmul.f32 %v1603_v42, %v1571_v60  ;;  %v1627_v53 = vmul.f32 %v1626_v52, %v1603_v42 }
0x241b   :  { %1607 = vrot.lane.b32.xlu1 %v1605_v44, %s2411_s22 }
0x247c   :  { %v1621_v47 = vpop.permute.xlu0 %1620  ;;  %v1618_v48 = vpop.permute.xlu1 %1617 }
0x247d   :  { %v1623_v49 = vsel %vm147_vm4, %v1618_v48, %v1621_v47 }
0x247e   :  { %v1624_v50 = vmul.f32 %v2809_v41, %v1623_v49 }
0x2480   :  { %v1625_v56 = vmul.f32 %v1624_v50, %v2906_v45 }
0x2482   :  { %v1628_v57 = vadd.f32 %v1627_v53, %v1625_v56 }
0x2484   :  { %1629 = vst.msk [vmem:[#allocation2] sm:$0xf] %vm23_vm0, %v1628_v57 }
0x248b   :  { %v1639_v59 = vld [vmem:[#allocation2] sm:$0xf] }
0x248c   :  { %v1640_v60 = vpack.c.bf16 %v1639_v59, %v1639_v59  ;;  %v1749_v57 = vld [vmem:[#allocation2] sm:$0xf] }
0x248d   :  { %v1608_v61 = vpop.permute.xlu1 %1607 }
0x248e   :  { %v1610_v62 = vadd.f32 %v1608_v61, %v1598_v32  ;;  %2246 = vmatmul.mubr.msk.bf16.vlgmr.msra.gmra.mrb[24].mxu1 %vm42_vm2, %v1640_v60 }
0x248f   :  { %2258 = vmatpush3.bf16.msra.mxu1 %v2738_v3  ;;  %2261 = vmatprep.mubr.msk.bf16.mxu1 %vm2408_vm1, %v2407_v0 }
0x2490   :  { %1612 = vrot.lane.b32.xlu0 %v1610_v62, %s2412_s25  ;;  %2259 = vmatprep.subr.bf16.mxu1 %v2407_v0 }
0x2493   :  { %2260 = vmatpush3.bf16.msra.mxu1 %v2748_v5 }
0x2502   :  { %v1613_v63 = vpop.permute.xlu0 %1612 }
0x2503   :  { %1615 = vst.msk [vmem:[#allocation3] sm:$0xf] %vm25_vm3, %v1613_v63 }
0x250a   :  { %v1694_v6 = vld [vmem:[#allocation3] sm:$0xf] }
0x250b   :  { %1696 = vrot.lane.b32.xlu0 %v1694_v6, %s2411_s22 }
0x2561   :  { %v1678_v3 = vpop.f32.mrb[24].mxu1 }
0x2562   :  { %v1684_v10 = vadd.f32 %v2074_v9, %v1678_v3  ;;  %v2247_v12 = vpop.f32.mrb[25].mxu1 }
0x2563   :  { %v1681_v13 = vpop.f32.mrb[26].mxu1  ;;  %v2079_v12 = vld [vmem:[%s3108_s0 + $0x38] sm:$0xf] }
0x2564   :  { %2380 = vtanh.f32 %v1684_v10  ;;  %v2248_v14 = vpop.f32.mrb[27].mxu1  ;;  %v2076_v0 = vmul.f32 -1.442695, %v1684_v10 }
0x2566   :  { %2382 = vpow2.f32 %v2076_v0 }
0x256e   :  { %v2381_v15 = vpop.eup %2380 }
0x256f   :  { %1701 = vrot.lane.b32.xlu1 %v2381_v15, %s2410_s21 }
0x2570   :  { %v2383_v5 = vpop.eup %2382 }
0x2571   :  { %v1688_v16 = vadd.f32 1.0, %v2383_v5 }
0x2573   :  { %2384 = vrcp.f32 %v1688_v16 }
0x257d   :  { %v2385_v1 = vpop.eup %2384  ;;  %v1697_v22 = vpop.permute.xlu0 %1696 }
0x257e   :  { %v1699_v23 = vmul.f32 %v2385_v1, %v1697_v22 }
0x25e1   :  { %v1702_v17 = vpop.permute.xlu1 %1701 }
0x25e2   :  { %v1704_v19 = vmul.f32 %v2385_v1, %v1702_v17 }
0x25e4   :  { %1706 = vrot.lane.b32.xlu1 %v1704_v19, %s2411_s22 }
0x25e8   :  { %1718 = vperm.xlu1 %2273, %v2077_v20  }
0x2656   :  { %v1707_v24 = vpop.permute.xlu1 %1706 }
0x2657   :  { %v1709_v2 = vadd.f32 %v1707_v24, %v1699_v23  ;;  %v2082_v24 = vld [vmem:[%s3109_s2 + $0x38] sm:$0xf] }
0x2659   :  { %2386 = vtanh.f32 %v1709_v2 }
0x2663   :  { %v2387_v29 = vpop.eup %2386 }
0x2664   :  { %1712 = vrot.lane.b32.xlu0 %v2387_v29, %s2411_s22 }
0x2667   :  { %v2938_v49 = vpop.permute.xlu1 %1718 }
0x2668   :  { %1725 = vperm.xlu0 %2272, %v1722_v34   ;;  %v1721_v62 = vmul.f32 %v2938_v49, %v1709_v2 }
0x26d6   :  { %v1713_v42 = vpop.permute.xlu0 %1712 }
0x26d7   :  { %v2931_v44 = vmul.f32 %v2385_v1, %v1713_v42 }
0x26d9   :  { %1743 = vrot.lane.b32.xlu0 %v2931_v44, %s2412_s25  ;;  %1740 = vrot.lane.b32.xlu1 %v2931_v44, %s2413_s26 }
0x26e7   :  { %v1726_v47 = vpop.permute.xlu0 %1725 }
0x26e8   :  { %v1728_v48 = vmul.f32 %v1726_v47, %v1694_v6  ;;  %v1750_v59 = vmul.f32 %v1749_v57, %v1726_v47 }
0x26ea   :  { %1730 = vrot.lane.b32.xlu1 %v1728_v48, %s2411_s22  ;;  %v1845_v48 = vsub.f32 1.0, %v2082_v24 }
0x274b   :  { %v1744_v50 = vpop.permute.xlu0 %1743  ;;  %v1741_v52 = vpop.permute.xlu1 %1740 }
0x274c   :  { %v1746_v53 = vsel %vm147_vm4, %v1741_v52, %v1744_v50 }
0x274d   :  { %v1747_v56 = vmul.f32 %v2809_v41, %v1746_v53 }
0x274f   :  { %v1748_v32 = vmul.f32 %v1747_v56, %v2938_v49 }
0x2751   :  { %v1751_v60 = vadd.f32 %v1750_v59, %v1748_v32 }
0x2753   :  { %1752 = vst.msk [vmem:[#allocation2] sm:$0xf] %vm23_vm0, %v1751_v60 }
0x275a   :  { %v1762_v61 = vld [vmem:[#allocation2] sm:$0xf] }
0x275b   :  { %v1763_v63 = vpack.c.bf16 %v1762_v61, %v1762_v61 }
0x275c   :  { %v1731_v6 = vpop.permute.xlu1 %1730 }
0x275d   :  { %v1733_v9 = vadd.f32 %v1731_v6, %v1721_v62  ;;  %2254 = vmatmul.mubr.msk.bf16.vlgmr.msra.gmra.mrb[28].mxu0 %vm42_vm2, %v1763_v63  ;;  %v1872_v62 = vld [vmem:[#allocation2] sm:$0xf] }
0x275f   :  { %1735 = vrot.lane.b32.xlu0 %v1733_v9, %s2412_s25 }
0x27d1   :  { %v1736_v3 = vpop.permute.xlu0 %1735 }
0x27d2   :  { %1738 = vst.msk [vmem:[#allocation3] sm:$0xf] %vm25_vm3, %v1736_v3 }
0x27d9   :  { %v1817_v10 = vld [vmem:[#allocation3] sm:$0xf] }
0x27da   :  { %1819 = vrot.lane.b32.xlu0 %v1817_v10, %s2411_s22 }
0x2830   :  { %v1801_v13 = vpop.f32.mrb[28].mxu0 }
0x2831   :  { %v1807_v14 = vadd.f32 %v2079_v12, %v1801_v13  ;;  %v2255_v15 = vpop.f32.mrb[29].mxu0 }
0x2832   :  { %v1804_v0 = vpop.f32.mrb[30].mxu0 }
0x2833   :  { %2388 = vtanh.f32 %v1807_v14  ;;  %v2256_v5 = vpop.f32.mrb[31].mxu0  ;;  %v2081_v1 = vmul.f32 -1.442695, %v1807_v14  ;;  %v2087_v0 = vld [vmem:[%s3109_s2 + $0x3c] sm:$0xf] }
0x2835   :  { %2390 = vpow2.f32 %v2081_v1  ;;  %v2084_v1 = vld [vmem:[%s3108_s0 + $0x3c] sm:$0xf] }
0x283d   :  { %v2389_v16 = vpop.eup %2388 }
0x283e   :  { %1824 = vrot.lane.b32.xlu1 %v2389_v16, %s2410_s21  ;;  %v1968_v16 = vsub.f32 1.0, %v2087_v0 }
0x283f   :  { %v2391_v17 = vpop.eup %2390 }
0x2840   :  { %v1811_v19 = vadd.f32 1.0, %v2391_v17 }
0x2842   :  { %2392 = vrcp.f32 %v1811_v19 }
0x284c   :  { %v2393_v20 = vpop.eup %2392  ;;  %v1820_v2 = vpop.permute.xlu0 %1819 }
0x284d   :  { %v1822_v29 = vmul.f32 %v2393_v20, %v1820_v2 }
0x28b0   :  { %v1825_v22 = vpop.permute.xlu1 %1824 }
0x28b1   :  { %v1827_v23 = vmul.f32 %v2393_v20, %v1825_v22 }
0x28b3   :  { %1829 = vrot.lane.b32.xlu1 %v1827_v23, %s2411_s22 }
0x28b7   :  { %1841 = vperm.xlu1 %2273, %v2082_v24  }
0x2925   :  { %v1830_v34 = vpop.permute.xlu1 %1829 }
0x2926   :  { %v1832_v42 = vadd.f32 %v1830_v34, %v1822_v29 }
0x2928   :  { %2394 = vtanh.f32 %v1832_v42 }
0x2932   :  { %v2395_v47 = vpop.eup %2394 }
0x2933   :  { %1835 = vrot.lane.b32.xlu0 %v2395_v47, %s2411_s22 }
0x2936   :  { %v2965_v57 = vpop.permute.xlu1 %1841 }
0x2937   :  { %1848 = vperm.xlu0 %2272, %v1845_v48  }
0x29a5   :  { %v1836_v50 = vpop.permute.xlu0 %1835 }
0x29a6   :  { %v2958_v52 = vmul.f32 %v2393_v20, %v1836_v50 }
0x29a8   :  { %1866 = vrot.lane.b32.xlu0 %v2958_v52, %s2412_s25  ;;  %1863 = vrot.lane.b32.xlu1 %v2958_v52, %s2413_s26 }
0x29b6   :  { %v1849_v53 = vpop.permute.xlu0 %1848 }
0x29b7   :  { %v1851_v56 = vmul.f32 %v1849_v53, %v1817_v10  ;;  %v1873_v63 = vmul.f32 %v1872_v62, %v1849_v53  ;;  %v1844_v10 = vmul.f32 %v2965_v57, %v1832_v42  ;;  %v646_v62 = vmul.f32 %v2628_v21, %v2621_v18 }
0x29b8   :  { %v1384_v18 = vmul.f32 %v2841_v30, %v2834_v25 }
0x29b9   :  { %1853 = vrot.lane.b32.xlu1 %v1851_v56, %s2411_s22 }
0x2a1a   :  { %v1867_v59 = vpop.permute.xlu0 %1866  ;;  %v1864_v32 = vpop.permute.xlu1 %1863 }
0x2a1b   :  { %v1869_v60 = vsel %vm147_vm4, %v1864_v32, %v1867_v59  ;;  %v277_v59 = vmul.f32 %v2529_v11, %v2522_v8  ;;  %v523_v32 = vmul.f32 %v2595_v38, %v2588_v35  ;;  %v1261_v8 = vmul.f32 %v2803_v33, %v2796_v27 }
0x2a1c   :  { %v1870_v61 = vmul.f32 %v2809_v41, %v1869_v60  ;;  %v769_v60 = vmul.f32 %v2661_v7, %v2654_v4  ;;  %v1507_v11 = vmul.f32 %v2874_v37, %v2867_v26  ;;  %v400_v27 = vmul.f32 %v2562_v54, %v2555_v51 }
0x2a1d   :  { %v1138_v51 = vmul.f32 %v2770_v40, %v2763_v36 }
0x2a1e   :  { %v1871_v6 = vmul.f32 %v1870_v61, %v2965_v57  ;;  %v1015_v61 = vmul.f32 %v2727_v46, %v2720_v43  ;;  %v155_v43 = vmul.f32 %v2491_v31, %v2484_v28  ;;  %v892_v28 = vmul.f32 %v2694_v58, %v2687_v55 }
0x2a1f   :  { %v1630_v55 = vmul.f32 %v2906_v45, %v2899_v39  ;;  %v1753_v39 = vmul.f32 %v2938_v49, %v2931_v44  ;;  %v1876_v45 = vmul.f32 %v2965_v57, %v2958_v52 }
0x2a20   :  { %v1874_v9 = vadd.f32 %v1873_v63, %v1871_v6 }
0x2a22   :  { %1875 = vst.msk [vmem:[#allocation2] sm:$0xf] %vm23_vm0, %v1874_v9 }
0x2a29   :  { %v1885_v3 = vld [vmem:[#allocation2] sm:$0xf] }
0x2a2a   :  { %v1886_v12 = vpack.c.bf16 %v1885_v3, %v1885_v3 }
0x2a2b   :  { %v1854_v13 = vpop.permute.xlu1 %1853 }
0x2a2c   :  { %v1856_v14 = vadd.f32 %v1854_v13, %v1844_v10  ;;  %2262 = vmatmul.mubr.msk.bf16.vlgmr.msra.gmra.mrb[28].mxu1 %vm42_vm2, %v1886_v12 }
0x2a2e   :  { %1858 = vrot.lane.b32.xlu0 %v1856_v14, %s2412_s25 }
0x2aa0   :  { %v1859_v15 = vpop.permute.xlu0 %1858 }
0x2aa1   :  { %1861 = vst.msk [vmem:[#allocation3] sm:$0xf] %vm25_vm3, %v1859_v15  ;;  %v1995_v15 = vld [vmem:[#allocation2] sm:$0xf] }
0x2aa8   :  { %v1940_v5 = vld [vmem:[#allocation3] sm:$0xf] }
0x2aa9   :  { %1942 = vrot.lane.b32.xlu0 %v1940_v5, %s2411_s22 }
0x2aad   :  { %1971 = vperm.xlu0 %2272, %v1968_v16  }
0x2aff   :  { %v1924_v17 = vpop.f32.mrb[28].mxu1 }
0x2b00   :  { %v1930_v19 = vadd.f32 %v2084_v1, %v1924_v17  ;;  %v2263_v20 = vpop.f32.mrb[29].mxu1 }
0x2b01   :  { %v1927_v22 = vpop.f32.mrb[30].mxu1 }
0x2b02   :  { %2396 = vtanh.f32 %v1930_v19  ;;  %v2264_v23 = vpop.f32.mrb[31].mxu1  ;;  %v2086_v2 = vmul.f32 -1.442695, %v1930_v19 }
0x2b04   :  { %2398 = vpow2.f32 %v2086_v2 }
0x2b0c   :  { %v2397_v24 = vpop.eup %2396 }
0x2b0d   :  { %1947 = vrot.lane.b32.xlu1 %v2397_v24, %s2410_s21 }
0x2b0e   :  { %v2399_v29 = vpop.eup %2398 }
0x2b0f   :  { %v1934_v34 = vadd.f32 1.0, %v2399_v29 }
0x2b11   :  { %2400 = vrcp.f32 %v1934_v34 }
0x2b1b   :  { %v2401_v42 = vpop.eup %2400  ;;  %v1943_v50 = vpop.permute.xlu0 %1942 }
0x2b1c   :  { %v1945_v35 = vmul.f32 %v2401_v42, %v1943_v50 }
0x2b2c   :  { %v2984_v53 = vpop.permute.xlu0 %1971 }
0x2b2d   :  { %v1974_v56 = vmul.f32 %v2984_v53, %v1940_v5 }
0x2b7f   :  { %v1948_v47 = vpop.permute.xlu1 %1947 }
0x2b80   :  { %v1950_v48 = vmul.f32 %v2401_v42, %v1948_v47 }
0x2b82   :  { %1952 = vrot.lane.b32.xlu1 %v1950_v48, %s2411_s22 }
0x2b86   :  { %1964 = vperm.xlu1 %2273, %v2087_v0   ;;  %v1996_v0 = vmul.f32 %v1995_v15, %v2984_v53 }
0x2b8a   :  { %1976 = vrot.lane.b32.xlu1 %v1974_v56, %s2411_s22 }
0x2b8e   :  { %279 = vrot.lane.b32.xlu1 %v277_v59, %s2413_s26 }
0x2b92   :  { %525 = vrot.lane.b32.xlu1 %v523_v32, %s2413_s26 }
0x2b96   :  { %771 = vrot.lane.b32.xlu1 %v769_v60, %s2413_s26 }
0x2b9a   :  { %1017 = vrot.lane.b32.xlu1 %v1015_v61, %s2413_s26 }
0x2b9e   :  { %1263 = vrot.lane.b32.xlu1 %v1261_v8, %s2413_s26 }
0x2ba2   :  { %1509 = vrot.lane.b32.xlu1 %v1507_v11, %s2413_s26 }
0x2bf4   :  { %v1953_v38 = vpop.permute.xlu1 %1952 }
0x2bf5   :  { %v1955_v4 = vadd.f32 %v1953_v38, %v1945_v35 }
0x2bf7   :  { %2402 = vtanh.f32 %v1955_v4 }
0x2c01   :  { %v2403_v7 = vpop.eup %2402 }
0x2c02   :  { %1958 = vrot.lane.b32.xlu0 %v2403_v7, %s2411_s22 }
0x2c05   :  { %v1965_v46 = vpop.permute.xlu1 %1964 }
0x2c06   :  { %157 = vrot.lane.b32.xlu0 %v155_v43, %s2413_s26  ;;  %v1967_v33 = vmul.f32 %v1965_v46, %v1955_v4 }
0x2c09   :  { %v1977_v26 = vpop.permute.xlu1 %1976 }
0x2c0a   :  { %v1979_v37 = vadd.f32 %v1977_v26, %v1967_v33  ;;  %402 = vrot.lane.b32.xlu0 %v400_v27, %s2413_s26 }
0x2c0d   :  { %v280_v63 = vpop.permute.xlu1 %279 }
0x2c0e   :  { %2018 = vst.msk [vmem:[%s3111_s4 + $0x4] sm:$0xf] %vm25_vm3, %v280_v63  ;;  %648 = vrot.lane.b32.xlu0 %v646_v62, %s2413_s26 }
0x2c11   :  { %v526_v31 = vpop.permute.xlu1 %525 }
0x2c12   :  { %2028 = vst.msk [vmem:[%s3111_s4 + $0xc] sm:$0xf] %vm25_vm3, %v526_v31  ;;  %894 = vrot.lane.b32.xlu0 %v892_v28, %s2413_s26 }
0x2c15   :  { %v772_v54 = vpop.permute.xlu1 %771 }
0x2c16   :  { %2038 = vst.msk [vmem:[%s3111_s4 + $0x14] sm:$0xf] %vm25_vm3, %v772_v54  ;;  %1140 = vrot.lane.b32.xlu0 %v1138_v51, %s2413_s26 }
0x2c19   :  { %v1018_v21 = vpop.permute.xlu1 %1017 }
0x2c1a   :  { %2048 = vst.msk [vmem:[%s3111_s4 + $0x1c] sm:$0xf] %vm25_vm3, %v1018_v21  ;;  %1386 = vrot.lane.b32.xlu0 %v1384_v18, %s2413_s26 }
0x2c1d   :  { %v1264_v58 = vpop.permute.xlu1 %1263 }
0x2c1e   :  { %2058 = vst.msk [vmem:[%s3111_s4 + $0x24] sm:$0xf] %vm25_vm3, %v1264_v58  ;;  %1632 = vrot.lane.b32.xlu0 %v1630_v55, %s2413_s26 }
0x2c21   :  { %v1510_v36 = vpop.permute.xlu1 %1509 }
0x2c22   :  { %2068 = vst.msk [vmem:[%s3111_s4 + $0x2c] sm:$0xf] %vm25_vm3, %v1510_v36 }
0x2c74   :  { %v1959_v40 = vpop.permute.xlu0 %1958 }
0x2c75   :  { %v1961_v25 = vmul.f32 %v2401_v42, %v1959_v40 }
0x2c77   :  { %1989 = vrot.lane.b32.xlu1 %v1961_v25, %s2412_s25  ;;  %1986 = vrot.lane.b32.xlu0 %v1961_v25, %s2413_s26  ;;  %v1999_v9 = vmul.f32 %v1965_v46, %v1961_v25 }
0x2c78   :  { %v158_v30 = vpop.permute.xlu0 %157 }
0x2c79   :  { %160 = vst.msk [vmem:[%s3111_s4] sm:$0xf] %vm25_vm3, %v158_v30 }
0x2c7b   :  { %1755 = vrot.lane.b32.xlu1 %v1753_v39, %s2413_s26  ;;  %1878 = vrot.lane.b32.xlu0 %v1876_v45, %s2413_s26 }
0x2c7c   :  { %v403_v6 = vpop.permute.xlu0 %402 }
0x2c7d   :  { %2023 = vst.msk [vmem:[%s3111_s4 + $0x8] sm:$0xf] %vm25_vm3, %v403_v6 }
0x2c7f   :  { %2001 = vrot.lane.b32.xlu0 %v1999_v9, %s2413_s26  ;;  %1981 = vrot.lane.b32.xlu1 %v1979_v37, %s2412_s25 }
0x2c80   :  { %v649_v44 = vpop.permute.xlu0 %648 }
0x2c81   :  { %2033 = vst.msk [vmem:[%s3111_s4 + $0x10] sm:$0xf] %vm25_vm3, %v649_v44 }
0x2c84   :  { %v895_v49 = vpop.permute.xlu0 %894 }
0x2c85   :  { %2043 = vst.msk [vmem:[%s3111_s4 + $0x18] sm:$0xf] %vm25_vm3, %v895_v49 }
0x2c88   :  { %v1141_v52 = vpop.permute.xlu0 %1140 }
0x2c89   :  { %2053 = vst.msk [vmem:[%s3111_s4 + $0x20] sm:$0xf] %vm25_vm3, %v1141_v52 }
0x2c8c   :  { %v1387_v57 = vpop.permute.xlu0 %1386 }
0x2c8d   :  { %2063 = vst.msk [vmem:[%s3111_s4 + $0x28] sm:$0xf] %vm25_vm3, %v1387_v57 }
0x2c90   :  { %v1633_v3 = vpop.permute.xlu0 %1632 }
0x2c91   :  { %2073 = vst.msk [vmem:[%s3111_s4 + $0x30] sm:$0xf] %vm25_vm3, %v1633_v3 }
0x2ce9   :  { %v1987_v10 = vpop.permute.xlu0 %1986  ;;  %v1990_v12 = vpop.permute.xlu1 %1989 }
0x2cea   :  { %v1992_v13 = vsel %vm147_vm4, %v1987_v10, %v1990_v12 }
0x2ceb   :  { %v1993_v14 = vmul.f32 %v2809_v41, %v1992_v13 }
0x2ced   :  { %v1994_v5 = vmul.f32 %v1993_v14, %v1965_v46  ;;  %v1879_v16 = vpop.permute.xlu0 %1878  ;;  %v1756_v1 = vpop.permute.xlu1 %1755 }
0x2cee   :  { %2083 = vst.msk [vmem:[%s3111_s4 + $0x38] sm:$0xf] %vm25_vm3, %v1879_v16  ;;  %2078 = vst.msk [vmem:[%s3111_s4 + $0x34] sm:$0xf] %vm25_vm3, %v1756_v1 }
0x2cef   :  { %v1997_v17 = vadd.f32 %v1996_v0, %v1994_v5 }
0x2cf1   :  { %1998 = vst.msk [vmem:[#allocation2] sm:$0xf] %vm23_vm0, %v1997_v17  ;;  %v2002_v41 = vpop.permute.xlu0 %2001  ;;  %v1982_v19 = vpop.permute.xlu1 %1981 }
0x2cf2   :  { %2088 = vst.msk [vmem:[%s3111_s4 + $0x3c] sm:$0xf] %vm25_vm3, %v2002_v41  ;;  %1984 = vst.msk [vmem:[#allocation3] sm:$0xf] %vm25_vm3, %v1982_v19 }

// kernel: bidaf_forward.26
= control target key start
LH: loop header
LB: loop body
LE: loop exit
PB: predicated region body
PF: predicated region fallthrough
CT: control target
= control target key end

     0   :  { %s452_s12 = smov 0   ;;  %s496_s0 = inlined_call_operand.vmem [shape: bf16[32,128], index: 0, kind: input, shape index: {}]   ;;  %s497_s1 = inlined_call_operand.vmem [shape: bf16[128,128], index: 1, kind: input, shape index: {}]   ;;  %s498_s2 = inlined_call_operand.vmem [shape: f32[1,128], index: 2, kind: input, shape index: {}]   ;;  %s499_s3 = inlined_call_operand.vmem [shape: f32[32,128], index: 3, kind: output, shape index: {}]  }
   0x1 LB: > { %s353_s13 = sadd.s32 4294967295, %s428_s12   ;;  %p357_p0 = scmp.ge.s32.totalorder %s428_s12, 1  ;;  %s428_s12 = sphi %s452_s12, %s13_s12  }
   0x2   : > { %p138_p1 = scmp.lt.s32.totalorder %s428_s12, 3 }
   0x4   : > { %p139_p2 = pnand %p357_p0, %p138_p1 }
   0x5   : > { %v413_v0 = vld [vmem:[%s497_s1] sm:$0xff] (!%p139_p2)   ;;  %v430_v1 = vmov (!%p139_p2), 0.0   ;;  %v414_v2 = vld [vmem:[%s497_s1 + $0x8] sm:$0xff] (!%p139_p2)   ;;  %vm431_vm0 = vmmov (!%p139_p2), 0   ;;  %s358_s18 = sshll.u32 (!%p139_p2), %s353_s13, 1  ;;  %v415_v3 = vld [vmem:[%s497_s1 + $0x10] sm:$0xff] (!%p139_p2)  }
   0x6   : > { %142 = sbr.rel (%p139_p2) target bundleno = 255 (0xff), region = 32  ;;  %383 = vmatprep.subr.bf16.mxu0 (!%p139_p2), %v430_v1  ;;  %399 = vmatprep.mubr.msk.bf16.mxu0 (!%p139_p2), %vm431_vm0, %v430_v1  ;;  %p163_p3 = scmp.lt.s32.totalorder (!%p139_p2), %s358_s18, 3  ;;  %v416_v4 = vld [vmem:[%s497_s1 + $0x18] sm:$0xff] (!%p139_p2)   ;;  %v417_v5 = vld [vmem:[%s497_s1 + $0x20] sm:$0xff] (!%p139_p2)   ;;  %v418_v6 = vld [vmem:[%s497_s1 + $0x28] sm:$0xff] (!%p139_p2)  }
   0x7   : > { %384 = vmatpush3.bf16.msra.mxu0 (!%p139_p2), %v413_v0  ;;  %v419_v7 = vld [vmem:[%s497_s1 + $0x30] sm:$0xff] (!%p139_p2)   ;;  %v420_v8 = vld [vmem:[%s497_s1 + $0x38] sm:$0xff] (!%p139_p2)   ;;  %v362_v10 = vld [vmem:[%s498_s2] ss:$0 sm:$0xff] (!%p139_p2) }
   0x8   : > { %385 = vmatprep.subr.bf16.mxu0 (!%p139_p2), %v430_v1 }
   0xb   : > { %386 = vmatpush3.bf16.msra.mxu0 (!%p139_p2), %v414_v2 }
   0xc   : > { %387 = vmatprep.subr.bf16.mxu0 (!%p139_p2), %v430_v1 }
   0xd   : > { %s501_s18 = smov (!%p163_p3, %s358_s18), 3 }
   0xe   : > { %s359_s21 = sshll.u32 %s501_s18, 2  ;;  %s361_s8 = sshll.u32 %s501_s18, 3 }
   0xf   : > { %s166_s24 = scalar_lea.vmem %s496_s0, %s359_s21  ;;  %388 = vmatpush3.bf16.msra.mxu0 %v415_v3  ;;  %s172_s14 = scalar_lea.vmem %s499_s3, %s361_s8 }
  0x10   : > { %389 = vmatprep.subr.bf16.mxu0 %v430_v1  ;;  %v421_v9 = vld [vmem:[%s166_s24] sm:$0xff]  }
  0x13   : > { %390 = vmatpush3.bf16.msra.mxu0 %v416_v4 }
  0x14   : > { %391 = vmatprep.subr.bf16.mxu0 %v430_v1 }
  0x17   : > { %392 = vmatpush3.bf16.msra.mxu0 %v417_v5 }
  0x18   : > { %393 = vmatprep.subr.bf16.mxu0 %v430_v1 }
  0x1b   : > { %394 = vmatpush3.bf16.msra.mxu0 %v418_v6 }
  0x1c   : > { %395 = vmatprep.subr.bf16.mxu0 %v430_v1 }
  0x1f   : > { %396 = vmatpush3.bf16.msra.mxu0 %v419_v7 }
  0x20   : > { %397 = vmatprep.subr.bf16.mxu0 %v430_v1 }
  0x23   : > { %398 = vmatpush3.bf16.msra.mxu0 %v420_v8 }
  0x26   : > { %400 = vmatmul.mubr.bf16.vlgmr.msra.gmra.mrb[0].mxu0 %v421_v9 }
  0xf9   : > { %v288_v11 = vpop.f32.mrb[0].mxu0 }
  0xfa   : > { %v289_v12 = vadd.f32 %v362_v10, %v288_v11  ;;  %v401_v13 = vpop.f32.mrb[1].mxu0 }
  0xfb   : > { %v291_v14 = vpop.f32.mrb[2].mxu0 }
  0xfc   : > { %295 = vst [vmem:[%s172_s14] sm:$0xff] %v289_v12  ;;  %v292_v15 = vadd.f32 %v362_v10, %v291_v14  ;;  %v402_v16 = vpop.f32.mrb[3].mxu0 }
  0xfe   : > { %296 = vst [vmem:[%s172_s14 + $0x8] sm:$0xff] %v292_v15 }
  0xff PF: > { %s13_s12 = sadd.s32 1, %s428_s12  }
 0x100   : > { %p10_p4 = scmp.ge.s32.totalorder %s13_s12, 4  }
 0x102   :  { %12 = sbr.rel (!%p10_p4) target bundleno = 1 (0x1), region = 62 }

// kernel: bidaf_forward.25
= control target key start
LH: loop header
LB: loop body
LE: loop exit
PB: predicated region body
PF: predicated region fallthrough
CT: control target
= control target key end

     0   :  { %s909_s24 = smov 0   ;;  %s1006_s0 = inlined_call_operand.vmem [shape: f32[2,16,32], index: 0, kind: input, shape index: {}]   ;;  %s1007_s1 = inlined_call_operand.vmem [shape: f32[2,8,32], index: 1, kind: input, shape index: {}]   ;;  %s1008_s2 = inlined_call_operand.vmem [shape: f32[2,1,16], index: 2, kind: input, shape index: {}]   ;;  %s1009_s3 = inlined_call_operand.vmem [shape: f32[2,1,8], index: 3, kind: input, shape index: {}]   ;;  %s1010_s4 = inlined_call_operand.vmem [shape: f32[1,32], index: 4, kind: input, shape index: {}]   ;;  %s1011_s5 = inlined_call_operand.vmem [shape: f32[1,32], index: 5, kind: input, shape index: {}]   ;;  %s1012_s6 = inlined_call_operand.vmem [shape: f32[1,32], index: 6, kind: input, shape index: {}]   ;;  %s1013_s7 = inlined_call_operand.vmem [shape: f32[2,16,128], index: 7, kind: output, shape index: {}]  }
   0x1 LB: > { %s767_s25 = sadd.s32 4294967295, %s861_s24   ;;  %p771_p0 = scmp.ge.s32.totalorder %s861_s24, 1  ;;  %s861_s24 = sphi %s909_s24, %s17_s24  }
   0x2   : > { %p262_p1 = scmp.lt.s32.totalorder %s861_s24, 3 }
   0x4   : > { %p263_p2 = pnand %p771_p0, %p262_p1 }
   0x5   : > { %p304_p3 = scmp.lt.s32.totalorder (!%p263_p2), %s767_s25, 1  ;;  %v863_v0 = vmov (!%p263_p2), 0.0   ;;  %vm864_vm0 = vmmov (!%p263_p2), 0   ;;  %v777_v1 = vld [vmem:[%s1012_s6] ss:$0 sm:$0xff] (!%p263_p2)  ;;  %vm359_vm1 = vcmask (!%p263_p2), 261120   ;;  %v456_v19 = vlaneseq (!%p263_p2) }
   0x6   : > { %266 = sbr.rel (%p263_p2) target bundleno = 1108 (0x454), region = 48  ;;  %799 = vmatprep.subr.bf16.mxu0 (!%p263_p2), %v863_v0  ;;  %805 = vmatprep.subr.bf16.mxu1 (!%p263_p2), %v863_v0  ;;  %v779_v2 = vld [vmem:[%s1010_s4] ss:$0 sm:$0xff] (!%p263_p2)  ;;  %v865_v24 = vmov (!%p263_p2), 0   ;;  %vm463_vm6 = vcmask (!%p263_p2), 64512   ;;  %vm495_vm7 = vcmask (!%p263_p2), 130048  }
   0x7   : > { %801 = vmatprep.mubr.msk.bf16.mxu0 (!%p263_p2), %vm864_vm0, %v863_v0  ;;  %807 = vmatprep.mubr.msk.bf16.mxu1 (!%p263_p2), %vm864_vm0, %v863_v0  ;;  %v778_v3 = vld [vmem:[%s1011_s5] ss:$0 sm:$0xff] (!%p263_p2)  ;;  %v457_v22 = vshrl.u32 (!%p263_p2), %v456_v19, 7  ;;  %vm511_vm8 = vcmask (!%p263_p2), 1043456   ;;  %s866_s23 = smov (!%p263_p2), 32   ;;  %s868_s27 = smov (!%p263_p2), 96  }
   0x8   : > { %vm674_vm9 = vcmask (!%p263_p2), 523264   ;;  %vm677_vm10 = vcmask (!%p263_p2), 785408  }
   0x9   : > { %v458_v23 = vsub.s32 (!%p263_p2), 0, %v457_v22 }
   0xd   : > { %s1015_s25 = smov (!%p304_p3, %s767_s25), 1 }
   0xe   : > { %s774_s26 = sshll.u32 %s1015_s25, 3  ;;  %s787_s29 = sshll.u32 %s1015_s25, 4 }
   0xf   : > { %s312_s9 = scalar_lea.vmem %s1007_s1, %s774_s26  ;;  %s308_s14 = scalar_lea.vmem %s1006_s0, %s787_s29 }
  0x10   : > { %v327_v4 = vld [vmem:[%s312_s9] sm:$0xff]  ;;  %v946_v6 = vld [vmem:[%s308_s14 + $0x8] sm:$0xff]  ;;  %s318_s19 = scalar_lea.vmem %s1009_s3, %s1015_s25  ;;  %s315_s22 = scalar_lea.vmem %s1008_s2, %s1015_s25 }
  0x11   : > { %v944_v5 = vld [vmem:[%s308_s14] sm:$0xff]  ;;  %v948_v7 = vpack.c.bf16 %v327_v4, %v327_v4  ;;  %v349_v8 = vmul.f32 %v777_v1, %v327_v4  ;;  %v338_v11 = vmul.f32 %v777_v1, %v946_v6  ;;  %s867_s26 = smov 64   ;;  %s323_s8 = scalar_lea.vmem %s1013_s7, %s787_s29 }
  0x12   : > { %v329_v9 = vpack.c.bf16 %v946_v6, %v944_v5  ;;  %v337_v10 = vmul.f32 %v777_v1, %v944_v5  ;;  %v453_v20 = vld [vmem:[%s318_s19] sm:$0x1] }
  0x13   : > { %v357_v12 = vadd.f32 %v779_v2, %v349_v8  ;;  %v364_v13 = vsel %vm359_vm1, %v948_v7, 0  ;;  %v347_v16 = vadd.f32 %v778_v3, %v338_v11  ;;  %v486_v21 = vld [vmem:[%s315_s22] sm:$0x1]  ;;  %vm454_vm2 = vcmp.gt.f32.partialorder %v453_v20, 0.0 }
  0x14   : > { %v411_v14 = vsel %vm359_vm1, %v329_v9, 0  ;;  %v346_v15 = vadd.f32 %v778_v3, %v337_v10  ;;  %800 = vmatpush3.bf16.xpose.msra.mxu0 %v364_v13  ;;  %vm487_vm3 = vcmp.gt.f32.partialorder %v486_v21, 0.0  ;;  %v455_v25 = vsel %vm454_vm2, 1, %v865_v24 }
  0x15   : > { %806 = vmatpush3.bf16.xpose.msra.mxu1 %v411_v14  ;;  %811 = vmatprep.subr.bf16.mxu0 %v863_v0  ;;  %v358_v17 = vpack.c.bf16 %v357_v12, %v357_v12  ;;  %v488_v26 = vsel %vm487_vm3, 1, %v865_v24  ;;  %v459_v27 = vrot.slane %v455_v25, %v458_v23  ;;  %v512_v58 = vsel %vm511_vm8, %v948_v7, 0 }
  0x16   : > { %817 = vmatprep.subr.bf16.mxu1 %v863_v0  ;;  %v348_v18 = vpack.c.bf16 %v347_v16, %v346_v15  ;;  %v492_v28 = vrot.slane %v488_v26, %v458_v23 }
  0x17   : > { %vm460_vm4 = vcmp.eq.s32.totalorder %v459_v27, 1 }
  0x18   : > { %vm493_vm5 = vcmp.eq.s32.totalorder %v492_v28, 1 }
  0x1b   : > { %802 = vmatmul.mubr.msk.bf16.vlgmr.msra.gmra.mrb[0].mxu0 %vm359_vm1, %v348_v18 }
  0x1c   : > { %808 = vmatmul.mubr.msk.bf16.vlgmr.msra.gmra.mrb[0].mxu1 %vm359_vm1, %v358_v17  ;;  %813 = vmatprep.mubr.msk.bf16.mxu0 %vm864_vm0, %v863_v0 }
  0x1d   : > { %818 = vmatpush3.bf16.msra.mxu1 %v329_v9  ;;  %819 = vmatprep.mubr.msk.bf16.mxu1 %vm864_vm0, %v863_v0 }
  0x1e   : > { %812 = vmatpush3.bf16.msra.mxu0 %v512_v58 }
  0x1f   : > { %823 = vmatprep.subr.bf16.mxu0 %v863_v0 }
  0xee   : > { %v400_v29 = vpop.f32.mrb[0].mxu0 }
  0xef   : > { %v447_v30 = vpop.f32.mrb[0].mxu1  ;;  %v461_v31 = vsel %vm460_vm4, %v400_v29, -1e+30  ;;  %v803_v34 = vpop.f32.mrb[1].mxu0 }
  0xf0   : > { %v494_v32 = vsel %vm493_vm5, %v447_v30, -1e+30  ;;  %v809_v33 = vpop.f32.mrb[1].mxu1  ;;  %v464_v36 = vsel %vm463_vm6, %v461_v31, -inf  ;;  %v403_v38 = vpop.f32.mrb[2].mxu0 }
  0xf1   : > { %v450_v35 = vpop.f32.mrb[2].mxu1  ;;  %v496_v37 = vsel %vm495_vm7, %v494_v32, -inf  ;;  %465 = vmax.xlane.f32.xlu1 %v464_v36  ;;  %v462_v40 = vsel %vm460_vm4, %v403_v38, -1e+30  ;;  %v804_v41 = vpop.f32.mrb[3].mxu0 }
  0xf2   : > { %497 = vmax.xlane.f32.xlu0 %v496_v37  ;;  %v810_v39 = vpop.f32.mrb[3].mxu1  ;;  %v467_v42 = vsel %vm463_vm6, %v462_v40, -inf }
  0xf5   : > { %468 = vmax.xlane.f32.xlu1 %v467_v42 }
 0x17e   : > { %v466_v43 = vpop.xlane.xlu1 %465 }
 0x17f   : > { %v498_v44 = vpop.xlane.xlu0 %497  ;;  %v470_v45 = vsub.f32 %v461_v31, %v466_v43 }
 0x180   : > { %v499_v46 = vsub.f32 %v494_v32, %v498_v44 }
 0x181   : > { %v472_v47 = vmul.f32 1.442695, %v470_v45 }
 0x182   : > { %v500_v48 = vmul.f32 1.442695, %v499_v46  ;;  %v469_v49 = vpop.xlane.xlu1 %468 }
 0x183   : > { %843 = vpow2.f32 %v472_v47  ;;  %v471_v50 = vsub.f32 %v462_v40, %v469_v49 }
 0x184   : > { %845 = vpow2.f32 %v500_v48 }
 0x185   : > { %v474_v51 = vmul.f32 1.442695, %v471_v50 }
 0x187   : > { %847 = vpow2.f32 %v474_v51 }
 0x18d   : > { %v844_v52 = vpop.eup %843 }
 0x18e   : > { %v846_v53 = vpop.eup %845  ;;  %v476_v56 = vsel %vm463_vm6, %v844_v52, 0.0 }
 0x18f   : > { %v502_v54 = vsel %vm495_vm7, %v846_v53, 0.0 }
 0x190   : > { %503 = vadd.xlane.f32.xlu0 %v502_v54 }
 0x191   : > { %v848_v55 = vpop.eup %847 }
 0x192   : > { %v479_v57 = vsel %vm463_vm6, %v848_v55, 0.0 }
 0x193   : > { %480 = vadd.xlane.f32.xlu1 %v479_v57 }
 0x194   : > { %477 = vadd.xlane.f32.xlu0 %v476_v56 }
 0x21d   : > { %v504_v59 = vpop.xlane.xlu0 %503 }
 0x21e   : > { %849 = vrcp.f32 %v504_v59 }
 0x220   : > { %v481_v60 = vpop.xlane.xlu1 %480 }
 0x221   : > { %851 = vrcp.f32 %v481_v60  ;;  %v478_v61 = vpop.xlane.xlu0 %477 }
 0x222   : > { %853 = vrcp.f32 %v478_v61 }
 0x228   : > { %v850_v62 = vpop.eup %849 }
 0x229   : > { %v506_v63 = vmul.f32 %v850_v62, %v846_v53 }
 0x22b   : > { %v852_v1 = vpop.eup %851  ;;  %v555_v2 = vpack.c.bf16 %v506_v63, %v506_v63 }
 0x22c   : > { %v854_v3 = vpop.eup %853  ;;  %v485_v4 = vmul.f32 %v852_v1, %v848_v55 }
 0x22d   : > { %v484_v8 = vmul.f32 %v854_v3, %v844_v52  ;;  %820 = vmatmul.mubr.msk.bf16.vlgmr.msra.gmra.mrb[4].mxu1 %vm495_vm7, %v555_v2 }
 0x22f   : > { %v507_v9 = vpack.c.bf16 %v485_v4, %v484_v8 }
 0x231   : > { %814 = vmatmul.mubr.msk.bf16.vlgmr.msra.gmra.mrb[4].mxu0 %vm463_vm6, %v507_v9 }
 0x232   : > { %825 = vmatprep.mubr.msk.bf16.mxu0 %vm864_vm0, %v863_v0 }
 0x300   : > { %v593_v7 = vpop.f32.mrb[4].mxu1 }
 0x301   : > { %v599_v10 = vpack.c.bf16 %v593_v7, %v593_v7  ;;  %v821_v11 = vpop.f32.mrb[5].mxu1 }
 0x302   : > { %v596_v12 = vpop.f32.mrb[6].mxu1 }
 0x303   : > { %v601_v13 = vsel %vm511_vm8, %v599_v10, 0  ;;  %v822_v14 = vpop.f32.mrb[7].mxu1 }
 0x304   : > { %v548_v15 = vpop.f32.mrb[4].mxu0  ;;  %824 = vmatpush3.bf16.msra.mxu0 %v601_v13 }
 0x305   : > { %650 = vrot.lane.b32.xlu0 %v548_v15, %s866_s23  ;;  %v815_v16 = vpop.f32.mrb[5].mxu0  ;;  %v644_v19 = vmul.f32 %v548_v15, %v944_v5 }
 0x306   : > { %v551_v17 = vpop.f32.mrb[6].mxu0 }
 0x307   : > { %652 = vrot.lane.b32.xlu1 %v551_v17, %s866_s23  ;;  %v816_v18 = vpop.f32.mrb[7].mxu0  ;;  %826 = vmatmul.mubr.msk.bf16.vlgmr.msra.gmra.mrb[8].mxu0 %vm463_vm6, %v507_v9  ;;  %v645_v0 = vmul.f32 %v551_v17, %v946_v6 }
 0x30b   : > { %658 = vrot.lane.b32.xlu1 %v644_v19, %s867_s26 }
 0x30f   : > { %660 = vrot.lane.b32.xlu1 %v645_v0, %s867_s26 }
 0x377   : > { %v651_v28 = vpop.permute.xlu0 %650 }
 0x378   : > { %v672_v30 = vsel %vm359_vm1, %v944_v5, %v651_v28 }
 0x379   : > { %v653_v26 = vpop.permute.xlu1 %652 }
 0x37a   : > { %v673_v33 = vsel %vm359_vm1, %v946_v6, %v653_v26 }
 0x37d   : > { %v659_v27 = vpop.permute.xlu1 %658 }
 0x37e   : > { %v675_v31 = vsel %vm674_vm9, %v672_v30, %v659_v27 }
 0x381   : > { %v661_v29 = vpop.permute.xlu1 %660 }
 0x382   : > { %v676_v35 = vsel %vm674_vm9, %v673_v33, %v661_v29 }
 0x3da   : > { %v637_v20 = vpop.f32.mrb[8].mxu0 }
 0x3db   : > { %v646_v21 = vmul.f32 %v637_v20, %v944_v5  ;;  %v827_v22 = vpop.f32.mrb[9].mxu0 }
 0x3dc   : > { %v640_v23 = vpop.f32.mrb[10].mxu0 }
 0x3dd   : > { %v647_v24 = vmul.f32 %v640_v23, %v946_v6  ;;  %666 = vrot.lane.b32.xlu0 %v646_v21, %s868_s27  ;;  %v828_v25 = vpop.f32.mrb[11].mxu0 }
 0x3df   : > { %668 = vrot.lane.b32.xlu1 %v647_v24, %s868_s27 }
 0x44f   : > { %v667_v32 = vpop.permute.xlu0 %666 }
 0x450   : > { %v678_v34 = vsel %vm677_vm10, %v675_v31, %v667_v32 }
 0x451   : > { %680 = vst [vmem:[%s323_s8] sm:$0xff] %v678_v34  ;;  %v669_v36 = vpop.permute.xlu1 %668 }
 0x452   : > { %v679_v37 = vsel %vm677_vm10, %v676_v35, %v669_v36 }
 0x453   : > { %681 = vst [vmem:[%s323_s8 + $0x8] sm:$0xff] %v679_v37 }
 0x454 PF: > { %s17_s24 = sadd.s32 1, %s861_s24  }
 0x455   : > { %p14_p4 = scmp.ge.s32.totalorder %s17_s24, 4  }
 0x457   :  { %16 = sbr.rel (!%p14_p4) target bundleno = 1 (0x1), region = 87 }

// kernel: bidaf_forward.24
= control target key start
LH: loop header
LB: loop body
LE: loop exit
PB: predicated region body
PF: predicated region fallthrough
CT: control target
= control target key end

     0   :  { %vm23_vm0 = vcmask 257024   ;;  %v1228_v0 = vmov 0.0   ;;  %vm1229_vm1 = vmmov 0   ;;  %vm42_vm2 = vcmask 261120   ;;  %s1231_s20 = smov 80   ;;  %s1232_s21 = smov 16   ;;  %s1589_s1 = inlined_call_operand.vmem [shape: bf16[32,64], index: 1, kind: input, shape index: {}]   ;;  %s1590_s0 = inlined_call_operand.vmem [shape: f32[8,4,64], index: 0, kind: input, shape index: {}]   ;;  %s1591_s2 = inlined_call_operand.vmem [shape: f32[8,4,1], index: 2, kind: input, shape index: {}]   ;;  %s1592_s3 = inlined_call_operand.vmem [shape: f32[4,32], index: 3, kind: input, shape index: {}]   ;;  %s1593_s4 = inlined_call_operand.vmem [shape: f32[8,4,16], index: 4, kind: output, shape index: {}]  }
   0x1   :  { %1089 = vmatprep.subr.bf16.mxu0 %v1228_v0  ;;  %v1264_v1 = vld [vmem:[%s1589_s1] sm:$0xff]   ;;  %1093 = vmatprep.mubr.msk.bf16.mxu0 %vm1229_vm1, %v1228_v0  ;;  %24 = vst.msk [vmem:[#allocation2] sm:$0xf] %vm23_vm0, %v1228_v0  ;;  %v1277_v2 = vld [vmem:[%s1589_s1 + $0x8] sm:$0xff]   ;;  %vm25_vm3 = vcmask 125952   ;;  %v1230_v5 = vmov 0  }
   0x2   :  { %1097 = vmatprep.subr.bf16.mxu1 %v1228_v0  ;;  %1101 = vmatprep.mubr.msk.bf16.mxu1 %vm1229_vm1, %v1228_v0  ;;  %26 = vst.msk [vmem:[#allocation3] sm:$0xf] %vm25_vm3, %v1228_v0  ;;  %v27_v6 = vld [vmem:[%s1590_s0] sm:$0xf]  ;;  %s1233_s24 = smov 112   ;;  %s1234_s25 = smov 96  }
   0x3   :  { %1090 = vmatpush3.bf16.msra.mxu0 %v1264_v1  ;;  %1098 = vmatpush3.bf16.msra.mxu1 %v1264_v1  ;;  %v94_v14 = vld [vmem:[%s1591_s2] sm:$0xf]  ;;  %vm147_vm4 = vcmask 130048   ;;  %v1030_v48 = vld [vmem:[%s1590_s0 + $0x4] sm:$0xf] }
   0x4   :  { %1091 = vmatprep.subr.bf16.mxu0 %v1228_v0  ;;  %1099 = vmatprep.subr.bf16.mxu1 %v1228_v0  ;;  %v123_v26 = vsub.f32 1.0, %v94_v14  ;;  %v1317_v32 = vld [vmem:[%s1592_s3] sm:$0xf]  ;;  %v1033_v61 = vld [vmem:[%s1591_s2 + $0x4] sm:$0xf] }
   0x5   :  { %1160 = vset.pattern.permute.xlu0 %v1230_v5  ;;  %1161 = vset.pattern.permute.xlu1 %v1230_v5 }
   0x7   :  { %1092 = vmatpush3.bf16.msra.mxu0 %v1277_v2  ;;  %1100 = vmatpush3.bf16.msra.mxu1 %v1277_v2 }
   0x8   :  { %v28_v3 = vld [vmem:[#allocation2] sm:$0xf]  ;;  %1105 = vmatprep.subr.bf16.mxu0 %v1228_v0  ;;  %1113 = vmatprep.subr.bf16.mxu1 %v1228_v0 }
   0x9   :  { %v29_v4 = vpack.c.bf16 %v28_v3, %v28_v3  ;;  %v95_v13 = vld [vmem:[#allocation3] sm:$0xf]  ;;  %v151_v35 = vld [vmem:[#allocation2] sm:$0xf] }
   0xb   :  { %1094 = vmatmul.mubr.msk.bf16.vlgmr.msra.gmra.mrb[0].mxu0 %vm42_vm2, %v29_v4 }
   0xc   :  { %1106 = vmatpush3.bf16.msra.mxu0 %v1264_v1  ;;  %1109 = vmatprep.mubr.msk.bf16.mxu0 %vm1229_vm1, %v1228_v0 }
   0xd   :  { %1107 = vmatprep.subr.bf16.mxu0 %v1228_v0 }
  0x10   :  { %1108 = vmatpush3.bf16.msra.mxu0 %v1277_v2 }
  0x11   :  { %1121 = vmatprep.subr.bf16.mxu0 %v1228_v0 }
  0xde   :  { %v80_v7 = vpop.f32.mrb[0].mxu0 }
  0xdf   :  { %v86_v8 = vadd.f32 %v80_v7, %v27_v6  ;;  %v1095_v9 = vpop.f32.mrb[1].mxu0  ;;  %v246_v6 = vsub.f32 1.0, %v1033_v61 }
  0xe0   :  { %v83_v10 = vpop.f32.mrb[2].mxu0 }
  0xe1   :  { %1164 = vtanh.f32 %v86_v8  ;;  %v1096_v11 = vpop.f32.mrb[3].mxu0  ;;  %v1029_v15 = vmul.f32 -1.442695, %v86_v8 }
  0xe3   :  { %1166 = vpow2.f32 %v1029_v15 }
  0xeb   :  { %v1165_v12 = vpop.eup %1164 }
  0xec   :  { %102 = vrot.lane.b32.xlu0 %v1165_v12, %s1231_s20 }
  0xed   :  { %v1167_v16 = vpop.eup %1166 }
  0xee   :  { %v90_v17 = vadd.f32 1.0, %v1167_v16 }
  0xf0   :  { %97 = vrot.lane.b32.xlu0 %v95_v13, %s1232_s21  ;;  %1168 = vrcp.f32 %v90_v17 }
  0xf4   :  { %119 = vperm.xlu0 %1160, %v94_v14  }
  0xfa   :  { %v1169_v18 = vpop.eup %1168 }
 0x15e   :  { %v103_v19 = vpop.permute.xlu0 %102 }
 0x15f   :  { %v105_v20 = vmul.f32 %v1169_v18, %v103_v19 }
 0x161   :  { %107 = vrot.lane.b32.xlu1 %v105_v20, %s1232_s21 }
 0x162   :  { %v98_v21 = vpop.permute.xlu0 %97 }
 0x163   :  { %v100_v22 = vmul.f32 %v1169_v18, %v98_v21 }
 0x173   :  { %v1312_v31 = vpop.permute.xlu0 %119 }
 0x1d3   :  { %v108_v23 = vpop.permute.xlu1 %107 }
 0x1d4   :  { %v110_v24 = vadd.f32 %v108_v23, %v100_v22 }
 0x1d6   :  { %1170 = vtanh.f32 %v110_v24  ;;  %v122_v42 = vmul.f32 %v1312_v31, %v110_v24 }
 0x1e0   :  { %v1171_v25 = vpop.eup %1170 }
 0x1e1   :  { %113 = vrot.lane.b32.xlu1 %v1171_v25, %s1232_s21 }
 0x1e5   :  { %126 = vperm.xlu1 %1161, %v123_v26  }
 0x253   :  { %v114_v27 = vpop.permute.xlu1 %113 }
 0x254   :  { %v1305_v28 = vmul.f32 %v1169_v18, %v114_v27  ;;  %v1035_v27 = vld [vmem:[%s1590_s0 + $0x8] sm:$0xf] }
 0x256   :  { %144 = vrot.lane.b32.xlu0 %v1305_v28, %s1233_s24  ;;  %141 = vrot.lane.b32.xlu1 %v1305_v28, %s1234_s25 }
 0x264   :  { %v127_v29 = vpop.permute.xlu1 %126 }
 0x265   :  { %v129_v30 = vmul.f32 %v127_v29, %v95_v13  ;;  %v152_v38 = vmul.f32 %v151_v35, %v127_v29 }
 0x267   :  { %131 = vrot.lane.b32.xlu1 %v129_v30, %s1232_s21 }
 0x2c8   :  { %v145_v33 = vpop.permute.xlu0 %144  ;;  %v142_v34 = vpop.permute.xlu1 %141 }
 0x2c9   :  { %v148_v36 = vsel %vm147_vm4, %v142_v34, %v145_v33 }
 0x2ca   :  { %v149_v37 = vmul.f32 %v148_v36, %v1317_v32 }
 0x2cc   :  { %v150_v39 = vmul.f32 %v149_v37, %v1312_v31 }
 0x2ce   :  { %v153_v40 = vadd.f32 %v152_v38, %v150_v39 }
 0x2d0   :  { %154 = vst.msk [vmem:[#allocation2] sm:$0xf] %vm23_vm0, %v153_v40 }
 0x2d7   :  { %v163_v41 = vld [vmem:[#allocation2] sm:$0xf] }
 0x2d8   :  { %v164_v43 = vpack.c.bf16 %v163_v41, %v163_v41  ;;  %v273_v16 = vld [vmem:[#allocation2] sm:$0xf] }
 0x2d9   :  { %v132_v44 = vpop.permute.xlu1 %131 }
 0x2da   :  { %v134_v45 = vadd.f32 %v132_v44, %v122_v42  ;;  %1102 = vmatmul.mubr.msk.bf16.vlgmr.msra.gmra.mrb[0].mxu1 %vm42_vm2, %v164_v43  ;;  %v1038_v43 = vld [vmem:[%s1591_s2 + $0x8] sm:$0xf] }
 0x2db   :  { %1114 = vmatpush3.bf16.msra.mxu1 %v1264_v1  ;;  %1117 = vmatprep.mubr.msk.bf16.mxu1 %vm1229_vm1, %v1228_v0 }
 0x2dc   :  { %136 = vrot.lane.b32.xlu0 %v134_v45, %s1233_s24  ;;  %1115 = vmatprep.subr.bf16.mxu1 %v1228_v0 }
 0x2df   :  { %1116 = vmatpush3.bf16.msra.mxu1 %v1277_v2 }
 0x2e0   :  { %1129 = vmatprep.subr.bf16.mxu1 %v1228_v0 }
 0x34e   :  { %v137_v46 = vpop.permute.xlu0 %136 }
 0x34f   :  { %139 = vst.msk [vmem:[#allocation3] sm:$0xf] %vm25_vm3, %v137_v46 }
 0x356   :  { %v218_v47 = vld [vmem:[#allocation3] sm:$0xf] }
 0x357   :  { %220 = vrot.lane.b32.xlu0 %v218_v47, %s1232_s21 }
 0x3ad   :  { %v202_v49 = vpop.f32.mrb[0].mxu1 }
 0x3ae   :  { %v208_v50 = vadd.f32 %v1030_v48, %v202_v49  ;;  %v1103_v51 = vpop.f32.mrb[1].mxu1  ;;  %v369_v49 = vsub.f32 1.0, %v1038_v43 }
 0x3af   :  { %v205_v52 = vpop.f32.mrb[2].mxu1 }
 0x3b0   :  { %1172 = vtanh.f32 %v208_v50  ;;  %v1104_v53 = vpop.f32.mrb[3].mxu1  ;;  %v1032_v55 = vmul.f32 -1.442695, %v208_v50 }
 0x3b2   :  { %1174 = vpow2.f32 %v1032_v55 }
 0x3ba   :  { %v1173_v54 = vpop.eup %1172 }
 0x3bb   :  { %225 = vrot.lane.b32.xlu1 %v1173_v54, %s1231_s20 }
 0x3bc   :  { %v1175_v56 = vpop.eup %1174 }
 0x3bd   :  { %v212_v57 = vadd.f32 1.0, %v1175_v56 }
 0x3bf   :  { %1176 = vrcp.f32 %v212_v57 }
 0x3c9   :  { %v1177_v58 = vpop.eup %1176  ;;  %v221_v62 = vpop.permute.xlu0 %220 }
 0x3ca   :  { %v223_v63 = vmul.f32 %v1177_v58, %v221_v62 }
 0x42d   :  { %v226_v59 = vpop.permute.xlu1 %225 }
 0x42e   :  { %v228_v60 = vmul.f32 %v1177_v58, %v226_v59 }
 0x430   :  { %230 = vrot.lane.b32.xlu1 %v228_v60, %s1232_s21 }
 0x434   :  { %242 = vperm.xlu1 %1161, %v1033_v61  }
 0x4a2   :  { %v231_v3 = vpop.permute.xlu1 %230 }
 0x4a3   :  { %v233_v4 = vadd.f32 %v231_v3, %v223_v63 }
 0x4a5   :  { %1178 = vtanh.f32 %v233_v4 }
 0x4af   :  { %v1179_v5 = vpop.eup %1178 }
 0x4b0   :  { %236 = vrot.lane.b32.xlu0 %v1179_v5, %s1232_s21 }
 0x4b3   :  { %v1350_v11 = vpop.permute.xlu1 %242 }
 0x4b4   :  { %249 = vperm.xlu0 %1160, %v246_v6   ;;  %v245_v21 = vmul.f32 %v1350_v11, %v233_v4 }
 0x522   :  { %v237_v7 = vpop.permute.xlu0 %236 }
 0x523   :  { %v1343_v8 = vmul.f32 %v1177_v58, %v237_v7 }
 0x525   :  { %267 = vrot.lane.b32.xlu0 %v1343_v8, %s1233_s24  ;;  %264 = vrot.lane.b32.xlu1 %v1343_v8, %s1234_s25 }
 0x533   :  { %v250_v9 = vpop.permute.xlu0 %249 }
 0x534   :  { %v252_v10 = vmul.f32 %v250_v9, %v218_v47  ;;  %v274_v17 = vmul.f32 %v273_v16, %v250_v9 }
 0x536   :  { %254 = vrot.lane.b32.xlu1 %v252_v10, %s1232_s21  ;;  %v1040_v10 = vld [vmem:[%s1590_s0 + $0xc] sm:$0xf] }
 0x597   :  { %v268_v12 = vpop.permute.xlu0 %267  ;;  %v265_v13 = vpop.permute.xlu1 %264 }
 0x598   :  { %v270_v14 = vsel %vm147_vm4, %v265_v13, %v268_v12 }
 0x599   :  { %v271_v15 = vmul.f32 %v270_v14, %v1317_v32 }
 0x59b   :  { %v272_v18 = vmul.f32 %v271_v15, %v1350_v11 }
 0x59d   :  { %v275_v19 = vadd.f32 %v274_v17, %v272_v18 }
 0x59f   :  { %276 = vst.msk [vmem:[#allocation2] sm:$0xf] %vm23_vm0, %v275_v19 }
 0x5a6   :  { %v286_v20 = vld [vmem:[#allocation2] sm:$0xf] }
 0x5a7   :  { %v287_v22 = vpack.c.bf16 %v286_v20, %v286_v20  ;;  %v396_v59 = vld [vmem:[#allocation2] sm:$0xf] }
 0x5a8   :  { %v255_v23 = vpop.permute.xlu1 %254 }
 0x5a9   :  { %v257_v24 = vadd.f32 %v255_v23, %v245_v21  ;;  %1110 = vmatmul.mubr.msk.bf16.vlgmr.msra.gmra.mrb[4].mxu0 %vm42_vm2, %v287_v22 }
 0x5aa   :  { %1122 = vmatpush3.bf16.msra.mxu0 %v1264_v1  ;;  %1125 = vmatprep.mubr.msk.bf16.mxu0 %vm1229_vm1, %v1228_v0 }
 0x5ab   :  { %259 = vrot.lane.b32.xlu0 %v257_v24, %s1233_s24  ;;  %1123 = vmatprep.subr.bf16.mxu0 %v1228_v0  ;;  %v1043_v24 = vld [vmem:[%s1591_s2 + $0xc] sm:$0xf] }
 0x5ae   :  { %1124 = vmatpush3.bf16.msra.mxu0 %v1277_v2 }
 0x5af   :  { %1137 = vmatprep.subr.bf16.mxu0 %v1228_v0 }
 0x61d   :  { %v260_v25 = vpop.permute.xlu0 %259 }
 0x61e   :  { %262 = vst.msk [vmem:[#allocation3] sm:$0xf] %vm25_vm3, %v260_v25 }
 0x625   :  { %v341_v26 = vld [vmem:[#allocation3] sm:$0xf] }
 0x626   :  { %343 = vrot.lane.b32.xlu0 %v341_v26, %s1232_s21 }
 0x67c   :  { %v325_v29 = vpop.f32.mrb[4].mxu0 }
 0x67d   :  { %v331_v30 = vadd.f32 %v1035_v27, %v325_v29  ;;  %v1111_v33 = vpop.f32.mrb[5].mxu0 }
 0x67e   :  { %v328_v34 = vpop.f32.mrb[6].mxu0  ;;  %v492_v33 = vsub.f32 1.0, %v1043_v24 }
 0x67f   :  { %1180 = vtanh.f32 %v331_v30  ;;  %v1112_v35 = vpop.f32.mrb[7].mxu0  ;;  %v1037_v37 = vmul.f32 -1.442695, %v331_v30 }
 0x681   :  { %1182 = vpow2.f32 %v1037_v37 }
 0x689   :  { %v1181_v36 = vpop.eup %1180 }
 0x68a   :  { %348 = vrot.lane.b32.xlu1 %v1181_v36, %s1231_s20 }
 0x68b   :  { %v1183_v38 = vpop.eup %1182 }
 0x68c   :  { %v335_v39 = vadd.f32 1.0, %v1183_v38 }
 0x68e   :  { %1184 = vrcp.f32 %v335_v39 }
 0x698   :  { %v1185_v40 = vpop.eup %1184  ;;  %v344_v44 = vpop.permute.xlu0 %343 }
 0x699   :  { %v346_v45 = vmul.f32 %v1185_v40, %v344_v44 }
 0x6fc   :  { %v349_v41 = vpop.permute.xlu1 %348 }
 0x6fd   :  { %v351_v42 = vmul.f32 %v1185_v40, %v349_v41 }
 0x6ff   :  { %353 = vrot.lane.b32.xlu1 %v351_v42, %s1232_s21 }
 0x703   :  { %365 = vperm.xlu1 %1161, %v1038_v43  }
 0x771   :  { %v354_v46 = vpop.permute.xlu1 %353 }
 0x772   :  { %v356_v47 = vadd.f32 %v354_v46, %v346_v45 }
 0x774   :  { %1186 = vtanh.f32 %v356_v47 }
 0x77e   :  { %v1187_v48 = vpop.eup %1186 }
 0x77f   :  { %359 = vrot.lane.b32.xlu0 %v1187_v48, %s1232_s21 }
 0x782   :  { %v1383_v54 = vpop.permute.xlu1 %365 }
 0x783   :  { %372 = vperm.xlu0 %1160, %v369_v49   ;;  %v368_v3 = vmul.f32 %v1383_v54, %v356_v47 }
 0x7f1   :  { %v360_v50 = vpop.permute.xlu0 %359 }
 0x7f2   :  { %v1376_v51 = vmul.f32 %v1185_v40, %v360_v50 }
 0x7f4   :  { %390 = vrot.lane.b32.xlu0 %v1376_v51, %s1233_s24  ;;  %387 = vrot.lane.b32.xlu1 %v1376_v51, %s1234_s25 }
 0x802   :  { %v373_v52 = vpop.permute.xlu0 %372 }
 0x803   :  { %v375_v53 = vmul.f32 %v373_v52, %v341_v26  ;;  %v397_v60 = vmul.f32 %v396_v59, %v373_v52 }
 0x805   :  { %377 = vrot.lane.b32.xlu1 %v375_v53, %s1232_s21 }
 0x866   :  { %v391_v55 = vpop.permute.xlu0 %390  ;;  %v388_v56 = vpop.permute.xlu1 %387 }
 0x867   :  { %v393_v57 = vsel %vm147_vm4, %v388_v56, %v391_v55  ;;  %v1045_v56 = vld [vmem:[%s1590_s0 + $0x10] sm:$0xf] }
 0x868   :  { %v394_v58 = vmul.f32 %v393_v57, %v1317_v32 }
 0x86a   :  { %v395_v61 = vmul.f32 %v394_v58, %v1383_v54 }
 0x86c   :  { %v398_v62 = vadd.f32 %v397_v60, %v395_v61 }
 0x86e   :  { %399 = vst.msk [vmem:[#allocation2] sm:$0xf] %vm23_vm0, %v398_v62 }
 0x875   :  { %v409_v63 = vld [vmem:[#allocation2] sm:$0xf] }
 0x876   :  { %v410_v4 = vpack.c.bf16 %v409_v63, %v409_v63  ;;  %v519_v43 = vld [vmem:[#allocation2] sm:$0xf] }
 0x877   :  { %v378_v5 = vpop.permute.xlu1 %377 }
 0x878   :  { %v380_v6 = vadd.f32 %v378_v5, %v368_v3  ;;  %1118 = vmatmul.mubr.msk.bf16.vlgmr.msra.gmra.mrb[4].mxu1 %vm42_vm2, %v410_v4 }
 0x879   :  { %1130 = vmatpush3.bf16.msra.mxu1 %v1264_v1  ;;  %1133 = vmatprep.mubr.msk.bf16.mxu1 %vm1229_vm1, %v1228_v0 }
 0x87a   :  { %382 = vrot.lane.b32.xlu0 %v380_v6, %s1233_s24  ;;  %1131 = vmatprep.subr.bf16.mxu1 %v1228_v0 }
 0x87d   :  { %1132 = vmatpush3.bf16.msra.mxu1 %v1277_v2 }
 0x87e   :  { %1145 = vmatprep.subr.bf16.mxu1 %v1228_v0 }
 0x8ec   :  { %v383_v7 = vpop.permute.xlu0 %382 }
 0x8ed   :  { %385 = vst.msk [vmem:[#allocation3] sm:$0xf] %vm25_vm3, %v383_v7 }
 0x8f4   :  { %v464_v9 = vld [vmem:[#allocation3] sm:$0xf] }
 0x8f5   :  { %466 = vrot.lane.b32.xlu0 %v464_v9, %s1232_s21 }
 0x94b   :  { %v448_v12 = vpop.f32.mrb[4].mxu1 }
 0x94c   :  { %v454_v13 = vadd.f32 %v1040_v10, %v448_v12  ;;  %v1119_v14 = vpop.f32.mrb[5].mxu1 }
 0x94d   :  { %v451_v15 = vpop.f32.mrb[6].mxu1 }
 0x94e   :  { %1188 = vtanh.f32 %v454_v13  ;;  %v1120_v16 = vpop.f32.mrb[7].mxu1  ;;  %v1042_v18 = vmul.f32 -1.442695, %v454_v13 }
 0x950   :  { %1190 = vpow2.f32 %v1042_v18 }
 0x958   :  { %v1189_v17 = vpop.eup %1188 }
 0x959   :  { %471 = vrot.lane.b32.xlu1 %v1189_v17, %s1231_s20 }
 0x95a   :  { %v1191_v19 = vpop.eup %1190 }
 0x95b   :  { %v458_v20 = vadd.f32 1.0, %v1191_v19 }
 0x95d   :  { %1192 = vrcp.f32 %v458_v20 }
 0x967   :  { %v1193_v21 = vpop.eup %1192  ;;  %v467_v25 = vpop.permute.xlu0 %466 }
 0x968   :  { %v469_v26 = vmul.f32 %v1193_v21, %v467_v25 }
 0x9cb   :  { %v472_v22 = vpop.permute.xlu1 %471 }
 0x9cc   :  { %v474_v23 = vmul.f32 %v1193_v21, %v472_v22 }
 0x9ce   :  { %476 = vrot.lane.b32.xlu1 %v474_v23, %s1232_s21 }
 0x9d2   :  { %488 = vperm.xlu1 %1161, %v1043_v24  }
 0xa40   :  { %v477_v27 = vpop.permute.xlu1 %476 }
 0xa41   :  { %v479_v29 = vadd.f32 %v477_v27, %v469_v26 }
 0xa43   :  { %1194 = vtanh.f32 %v479_v29 }
 0xa4d   :  { %v1195_v30 = vpop.eup %1194 }
 0xa4e   :  { %482 = vrot.lane.b32.xlu0 %v1195_v30, %s1232_s21 }
 0xa51   :  { %v1416_v38 = vpop.permute.xlu1 %488 }
 0xa52   :  { %495 = vperm.xlu0 %1160, %v492_v33   ;;  %v491_v48 = vmul.f32 %v1416_v38, %v479_v29 }
 0xac0   :  { %v483_v34 = vpop.permute.xlu0 %482 }
 0xac1   :  { %v1409_v35 = vmul.f32 %v1193_v21, %v483_v34 }
 0xac3   :  { %513 = vrot.lane.b32.xlu0 %v1409_v35, %s1233_s24  ;;  %510 = vrot.lane.b32.xlu1 %v1409_v35, %s1234_s25 }
 0xad1   :  { %v496_v36 = vpop.permute.xlu0 %495 }
 0xad2   :  { %v498_v37 = vmul.f32 %v496_v36, %v464_v9  ;;  %v520_v44 = vmul.f32 %v519_v43, %v496_v36  ;;  %v1048_v9 = vld [vmem:[%s1591_s2 + $0x10] sm:$0xf] }
 0xad3   :  { %v615_v16 = vsub.f32 1.0, %v1048_v9 }
 0xad4   :  { %500 = vrot.lane.b32.xlu1 %v498_v37, %s1232_s21 }
 0xb35   :  { %v514_v39 = vpop.permute.xlu0 %513  ;;  %v511_v40 = vpop.permute.xlu1 %510 }
 0xb36   :  { %v516_v41 = vsel %vm147_vm4, %v511_v40, %v514_v39 }
 0xb37   :  { %v517_v42 = vmul.f32 %v516_v41, %v1317_v32 }
 0xb39   :  { %v518_v45 = vmul.f32 %v517_v42, %v1416_v38  ;;  %v1050_v42 = vld [vmem:[%s1590_s0 + $0x14] sm:$0xf] }
 0xb3b   :  { %v521_v46 = vadd.f32 %v520_v44, %v518_v45 }
 0xb3d   :  { %522 = vst.msk [vmem:[#allocation2] sm:$0xf] %vm23_vm0, %v521_v46 }
 0xb44   :  { %v532_v47 = vld [vmem:[#allocation2] sm:$0xf] }
 0xb45   :  { %v533_v49 = vpack.c.bf16 %v532_v47, %v532_v47  ;;  %v642_v26 = vld [vmem:[#allocation2] sm:$0xf] }
 0xb46   :  { %v501_v50 = vpop.permute.xlu1 %500 }
 0xb47   :  { %v503_v52 = vadd.f32 %v501_v50, %v491_v48  ;;  %1126 = vmatmul.mubr.msk.bf16.vlgmr.msra.gmra.mrb[8].mxu0 %vm42_vm2, %v533_v49 }
 0xb48   :  { %1138 = vmatpush3.bf16.msra.mxu0 %v1264_v1  ;;  %1141 = vmatprep.mubr.msk.bf16.mxu0 %vm1229_vm1, %v1228_v0 }
 0xb49   :  { %505 = vrot.lane.b32.xlu0 %v503_v52, %s1233_s24  ;;  %1139 = vmatprep.subr.bf16.mxu0 %v1228_v0 }
 0xb4c   :  { %1140 = vmatpush3.bf16.msra.mxu0 %v1277_v2 }
 0xbbb   :  { %v506_v53 = vpop.permute.xlu0 %505 }
 0xbbc   :  { %508 = vst.msk [vmem:[#allocation3] sm:$0xf] %vm25_vm3, %v506_v53  ;;  %v1053_v53 = vld [vmem:[%s1591_s2 + $0x14] sm:$0xf] }
 0xbc3   :  { %v587_v55 = vld [vmem:[#allocation3] sm:$0xf] }
 0xbc4   :  { %589 = vrot.lane.b32.xlu0 %v587_v55, %s1232_s21 }
 0xc1a   :  { %v571_v57 = vpop.f32.mrb[8].mxu0 }
 0xc1b   :  { %v577_v58 = vadd.f32 %v1045_v56, %v571_v57  ;;  %v1127_v59 = vpop.f32.mrb[9].mxu0 }
 0xc1c   :  { %v574_v60 = vpop.f32.mrb[10].mxu0 }
 0xc1d   :  { %1196 = vtanh.f32 %v577_v58  ;;  %v1128_v61 = vpop.f32.mrb[11].mxu0  ;;  %v1047_v63 = vmul.f32 -1.442695, %v577_v58  ;;  %v738_v60 = vsub.f32 1.0, %v1053_v53 }
 0xc1f   :  { %1198 = vpow2.f32 %v1047_v63 }
 0xc27   :  { %v1197_v62 = vpop.eup %1196 }
 0xc28   :  { %594 = vrot.lane.b32.xlu1 %v1197_v62, %s1231_s20 }
 0xc29   :  { %v1199_v3 = vpop.eup %1198 }
 0xc2a   :  { %v581_v4 = vadd.f32 1.0, %v1199_v3 }
 0xc2c   :  { %1200 = vrcp.f32 %v581_v4 }
 0xc36   :  { %v1201_v5 = vpop.eup %1200  ;;  %v590_v10 = vpop.permute.xlu0 %589 }
 0xc37   :  { %v592_v12 = vmul.f32 %v1201_v5, %v590_v10 }
 0xc9a   :  { %v595_v6 = vpop.permute.xlu1 %594 }
 0xc9b   :  { %v597_v7 = vmul.f32 %v1201_v5, %v595_v6 }
 0xc9d   :  { %599 = vrot.lane.b32.xlu1 %v597_v7, %s1232_s21 }
 0xca1   :  { %611 = vperm.xlu1 %1161, %v1048_v9  }
 0xd0f   :  { %v600_v13 = vpop.permute.xlu1 %599 }
 0xd10   :  { %v602_v14 = vadd.f32 %v600_v13, %v592_v12 }
 0xd12   :  { %1202 = vtanh.f32 %v602_v14 }
 0xd1c   :  { %v1203_v15 = vpop.eup %1202 }
 0xd1d   :  { %605 = vrot.lane.b32.xlu0 %v1203_v15, %s1232_s21 }
 0xd20   :  { %v1448_v21 = vpop.permute.xlu1 %611 }
 0xd21   :  { %618 = vperm.xlu0 %1160, %v615_v16   ;;  %v614_v34 = vmul.f32 %v1448_v21, %v602_v14 }
 0xd8f   :  { %v606_v17 = vpop.permute.xlu0 %605 }
 0xd90   :  { %v1441_v18 = vmul.f32 %v1201_v5, %v606_v17 }
 0xd92   :  { %636 = vrot.lane.b32.xlu0 %v1441_v18, %s1233_s24  ;;  %633 = vrot.lane.b32.xlu1 %v1441_v18, %s1234_s25 }
 0xda0   :  { %v619_v19 = vpop.permute.xlu0 %618 }
 0xda1   :  { %v621_v20 = vmul.f32 %v619_v19, %v587_v55  ;;  %v643_v27 = vmul.f32 %v642_v26, %v619_v19 }
 0xda3   :  { %623 = vrot.lane.b32.xlu1 %v621_v20, %s1232_s21 }
 0xe04   :  { %v637_v22 = vpop.permute.xlu0 %636  ;;  %v634_v23 = vpop.permute.xlu1 %633 }
 0xe05   :  { %v639_v24 = vsel %vm147_vm4, %v634_v23, %v637_v22 }
 0xe06   :  { %v640_v25 = vmul.f32 %v639_v24, %v1317_v32  ;;  %v1055_v24 = vld [vmem:[%s1590_s0 + $0x18] sm:$0xf] }
 0xe08   :  { %v641_v29 = vmul.f32 %v640_v25, %v1448_v21 }
 0xe0a   :  { %v644_v30 = vadd.f32 %v643_v27, %v641_v29 }
 0xe0c   :  { %645 = vst.msk [vmem:[#allocation2] sm:$0xf] %vm23_vm0, %v644_v30 }
 0xe13   :  { %v655_v33 = vld [vmem:[#allocation2] sm:$0xf] }
 0xe14   :  { %v656_v36 = vpack.c.bf16 %v655_v33, %v655_v33  ;;  %v765_v10 = vld [vmem:[#allocation2] sm:$0xf] }
 0xe15   :  { %v624_v37 = vpop.permute.xlu1 %623 }
 0xe16   :  { %v626_v39 = vadd.f32 %v624_v37, %v614_v34  ;;  %1134 = vmatmul.mubr.msk.bf16.vlgmr.msra.gmra.mrb[8].mxu1 %vm42_vm2, %v656_v36 }
 0xe17   :  { %1146 = vmatpush3.bf16.msra.mxu1 %v1264_v1  ;;  %1149 = vmatprep.mubr.msk.bf16.mxu1 %vm1229_vm1, %v1228_v0 }
 0xe18   :  { %628 = vrot.lane.b32.xlu0 %v626_v39, %s1233_s24  ;;  %1147 = vmatprep.subr.bf16.mxu1 %v1228_v0 }
 0xe1b   :  { %1148 = vmatpush3.bf16.msra.mxu1 %v1277_v2 }
 0xe8a   :  { %v629_v40 = vpop.permute.xlu0 %628 }
 0xe8b   :  { %631 = vst.msk [vmem:[#allocation3] sm:$0xf] %vm25_vm3, %v629_v40 }
 0xe92   :  { %v710_v41 = vld [vmem:[#allocation3] sm:$0xf] }
 0xe93   :  { %712 = vrot.lane.b32.xlu0 %v710_v41, %s1232_s21 }
 0xee9   :  { %v694_v1 = vpop.f32.mrb[8].mxu1 }
 0xeea   :  { %v700_v43 = vadd.f32 %v1050_v42, %v694_v1  ;;  %v1135_v44 = vpop.f32.mrb[9].mxu1  ;;  %v1058_v42 = vld [vmem:[%s1591_s2 + $0x18] sm:$0xf] }
 0xeeb   :  { %v697_v45 = vpop.f32.mrb[10].mxu1 }
 0xeec   :  { %1204 = vtanh.f32 %v700_v43  ;;  %v1136_v46 = vpop.f32.mrb[11].mxu1  ;;  %v1052_v0 = vmul.f32 -1.442695, %v700_v43 }
 0xeee   :  { %1206 = vpow2.f32 %v1052_v0 }
 0xef6   :  { %v1205_v47 = vpop.eup %1204 }
 0xef7   :  { %717 = vrot.lane.b32.xlu1 %v1205_v47, %s1231_s20  ;;  %v861_v47 = vsub.f32 1.0, %v1058_v42 }
 0xef8   :  { %v1207_v2 = vpop.eup %1206 }
 0xef9   :  { %v704_v48 = vadd.f32 1.0, %v1207_v2 }
 0xefb   :  { %1208 = vrcp.f32 %v704_v48 }
 0xf05   :  { %v1209_v49 = vpop.eup %1208  ;;  %v713_v55 = vpop.permute.xlu0 %712 }
 0xf06   :  { %v715_v56 = vmul.f32 %v1209_v49, %v713_v55 }
 0xf69   :  { %v718_v50 = vpop.permute.xlu1 %717 }
 0xf6a   :  { %v720_v52 = vmul.f32 %v1209_v49, %v718_v50 }
 0xf6c   :  { %722 = vrot.lane.b32.xlu1 %v720_v52, %s1232_s21 }
 0xf70   :  { %734 = vperm.xlu1 %1161, %v1053_v53  }
 0xfde   :  { %v723_v57 = vpop.permute.xlu1 %722 }
 0xfdf   :  { %v725_v58 = vadd.f32 %v723_v57, %v715_v56 }
 0xfe1   :  { %1210 = vtanh.f32 %v725_v58 }
 0xfeb   :  { %v1211_v59 = vpop.eup %1210 }
 0xfec   :  { %728 = vrot.lane.b32.xlu0 %v1211_v59, %s1232_s21 }
 0xfef   :  { %v1480_v4 = vpop.permute.xlu1 %734 }
 0xff0   :  { %741 = vperm.xlu0 %1160, %v738_v60   ;;  %v737_v16 = vmul.f32 %v1480_v4, %v725_v58 }
0x105e   :  { %v729_v61 = vpop.permute.xlu0 %728 }
0x105f   :  { %v1473_v62 = vmul.f32 %v1209_v49, %v729_v61 }
0x1061   :  { %759 = vrot.lane.b32.xlu0 %v1473_v62, %s1233_s24  ;;  %756 = vrot.lane.b32.xlu1 %v1473_v62, %s1234_s25 }
0x106f   :  { %v742_v63 = vpop.permute.xlu0 %741 }
0x1070   :  { %v744_v3 = vmul.f32 %v742_v63, %v710_v41  ;;  %v766_v12 = vmul.f32 %v765_v10, %v742_v63 }
0x1072   :  { %746 = vrot.lane.b32.xlu1 %v744_v3, %s1232_s21 }
0x10d3   :  { %v760_v5 = vpop.permute.xlu0 %759  ;;  %v757_v6 = vpop.permute.xlu1 %756 }
0x10d4   :  { %v762_v7 = vsel %vm147_vm4, %v757_v6, %v760_v5 }
0x10d5   :  { %v763_v9 = vmul.f32 %v762_v7, %v1317_v32 }
0x10d7   :  { %v764_v13 = vmul.f32 %v763_v9, %v1480_v4  ;;  %v1063_v9 = vld [vmem:[%s1591_s2 + $0x1c] sm:$0xf] }
0x10d9   :  { %v767_v14 = vadd.f32 %v766_v12, %v764_v13  ;;  %v984_v12 = vsub.f32 1.0, %v1063_v9  ;;  %v1060_v13 = vld [vmem:[%s1590_s0 + $0x1c] sm:$0xf] }
0x10db   :  { %768 = vst.msk [vmem:[#allocation2] sm:$0xf] %vm23_vm0, %v767_v14 }
0x10e2   :  { %v778_v15 = vld [vmem:[#allocation2] sm:$0xf] }
0x10e3   :  { %v779_v17 = vpack.c.bf16 %v778_v15, %v778_v15  ;;  %v888_v57 = vld [vmem:[#allocation2] sm:$0xf] }
0x10e4   :  { %v747_v19 = vpop.permute.xlu1 %746 }
0x10e5   :  { %v749_v20 = vadd.f32 %v747_v19, %v737_v16  ;;  %1142 = vmatmul.mubr.msk.bf16.vlgmr.msra.gmra.mrb[12].mxu0 %vm42_vm2, %v779_v17 }
0x10e7   :  { %751 = vrot.lane.b32.xlu0 %v749_v20, %s1233_s24 }
0x1159   :  { %v752_v22 = vpop.permute.xlu0 %751 }
0x115a   :  { %754 = vst.msk [vmem:[#allocation3] sm:$0xf] %vm25_vm3, %v752_v22 }
0x1161   :  { %v833_v23 = vld [vmem:[#allocation3] sm:$0xf] }
0x1162   :  { %835 = vrot.lane.b32.xlu0 %v833_v23, %s1232_s21 }
0x11b8   :  { %v817_v25 = vpop.f32.mrb[12].mxu0 }
0x11b9   :  { %v823_v26 = vadd.f32 %v1055_v24, %v817_v25  ;;  %v1143_v27 = vpop.f32.mrb[13].mxu0 }
0x11ba   :  { %v820_v29 = vpop.f32.mrb[14].mxu0 }
0x11bb   :  { %1212 = vtanh.f32 %v823_v26  ;;  %v1144_v30 = vpop.f32.mrb[15].mxu0  ;;  %v1057_v34 = vmul.f32 -1.442695, %v823_v26 }
0x11bd   :  { %1214 = vpow2.f32 %v1057_v34  ;;  %v277_v34 = vmul.f32 %v1350_v11, %v1343_v8  ;;  %v400_v11 = vmul.f32 %v1383_v54, %v1376_v51 }
0x11c5   :  { %v1213_v33 = vpop.eup %1212 }
0x11c6   :  { %840 = vrot.lane.b32.xlu1 %v1213_v33, %s1231_s20 }
0x11c7   :  { %v1215_v36 = vpop.eup %1214 }
0x11c8   :  { %v827_v37 = vadd.f32 1.0, %v1215_v36  ;;  %v523_v36 = vmul.f32 %v1416_v38, %v1409_v35 }
0x11ca   :  { %1216 = vrcp.f32 %v827_v37 }
0x11d4   :  { %v1217_v39 = vpop.eup %1216  ;;  %v836_v1 = vpop.permute.xlu0 %835 }
0x11d5   :  { %v838_v43 = vmul.f32 %v1217_v39, %v836_v1 }
0x1238   :  { %v841_v40 = vpop.permute.xlu1 %840 }
0x1239   :  { %v843_v41 = vmul.f32 %v1217_v39, %v841_v40 }
0x123b   :  { %845 = vrot.lane.b32.xlu1 %v843_v41, %s1232_s21 }
0x123f   :  { %857 = vperm.xlu1 %1161, %v1058_v42   ;;  %v155_v42 = vmul.f32 %v1312_v31, %v1305_v28 }
0x12ad   :  { %v846_v44 = vpop.permute.xlu1 %845 }
0x12ae   :  { %v848_v45 = vadd.f32 %v846_v44, %v838_v43  ;;  %v646_v43 = vmul.f32 %v1448_v21, %v1441_v18  ;;  %v769_v18 = vmul.f32 %v1480_v4, %v1473_v62 }
0x12b0   :  { %1218 = vtanh.f32 %v848_v45 }
0x12ba   :  { %v1219_v46 = vpop.eup %1218 }
0x12bb   :  { %851 = vrot.lane.b32.xlu0 %v1219_v46, %s1232_s21 }
0x12be   :  { %v1507_v50 = vpop.permute.xlu1 %857 }
0x12bf   :  { %864 = vperm.xlu0 %1160, %v861_v47   ;;  %v860_v63 = vmul.f32 %v1507_v50, %v848_v45 }
0x132d   :  { %v852_v0 = vpop.permute.xlu0 %851 }
0x132e   :  { %v1500_v2 = vmul.f32 %v1217_v39, %v852_v0 }
0x1330   :  { %882 = vrot.lane.b32.xlu0 %v1500_v2, %s1233_s24  ;;  %879 = vrot.lane.b32.xlu1 %v1500_v2, %s1234_s25  ;;  %v892_v21 = vmul.f32 %v1507_v50, %v1500_v2 }
0x133e   :  { %v865_v48 = vpop.permute.xlu0 %864 }
0x133f   :  { %v867_v49 = vmul.f32 %v865_v48, %v833_v23  ;;  %v889_v58 = vmul.f32 %v888_v57, %v865_v48 }
0x1341   :  { %869 = vrot.lane.b32.xlu1 %v867_v49, %s1232_s21 }
0x13a2   :  { %v883_v52 = vpop.permute.xlu0 %882  ;;  %v880_v53 = vpop.permute.xlu1 %879 }
0x13a3   :  { %v885_v55 = vsel %vm147_vm4, %v880_v53, %v883_v52 }
0x13a4   :  { %v886_v56 = vmul.f32 %v885_v55, %v1317_v32 }
0x13a6   :  { %v887_v59 = vmul.f32 %v886_v56, %v1507_v50 }
0x13a8   :  { %v890_v60 = vadd.f32 %v889_v58, %v887_v59 }
0x13aa   :  { %891 = vst.msk [vmem:[#allocation2] sm:$0xf] %vm23_vm0, %v890_v60 }
0x13b1   :  { %v901_v61 = vld [vmem:[#allocation2] sm:$0xf] }
0x13b2   :  { %v902_v3 = vpack.c.bf16 %v901_v61, %v901_v61  ;;  %v1011_v48 = vld [vmem:[#allocation2] sm:$0xf] }
0x13b3   :  { %v870_v5 = vpop.permute.xlu1 %869 }
0x13b4   :  { %v872_v6 = vadd.f32 %v870_v5, %v860_v63  ;;  %1150 = vmatmul.mubr.msk.bf16.vlgmr.msra.gmra.mrb[12].mxu1 %vm42_vm2, %v902_v3 }
0x13b6   :  { %874 = vrot.lane.b32.xlu0 %v872_v6, %s1233_s24 }
0x1428   :  { %v875_v7 = vpop.permute.xlu0 %874 }
0x1429   :  { %877 = vst.msk [vmem:[#allocation3] sm:$0xf] %vm25_vm3, %v875_v7 }
0x1430   :  { %v956_v10 = vld [vmem:[#allocation3] sm:$0xf] }
0x1431   :  { %958 = vrot.lane.b32.xlu0 %v956_v10, %s1232_s21 }
0x1435   :  { %987 = vperm.xlu0 %1160, %v984_v12  }
0x1487   :  { %v940_v14 = vpop.f32.mrb[12].mxu1 }
0x1488   :  { %v946_v15 = vadd.f32 %v1060_v13, %v940_v14  ;;  %v1151_v16 = vpop.f32.mrb[13].mxu1 }
0x1489   :  { %v943_v17 = vpop.f32.mrb[14].mxu1 }
0x148a   :  { %1220 = vtanh.f32 %v946_v15  ;;  %v1152_v19 = vpop.f32.mrb[15].mxu1  ;;  %v1062_v22 = vmul.f32 -1.442695, %v946_v15 }
0x148c   :  { %1222 = vpow2.f32 %v1062_v22 }
0x1494   :  { %v1221_v20 = vpop.eup %1220 }
0x1495   :  { %963 = vrot.lane.b32.xlu1 %v1221_v20, %s1231_s20 }
0x1496   :  { %v1223_v23 = vpop.eup %1222 }
0x1497   :  { %v950_v24 = vadd.f32 1.0, %v1223_v23 }
0x1499   :  { %1224 = vrcp.f32 %v950_v24 }
0x14a3   :  { %v1225_v25 = vpop.eup %1224  ;;  %v959_v29 = vpop.permute.xlu0 %958 }
0x14a4   :  { %v961_v37 = vmul.f32 %v1225_v25, %v959_v29 }
0x14b4   :  { %v988_v30 = vpop.permute.xlu0 %987 }
0x14b5   :  { %v990_v33 = vmul.f32 %v988_v30, %v956_v10  ;;  %v1012_v49 = vmul.f32 %v1011_v48, %v988_v30 }
0x1507   :  { %v964_v26 = vpop.permute.xlu1 %963 }
0x1508   :  { %v966_v27 = vmul.f32 %v1225_v25, %v964_v26 }
0x150a   :  { %968 = vrot.lane.b32.xlu1 %v966_v27, %s1232_s21 }
0x150e   :  { %980 = vperm.xlu1 %1161, %v1063_v9  }
0x1512   :  { %992 = vrot.lane.b32.xlu1 %v990_v33, %s1232_s21 }
0x1516   :  { %279 = vrot.lane.b32.xlu1 %v277_v34, %s1234_s25 }
0x151a   :  { %525 = vrot.lane.b32.xlu1 %v523_v36, %s1234_s25 }
0x157c   :  { %v969_v39 = vpop.permute.xlu1 %968 }
0x157d   :  { %v971_v40 = vadd.f32 %v969_v39, %v961_v37 }
0x157f   :  { %1226 = vtanh.f32 %v971_v40 }
0x1589   :  { %v1227_v41 = vpop.eup %1226 }
0x158a   :  { %974 = vrot.lane.b32.xlu0 %v1227_v41, %s1232_s21 }
0x158d   :  { %v981_v1 = vpop.permute.xlu1 %980 }
0x158e   :  { %157 = vrot.lane.b32.xlu0 %v155_v42, %s1234_s25  ;;  %v983_v8 = vmul.f32 %v981_v1, %v971_v40 }
0x1591   :  { %v993_v35 = vpop.permute.xlu1 %992 }
0x1592   :  { %v995_v38 = vadd.f32 %v993_v35, %v983_v8  ;;  %402 = vrot.lane.b32.xlu0 %v400_v11, %s1234_s25 }
0x1595   :  { %v280_v44 = vpop.permute.xlu1 %279 }
0x1596   :  { %1034 = vst.msk [vmem:[%s1593_s4 + $0x4] sm:$0xf] %vm25_vm3, %v280_v44  ;;  %648 = vrot.lane.b32.xlu0 %v646_v43, %s1234_s25 }
0x1599   :  { %v526_v28 = vpop.permute.xlu1 %525 }
0x159a   :  { %1044 = vst.msk [vmem:[%s1593_s4 + $0xc] sm:$0xf] %vm25_vm3, %v526_v28 }
0x15fc   :  { %v975_v31 = vpop.permute.xlu0 %974 }
0x15fd   :  { %v977_v51 = vmul.f32 %v1225_v25, %v975_v31 }
0x15ff   :  { %1005 = vrot.lane.b32.xlu1 %v977_v51, %s1233_s24  ;;  %1002 = vrot.lane.b32.xlu0 %v977_v51, %s1234_s25  ;;  %v1015_v46 = vmul.f32 %v981_v1, %v977_v51 }
0x1600   :  { %v158_v54 = vpop.permute.xlu0 %157 }
0x1601   :  { %160 = vst.msk [vmem:[%s1593_s4] sm:$0xf] %vm25_vm3, %v158_v54 }
0x1603   :  { %771 = vrot.lane.b32.xlu1 %v769_v18, %s1234_s25  ;;  %894 = vrot.lane.b32.xlu0 %v892_v21, %s1234_s25 }
0x1604   :  { %v403_v45 = vpop.permute.xlu0 %402 }
0x1605   :  { %1039 = vst.msk [vmem:[%s1593_s4 + $0x8] sm:$0xf] %vm25_vm3, %v403_v45 }
0x1607   :  { %1017 = vrot.lane.b32.xlu0 %v1015_v46, %s1234_s25  ;;  %997 = vrot.lane.b32.xlu1 %v995_v38, %s1233_s24 }
0x1608   :  { %v649_v47 = vpop.permute.xlu0 %648 }
0x1609   :  { %1049 = vst.msk [vmem:[%s1593_s4 + $0x10] sm:$0xf] %vm25_vm3, %v649_v47 }
0x1671   :  { %v1003_v62 = vpop.permute.xlu0 %1002  ;;  %v1006_v4 = vpop.permute.xlu1 %1005 }
0x1672   :  { %v1008_v0 = vsel %vm147_vm4, %v1003_v62, %v1006_v4 }
0x1673   :  { %v1009_v2 = vmul.f32 %v1008_v0, %v1317_v32 }
0x1675   :  { %v1010_v50 = vmul.f32 %v1009_v2, %v981_v1  ;;  %v895_v52 = vpop.permute.xlu0 %894  ;;  %v772_v53 = vpop.permute.xlu1 %771 }
0x1676   :  { %1059 = vst.msk [vmem:[%s1593_s4 + $0x18] sm:$0xf] %vm25_vm3, %v895_v52  ;;  %1054 = vst.msk [vmem:[%s1593_s4 + $0x14] sm:$0xf] %vm25_vm3, %v772_v53 }
0x1677   :  { %v1013_v55 = vadd.f32 %v1012_v49, %v1010_v50 }
0x1679   :  { %1014 = vst.msk [vmem:[#allocation2] sm:$0xf] %vm23_vm0, %v1013_v55  ;;  %v1018_v56 = vpop.permute.xlu0 %1017  ;;  %v998_v32 = vpop.permute.xlu1 %997 }
0x167a   :  { %1064 = vst.msk [vmem:[%s1593_s4 + $0x1c] sm:$0xf] %vm25_vm3, %v1018_v56  ;;  %1000 = vst.msk [vmem:[#allocation3] sm:$0xf] %vm25_vm3, %v998_v32 }

// kernel: bidaf_forward.28
= control target key start
LH: loop header
LB: loop body
LE: loop exit
PB: predicated region body
PF: predicated region fallthrough
CT: control target
= control target key end

     0   :  { %s378_s12 = smov 0   ;;  %s404_s0 = inlined_call_operand.vmem [shape: bf16[32,32], index: 0, kind: input, shape index: {}]   ;;  %s405_s1 = inlined_call_operand.vmem [shape: bf16[32,128], index: 1, kind: input, shape index: {}]   ;;  %s406_s2 = inlined_call_operand.vmem [shape: f32[1,128], index: 2, kind: input, shape index: {}]   ;;  %s407_s3 = inlined_call_operand.vmem [shape: f32[32,128], index: 3, kind: output, shape index: {}]  }
   0x1 LB: > { %s308_s13 = sadd.s32 4294967295, %s354_s12   ;;  %p312_p0 = scmp.ge.s32.totalorder %s354_s12, 1  ;;  %s354_s12 = sphi %s378_s12, %s13_s12  }
   0x2   : > { %p138_p1 = scmp.lt.s32.totalorder %s354_s12, 3 }
   0x4   : > { %p139_p2 = pnand %p312_p0, %p138_p1 }
   0x5   : > { %v345_v0 = vld [vmem:[%s405_s1] sm:$0xff] (!%p139_p2)   ;;  %v356_v1 = vmov (!%p139_p2), 0.0   ;;  %v346_v2 = vld [vmem:[%s405_s1 + $0x8] sm:$0xff] (!%p139_p2)   ;;  %vm357_vm0 = vmmov (!%p139_p2), 0   ;;  %s313_s18 = sshll.u32 (!%p139_p2), %s308_s13, 1  ;;  %vm205_vm1 = vcmask (!%p139_p2), 261120  }
   0x6   : > { %142 = sbr.rel (%p139_p2) target bundleno = 234 (0xea), region = 32  ;;  %327 = vmatprep.subr.bf16.mxu0 (!%p139_p2), %v356_v1  ;;  %331 = vmatprep.mubr.msk.bf16.mxu0 (!%p139_p2), %vm357_vm0, %v356_v1  ;;  %p163_p3 = scmp.lt.s32.totalorder (!%p139_p2), %s313_s18, 3  ;;  %v317_v4 = vld [vmem:[%s406_s2] ss:$0 sm:$0xff] (!%p139_p2) }
   0x7   : > { %328 = vmatpush3.bf16.msra.mxu0 (!%p139_p2), %v345_v0 }
   0x8   : > { %329 = vmatprep.subr.bf16.mxu0 (!%p139_p2), %v356_v1 }
   0xb   : > { %330 = vmatpush3.bf16.msra.mxu0 (!%p139_p2), %v346_v2 }
   0xd   : > { %s409_s18 = smov (!%p163_p3, %s313_s18), 3 }
   0xe   : > { %s314_s19 = sshll.u32 %s409_s18, 2  ;;  %s316_s23 = sshll.u32 %s409_s18, 3 }
   0xf   : > { %s166_s22 = scalar_lea.vmem %s404_s0, %s314_s19  ;;  %s172_s28 = scalar_lea.vmem %s407_s3, %s316_s23 }
  0x10   : > { %v347_v3 = vld [vmem:[%s166_s22] sm:$0xff]  }
  0x11   : > { %332 = vmatmul.mubr.msk.bf16.vlgmr.msra.gmra.mrb[0].mxu0 %vm205_vm1, %v347_v3 }
  0xe4   : > { %v243_v5 = vpop.f32.mrb[0].mxu0 }
  0xe5   : > { %v244_v6 = vadd.f32 %v317_v4, %v243_v5  ;;  %v333_v7 = vpop.f32.mrb[1].mxu0 }
  0xe6   : > { %v246_v8 = vpop.f32.mrb[2].mxu0 }
  0xe7   : > { %250 = vst [vmem:[%s172_s28] sm:$0xff] %v244_v6  ;;  %v247_v9 = vadd.f32 %v317_v4, %v246_v8  ;;  %v334_v10 = vpop.f32.mrb[3].mxu0 }
  0xe9   : > { %251 = vst [vmem:[%s172_s28 + $0x8] sm:$0xff] %v247_v9 }
  0xea PF: > { %s13_s12 = sadd.s32 1, %s354_s12  }
  0xeb   : > { %p10_p4 = scmp.ge.s32.totalorder %s13_s12, 4  }
  0xed   :  { %12 = sbr.rel (!%p10_p4) target bundleno = 1 (0x1), region = 62 }

// kernel: bidaf_forward.34
= control target key start
LH: loop header
LB: loop body
LE: loop exit
PB: predicated region body
PF: predicated region fallthrough
CT: control target
= control target key end

     0   :  { %s1176_s17 = smov 0   ;;  %s1310_s0 = inlined_call_operand.vmem [shape: bf16[2,16,128], index: 0, kind: input, shape index: {}]   ;;  %s1311_s1 = inlined_call_operand.vmem [shape: f32[2,16,32], index: 1, kind: input, shape index: {}]   ;;  %s1312_s2 = inlined_call_operand.vmem [shape: f32[2,1,16], index: 2, kind: input, shape index: {}]   ;;  %s1313_s3 = inlined_call_operand.vmem [shape: bf16[128,32], index: 3, kind: input, shape index: {}]   ;;  %s1314_s4 = inlined_call_operand.vmem [shape: f32[1,32], index: 4, kind: input, shape index: {}]   ;;  %s1315_s5 = inlined_call_operand.vmem [shape: bf16[32,32], index: 5, kind: input, shape index: {}]   ;;  %s1316_s6 = inlined_call_operand.vmem [shape: bf16[32,32], index: 6, kind: input, shape index: {}]   ;;  %s1317_s7 = inlined_call_operand.vmem [shape: bf16[32,32], index: 7, kind: input, shape index: {}]   ;;  %s1318_s8 = inlined_call_operand.vmem [shape: f32[1,32], index: 8, kind: input, shape index: {}]   ;;  %s1319_s9 = inlined_call_operand.vmem [shape: f32[1,32], index: 9, kind: input, shape index: {}]   ;;  %s1320_s10 = inlined_call_operand.vmem [shape: f32[1,32], index: 10, kind: input, shape index: {}]   ;;  %s1321_s11 = inlined_call_operand.vmem [shape: f32[2,16,32], index: 11, kind: output, shape index: {}]  }
   0x1 LB: > { %s953_s18 = sadd.s32 4294967295, %s1111_s17   ;;  %p957_p0 = scmp.ge.s32.totalorder %s1111_s17, 1  ;;  %s1111_s17 = sphi %s1176_s17, %s21_s17  }
   0x2   : > { %p355_p1 = scmp.lt.s32.totalorder %s1111_s17, 3 }
   0x4   : > { %p356_p2 = pnand %p957_p0, %p355_p1 }
   0x5   : > { %v1082_v0 = vld [vmem:[%s1313_s3] sm:$0xff] (!%p356_p2)   ;;  %v1113_v1 = vmov (!%p356_p2), 0.0   ;;  %v1083_v2 = vld [vmem:[%s1313_s3 + $0x8] sm:$0xff] (!%p356_p2)   ;;  %vm1114_vm0 = vmmov (!%p356_p2), 0   ;;  %p403_p3 = scmp.lt.s32.totalorder (!%p356_p2), %s953_s18, 1  ;;  %v1084_v3 = vld [vmem:[%s1313_s3 + $0x10] sm:$0xff] (!%p356_p2)   ;;  %v797_v53 = vlaneseq (!%p356_p2) }
   0x6   : > { %359 = sbr.rel (%p356_p2) target bundleno = 1244 (0x4dc), region = 64  ;;  %1015 = vmatprep.subr.bf16.mxu0 (!%p356_p2), %v1113_v1  ;;  %1035 = vmatprep.subr.bf16.mxu1 (!%p356_p2), %v1113_v1  ;;  %v1085_v4 = vld [vmem:[%s1313_s3 + $0x18] sm:$0xff] (!%p356_p2)   ;;  %v1086_v5 = vld [vmem:[%s1313_s3 + $0x20] sm:$0xff] (!%p356_p2)   ;;  %v1087_v6 = vld [vmem:[%s1313_s3 + $0x28] sm:$0xff] (!%p356_p2)   ;;  %vm570_vm1 = vcmask (!%p356_p2), 261120   ;;  %v1115_v57 = vmov (!%p356_p2), 0  }
   0x7   : > { %1016 = vmatpush3.bf16.msra.mxu0 (!%p356_p2), %v1082_v0  ;;  %1031 = vmatprep.mubr.msk.bf16.mxu0 (!%p356_p2), %vm1114_vm0, %v1113_v1  ;;  %v1088_v7 = vld [vmem:[%s1313_s3 + $0x30] sm:$0xff] (!%p356_p2)   ;;  %v1089_v8 = vld [vmem:[%s1313_s3 + $0x38] sm:$0xff] (!%p356_p2)   ;;  %v1091_v10 = vld [vmem:[%s1315_s5] sm:$0xff] (!%p356_p2)   ;;  %v798_v55 = vshrl.u32 (!%p356_p2), %v797_v53, 7  ;;  %vm804_vm4 = vcmask (!%p356_p2), 130048  }
   0x8   : > { %1017 = vmatprep.subr.bf16.mxu0 (!%p356_p2), %v1113_v1  ;;  %1039 = vmatprep.mubr.msk.bf16.mxu1 (!%p356_p2), %vm1114_vm0, %v1113_v1  ;;  %v1092_v11 = vld [vmem:[%s1315_s5 + $0x8] sm:$0xff] (!%p356_p2)   ;;  %v964_v12 = vld [vmem:[%s1314_s4] ss:$0 sm:$0xff] (!%p356_p2) }
   0x9   : > { %1036 = vmatpush3.bf16.msra.mxu1 (!%p356_p2), %v1091_v10  ;;  %v1093_v23 = vld [vmem:[%s1316_s6] sm:$0xff] (!%p356_p2)   ;;  %v1094_v25 = vld [vmem:[%s1316_s6 + $0x8] sm:$0xff] (!%p356_p2)   ;;  %v799_v56 = vsub.s32 (!%p356_p2), 0, %v798_v55 }
   0xa   : > { %1037 = vmatprep.subr.bf16.mxu1 (!%p356_p2), %v1113_v1  ;;  %v1095_v26 = vld [vmem:[%s1317_s7] sm:$0xff] (!%p356_p2)   ;;  %v1096_v27 = vld [vmem:[%s1317_s7 + $0x8] sm:$0xff] (!%p356_p2)  }
   0xb   : > { %1018 = vmatpush3.bf16.msra.mxu0 (!%p356_p2), %v1083_v2  ;;  %v974_v28 = vld [vmem:[%s1318_s8] ss:$0 sm:$0xff] (!%p356_p2) }
   0xc   : > { %1019 = vmatprep.subr.bf16.mxu0 (!%p356_p2), %v1113_v1  ;;  %v978_v36 = vld [vmem:[%s1319_s9] ss:$0 sm:$0xff] (!%p356_p2) }
   0xd   : > { %s1323_s18 = smov (!%p403_p3, %s953_s18), 1  ;;  %1038 = vmatpush3.bf16.msra.mxu1 %v1092_v11  ;;  %v982_v45 = vld [vmem:[%s1320_s10] ss:$0 sm:$0xff] }
   0xe   : > { %s990_s25 = sshll.u32 %s1323_s18, 3  ;;  %1043 = vmatprep.subr.bf16.mxu1 %v1113_v1  ;;  %s991_s26 = sshll.u32 %s1323_s18, 4 }
   0xf   : > { %s407_s28 = scalar_lea.vmem %s1310_s0, %s990_s25  ;;  %1020 = vmatpush3.bf16.msra.mxu0 %v1084_v3  ;;  %s412_s12 = scalar_lea.vmem %s1311_s1, %s991_s26 }
  0x10   : > { %1021 = vmatprep.subr.bf16.mxu0 %v1113_v1  ;;  %v1090_v9 = vld [vmem:[%s407_s28] sm:$0xff]   ;;  %v543_v18 = vld [vmem:[%s412_s12 + $0x8] sm:$0xff]  ;;  %s415_s13 = scalar_lea.vmem %s1312_s2, %s1323_s18  ;;  %s420_s16 = scalar_lea.vmem %s1321_s11, %s991_s26 }
  0x11   : > { %v542_v16 = vld [vmem:[%s412_s12] sm:$0xff] }
  0x12   : > { %v794_v54 = vld [vmem:[%s415_s13] sm:$0x1] }
  0x13   : > { %1022 = vmatpush3.bf16.msra.mxu0 %v1085_v4  ;;  %vm795_vm2 = vcmp.gt.f32.partialorder %v794_v54, 0.0 }
  0x14   : > { %1023 = vmatprep.subr.bf16.mxu0 %v1113_v1  ;;  %v796_v58 = vsel %vm795_vm2, 1, %v1115_v57 }
  0x15   : > { %v800_v59 = vrot.slane %v796_v58, %v799_v56 }
  0x17   : > { %1024 = vmatpush3.bf16.msra.mxu0 %v1086_v5  ;;  %vm801_vm3 = vcmp.eq.s32.totalorder %v800_v59, 1 }
  0x18   : > { %1025 = vmatprep.subr.bf16.mxu0 %v1113_v1 }
  0x1b   : > { %1026 = vmatpush3.bf16.msra.mxu0 %v1087_v6 }
  0x1c   : > { %1027 = vmatprep.subr.bf16.mxu0 %v1113_v1 }
  0x1f   : > { %1028 = vmatpush3.bf16.msra.mxu0 %v1088_v7 }
  0x20   : > { %1029 = vmatprep.subr.bf16.mxu0 %v1113_v1 }
  0x23   : > { %1030 = vmatpush3.bf16.msra.mxu0 %v1089_v8 }
  0x24   : > { %1065 = vmatprep.subr.bf16.mxu0 %v1113_v1 }
  0x26   : > { %1032 = vmatmul.mubr.bf16.vlgmr.msra.gmra.mrb[0].mxu0 %v1090_v9 }
  0x27   : > { %1067 = vmatprep.mubr.msk.bf16.mxu0 %vm1114_vm0, %v1113_v1 }
  0xf9   : > { %v535_v13 = vpop.f32.mrb[0].mxu0 }
  0xfa   : > { %v536_v14 = vadd.f32 %v964_v12, %v535_v13  ;;  %v1033_v15 = vpop.f32.mrb[1].mxu0 }
  0xfb   : > { %v538_v17 = vpop.f32.mrb[2].mxu0 }
  0xfc   : > { %v539_v19 = vadd.f32 %v964_v12, %v538_v17  ;;  %v1034_v20 = vpop.f32.mrb[3].mxu0  ;;  %v1247_v21 = vadd.f32 %v542_v16, %v536_v14 }
  0xfe   : > { %v1249_v22 = vadd.f32 %v543_v18, %v539_v19 }
 0x100   : > { %v546_v24 = vpack.c.bf16 %v1249_v22, %v1247_v21 }
 0x102   : > { %1040 = vmatmul.mubr.msk.bf16.vlgmr.msra.gmra.mrb[0].mxu1 %vm570_vm1, %v546_v24 }
 0x103   : > { %1044 = vmatpush3.bf16.msra.mxu1 %v1093_v23  ;;  %1047 = vmatprep.mubr.msk.bf16.mxu1 %vm1114_vm0, %v1113_v1 }
 0x104   : > { %1045 = vmatprep.subr.bf16.mxu1 %v1113_v1 }
 0x107   : > { %1046 = vmatpush3.bf16.msra.mxu1 %v1094_v25 }
 0x108   : > { %1051 = vmatprep.subr.bf16.mxu1 %v1113_v1 }
 0x10a   : > { %1048 = vmatmul.mubr.msk.bf16.vlgmr.msra.gmra.mrb[4].mxu1 %vm570_vm1, %v546_v24 }
 0x10b   : > { %1052 = vmatpush3.bf16.msra.mxu1 %v1095_v26  ;;  %1055 = vmatprep.mubr.msk.bf16.mxu1 %vm1114_vm0, %v1113_v1 }
 0x10c   : > { %1053 = vmatprep.subr.bf16.mxu1 %v1113_v1 }
 0x10f   : > { %1054 = vmatpush3.bf16.msra.mxu1 %v1096_v27 }
 0x110   : > { %1059 = vmatprep.subr.bf16.mxu1 %v1113_v1 }
 0x112   : > { %1056 = vmatmul.mubr.msk.bf16.vlgmr.msra.gmra.mrb[8].mxu1 %vm570_vm1, %v546_v24 }
 0x113   : > { %1061 = vmatprep.mubr.msk.bf16.mxu1 %vm1114_vm0, %v1113_v1 }
 0x1d5   : > { %v608_v29 = vpop.f32.mrb[0].mxu1 }
 0x1d6   : > { %v1041_v30 = vpop.f32.mrb[1].mxu1  ;;  %v609_v32 = vadd.f32 %v974_v28, %v608_v29 }
 0x1d7   : > { %v611_v31 = vpop.f32.mrb[2].mxu1 }
 0x1d8   : > { %v612_v33 = vadd.f32 %v974_v28, %v611_v31  ;;  %v1042_v34 = vpop.f32.mrb[3].mxu1 }
 0x1da   : > { %v743_v35 = vpack.c.bf16 %v612_v33, %v609_v32 }
 0x1dd   : > { %v672_v37 = vpop.f32.mrb[4].mxu1 }
 0x1de   : > { %v1049_v38 = vpop.f32.mrb[5].mxu1  ;;  %v673_v40 = vadd.f32 %v978_v36, %v672_v37 }
 0x1df   : > { %v675_v39 = vpop.f32.mrb[6].mxu1 }
 0x1e0   : > { %v676_v41 = vadd.f32 %v978_v36, %v675_v39  ;;  %v1050_v42 = vpop.f32.mrb[7].mxu1 }
 0x1e2   : > { %v744_v43 = vpack.c.bf16 %v676_v41, %v673_v40 }
 0x1e4   : > { %v749_v44 = vsel %vm570_vm1, %v744_v43, 0 }
 0x1e5   : > { %v736_v46 = vpop.f32.mrb[8].mxu1  ;;  %1060 = vmatpush3.bf16.xpose.msra.mxu1 %v749_v44 }
 0x1e6   : > { %v1057_v47 = vpop.f32.mrb[9].mxu1  ;;  %v737_v49 = vadd.f32 %v982_v45, %v736_v46 }
 0x1e7   : > { %v739_v48 = vpop.f32.mrb[10].mxu1 }
 0x1e8   : > { %v740_v50 = vadd.f32 %v982_v45, %v739_v48  ;;  %v1058_v51 = vpop.f32.mrb[11].mxu1 }
 0x1ea   : > { %v828_v52 = vpack.c.bf16 %v740_v50, %v737_v49 }
 0x1ec   : > { %1062 = vmatmul.mubr.msk.bf16.vlgmr.msra.gmra.mrb[12].mxu1 %vm570_vm1, %v743_v35  ;;  %1066 = vmatpush3.bf16.msra.mxu0 %v828_v52 }
 0x2bf   : > { %v785_v60 = vpop.f32.mrb[12].mxu1 }
 0x2c0   : > { %v792_v61 = vmul.f32 0.17677669, %v785_v60  ;;  %v1063_v62 = vpop.f32.mrb[13].mxu1 }
 0x2c1   : > { %v788_v63 = vpop.f32.mrb[14].mxu1 }
 0x2c2   : > { %v793_v0 = vmul.f32 0.17677669, %v788_v63  ;;  %v1064_v1 = vpop.f32.mrb[15].mxu1  ;;  %v802_v2 = vsel %vm801_vm3, %v792_v61, -1e+30 }
 0x2c3   : > { %v805_v3 = vsel %vm804_vm4, %v802_v2, -inf }
 0x2c4   : > { %806 = vmax.xlane.f32.xlu0 %v805_v3  ;;  %v803_v4 = vsel %vm801_vm3, %v793_v0, -1e+30 }
 0x2c5   : > { %v808_v5 = vsel %vm804_vm4, %v803_v4, -inf }
 0x2c8   : > { %809 = vmax.xlane.f32.xlu0 %v808_v5 }
 0x351   : > { %v807_v6 = vpop.xlane.xlu0 %806 }
 0x352   : > { %v811_v7 = vsub.f32 %v802_v2, %v807_v6 }
 0x354   : > { %v813_v8 = vmul.f32 1.442695, %v811_v7 }
 0x355   : > { %v810_v9 = vpop.xlane.xlu0 %809 }
 0x356   : > { %1097 = vpow2.f32 %v813_v8  ;;  %v812_v10 = vsub.f32 %v803_v4, %v810_v9 }
 0x358   : > { %v815_v11 = vmul.f32 1.442695, %v812_v10 }
 0x35a   : > { %1099 = vpow2.f32 %v815_v11 }
 0x360   : > { %v1098_v12 = vpop.eup %1097 }
 0x361   : > { %v817_v13 = vsel %vm804_vm4, %v1098_v12, 0.0 }
 0x362   : > { %818 = vadd.xlane.f32.xlu1 %v817_v13 }
 0x364   : > { %v1100_v14 = vpop.eup %1099 }
 0x365   : > { %v820_v15 = vsel %vm804_vm4, %v1100_v14, 0.0 }
 0x366   : > { %821 = vadd.xlane.f32.xlu1 %v820_v15 }
 0x3ef   : > { %v819_v16 = vpop.xlane.xlu1 %818 }
 0x3f0   : > { %1101 = vrcp.f32 %v819_v16 }
 0x3f3   : > { %v822_v17 = vpop.xlane.xlu1 %821 }
 0x3f4   : > { %1103 = vrcp.f32 %v822_v17 }
 0x3fa   : > { %v1102_v18 = vpop.eup %1101 }
 0x3fb   : > { %v825_v20 = vmul.f32 %v1102_v18, %v1098_v12 }
 0x3fe   : > { %v1104_v19 = vpop.eup %1103 }
 0x3ff   : > { %v826_v23 = vmul.f32 %v1104_v19, %v1100_v14 }
 0x401   : > { %v827_v24 = vpack.c.bf16 %v826_v23, %v825_v20 }
 0x403   : > { %1068 = vmatmul.mubr.msk.bf16.vlgmr.msra.gmra.mrb[4].mxu0 %vm804_vm4, %v827_v24 }
 0x4d6   : > { %v866_v25 = vpop.f32.mrb[4].mxu0 }
 0x4d7   : > { %v873_v26 = vadd.f32 %v866_v25, %v1247_v21  ;;  %v1069_v27 = vpop.f32.mrb[5].mxu0 }
 0x4d8   : > { %v869_v28 = vpop.f32.mrb[6].mxu0 }
 0x4d9   : > { %875 = vst.msk [vmem:[%s420_s16] sm:$0xff] %vm570_vm1, %v873_v26  ;;  %v874_v29 = vadd.f32 %v869_v28, %v1249_v22  ;;  %v1070_v30 = vpop.f32.mrb[7].mxu0 }
 0x4db   : > { %876 = vst.msk [vmem:[%s420_s16 + $0x8] sm:$0xff] %vm570_vm1, %v874_v29 }
 0x4dc PF: > { %s21_s17 = sadd.s32 1, %s1111_s17  }
 0x4dd   : > { %p18_p4 = scmp.ge.s32.totalorder %s21_s17, 4  }
 0x4df   :  { %20 = sbr.rel (!%p18_p4) target bundleno = 1 (0x1), region = 100 }

// kernel: bidaf_forward.37
= control target key start
LH: loop header
LB: loop body
LE: loop exit
PB: predicated region body
PF: predicated region fallthrough
CT: control target
= control target key end

     0   :  { %s578_s15 = smov 0   ;;  %s647_s0 = inlined_call_operand.vmem [shape: bf16[2,16,192], index: 0, kind: input, shape index: {}]   ;;  %s648_s1 = inlined_call_operand.vmem [shape: f32[2,1,16], index: 1, kind: input, shape index: {}]   ;;  %s649_s2 = inlined_call_operand.vmem [shape: bf16[192,2], index: 2, kind: input, shape index: {}]   ;;  %s650_s3 = inlined_call_operand.vmem [shape: f32[2,1], index: 3, kind: input, shape index: {}]   ;;  %s651_s4 = inlined_call_operand.vmem [shape: f32[2,2,16], index: 4, kind: output, shape index: {}]  }
   0x1 LB: > { %s488_s16 = sadd.s32 4294967295, %s550_s15   ;;  %p492_p0 = scmp.ge.s32.totalorder %s550_s15, 1  ;;  %s550_s15 = sphi %s578_s15, %s14_s15  }
   0x2   : > { %p170_p1 = scmp.lt.s32.totalorder %s550_s15, 3 }
   0x4   : > { %p171_p2 = pnand %p492_p0, %p170_p1 }
   0x5   : > { %v525_v0 = vld [vmem:[%s649_s2 + $0x40] sm:$0xff] (!%p171_p2)   ;;  %p198_p3 = scmp.lt.s32.totalorder (!%p171_p2), %s488_s16, 1  ;;  %v527_v2 = vld [vmem:[%s649_s2 + $0x48] sm:$0xff] (!%p171_p2)   ;;  %v529_v4 = vld [vmem:[%s649_s2 + $0x50] sm:$0xff] (!%p171_p2)   ;;  %vm356_vm0 = vcmask (!%p171_p2), 523264   ;;  %v552_v14 = vmov (!%p171_p2), 0   ;;  %v406_v18 = vlaneseq (!%p171_p2) }
   0x6   : > { %174 = sbr.rel (%p171_p2) target bundleno = 642 (0x282), region = 36  ;;  %v526_v1 = vld [vmem:[%s649_s2] sm:$0xff] (!%p171_p2)   ;;  %331 = vxpose.xlu0.c.b16.start [1/4] (short) (narrow) (!%p171_p2), %v525_v0, 16  ;;  %v528_v3 = vld [vmem:[%s649_s2 + $0x8] sm:$0xff] (!%p171_p2)   ;;  %v530_v5 = vld [vmem:[%s649_s2 + $0x10] sm:$0xff] (!%p171_p2)   ;;  %vm412_vm3 = vcmask (!%p171_p2), 123904  }
   0x7   : > { %315 = vxpose.xlu1.c.b16.start [1/8] (narrow) (!%p171_p2), %v526_v1, 16  ;;  %v531_v6 = vld [vmem:[%s649_s2 + $0x58] sm:$0xff] (!%p171_p2)   ;;  %v533_v10 = vld [vmem:[%s649_s2 + $0x20] sm:$0xff] (!%p171_p2)   ;;  %v534_v11 = vld [vmem:[%s649_s2 + $0x28] sm:$0xff] (!%p171_p2)   ;;  %v407_v20 = vshrl.u32 (!%p171_p2), %v406_v18, 7 }
   0x8   : > { %v532_v7 = vld [vmem:[%s649_s2 + $0x18] sm:$0xff] (!%p171_p2)   ;;  %v237_v12 = vld [vmem:[%s650_s3] sm:$0x3] (!%p171_p2)  ;;  %v535_v13 = vld [vmem:[%s649_s2 + $0x30] sm:$0xff] (!%p171_p2)  }
   0x9   : > { %v536_v15 = vld [vmem:[%s649_s2 + $0x38] sm:$0xff] (!%p171_p2)   ;;  %v408_v21 = vsub.s32 (!%p171_p2), 0, %v407_v20 }
   0xa   : > { %332 = vxpose.xlu0.c.b16.cont [2/4] (short) (narrow) (!%p171_p2), %v527_v2, 16 }
   0xb   : > { %316 = vxpose.xlu1.c.b16.cont [2/8] (narrow) (!%p171_p2), %v528_v3, 16 }
   0xd   : > { %s653_s16 = smov (!%p198_p3, %s488_s16), 1 }
   0xe   : > { %s514_s29 = sshll.u32 %s653_s16, 4  ;;  %333 = vxpose.xlu0.c.b16.cont [3/4] (short) (narrow) %v529_v4, 16  ;;  %s205_s25 = scalar_lea.vmem %s648_s1, %s653_s16 }
   0xf   : > { %s202_s6 = scalar_lea.vmem %s647_s0, %s514_s29  ;;  %317 = vxpose.xlu1.c.b16.cont [3/8] (narrow) %v530_v5, 16  ;;  %v403_v19 = vld [vmem:[%s205_s25] sm:$0x1]  ;;  %s495_s26 = sshll.u32 %s653_s16, 1 }
  0x10   : > { %v537_v8 = vld [vmem:[%s202_s6 + $0x4] ss:$8 sps:$4 sm:$0xff]   ;;  %v539_v9 = vld [vmem:[%s202_s6] ss:$8 sps:$4 sm:$0xff]   ;;  %vm404_vm1 = vcmp.gt.f32.partialorder %v403_v19, 0.0  ;;  %s209_s29 = scalar_lea.vmem %s651_s4, %s495_s26 }
  0x11   : > { %510 = vmatprep.subr.msk.bf16.mxu0 %vm356_vm0, %v537_v8  ;;  %v405_v22 = vsel %vm404_vm1, 1, %v552_v14 }
  0x12   : > { %334 = vxpose.xlu0.c.b16.end [4/4] (short) (narrow) %v531_v6, 16  ;;  %364 = vmatpush1.bf16.xpose.msra.mxu0 %v539_v9  ;;  %v409_v23 = vrot.slane %v405_v22, %v408_v21 }
  0x13   : > { %318 = vxpose.xlu1.c.b16.cont [4/8] (narrow) %v532_v7, 16 }
  0x14   : > { %vm410_vm2 = vcmp.eq.s32.totalorder %v409_v23, 1 }
  0x17   : > { %319 = vxpose.xlu1.c.b16.cont [5/8] (narrow) %v533_v10, 16 }
  0x1b   : > { %320 = vxpose.xlu1.c.b16.cont [6/8] (narrow) %v534_v11, 16  ;;  %524 = vset.pattern.permute.xlu0 %v552_v14 }
  0x1c   : > { %240 = vperm.xlu0 %524, %v237_v12  }
  0x1f   : > { %321 = vxpose.xlu1.c.b16.cont [7/8] (narrow) %v535_v13, 16 }
  0x23   : > { %322 = vxpose.xlu1.c.b16.end [8/8] (narrow) %v536_v15, 16 }
  0x6c   : > { %v339_v16 = vpop.trf.xlu0 }
  0x6d   : > { %511 = vmatprep.mubr.msk.bf16.mxu0 %vm356_vm0, %v339_v16  ;;  %v323_v17 = vpop.trf.xlu1 }
  0x6e   : > { %396 = vmatmul.mubr.bf16.vlgmr.msra.gmra.mrb[0].mxu0 %v323_v17 }
  0x9b   : > { %v241_v24 = vpop.permute.xlu0 %240 }
 0x141   : > { %v397_v25 = vpop.f32.mrb[0].mxu0 }
 0x142   : > { %v398_v26 = vadd.f32 %v397_v25, %v241_v24  ;;  %v399_v27 = vpop.f32.mrb[1].mxu0 }
 0x143   : > { %v400_v28 = vpop.f32.mrb[2].mxu0 }
 0x144   : > { %v401_v29 = vpop.f32.mrb[3].mxu0  ;;  %v411_v30 = vsel %vm410_vm2, %v398_v26, -1e+30 }
 0x145   : > { %v413_v31 = vsel %vm412_vm3, %v411_v30, -inf }
 0x146   : > { %414 = vmax.xlane.f32.xlu0 %v413_v31 }
 0x1d3   : > { %v415_v32 = vpop.xlane.xlu0 %414 }
 0x1d4   : > { %v416_v33 = vsub.f32 %v411_v30, %v415_v32 }
 0x1d6   : > { %v417_v34 = vmul.f32 1.442695, %v416_v33 }
 0x1d8   : > { %540 = vpow2.f32 %v417_v34 }
 0x1e2   : > { %v541_v35 = vpop.eup %540 }
 0x1e3   : > { %v419_v36 = vsel %vm412_vm3, %v541_v35, 0.0 }
 0x1e4   : > { %420 = vadd.xlane.f32.xlu1 %v419_v36 }
 0x271   : > { %v421_v37 = vpop.xlane.xlu1 %420 }
 0x272   : > { %542 = vlog2.f32 %v421_v37 }
 0x27c   : > { %v543_v38 = vpop.eup %542 }
 0x27d   : > { %v423_v39 = vmul.f32 0.6931472, %v543_v38 }
 0x27f   : > { %v424_v40 = vsub.f32 %v416_v33, %v423_v39 }
 0x281   : > { %425 = vst.msk [vmem:[%s209_s29] sm:$0x3] %vm412_vm3, %v424_v40 }
 0x282 PF: > { %s14_s15 = sadd.s32 1, %s550_s15  }
 0x283   : > { %p11_p4 = scmp.ge.s32.totalorder %s14_s15, 4  }
 0x285   :  { %13 = sbr.rel (!%p11_p4) target bundleno = 1 (0x1), region = 69 }

</bundles_post_ra>
